<compile_context>
chip_gen: v7x
topology: tpu7x:2x2x1
jax: 0.10.0
libtpu: 0.0.40
codegen_flags: <defaults>
</compile_context>

<pallas_src>
import functools
import math

import jax
import jax.numpy as jnp
from jax import lax
from jax.experimental import pallas as pl
from jax.experimental.pallas import tpu as pltpu


def _erf(x):
    """erf via Abramowitz & Stegun 7.1.26 (|err| < 1.5e-7): exp/mul/add only."""
    p = 0.3275911
    a1, a2, a3, a4, a5 = (0.254829592, -0.284496736, 1.421413741,
                          -1.453152027, 1.061405429)
    ax = jnp.abs(x)
    t = 1.0 / (1.0 + p * ax)
    poly = ((((a5 * t + a4) * t + a3) * t + a2) * t + a1) * t
    y = 1.0 - poly * jnp.exp(-(ax * ax))
    return jnp.where(x < 0.0, -y, y)


def _gelu(x, approximate):
    if approximate:  # tanh form -> EUP slot (VALU relief on v6e/v7x)
        c = math.sqrt(2.0 / math.pi)
        return 0.5 * x * (1.0 + jnp.tanh(c * (x + 0.044715 * x * x * x)))
    return 0.5 * x * (1.0 + _erf(x * (1.0 / math.sqrt(2.0))))


def _mlp_kernel(x_up_ref, x_mid_ref, x_dn_ref,
                w1_ref, b1_ref, dw_ref, dwb_ref, w2_ref, b2_ref,
                o_ref, h_ref, *, W, TH, gelu_approx):
    T = TH * W               # tokens produced by this grid step
    T2 = T + 2 * W           # + one halo image row above and one below
    hid = w1_ref.shape[1]
    t = pl.program_id(1)
    n_t = pl.num_programs(1)

    w1 = w1_ref[...]
    b1 = b1_ref[...]

    # ---- fc1 straight into the halo'd scratch (no concatenate) ----
    h_ref[W:W + T, :] = jnp.dot(x_mid_ref[0], w1,
                                preferred_element_type=jnp.float32) + b1
    # Halo rows: fc1 recomputed on one image row each (2*W/T extra work);
    # rows that fall outside the image are zeroed, which realizes the conv's
    # zero padding.  The zeroing is folded into these two W-row halos only,
    # so interior work never pays a full-block boundary mask.
    h_top = jnp.dot(x_up_ref[0], w1, preferred_element_type=jnp.float32) + b1
    h_bot = jnp.dot(x_dn_ref[0], w1, preferred_element_type=jnp.float32) + b1
    h_ref[0:W, :] = jnp.where(t > 0, h_top, 0.0)
    h_ref[W + T:T2, :] = jnp.where(t < n_t - 1, h_bot, 0.0)

    # ---- depthwise 3x3 conv (pad=1, groups=hid), channels-last tokens ----
    h = h_ref[...]                                              # (T2, hid) f32
    col = lax.broadcasted_iota(jnp.int32, (T2, 1), 0) % W
    h_m = jnp.where(col > 0, pltpu.roll(h, shift=1, axis=0), 0.0)          # col j-1
    h_p = jnp.where(col < W - 1, pltpu.roll(h, shift=T2 - 1, axis=0), 0.0)  # col j+1

    dw = dw_ref[...]                                            # (9, hid) f32
    acc = jnp.zeros((T, hid), jnp.float32)
    for di in range(3):                                         # static row-tap loop
        s = di * W                                              # sublane-aligned (W % 8 == 0)
        acc = acc + h_m[s:s + T] * dw[3 * di + 0:3 * di + 1]
        acc = acc + h[s:s + T] * dw[3 * di + 1:3 * di + 2]
        acc = acc + h_p[s:s + T] * dw[3 * di + 2:3 * di + 3]
    acc = acc + dwb_ref[...]                                    # conv bias

    # ---- GELU ----
    y = _gelu(acc, gelu_approx)

    # ---- fc2: (T, hid) @ (hid, c_out) + b2 ----
    out = jnp.dot(y.astype(w2_ref.dtype), w2_ref[...],
                  preferred_element_type=jnp.float32) + b2_ref[...]
    o_ref[0] = out.astype(o_ref.dtype)


def _infer_hw(N, H, W):
    """Mirror the module's H/W fallback when H*W != N."""
    if H * W == N:
        return H, W
    s = int(N ** 0.5)
    if s * s == N:
        return s, s
    h = int(math.sqrt(N))
    if h > 0 and N % h == 0:
        return h, N // h
    for i in range(int(math.sqrt(N)), 0, -1):
        if N % i == 0:
            return i, N // i
    return 1, N


def _step_vmem_bytes(T, W, C, hid, c_out, x_bytes, w_bytes, out_bytes):
    """Generous per-grid-step VMEM estimate (dbl-buffered I/O + scratch + live)."""
    T2 = T + 2 * W
    io = 2 * (T2 * C * x_bytes + T * c_out * out_bytes)           # activations
    wts = 2 * ((C * hid + hid * c_out) * w_bytes + (11 * hid + c_out) * 4)
    scratch = T2 * hid * 4
    live = 4 * (3 * T2 * hid + 2 * T * hid + 2 * T * c_out)       # h/h_m/h_p/acc/y/out
    return io + wts + scratch + live


def _pick_row_tile(H, W, C, hid, c_out, x_bytes, w_bytes, out_bytes,
                   batch, vmem_budget, max_tokens):
    """Largest row tile dividing H that fits the token cap and VMEM budget,
    preferring tilings that keep >= 2 total grid steps (v7x has 2 TCs)."""
    divs = sorted((d for d in range(1, H + 1) if H % d == 0), reverse=True)
    fits = [d for d in divs
            if d * W <= max_tokens
            and _step_vmem_bytes(d * W, W, C, hid, c_out,
                                 x_bytes, w_bytes, out_bytes) <= vmem_budget]
    if not fits:
        return 1
    multi = [d for d in fits if batch * (H // d) >= 2]
    return multi[0] if multi else fits[0]


def mlp_pallas(x, params, H, W, *, row_tile=None, compute_dtype=jnp.bfloat16,
               gelu_approx=False, out_dtype=None, max_tokens=4096):
    """x: (B, N, C) with N == H*W row-major tokens. Returns (B, N, C_out)."""
    B, N, C = x.shape
    H, W = _infer_hw(N, H, W)
    w1, b1 = params["w1"], params["b1"]
    dww, dwb = params["dw_w"], params["dw_b"]
    w2, b2 = params["w2"], params["b2"]
    hid, c_out = w1.shape[1], w2.shape[1]
    out_dtype = x.dtype if out_dtype is None else out_dtype
    assert H * W == N, "token count must equal H*W"
    # TODO(synk): support W % 8 != 0 (needs a column-padding / relayout path
    # for the sublane-aligned row-tap slices).
    assert W % 8 == 0, "kernel requires W to be a multiple of 8 (f32 sublane)"

    x_bytes = jnp.dtype(compute_dtype).itemsize
    out_bytes = jnp.dtype(out_dtype).itemsize

    # Per-generation VMEM budget: 3/4 of reported capacity (v5e/v6e: 128 MiB
    # -> ~96 MiB, v7x: 64 MiB per TC -> ~48 MiB); conservative 48 MiB fallback.
    try:
        vmem_cap = int(pltpu.get_tpu_info().vmem_capacity_bytes)
    except Exception:
        vmem_cap = 64 << 20
    vmem_budget = (vmem_cap * 3) // 4

    if row_tile is None:
        TH = _pick_row_tile(H, W, C, hid, c_out, x_bytes, x_bytes, out_bytes,
                            B, vmem_budget, max_tokens)
    else:
        TH = row_tile
    assert H % TH == 0, "row_tile must divide H"
    nT = H // TH
    T = TH * W
    T2 = T + 2 * W

    need = _step_vmem_bytes(T, W, C, hid, c_out, x_bytes, x_bytes, out_bytes)
    vmem_limit = int(min(max(vmem_budget, need + (8 << 20)),
                         (vmem_cap * 15) // 16))

    # Cast the big MXU/DMA operands once in the wrapper (bf16 halves their
    # HBM traffic); biases and the depthwise weights stay f32.
    x_c = x.astype(compute_dtype)
    w1c = w1.astype(compute_dtype)
    w2c = w2.astype(compute_dtype)
    dw9 = dww.reshape(9, hid).astype(jnp.float32)     # lane-dense, no (3,3,.) pad
    b1f = b1.reshape(1, hid).astype(jnp.float32)
    dwbf = dwb.reshape(1, hid).astype(jnp.float32)
    b2f = b2.reshape(1, c_out).astype(jnp.float32)

    kernel = functools.partial(_mlp_kernel, W=W, TH=TH, gelu_approx=gelu_approx)

    # Weight/bias specs keep a constant block index; their second pipeline
    # buffer is dead VMEM (<0.5 MiB here) and is included in the budget above.
    # TODO(synk): single-buffer them (pipeline_mode=pl.Buffered(1)) once that
    # BlockSpec option is plumbed through this pallas_call path.
    wspec = lambda a: pl.BlockSpec(a.shape, lambda b, t: (0, 0))

    in_specs = [
        # one halo image row above the tile (clamped at the top border)
        pl.BlockSpec((1, W, C), lambda b, t: (b, jnp.maximum(t * TH - 1, 0), 0)),
        # the TH image rows of this tile
        pl.BlockSpec((1, T, C), lambda b, t: (b, t, 0)),
        # one halo image row below the tile (clamped at the bottom border)
        pl.BlockSpec((1, W, C), lambda b, t: (b, jnp.minimum(t * TH + TH, H - 1), 0)),
        wspec(w1c), wspec(b1f), wspec(dw9), wspec(dwbf), wspec(w2c), wspec(b2f),
    ]

    return pl.pallas_call(
        kernel,
        out_shape=jax.ShapeDtypeStruct((B, N, c_out), out_dtype),
        grid_spec=pltpu.PrefetchScalarGridSpec(
            num_scalar_prefetch=0,
            grid=(B, nT),
            in_specs=in_specs,
            out_specs=pl.BlockSpec((1, T, c_out), lambda b, t: (b, t, 0)),
            scratch_shapes=[pltpu.VMEM((T2, hid), jnp.float32)],
        ),
        compiler_params=pltpu.CompilerParams(
            dimension_semantics=("parallel", "parallel"),
            vmem_limit_bytes=vmem_limit),
    )(x_c, x_c, x_c, w1c, b1f, dw9, dwbf, w2c, b2f)


def mlp_reference(x, params, H, W):
    """Plain-JAX reference (same math) for a sanity check."""
    B, N, C = x.shape
    hid = params["w1"].shape[1]
    h = x @ params["w1"] + params["b1"]
    h_hw = h.reshape(B, H, W, hid)
    padded = jnp.pad(h_hw, ((0, 0), (1, 1), (1, 1), (0, 0)))
    acc = jnp.zeros_like(h_hw) + params["dw_b"]
    for di in range(3):
        for dj in range(3):
            acc = acc + padded[:, di:di + H, dj:dj + W, :] * params["dw_w"][di, dj]
    y = jax.nn.gelu(acc.reshape(B, N, hid), approximate=False)
    return y @ params["w2"] + params["b2"]


if __name__ == "__main__":
    B, H, W = 2, 16, 16
    N = H * W
    C_IN = 128          # in_features (lane-dense)
    HID = 256           # hidden_features
    C_OUT = C_IN        # out_features defaults to in_features in the module

    key = jax.random.PRNGKey(0)
    ks = jax.random.split(key, 7)
    params = {
        "w1":   0.1 * jax.random.normal(ks[0], (C_IN, HID), jnp.float32),
        "b1":   0.1 * jax.random.normal(ks[1], (1, HID), jnp.float32),
        # nn.Conv2d(hid, hid, 3, groups=hid).weight is (hid, 1, 3, 3);
        # stored channels-last here as (3, 3, hid).
        "dw_w": 0.1 * jax.random.normal(ks[2], (3, 3, HID), jnp.float32),
        "dw_b": 0.1 * jax.random.normal(ks[3], (1, HID), jnp.float32),
        "w2":   0.1 * jax.random.normal(ks[4], (HID, C_OUT), jnp.float32),
        "b2":   0.1 * jax.random.normal(ks[5], (1, C_OUT), jnp.float32),
    }
    x = jax.random.normal(ks[6], (B, N, C_IN), jnp.float32)

    ref = mlp_reference(x, params, H, W)

    # Production path: auto row tile (the picker chooses the full image here,
    # so there is no halo recompute), bf16 MXU/DMA operands, f32 accumulation.
    out = jax.block_until_ready(mlp_pallas(x, params, H, W))
    assert out.shape == (B, N, C_OUT)
    err = float(jnp.max(jnp.abs(out - ref)))
    assert jnp.allclose(out, ref, atol=5e-2, rtol=5e-2), err

    # Tiled grid (4 row tiles): exercises the halo rows at both image borders.
    out_t = jax.block_until_ready(mlp_pallas(x, params, H, W, row_tile=4))
    err_t = float(jnp.max(jnp.abs(out_t - ref)))
    assert jnp.allclose(out_t, ref, atol=5e-2, rtol=5e-2), err_t

    # f32 MXU path with a different tiling.
    out_f = jax.block_until_ready(
        mlp_pallas(x, params, H, W, row_tile=8, compute_dtype=jnp.float32))
    err_f = float(jnp.max(jnp.abs(out_f - ref)))
    assert jnp.allclose(out_f, ref, atol=5e-2, rtol=5e-2), err_f

    print("KERNEL_OK")
</pallas_src>

<mosaic_0001>
module attributes {stable_mosaic.version = 11 : i64} {
  func.func @_mlp_kernel(%arg0: i32, %arg1: i32, %arg2: memref<1x16x128xbf16, #tpu.memory_space<vmem>>, %arg3: memref<1x256x128xbf16, #tpu.memory_space<vmem>>, %arg4: memref<1x16x128xbf16, #tpu.memory_space<vmem>>, %arg5: memref<128x256xbf16, #tpu.memory_space<vmem>>, %arg6: memref<1x256xf32, #tpu.memory_space<vmem>>, %arg7: memref<9x256xf32, #tpu.memory_space<vmem>>, %arg8: memref<1x256xf32, #tpu.memory_space<vmem>>, %arg9: memref<256x128xbf16, #tpu.memory_space<vmem>>, %arg10: memref<1x128xf32, #tpu.memory_space<vmem>>, %arg11: memref<1x256x128xf32, #tpu.memory_space<vmem>>, %arg12: memref<288x256xf32, #tpu.memory_space<vmem>>) attributes {dimension_semantics = [#tpu.dimension_semantics<parallel>, #tpu.dimension_semantics<parallel>], iteration_bounds = array<i64: 2, 1>, scalar_prefetch = 0 : i64, scratch_operands = 1 : i64, tpu.core_type = #tpu.core_type<tc>, window_params = [{transform_indices = @transform_0, window_bounds = array<i64: 1, 16, 128>}, {transform_indices = @transform_1, window_bounds = array<i64: 1, 256, 128>}, {transform_indices = @transform_2, window_bounds = array<i64: 1, 16, 128>}, {pipeline_mode = #tpu.pipeline_mode<synchronous>, transform_indices = @transform_3, window_bounds = array<i64: 128, 256>}, {pipeline_mode = #tpu.pipeline_mode<synchronous>, transform_indices = @transform_4, window_bounds = array<i64: 1, 256>}, {pipeline_mode = #tpu.pipeline_mode<synchronous>, transform_indices = @transform_5, window_bounds = array<i64: 9, 256>}, {pipeline_mode = #tpu.pipeline_mode<synchronous>, transform_indices = @transform_6, window_bounds = array<i64: 1, 256>}, {pipeline_mode = #tpu.pipeline_mode<synchronous>, transform_indices = @transform_7, window_bounds = array<i64: 256, 128>}, {pipeline_mode = #tpu.pipeline_mode<synchronous>, transform_indices = @transform_8, window_bounds = array<i64: 1, 128>}, {transform_indices = @transform_9, window_bounds = array<i64: 1, 256, 128>}]} {
    %c0 = arith.constant 0 : index
    %c0_0 = arith.constant 0 : index
    %0 = vector.load %arg5[%c0, %c0_0] : memref<128x256xbf16, #tpu.memory_space<vmem>>, vector<128x256xbf16>
    %c0_1 = arith.constant 0 : index
    %c0_2 = arith.constant 0 : index
    %1 = vector.load %arg6[%c0_1, %c0_2] : memref<1x256xf32, #tpu.memory_space<vmem>>, vector<1x256xf32>
    %c0_3 = arith.constant 0 : index
    %c0_4 = arith.constant 0 : index
    %c0_5 = arith.constant 0 : index
    %2 = vector.load %arg3[%c0_3, %c0_4, %c0_5] : memref<1x256x128xbf16, #tpu.memory_space<vmem>>, vector<1x256x128xbf16>
    %3 = vector.shape_cast %2 : vector<1x256x128xbf16> to vector<256x128xbf16>
    %cst = arith.constant dense<0.000000e+00> : vector<256x256xf32>
    %4 = tpu.matmul %3, %0, %cst {dimension_numbers = #tpu.dot_dimension_numbers<[1], [0], [0], [1], [0, 0, 1, 1], [], []>} : vector<256x128xbf16>, vector<128x256xbf16>, vector<256x256xf32> -> vector<256x256xf32>
    %5 = vector.broadcast %1 : vector<1x256xf32> to vector<256x256xf32>
    %6 = arith.addf %4, %5 : vector<256x256xf32>
    %c16 = arith.constant 16 : index
    %c0_6 = arith.constant 0 : index
    %7 = vector.load %arg12[%c16, %c0_6] : memref<288x256xf32, #tpu.memory_space<vmem>>, vector<256x256xf32>
    tpu.vector_store %arg12[%c16, %c0_6], %6 {strides = array<i32>} : memref<288x256xf32, #tpu.memory_space<vmem>>, vector<256x256xf32>,
    %c0_7 = arith.constant 0 : index
    %c0_8 = arith.constant 0 : index
    %c0_9 = arith.constant 0 : index
    %8 = vector.load %arg2[%c0_7, %c0_8, %c0_9] : memref<1x16x128xbf16, #tpu.memory_space<vmem>>, vector<1x16x128xbf16>
    %9 = vector.shape_cast %8 : vector<1x16x128xbf16> to vector<16x128xbf16>
    %cst_10 = arith.constant dense<0.000000e+00> : vector<16x256xf32>
    %10 = tpu.matmul %9, %0, %cst_10 {dimension_numbers = #tpu.dot_dimension_numbers<[1], [0], [0], [1], [0, 0, 1, 1], [], []>} : vector<16x128xbf16>, vector<128x256xbf16>, vector<16x256xf32> -> vector<16x256xf32>
    %11 = vector.broadcast %1 : vector<1x256xf32> to vector<16x256xf32>
    %12 = arith.addf %10, %11 : vector<16x256xf32>
    %c0_11 = arith.constant 0 : index
    %c0_12 = arith.constant 0 : index
    %c0_13 = arith.constant 0 : index
    %13 = vector.load %arg4[%c0_11, %c0_12, %c0_13] : memref<1x16x128xbf16, #tpu.memory_space<vmem>>, vector<1x16x128xbf16>
    %14 = vector.shape_cast %13 : vector<1x16x128xbf16> to vector<16x128xbf16>
    %cst_14 = arith.constant dense<0.000000e+00> : vector<16x256xf32>
    %15 = tpu.matmul %14, %0, %cst_14 {dimension_numbers = #tpu.dot_dimension_numbers<[1], [0], [0], [1], [0, 0, 1, 1], [], []>} : vector<16x128xbf16>, vector<128x256xbf16>, vector<16x256xf32> -> vector<16x256xf32>
    %16 = vector.broadcast %1 : vector<1x256xf32> to vector<16x256xf32>
    %17 = arith.addf %15, %16 : vector<16x256xf32>
    %c0_i32 = arith.constant 0 : i32
    %18 = arith.cmpi sgt, %arg1, %c0_i32 : i32
    %cst_15 = arith.constant 0.000000e+00 : f32
    %19 = vector.broadcast %cst_15 : f32 to vector<16x256xf32>
    %20 = arith.select %18, %12, %19 : vector<16x256xf32>
    %c0_16 = arith.constant 0 : index
    %c0_17 = arith.constant 0 : index
    %21 = vector.load %arg12[%c0_16, %c0_17] : memref<288x256xf32, #tpu.memory_space<vmem>>, vector<16x256xf32>
    tpu.vector_store %arg12[%c0_16, %c0_17], %20 {strides = array<i32>} : memref<288x256xf32, #tpu.memory_space<vmem>>, vector<16x256xf32>,
    %c0_i32_18 = arith.constant 0 : i32
    %22 = arith.cmpi slt, %arg1, %c0_i32_18 : i32
    %cst_19 = arith.constant 0.000000e+00 : f32
    %23 = vector.broadcast %cst_19 : f32 to vector<16x256xf32>
    %24 = arith.select %22, %17, %23 : vector<16x256xf32>
    %c272 = arith.constant 272 : index
    %c0_20 = arith.constant 0 : index
    %25 = vector.load %arg12[%c272, %c0_20] : memref<288x256xf32, #tpu.memory_space<vmem>>, vector<16x256xf32>
    tpu.vector_store %arg12[%c272, %c0_20], %24 {strides = array<i32>} : memref<288x256xf32, #tpu.memory_space<vmem>>, vector<16x256xf32>,
    %c0_21 = arith.constant 0 : index
    %c0_22 = arith.constant 0 : index
    %26 = vector.load %arg12[%c0_21, %c0_22] : memref<288x256xf32, #tpu.memory_space<vmem>>, vector<288x256xf32>
    %27 = tpu.iota {dimensions = array<i32: 0>} : vector<288x1xi32>
    %c16_i32 = arith.constant 16 : i32
    %c0_i32_23 = arith.constant 0 : i32
    %28 = arith.cmpi eq, %c16_i32, %c0_i32_23 : i32
    %c1_i32 = arith.constant 1 : i32
    %29 = arith.select %28, %c1_i32, %c16_i32 : i32
    %30 = vector.broadcast %29 : i32 to vector<288x1xi32>
    %31 = arith.remsi %27, %30 : vector<288x1xi32>
    %c0_i32_24 = arith.constant 0 : i32
    %32 = vector.broadcast %c0_i32_24 : i32 to vector<288x1xi32>
    %33 = arith.cmpi ne, %31, %32 : vector<288x1xi32>
    %c0_i32_25 = arith.constant 0 : i32
    %34 = vector.broadcast %c0_i32_25 : i32 to vector<288x1xi32>
    %35 = arith.cmpi slt, %31, %34 : vector<288x1xi32>
    %c0_i32_26 = arith.constant 0 : i32
    %36 = arith.cmpi slt, %29, %c0_i32_26 : i32
    %37 = vector.broadcast %36 : i1 to vector<288x1xi1>
    %38 = vector.broadcast %37 : vector<288x1xi1> to vector<288x1xi1>
    %39 = arith.xori %35, %38 : vector<288x1xi1>
    %40 = arith.andi %39, %33 : vector<288x1xi1>
    %41 = vector.broadcast %29 : i32 to vector<288x1xi32>
    %42 = arith.addi %31, %41 : vector<288x1xi32>
    %43 = arith.select %40, %42, %31 : vector<288x1xi1>, vector<288x1xi32>
    %c0_i32_27 = arith.constant 0 : i32
    %44 = vector.broadcast %c0_i32_27 : i32 to vector<288x1xi32>
    %45 = arith.cmpi sgt, %43, %44 : vector<288x1xi32>
    %c1_i32_28 = arith.constant 1 : i32
    %46 = tpu.dynamic_rotate %26 by %c1_i32_28 dim 0 : vector<288x256xf32>, i32 -> vector<288x256xf32>
    %cst_29 = arith.constant 0.000000e+00 : f32
    %47 = vector.shape_cast %45 : vector<288x1xi1> to vector<288x1xi1>
    %48 = vector.broadcast %47 : vector<288x1xi1> to vector<288x256xi1>
    %49 = vector.broadcast %cst_29 : f32 to vector<288x256xf32>
    %50 = arith.select %48, %46, %49 : vector<288x256xi1>, vector<288x256xf32>
    %c15_i32 = arith.constant 15 : i32
    %51 = vector.broadcast %c15_i32 : i32 to vector<288x1xi32>
    %52 = arith.cmpi slt, %43, %51 : vector<288x1xi32>
    %c287_i32 = arith.constant 287 : i32
    %53 = tpu.dynamic_rotate %26 by %c287_i32 dim 0 : vector<288x256xf32>, i32 -> vector<288x256xf32>
    %cst_30 = arith.constant 0.000000e+00 : f32
    %54 = vector.shape_cast %52 : vector<288x1xi1> to vector<288x1xi1>
    %55 = vector.broadcast %54 : vector<288x1xi1> to vector<288x256xi1>
    %56 = vector.broadcast %cst_30 : f32 to vector<288x256xf32>
    %57 = arith.select %55, %53, %56 : vector<288x256xi1>, vector<288x256xf32>
    %c0_31 = arith.constant 0 : index
    %c0_32 = arith.constant 0 : index
    %58 = vector.load %arg7[%c0_31, %c0_32] : memref<9x256xf32, #tpu.memory_space<vmem>>, vector<9x256xf32>
    %cst_33 = arith.constant 0.000000e+00 : f32
    %59 = vector.broadcast %cst_33 : f32 to vector<256x256xf32>
    %60 = vector.extract_strided_slice %50 {offsets = [0, 0], sizes = [256, 256], strides = [1, 1]} : vector<288x256xf32> to vector<256x256xf32>
    %61 = vector.extract_strided_slice %58 {offsets = [0, 0], sizes = [1, 256], strides = [1, 1]} : vector<9x256xf32> to vector<1x256xf32>
    %62 = vector.broadcast %61 : vector<1x256xf32> to vector<256x256xf32>
    %63 = arith.mulf %60, %62 : vector<256x256xf32>
    %64 = arith.addf %59, %63 : vector<256x256xf32>
    %65 = vector.extract_strided_slice %26 {offsets = [0, 0], sizes = [256, 256], strides = [1, 1]} : vector<288x256xf32> to vector<256x256xf32>
    %66 = vector.extract_strided_slice %58 {offsets = [1, 0], sizes = [1, 256], strides = [1, 1]} : vector<9x256xf32> to vector<1x256xf32>
    %67 = vector.broadcast %66 : vector<1x256xf32> to vector<256x256xf32>
    %68 = arith.mulf %65, %67 : vector<256x256xf32>
    %69 = arith.addf %64, %68 : vector<256x256xf32>
    %70 = vector.extract_strided_slice %57 {offsets = [0, 0], sizes = [256, 256], strides = [1, 1]} : vector<288x256xf32> to vector<256x256xf32>
    %71 = vector.extract_strided_slice %58 {offsets = [2, 0], sizes = [1, 256], strides = [1, 1]} : vector<9x256xf32> to vector<1x256xf32>
    %72 = vector.broadcast %71 : vector<1x256xf32> to vector<256x256xf32>
    %73 = arith.mulf %70, %72 : vector<256x256xf32>
    %74 = arith.addf %69, %73 : vector<256x256xf32>
    %75 = vector.extract_strided_slice %50 {offsets = [16, 0], sizes = [256, 256], strides = [1, 1]} : vector<288x256xf32> to vector<256x256xf32>
    %76 = vector.extract_strided_slice %58 {offsets = [3, 0], sizes = [1, 256], strides = [1, 1]} : vector<9x256xf32> to vector<1x256xf32>
    %77 = vector.broadcast %76 : vector<1x256xf32> to vector<256x256xf32>
    %78 = arith.mulf %75, %77 : vector<256x256xf32>
    %79 = arith.addf %74, %78 : vector<256x256xf32>
    %80 = vector.extract_strided_slice %26 {offsets = [16, 0], sizes = [256, 256], strides = [1, 1]} : vector<288x256xf32> to vector<256x256xf32>
    %81 = vector.extract_strided_slice %58 {offsets = [4, 0], sizes = [1, 256], strides = [1, 1]} : vector<9x256xf32> to vector<1x256xf32>
    %82 = vector.broadcast %81 : vector<1x256xf32> to vector<256x256xf32>
    %83 = arith.mulf %80, %82 : vector<256x256xf32>
    %84 = arith.addf %79, %83 : vector<256x256xf32>
    %85 = vector.extract_strided_slice %57 {offsets = [16, 0], sizes = [256, 256], strides = [1, 1]} : vector<288x256xf32> to vector<256x256xf32>
    %86 = vector.extract_strided_slice %58 {offsets = [5, 0], sizes = [1, 256], strides = [1, 1]} : vector<9x256xf32> to vector<1x256xf32>
    %87 = vector.broadcast %86 : vector<1x256xf32> to vector<256x256xf32>
    %88 = arith.mulf %85, %87 : vector<256x256xf32>
    %89 = arith.addf %84, %88 : vector<256x256xf32>
    %90 = vector.extract_strided_slice %50 {offsets = [32, 0], sizes = [256, 256], strides = [1, 1]} : vector<288x256xf32> to vector<256x256xf32>
    %91 = vector.extract_strided_slice %58 {offsets = [6, 0], sizes = [1, 256], strides = [1, 1]} : vector<9x256xf32> to vector<1x256xf32>
    %92 = vector.broadcast %91 : vector<1x256xf32> to vector<256x256xf32>
    %93 = arith.mulf %90, %92 : vector<256x256xf32>
    %94 = arith.addf %89, %93 : vector<256x256xf32>
    %95 = vector.extract_strided_slice %26 {offsets = [32, 0], sizes = [256, 256], strides = [1, 1]} : vector<288x256xf32> to vector<256x256xf32>
    %96 = vector.extract_strided_slice %58 {offsets = [7, 0], sizes = [1, 256], strides = [1, 1]} : vector<9x256xf32> to vector<1x256xf32>
    %97 = vector.broadcast %96 : vector<1x256xf32> to vector<256x256xf32>
    %98 = arith.mulf %95, %97 : vector<256x256xf32>
    %99 = arith.addf %94, %98 : vector<256x256xf32>
    %100 = vector.extract_strided_slice %57 {offsets = [32, 0], sizes = [256, 256], strides = [1, 1]} : vector<288x256xf32> to vector<256x256xf32>
    %101 = vector.extract_strided_slice %58 {offsets = [8, 0], sizes = [1, 256], strides = [1, 1]} : vector<9x256xf32> to vector<1x256xf32>
    %102 = vector.broadcast %101 : vector<1x256xf32> to vector<256x256xf32>
    %103 = arith.mulf %100, %102 : vector<256x256xf32>
    %104 = arith.addf %99, %103 : vector<256x256xf32>
    %c0_34 = arith.constant 0 : index
    %c0_35 = arith.constant 0 : index
    %105 = vector.load %arg8[%c0_34, %c0_35] : memref<1x256xf32, #tpu.memory_space<vmem>>, vector<1x256xf32>
    %106 = vector.broadcast %105 : vector<1x256xf32> to vector<256x256xf32>
    %107 = arith.addf %104, %106 : vector<256x256xf32>
    %cst_36 = arith.constant 5.000000e-01 : f32
    %108 = vector.broadcast %cst_36 : f32 to vector<256x256xf32>
    %109 = arith.mulf %108, %107 : vector<256x256xf32>
    %cst_37 = arith.constant 0.707106769 : f32
    %110 = vector.broadcast %cst_37 : f32 to vector<256x256xf32>
    %111 = arith.mulf %107, %110 : vector<256x256xf32>
    %112 = math.absf %111 : vector<256x256xf32>
    %cst_38 = arith.constant 0.327591091 : f32
    %113 = vector.broadcast %cst_38 : f32 to vector<256x256xf32>
    %114 = arith.mulf %113, %112 : vector<256x256xf32>
    %cst_39 = arith.constant 1.000000e+00 : f32
    %115 = vector.broadcast %cst_39 : f32 to vector<256x256xf32>
    %116 = arith.addf %115, %114 : vector<256x256xf32>
    %cst_40 = arith.constant 1.000000e+00 : f32
    %117 = vector.broadcast %cst_40 : f32 to vector<256x256xf32>
    %118 = arith.divf %117, %116 : vector<256x256xf32>
    %cst_41 = arith.constant 1.06140542 : f32
    %119 = vector.broadcast %cst_41 : f32 to vector<256x256xf32>
    %120 = arith.mulf %119, %118 : vector<256x256xf32>
    %cst_42 = arith.constant -1.45315206 : f32
    %121 = vector.broadcast %cst_42 : f32 to vector<256x256xf32>
    %122 = arith.addf %120, %121 : vector<256x256xf32>
    %123 = arith.mulf %122, %118 : vector<256x256xf32>
    %cst_43 = arith.constant 1.42141378 : f32
    %124 = vector.broadcast %cst_43 : f32 to vector<256x256xf32>
    %125 = arith.addf %123, %124 : vector<256x256xf32>
    %126 = arith.mulf %125, %118 : vector<256x256xf32>
    %cst_44 = arith.constant -0.284496725 : f32
    %127 = vector.broadcast %cst_44 : f32 to vector<256x256xf32>
    %128 = arith.addf %126, %127 : vector<256x256xf32>
    %129 = arith.mulf %128, %118 : vector<256x256xf32>
    %cst_45 = arith.constant 0.254829586 : f32
    %130 = vector.broadcast %cst_45 : f32 to vector<256x256xf32>
    %131 = arith.addf %129, %130 : vector<256x256xf32>
    %132 = arith.mulf %131, %118 : vector<256x256xf32>
    %133 = arith.mulf %112, %112 : vector<256x256xf32>
    %cst_46 = arith.constant 0.000000e+00 : f32
    %134 = vector.broadcast %cst_46 : f32 to vector<256x256xf32>
    %135 = arith.subf %134, %133 : vector<256x256xf32>
    %136 = math.exp %135 : vector<256x256xf32>
    %137 = arith.mulf %132, %136 : vector<256x256xf32>
    %cst_47 = arith.constant 1.000000e+00 : f32
    %138 = vector.broadcast %cst_47 : f32 to vector<256x256xf32>
    %139 = arith.subf %138, %137 : vector<256x256xf32>
    %cst_48 = arith.constant 0.000000e+00 : f32
    %140 = vector.broadcast %cst_48 : f32 to vector<256x256xf32>
    %141 = arith.cmpf olt, %111, %140 : vector<256x256xf32>
    %cst_49 = arith.constant 0.000000e+00 : f32
    %142 = vector.broadcast %cst_49 : f32 to vector<256x256xf32>
    %143 = arith.subf %142, %139 : vector<256x256xf32>
    %144 = arith.select %141, %143, %139 : vector<256x256xi1>, vector<256x256xf32>
    %cst_50 = arith.constant 1.000000e+00 : f32
    %145 = vector.broadcast %cst_50 : f32 to vector<256x256xf32>
    %146 = arith.addf %145, %144 : vector<256x256xf32>
    %147 = arith.mulf %109, %146 : vector<256x256xf32>
    %148 = arith.truncf %147 : vector<256x256xf32> to vector<256x256xbf16>
    %c0_51 = arith.constant 0 : index
    %c0_52 = arith.constant 0 : index
    %149 = vector.load %arg9[%c0_51, %c0_52] : memref<256x128xbf16, #tpu.memory_space<vmem>>, vector<256x128xbf16>
    %cst_53 = arith.constant dense<0.000000e+00> : vector<256x128xf32>
    %150 = tpu.matmul %148, %149, %cst_53 {dimension_numbers = #tpu.dot_dimension_numbers<[1], [0], [0], [1], [0, 0, 1, 1], [], []>} : vector<256x256xbf16>, vector<256x128xbf16>, vector<256x128xf32> -> vector<256x128xf32>
    %c0_54 = arith.constant 0 : index
    %c0_55 = arith.constant 0 : index
    %151 = vector.load %arg10[%c0_54, %c0_55] : memref<1x128xf32, #tpu.memory_space<vmem>>, vector<1x128xf32>
    %152 = vector.broadcast %151 : vector<1x128xf32> to vector<256x128xf32>
    %153 = arith.addf %150, %152 : vector<256x128xf32>
    %c0_56 = arith.constant 0 : index
    %c0_57 = arith.constant 0 : index
    %c0_58 = arith.constant 0 : index
    %154 = vector.load %arg11[%c0_56, %c0_57, %c0_58] : memref<1x256x128xf32, #tpu.memory_space<vmem>>, vector<1x256x128xf32>
    %155 = vector.shape_cast %154 : vector<1x256x128xf32> to vector<256x128xf32>
    %156 = vector.shape_cast %153 : vector<256x128xf32> to vector<1x256x128xf32>
    tpu.vector_store %arg11[%c0_56, %c0_57, %c0_58], %156 {strides = array<i32>} : memref<1x256x128xf32, #tpu.memory_space<vmem>>, vector<1x256x128xf32>,
    return
  }
  func.func @transform_0(%arg0: i32, %arg1: i32) -> (i32, i32, i32) {
    %c16_i32 = arith.constant 16 : i32
    %0 = arith.muli %arg1, %c16_i32 : i32
    %c1_i32 = arith.constant 1 : i32
    %1 = arith.subi %0, %c1_i32 : i32
    %c0_i32 = arith.constant 0 : i32
    %2 = arith.maxsi %1, %c0_i32 : i32
    %c0_i32_0 = arith.constant 0 : i32
    %c0_i32_1 = arith.constant 0 : i32
    return %arg0, %2, %c0_i32_0 : i32, i32, i32
  }
  func.func @transform_1(%arg0: i32, %arg1: i32) -> (i32, i32, i32) {
    %c0_i32 = arith.constant 0 : i32
    %c0_i32_0 = arith.constant 0 : i32
    return %arg0, %arg1, %c0_i32 : i32, i32, i32
  }
  func.func @transform_2(%arg0: i32, %arg1: i32) -> (i32, i32, i32) {
    %c16_i32 = arith.constant 16 : i32
    %0 = arith.muli %arg1, %c16_i32 : i32
    %c16_i32_0 = arith.constant 16 : i32
    %1 = arith.addi %0, %c16_i32_0 : i32
    %c15_i32 = arith.constant 15 : i32
    %2 = arith.minsi %1, %c15_i32 : i32
    %c0_i32 = arith.constant 0 : i32
    %c0_i32_1 = arith.constant 0 : i32
    return %arg0, %2, %c0_i32 : i32, i32, i32
  }
  func.func @transform_3(%arg0: i32, %arg1: i32) -> (i32, i32) {
    %c0_i32 = arith.constant 0 : i32
    %c0_i32_0 = arith.constant 0 : i32
    %c0_i32_1 = arith.constant 0 : i32
    return %c0_i32, %c0_i32_0 : i32, i32
  }
  func.func @transform_4(%arg0: i32, %arg1: i32) -> (i32, i32) {
    %c0_i32 = arith.constant 0 : i32
    %c0_i32_0 = arith.constant 0 : i32
    %c0_i32_1 = arith.constant 0 : i32
    return %c0_i32, %c0_i32_0 : i32, i32
  }
  func.func @transform_5(%arg0: i32, %arg1: i32) -> (i32, i32) {
    %c0_i32 = arith.constant 0 : i32
    %c0_i32_0 = arith.constant 0 : i32
    %c0_i32_1 = arith.constant 0 : i32
    return %c0_i32, %c0_i32_0 : i32, i32
  }
  func.func @transform_6(%arg0: i32, %arg1: i32) -> (i32, i32) {
    %c0_i32 = arith.constant 0 : i32
    %c0_i32_0 = arith.constant 0 : i32
    %c0_i32_1 = arith.constant 0 : i32
    return %c0_i32, %c0_i32_0 : i32, i32
  }
  func.func @transform_7(%arg0: i32, %arg1: i32) -> (i32, i32) {
    %c0_i32 = arith.constant 0 : i32
    %c0_i32_0 = arith.constant 0 : i32
    %c0_i32_1 = arith.constant 0 : i32
    return %c0_i32, %c0_i32_0 : i32, i32
  }
  func.func @transform_8(%arg0: i32, %arg1: i32) -> (i32, i32) {
    %c0_i32 = arith.constant 0 : i32
    %c0_i32_0 = arith.constant 0 : i32
    %c0_i32_1 = arith.constant 0 : i32
    return %c0_i32, %c0_i32_0 : i32, i32
  }
  func.func @transform_9(%arg0: i32, %arg1: i32) -> (i32, i32, i32) {
    %c0_i32 = arith.constant 0 : i32
    %c0_i32_0 = arith.constant 0 : i32
    return %arg0, %arg1, %c0_i32 : i32, i32, i32
  }
}

</mosaic_0001>

<bundles_post_ra>
// kernel: tpu_custom_call.1
= control target key start
LH: loop header
LB: loop body
LE: loop exit
PB: predicated region body
PF: predicated region fallthrough
CT: control target
= control target key end

     0   :  { %s12094_s0 = inlined_call_operand.hbm [shape: bf16[2,256,128], index: 0, kind: input, shape index: {}]   ;;  %s12095_s1 = inlined_call_operand.hbm [shape: bf16[2,256,128], index: 1, kind: input, shape index: {}]   ;;  %s12096_s2 = inlined_call_operand.hbm [shape: bf16[2,256,128], index: 2, kind: input, shape index: {}]   ;;  %s12097_s3 = inlined_call_operand.hbm [shape: bf16[128,256], index: 3, kind: input, shape index: {}]   ;;  %s12098_s4 = inlined_call_operand.vmem [shape: f32[1,256], index: 4, kind: input, shape index: {}]   ;;  %s12099_s5 = inlined_call_operand.hbm [shape: f32[9,256], index: 5, kind: input, shape index: {}]   ;;  %s12100_s6 = inlined_call_operand.vmem [shape: f32[1,256], index: 6, kind: input, shape index: {}]   ;;  %s12101_s7 = inlined_call_operand.hbm [shape: bf16[256,128], index: 7, kind: input, shape index: {}]   ;;  %s12102_s8 = inlined_call_operand.vmem [shape: f32[1,128], index: 8, kind: input, shape index: {}]   ;;  %s12103_s9 = inlined_call_operand.hbm [shape: f32[2,256,128], index: 9, kind: output, shape index: {}]  }
   0x1   :  { %12433 = sst [smem:[#allocation206_spill]] %s12095_s1 }
   0x2   :  { %12434 = sst [smem:[#allocation207_spill]] %s12097_s3 }
   0x3   :  { %12435 = sst [smem:[#allocation208_spill]] %s12100_s6 }
   0x4   :  { %12436 = sst [smem:[#allocation209_spill]] %s12102_s8 }
   0x5   :  { %12437 = sst [smem:[#allocation210_spill]] %s12103_s9 }
   0x6   :  { %14 = vsyncpa [#allocation4], 0 }
   0x7   :  { %16 = vsyncpa [#allocation4 + $0x1], 0 }
   0x8   :  { %17 = vsyncpa [#allocation7], 0 }
   0x9   :  { %19 = vsyncpa [#allocation7 + $0x1], 0 }
   0xa   :  { %20 = vsyncpa [#allocation10], 0 }
   0xb   :  { %21 = vsyncpa [#allocation13], 0 }
   0xc   :  { %22 = vsyncpa [#allocation5], 0 }
   0xd   :  { %24 = vsyncpa [#allocation5 + $0x1], 0  ;;  %s6891_s30 = smov 0   ;;  %s6893_s10 = smov 0  }
   0xe   :  { %s6895_s11 = smov 0   ;;  %s6897_s12 = smov 0  }
   0xf   :  { %s6899_s13 = smov 0   ;;  %s6901_s14 = smov 0  }
  0x10 LB: > { %12438 = sst [smem:[#allocation20_spill]] %s6802_s30  ;;  %s6922_s15 = sadd.s32 4294967295, %s6822_s14   ;;  %s6822_s14 = sphi %s6901_s14, %s30_s14   ;;  %s6818_s13 = sphi %s6899_s13, %s13378_s13   ;;  %s6814_s12 = sphi %s6897_s12, %s13377_s12   ;;  %s6810_s11 = sphi %s6895_s11, %s13376_s11   ;;  %s6806_s10 = sphi %s6893_s10, %s13380_s10   ;;  %s6802_s30 = sphi %s6891_s30, %s13379_s30  }
  0x11   : > { %12439 = sst [smem:[#allocation21_spill]] %s6810_s11  ;;  %s5919_s16 = sadd.s32 4294967294, %s6822_s14  }
  0x12   : > { %12440 = sst [smem:[#allocation22_spill]] %s6814_s12  ;;  %p66_p0 = scmp.ne.s32.totalorder %s6810_s11, %s6806_s10 }
  0x13   : > { %12441 = sst [smem:[#allocation23_spill]] %s6818_s13  ;;  %p67_p1 = scmp.eq.s32.totalorder %s6822_s14, 0 }
  0x14   : > { %12442 = sst [smem:[#allocation24_spill]] %s6822_s14  ;;  %p72_p2 = scmp.ne.s32.totalorder %s6806_s10, %s6802_s30 }
  0x15   : > { %p12107_p3 = scmp.eq.s32.totalorder %s6922_s15, 0  ;;  %p6931_p4 = por %p67_p1, %p66_p0 }
  0x16   : > { %p288_p5 = scmp.eq.s32.totalorder %s6922_s15, 1  ;;  %p294_p7 = scmp.eq.s32.totalorder %s5919_s16, 1 }
  0x17   : > { %p6938_p6 = por %p12107_p3, %p72_p2  ;;  %p5920_p9 = scmp.ge.s32.totalorder %s6822_s14, 1 }
  0x18   : > { %p6942_p8 = por %p288_p5, %p66_p0  ;;  %p6947_p10 = por %p294_p7, %p72_p2 }
  0x19   : > { %s12444_s18 = scalar_select %p6938_p6, 1, 0 }
  0x1a   : > { %s12445_s19 = scalar_select %p6942_p8, 1, 0 }
  0x1b   : > { %s12447_s20 = scalar_select %p6947_p10, 1, 0 }
  0x1c   : > { %12446 = sst [smem:[#allocation25_spill]] %s12445_s19  ;;  %p301_p11 = scmp.lt.s32.totalorder %s6822_s14, 3 }
  0x1d   : > { %12448 = sst [smem:[#allocation26_spill]] %s12447_s20  ;;  %s6824_s22 = smov [#allocation9]  }
  0x1e   : > { %p6952_p12 = pnand %p5920_p9, %p301_p11  ;;  %s313_s23 = sshll.u32 %s6824_s22, 4  ;;  %s6956_s23 = int_to_ptr.vmem [resolvable:$true] %s313_s23 }
  0x1f   : > { %s42_s25 = sadd.s32 1, %s6818_s13  ;;  %s12452_s3 = sld [smem:[#allocation207_spill]] }
  0x20   : > { %s12449_s21 = scalar_select %p6952_p12, 1, 0 }
  0x21   : > { %p6138_p13 = pneg %p6952_p12  ;;  %p6969_p2 = scmp.ge.s32.totalorder %s42_s25, 2 }
  0x23   : > { %p6963_p1 = pnand %p6138_p13, %p12107_p3 }
  0x25   : > { %s12450_s24 = scalar_select %p6963_p1, 1, 0 }
  0x26   : > { %s6554_s16 = scalar_lea.hbm %s12452_s3, 2048  ;;  %p6981_p7 = pneg %p6963_p1 }
  0x27   : > { %p6555_p5 = scmp.ne.s32.totalorder %s12452_s3, %s6554_s16  ;;  %p6561_p13 = scmp.lt.u32.totalorder %s6554_s16, %s12452_s3 }
  0x28   : > { %s12453_s30 = scalar_select %p6981_p7, 1, 0 }
  0x29   : > { %p6557_p9 = pnand %p6981_p7, %p6555_p5 }
  0x2b   : > { %p6558_p11 = pneg %p6557_p9 }
  0x2d   : > { %p6563_p0 = pnand %p6561_p13, %p6558_p11 }
  0x2f   : > { %6566 = shalt.err (!%p6563_p0)
}
  0x30   : > { %s6567_s20 = scalar_lea.vmem %s6956_s23, 2048  ;;  %p6575_p6 = scmp.lt.s32.totalorder %s6956_s23, %s6956_s23 }
  0x31   : > { %p6568_p3 = scmp.ne.s32.totalorder %s6956_s23, %s6567_s20  ;;  %p6576_p12 = scmp.lt.s32.totalorder %s6567_s20, %s6567_s20 }
  0x33   : > { %p6570_p10 = pnand %p6568_p3, %p6981_p7  ;;  %p6577_p5 = por %p6576_p12, %p6575_p6 }
  0x35   : > { %p6571_p8 = pneg %p6570_p10 }
  0x37   : > { %p6578_p9 = pnand %p6577_p5, %p6571_p8 }
  0x39   : > { %6581 = shalt.err (!%p6578_p9)
}
  0x3a   : > { %s6825_s28 = smov 128   ;;  %s6826_s9 = smov 8  }
  0x3b   : > { %6141 = dma.hbm_to_vmem [thread:$0]  (!%p6963_p1), %s12452_s3, 2048, %s6956_s23, [#allocation10], %s6825_s28, %s6825_s28, %s6826_s9  }
  0x3c   : > { %s13382_s25 = smov (%p6969_p2, %s42_s25), 0  ;;  %p6165_p3 = scmp.lt.s32.totalorder %s6822_s14, 2 }
  0x3d   : > { %12454 = sst [smem:[#allocation27_spill]] %s13382_s25  ;;  %s54_s16 = ssub.s32 %s6818_s13, %s13382_s25 }
  0x3e   : > { %p57_p6 = scmp.eq.s32.totalorder %s54_s16, 0  ;;  %s7010_s22 = sand.u32 1, %s6810_s11  }
  0x3f   : > { %s7013_s20 = sshll.u32 %s6818_s13, 11  ;;  %p7017_p8 = pnand %p6165_p3, %p6931_p4 }
  0x40   : > { %s12456_s26 = sadd.s32 1, %s6810_s11  ;;  %s389_s27 = sand.u32 1, %s6822_s14  }
  0x41   : > { %s12455_s19 = scalar_select %p7017_p8, 1, 0 }
  0x42   : > { %s7024_s23 = scalar_select %p57_p6, %s6810_s11, %s12456_s26  }
  0x43   : > { %s5928_s28 = sshll.u32 %s7010_s22, 7  ;;  %s12458_s1 = sld [smem:[#allocation206_spill]] }
  0x44   : > { %12457 = sst [smem:[#allocation28_spill]] %s7024_s23  ;;  %s393_s17 = scalar_lea.vmem [#allocation6], %s5928_s28 }
  0x45   : > { %s402_s3 = sshll.u32 %s393_s17, 4  ;;  %s6827_s25 = smov [#allocation11]   ;;  %s7034_s3 = int_to_ptr.vmem [resolvable:$true] %s402_s3 }
  0x46   : > { %s7036_s13 = sshll.u32 %s6827_s25, 4  ;;  %s7038_s26 = scalar_lea.sflag [#allocation7], %s389_s27  ;;  %s330_s13 = int_to_ptr.vmem [resolvable:$true] %s7036_s13 }
  0x47   : > { %p7044_p10 = pneg %p7017_p8 }
  0x49   : > { %s7032_s16 = scalar_lea.hbm %s12458_s1, %s7013_s20  ;;  %s6587_s17 = scalar_lea.hbm %s12458_s1, 4096 }
  0x4a   : > { %s6582_s23 = scalar_lea.hbm %s7032_s16, 2048  ;;  %p6588_p2 = scmp.lt.u32.totalorder %s7032_s16, %s12458_s1 }
  0x4b   : > { %p6583_p4 = scmp.ne.s32.totalorder %s7032_s16, %s6582_s23  ;;  %p6589_p11 = scmp.lt.u32.totalorder %s6587_s17, %s6582_s23 }
  0x4c   : > { %s12459_s9 = scalar_select %p7044_p10, 1, 0 }
  0x4d   : > { %p6585_p12 = pnand %p7044_p10, %p6583_p4  ;;  %p6590_p13 = por %p6589_p11, %p6588_p2 }
  0x4e   : > { %p6591_p5 = scmp.lt.u32.totalorder %s6582_s23, %s7032_s16 }
  0x4f   : > { %p6586_p0 = pneg %p6585_p12 }
  0x50   : > { %p6592_p9 = por %p6591_p5, %p6590_p13 }
  0x52   : > { %p6593_p3 = pnand %p6592_p9, %p6586_p0 }
  0x54   : > { %6596 = shalt.err (!%p6593_p3)
}
  0x55   : > { %s6597_s27 = scalar_lea.vmem %s7034_s3, 2048  ;;  %s6828_s28 = smov [#allocation6]  }
  0x56   : > { %p6598_p6 = scmp.ne.s32.totalorder %s7034_s3, %s6597_s27  ;;  %s6602_s29 = sshll.u32 %s6828_s28, 4  ;;  %s6603_s29 = int_to_ptr.vmem [resolvable:$false] %s6602_s29 }
  0x57   : > { %s6604_s11 = scalar_lea.vmem %s6603_s29, 4096  ;;  %p6605_p1 = scmp.lt.s32.totalorder %s7034_s3, %s6603_s29 }
  0x58   : > { %p6600_p4 = pnand %p6598_p6, %p7044_p10  ;;  %p6606_p7 = scmp.lt.s32.totalorder %s6604_s11, %s6597_s27 }
  0x5a   : > { %p6601_p12 = pneg %p6600_p4  ;;  %p6607_p2 = por %p6606_p7, %p6605_p1 }
  0x5c   : > { %p6608_p11 = pnand %p6607_p2, %p6601_p12 }
  0x5e   : > { %6611 = shalt.err (!%p6608_p11)
}
  0x5f   : > { %s12124_s23 = smov 64   ;;  %s12126_s17 = smov 4  }
  0x60   : > { %6154 = dma.hbm_to_vmem [thread:$0]  (!%p7017_p8), %s7032_s16, 2048, %s7034_s3, %s7038_s26, %s12124_s23, %s12124_s23, %s12126_s17  }
  0x61   : > { %s6612_s27 = scalar_lea.hbm %s12099_s5, 512  ;;  %p12460_p7 = scmp.ne.s32.totalorder %s12453_s30, 0 }
  0x62   : > { %p6613_p1 = scmp.ne.s32.totalorder %s12099_s5, %s6612_s27  ;;  %p6619_p5 = scmp.lt.u32.totalorder %s6612_s27, %s12099_s5 }
  0x64   : > { %p6615_p0 = pnand %p6613_p1, %p12460_p7 }
  0x66   : > { %p6616_p13 = pneg %p6615_p0 }
  0x68   : > { %p6621_p9 = pnand %p6619_p5, %p6616_p13 }
  0x6a   : > { %6624 = shalt.err (!%p6621_p9)
}
  0x6b   : > { %s6625_s12 = scalar_lea.vmem %s330_s13, 512  ;;  %p6633_p12 = scmp.lt.s32.totalorder %s330_s13, %s330_s13 }
  0x6c   : > { %p6626_p3 = scmp.ne.s32.totalorder %s330_s13, %s6625_s12  ;;  %p6634_p2 = scmp.lt.s32.totalorder %s6625_s12, %s6625_s12 }
  0x6e   : > { %p6628_p6 = pnand %p6626_p3, %p12460_p7  ;;  %p6635_p11 = por %p6634_p2, %p6633_p12 }
  0x70   : > { %p6629_p4 = pneg %p6628_p6 }
  0x72   : > { %p6636_p8 = pnand %p6635_p11, %p6629_p4 }
  0x74   : > { %6639 = shalt.err (!%p6636_p8)
}
  0x75   : > { %s6831_s3 = smov 256   ;;  %s6832_s16 = smov 16  }
  0x76   : > { %p12461_p1 = scmp.ne.s32.totalorder %s12450_s24, 0  ;;  %s6833_s25 = smov [#allocation12]  }
  0x77   : > { %s345_s28 = sshll.u32 %s6833_s25, 4  ;;  %s5925_s27 = sshll.u32 %s7010_s22, 3  ;;  %s346_s28 = int_to_ptr.vmem [resolvable:$true] %s345_s28 }
  0x78   : > { %6144 = dma.hbm_to_vmem [thread:$0]  (!%p12461_p1), %s12099_s5, 512, %s330_s13, [#allocation10], %s6831_s3, %s6831_s3, %s6832_s16  }
  0x79   : > { %s6640_s12 = scalar_lea.hbm %s12101_s7, 2048 }
  0x7a   : > { %p6641_p8 = scmp.ne.s32.totalorder %s12101_s7, %s6640_s12  ;;  %p6647_p5 = scmp.lt.u32.totalorder %s6640_s12, %s12101_s7 }
  0x7c   : > { %p6643_p0 = pnand %p6641_p8, %p12460_p7 }
  0x7e   : > { %p6644_p13 = pneg %p6643_p0 }
  0x80   : > { %p6649_p9 = pnand %p6647_p5, %p6644_p13 }
  0x82   : > { %6652 = shalt.err (!%p6649_p9)
}
  0x83   : > { %s6653_s13 = scalar_lea.vmem %s346_s28, 2048  ;;  %p6661_p12 = scmp.lt.s32.totalorder %s346_s28, %s346_s28 }
  0x84   : > { %p6654_p3 = scmp.ne.s32.totalorder %s346_s28, %s6653_s13  ;;  %p6662_p2 = scmp.lt.s32.totalorder %s6653_s13, %s6653_s13 }
  0x86   : > { %p6656_p6 = pnand %p6654_p3, %p12460_p7  ;;  %p6663_p11 = por %p6662_p2, %p6661_p12 }
  0x88   : > { %p6657_p4 = pneg %p6656_p6 }
  0x8a   : > { %p6664_p10 = pnand %p6663_p11, %p6657_p4 }
  0x8c   : > { %6667 = shalt.err (!%p6664_p10)
}
  0x8d   : > { %s12462_s23 = smov 4   ;;  %s12463_s17 = smov 64  }
  0x8e   : > { %6147 = dma.hbm_to_vmem [thread:$0]  (!%p12461_p1), %s12101_s7, 2048, %s346_s28, [#allocation13], %s12463_s17, %s12463_s17, %s12462_s23  }
  0x8f   : > { %s7116_s16 = scalar_lea.hbm %s12094_s0, %s7013_s20  ;;  %s366_s24 = scalar_lea.vmem [#allocation3], %s5925_s27 }
  0x90   : > { %s379_s1 = sshll.u32 %s366_s24, 4  ;;  %s7120_s14 = scalar_lea.vmem [#allocation8], %s5925_s27  ;;  %s7118_s1 = int_to_ptr.vmem [resolvable:$true] %s379_s1 }
  0x91   : > { %s429_s25 = sshll.u32 %s7120_s14, 4  ;;  %s363_s29 = scalar_lea.sflag [#allocation4], %s7010_s22  ;;  %s7152_s25 = int_to_ptr.vmem [resolvable:$true] %s429_s25 }
  0x92   : > { %s6668_s11 = scalar_lea.hbm %s7116_s16, 128  ;;  %p12464_p7 = scmp.ne.s32.totalorder %s12459_s9, 0 }
  0x93   : > { %p6669_p10 = scmp.ne.s32.totalorder %s7116_s16, %s6668_s11  ;;  %s6673_s13 = scalar_lea.hbm %s12094_s0, 4096 }
  0x94   : > { %p6674_p0 = scmp.lt.u32.totalorder %s7116_s16, %s12094_s0  ;;  %p6675_p13 = scmp.lt.u32.totalorder %s6673_s13, %s6668_s11 }
  0x95   : > { %p6671_p1 = pnand %p6669_p10, %p12464_p7  ;;  %p6677_p9 = scmp.lt.u32.totalorder %s6668_s11, %s7116_s16 }
  0x96   : > { %p6676_p5 = por %p6675_p13, %p6674_p0 }
  0x97   : > { %p6672_p8 = pneg %p6671_p1 }
  0x98   : > { %p6678_p3 = por %p6677_p9, %p6676_p5 }
  0x9a   : > { %p6679_p6 = pnand %p6678_p3, %p6672_p8 }
  0x9c   : > { %6682 = shalt.err (!%p6679_p6)
}
  0x9d   : > { %s6683_s27 = scalar_lea.vmem %s7118_s1, 128  ;;  %s6834_s30 = smov [#allocation3]  }
  0x9e   : > { %p6684_p4 = scmp.ne.s32.totalorder %s7118_s1, %s6683_s27  ;;  %s6688_s3 = sshll.u32 %s6834_s30, 4  ;;  %s6689_s3 = int_to_ptr.vmem [resolvable:$false] %s6688_s3 }
  0x9f   : > { %s6690_s24 = scalar_lea.vmem %s6689_s3, 256  ;;  %p6691_p11 = scmp.lt.s32.totalorder %s7118_s1, %s6689_s3 }
  0xa0   : > { %p6686_p12 = pnand %p6684_p4, %p12464_p7  ;;  %p6692_p10 = scmp.lt.s32.totalorder %s6690_s24, %s6683_s27 }
  0xa2   : > { %p6687_p2 = pneg %p6686_p12  ;;  %p6693_p1 = por %p6692_p10, %p6691_p11 }
  0xa4   : > { %p6694_p0 = pnand %p6693_p1, %p6687_p2 }
  0xa6   : > { %6697 = shalt.err (!%p6694_p0)
}
  0xa7   : > { %p12465_p8 = scmp.ne.s32.totalorder %s12455_s19, 0  ;;  %s6003_s11 = sadd.s32 1920, %s7013_s20 }
  0xa8   : > { %s7158_s13 = scalar_lea.hbm %s12096_s2, %s6003_s11 }
  0xa9   : > { %6151 = dma.hbm_to_vmem [thread:$0]  (!%p12465_p8), %s7116_s16, 128, %s7118_s1, %s363_s29, %s12463_s17, %s12463_s17, %s12462_s23  }
  0xaa   : > { %s6698_s22 = scalar_lea.hbm %s7158_s13, 128  ;;  %s6703_s1 = scalar_lea.hbm %s12096_s2, 4096 }
  0xab   : > { %p6699_p13 = scmp.ne.s32.totalorder %s7158_s13, %s6698_s22  ;;  %p6704_p3 = scmp.lt.u32.totalorder %s7158_s13, %s12096_s2 }
  0xac   : > { %p6705_p6 = scmp.lt.u32.totalorder %s6703_s1, %s6698_s22  ;;  %p6707_p12 = scmp.lt.u32.totalorder %s6698_s22, %s7158_s13 }
  0xad   : > { %p6701_p5 = pnand %p6699_p13, %p12464_p7 }
  0xae   : > { %p6706_p4 = por %p6705_p6, %p6704_p3 }
  0xaf   : > { %p6702_p9 = pneg %p6701_p5 }
  0xb0   : > { %p6708_p2 = por %p6707_p12, %p6706_p4 }
  0xb2   : > { %p6709_p11 = pnand %p6708_p2, %p6702_p9 }
  0xb4   : > { %6712 = shalt.err (!%p6709_p11)
}
  0xb5   : > { %s6713_s29 = scalar_lea.vmem %s7152_s25, 128  ;;  %s6835_s8 = smov [#allocation8]  }
  0xb6   : > { %p6714_p10 = scmp.ne.s32.totalorder %s7152_s25, %s6713_s29  ;;  %s6718_s27 = sshll.u32 %s6835_s8, 4  ;;  %s6719_s27 = int_to_ptr.vmem [resolvable:$false] %s6718_s27 }
  0xb7   : > { %s6720_s30 = scalar_lea.vmem %s6719_s27, 256  ;;  %p6721_p13 = scmp.lt.s32.totalorder %s7152_s25, %s6719_s27 }
  0xb8   : > { %p6716_p1 = pnand %p6714_p10, %p12464_p7  ;;  %p6722_p5 = scmp.lt.s32.totalorder %s6720_s30, %s6713_s29 }
  0xba   : > { %p6717_p0 = pneg %p6716_p1  ;;  %p6723_p3 = por %p6722_p5, %p6721_p13 }
  0xbc   : > { %p6724_p6 = pnand %p6723_p3, %p6717_p0 }
  0xbe   : > { %6727 = shalt.err (!%p6724_p6)
}
  0xbf   : > { %6157 = dma.hbm_to_vmem [thread:$0]  (!%p12465_p8), %s7158_s13, 128, %s7152_s25, %s7038_s26, %s12463_s17, %s12463_s17, %s12462_s23  }
  0xc0   : > { %p12466_p7 = scmp.ne.s32.totalorder %s12449_s21, 0 }
  0xc2   : > { %441 = sbr.rel (%p12466_p7) target bundleno = 1571 (0x623), region = 56 }
  0xc9   : > { %s7188_s9 = sand.u32 1, %s6806_s10   ;;  %p12467_p9 = scmp.ne.s32.totalorder %s12444_s18, 0 }
  0xca   : > { %s5935_s3 = sshll.u32 %s7188_s9, 3  ;;  %s444_s24 = scalar_lea.sflag [#allocation4], %s7188_s9 }
  0xcb   : > { %s7192_s11 = scalar_lea.vmem [#allocation3], %s5935_s3 }
  0xcc   : > { %6781 = dma.done.wait (%p12467_p9), %s444_s24, 128  }
  0xcd   : > { %6783 = vsyncadd (%p12467_p9), %s444_s24, 4294967168  ;;  %s452_s19 = sand.u32 1, %s6922_s15   ;;  %s5936_s21 = sshll.u32 %s7188_s9, 7 }
  0xce   : > { %s453_s26 = scalar_lea.sflag [#allocation7], %s452_s19  ;;  %s7200_s23 = scalar_lea.vmem [#allocation6], %s5936_s21 }
  0xcf   : > { %6785 = dma.done.wait (%p12467_p9), %s453_s26, 2176  }
  0xd0   : > { %6787 = vsyncadd (%p12467_p9), %s453_s26, 4294965120  ;;  %s7206_s17 = scalar_lea.vmem [#allocation8], %s5935_s3  ;;  %p12468_p8 = scmp.eq.s32.totalorder %s6922_s15, 0 }
  0xd2   : > { %6789 = dma.done.wait (%p12468_p8), [#allocation10], 2560   ;;  %p12469_p4 = pmov %p12468_p8 }
  0xd4   : > { %6791 = vsyncadd (%p12469_p4), [#allocation10], 4294964736  ;;  %p12470_p12 = pmov %p12469_p4 }
  0xd5   : > { %p12471_p2 = pmov %p12469_p4 }
  0xd6   : > { %6793 = dma.done.wait (%p12470_p12), [#allocation13], 2048  }
  0xd7   : > { %6795 = vsyncadd (%p12471_p2), [#allocation13], 4294965248  ;;  %v6836_v0 = vmov 0   ;;  %v6231_v1 = vld [vmem:[#allocation9 + $0x4] ss:$8 sps:$4 sm:$0xff]   ;;  %v6255_v17 = vld [vmem:[%s7200_s23] sm:$0xff]   ;;  %v585_v34 = vlaneseq }
  0xd8   : > { %803 = vmatprep.mubr.bf16.mxu0 %v6836_v0  ;;  %1119 = vmatprep.mubr.bf16.mxu1 %v6836_v0  ;;  %v6233_v2 = vld [vmem:[#allocation9] ss:$8 sps:$4 sm:$0xff]   ;;  %v6234_v3 = vld [vmem:[#allocation9 + $0x14] ss:$8 sps:$4 sm:$0xff]   ;;  %v6236_v4 = vld [vmem:[#allocation9 + $0x10] ss:$8 sps:$4 sm:$0xff]  }
  0xd9   : > { %771 = vmatprep.subr.bf16.mxu0 %v6231_v1  ;;  %1087 = vmatprep.subr.bf16.mxu1 %v6231_v1  ;;  %v6237_v5 = vld [vmem:[#allocation9 + $0x24] ss:$8 sps:$4 sm:$0xff]   ;;  %v6239_v6 = vld [vmem:[#allocation9 + $0x20] ss:$8 sps:$4 sm:$0xff]   ;;  %v6240_v7 = vld [vmem:[#allocation9 + $0x34] ss:$8 sps:$4 sm:$0xff]  }
  0xda   : > { %772 = vmatpush1.bf16.msra.mxu0 %v6233_v2  ;;  %1088 = vmatpush1.bf16.msra.mxu1 %v6233_v2  ;;  %v6242_v8 = vld [vmem:[#allocation9 + $0x30] ss:$8 sps:$4 sm:$0xff]   ;;  %v6243_v9 = vld [vmem:[#allocation9 + $0x44] ss:$8 sps:$4 sm:$0xff]   ;;  %v6245_v10 = vld [vmem:[#allocation9 + $0x40] ss:$8 sps:$4 sm:$0xff]  }
  0xdb   : > { %773 = vmatprep.subr.bf16.mxu0 %v6234_v3  ;;  %1089 = vmatprep.subr.bf16.mxu1 %v6234_v3  ;;  %v6246_v11 = vld [vmem:[#allocation9 + $0x54] ss:$8 sps:$4 sm:$0xff]   ;;  %v6248_v12 = vld [vmem:[#allocation9 + $0x50] ss:$8 sps:$4 sm:$0xff]   ;;  %v6249_v13 = vld [vmem:[#allocation9 + $0x64] ss:$8 sps:$4 sm:$0xff]  }
  0xdc   : > { %v6251_v14 = vld [vmem:[#allocation9 + $0x60] ss:$8 sps:$4 sm:$0xff]   ;;  %v6252_v15 = vld [vmem:[#allocation9 + $0x74] ss:$8 sps:$4 sm:$0xff]   ;;  %v6254_v16 = vld [vmem:[#allocation9 + $0x70] ss:$8 sps:$4 sm:$0xff]  }
  0xdd   : > { %v6256_v18 = vld [vmem:[%s7200_s23 + $0x8] sm:$0xff]   ;;  %v6257_v19 = vld [vmem:[%s7200_s23 + $0x10] sm:$0xff]   ;;  %v6258_v20 = vld [vmem:[%s7200_s23 + $0x18] sm:$0xff]   ;;  %v7251_v36 = vshrl.u32 %v585_v34, 7  ;;  %v6837_v40 = vmov 0.0   ;;  %s12739_s12 = sld [smem:[#allocation208_spill]] }
  0xde   : > { %774 = vmatpush1.bf16.msra.mxu0 %v6236_v4  ;;  %1090 = vmatpush1.bf16.msra.mxu1 %v6236_v4  ;;  %v6259_v21 = vld [vmem:[%s7200_s23 + $0x20] sm:$0xff]   ;;  %v6260_v22 = vld [vmem:[%s7200_s23 + $0x28] sm:$0xff]   ;;  %v6261_v23 = vld [vmem:[%s7200_s23 + $0x30] sm:$0xff]   ;;  %v7257_v41 = vrot.slane %v6837_v40, 7  ;;  %v7289_v56 = vrot.slane %v6837_v40, 1  ;;  %s5941_s13 = sshll.u32 %s7188_s9, 8 }
  0xdf   : > { %775 = vmatprep.subr.bf16.mxu0 %v6237_v5  ;;  %1091 = vmatprep.subr.bf16.mxu1 %v6237_v5  ;;  %v6262_v24 = vld [vmem:[%s7200_s23 + $0x38] sm:$0xff]   ;;  %v6263_v25 = vld [vmem:[%s7200_s23 + $0x40] sm:$0xff]   ;;  %v6264_v26 = vld [vmem:[%s7200_s23 + $0x48] sm:$0xff]   ;;  %v1267_v38 = vand.u32 15, %v7251_v36  ;;  %v7255_v39 = vsub.s32 1, %v7251_v36  ;;  %v7262_v43 = vsub.s32 0, %v7251_v36 }
  0xe0   : > { %v6265_v27 = vld [vmem:[%s7200_s23 + $0x50] sm:$0xff]   ;;  %v6266_v28 = vld [vmem:[%s7200_s23 + $0x58] sm:$0xff]   ;;  %v6267_v29 = vld [vmem:[%s7200_s23 + $0x60] sm:$0xff]   ;;  %12473 = vst [vmem:[#allocation30_spill] sm:$0xff] %v7257_v41  ;;  %v2623_v49 = vsub.s32 2, %v7251_v36  ;;  %v1228_v53 = vadd.s32 8, %v7251_v36 }
  0xe1   : > { %v6268_v30 = vld [vmem:[%s7200_s23 + $0x68] sm:$0xff]   ;;  %v6269_v31 = vld [vmem:[%s7200_s23 + $0x70] sm:$0xff]   ;;  %v6270_v32 = vld [vmem:[%s7200_s23 + $0x78] sm:$0xff]   ;;  %12472 = vst [vmem:[#allocation29_spill] sm:$0xff] %v7255_v39  ;;  %vm1695_vm0 = vcmp.gt.s32.totalorder %v1267_v38, 0  ;;  %v1229_v54 = vadd.s32 16, %v7251_v36 }
  0xe2   : > { %776 = vmatpush1.bf16.msra.mxu0 %v6239_v6  ;;  %1092 = vmatpush1.bf16.msra.mxu1 %v6239_v6  ;;  %v6271_v33 = vld [vmem:[%s7206_s17] sm:$0xff]   ;;  %v6272_v35 = vld [vmem:[#allocation12 + $0x40] sm:$0xff]   ;;  %12474 = vst [vmem:[#allocation31_spill] sm:$0xff] %v7262_v43  ;;  %v7264_v44 = vld [vmem:[#allocation11 + $0x8] sm:$0xff]  ;;  %v1948_v50 = vsel %vm1695_vm0, %v7257_v41, 0.0  ;;  %vm1803_vm1 = vcmp.lt.s32.totalorder %v7251_v36, 1 }
  0xe3   : > { %777 = vmatprep.subr.bf16.mxu0 %v6240_v7  ;;  %1093 = vmatprep.subr.bf16.mxu1 %v6240_v7  ;;  %v6273_v37 = vld [vmem:[#allocation12] sm:$0xff]   ;;  %v6274_v45 = vld [vmem:[#allocation12 + $0x48] sm:$0xff]   ;;  %v7278_v51 = vrot.slane %v7264_v44, %v7262_v43  ;;  %v7282_v52 = vrot.slane %v7264_v44, %v7255_v39  ;;  %12477 = vst [vmem:[#allocation34_spill] sm:$0xff] %v7289_v56  ;;  %v6276_v60 = vld [vmem:[#allocation12 + $0x50] sm:$0xff]   ;;  %vm2128_vm3 = vcmp.lt.s32.totalorder %v7251_v36, 7  ;;  %s13349_s16 = sld [smem:[#allocation209_spill]] }
  0xe4   : > { %v7259_v42 = vld [vmem:[#allocation11] sm:$0xff]  ;;  %v6275_v46 = vld [vmem:[#allocation12 + $0x8] sm:$0xff]   ;;  %v7299_v63 = vrot.slane %v7264_v44, %v2623_v49  ;;  %s11921_s1 = scalar_lea.vmem [#allocation14], %s5941_s13  ;;  %s13366_s14 = sld [smem:[#allocation22_spill]] }
  0xe5   : > { %v7268_v47 = vrot.slane %v7259_v42, %v7262_v43  ;;  %v7272_v48 = vrot.slane %v7259_v42, %v7255_v39  ;;  %v551_v55 = vld [vmem:[%s12098_s4] sm:$0x3]  ;;  %v7294_v59 = vrot.slane %v7259_v42, %v2623_v49  ;;  %v2358_v61 = vmul.f32 %v7278_v51, %v1948_v50  ;;  %s13367_s20 = sld [smem:[#allocation25_spill]]  ;;  %s5753_s8 = sshll.u32 %s11921_s1, 4  ;;  %s12042_s8 = int_to_ptr.vmem [resolvable:$true] %s5753_s8 }
  0xe6   : > { %778 = vmatpush1.bf16.msra.mxu0 %v6242_v8  ;;  %1094 = vmatpush1.bf16.msra.mxu1 %v6242_v8  ;;  %v2494_v62 = vmul.f32 0.0, %v7282_v52  ;;  %v7364_v49 = vadd.s32 48, %v7251_v36  ;;  %s13368_s3 = sld [smem:[#allocation210_spill]]  ;;  %s6728_s19 = scalar_lea.vmem %s12042_s8, 4096 }
  0xe7   : > { %779 = vmatprep.subr.bf16.mxu0 %v6243_v9  ;;  %1095 = vmatprep.subr.bf16.mxu1 %v6243_v9  ;;  %12475 = vst [vmem:[#allocation32_spill] sm:$0xff] %v7268_v47  ;;  %12476 = vst [vmem:[#allocation33_spill] sm:$0xff] %v7272_v48  ;;  %v2357_v57 = vmul.f32 %v7268_v47, %v1948_v50  ;;  %v2493_v58 = vmul.f32 0.0, %v7272_v48  ;;  %v6278_v50 = vld [vmem:[#allocation12 + $0x58] sm:$0xff]   ;;  %p6729_p11 = scmp.ne.s32.totalorder %s12042_s8, %s6728_s19  ;;  %s6838_s21 = smov [#allocation14]  }
  0xe8   : > { %s6732_s26 = sshll.u32 %s6838_s21, 4  ;;  %s6733_s26 = int_to_ptr.vmem [resolvable:$false] %s6732_s26 }
  0xe9   : > { %s6734_s23 = scalar_lea.vmem %s6733_s26, 8192  ;;  %p6735_p13 = scmp.lt.s32.totalorder %s12042_s8, %s6733_s26 }
  0xea   : > { %780 = vmatpush1.bf16.msra.mxu0 %v6245_v10  ;;  %1096 = vmatpush1.bf16.msra.mxu1 %v6245_v10  ;;  %s6004_s29 = sshll.u32 %s13366_s14, 12  ;;  %p6736_p5 = scmp.lt.s32.totalorder %s6734_s23, %s6728_s19 }
  0xeb   : > { %781 = vmatprep.subr.bf16.mxu0 %v6246_v11  ;;  %1097 = vmatprep.subr.bf16.mxu1 %v6246_v11  ;;  %p13369_p10 = scmp.ne.s32.totalorder %s13367_s20, 0 }
  0xec   : > { %s12040_s24 = scalar_lea.hbm %s13368_s3, %s6004_s29  ;;  %p6737_p3 = por %p6736_p5, %p6735_p13 }
  0xed   : > { %p6730_p1 = pnand %p6729_p11, %p13369_p10 }
  0xee   : > { %782 = vmatpush1.bf16.msra.mxu0 %v6248_v12  ;;  %1098 = vmatpush1.bf16.msra.mxu1 %v6248_v12 }
  0xef   : > { %783 = vmatprep.subr.bf16.mxu0 %v6249_v13  ;;  %1099 = vmatprep.subr.bf16.mxu1 %v6249_v13  ;;  %p6731_p0 = pneg %p6730_p1 }
  0xf1   : > { %p6738_p6 = pnand %p6737_p3, %p6731_p0 }
  0xf2   : > { %784 = vmatpush1.bf16.msra.mxu0 %v6251_v14  ;;  %1100 = vmatpush1.bf16.msra.mxu1 %v6251_v14 }
  0xf3   : > { %785 = vmatprep.subr.bf16.mxu0 %v6252_v15  ;;  %1101 = vmatprep.subr.bf16.mxu1 %v6252_v15 }
  0xf6   : > { %786 = vmatpush1.bf16.msra.mxu0 %v6254_v16  ;;  %1102 = vmatpush1.bf16.msra.mxu1 %v6254_v16 }
  0xf7   : > { %1036 = vmatprep.subr.bf16.mxu0 %v6231_v1  ;;  %6006 = vmatprep.subr.bf16.mxu1 %v6272_v35  ;;  %v7303_v1 = vrot.slane %v551_v55, %v7262_v43 }
  0xf9   : > { %804 = vmatmul.mubr.bf16.vlgmr.msra.gmra.mrb[0].mxu0 %v6255_v17  ;;  %1120 = vmatmul.mubr.bf16.vlgmr.msra.gmra.mrb[0].mxu1 %v6271_v33  ;;  %v7331_v17 = vadd.s32 32, %v7251_v36 }
  0xfa   : > { %813 = vmatprep.mubr.bf16.mxu0 %v6836_v0  ;;  %1037 = vmatpush1.bf16.msra.mxu0 %v6233_v2  ;;  %v1281_v2 = vand.u32 15, %v1229_v54 }
  0xfb   : > { %1038 = vmatprep.subr.bf16.mxu0 %v6234_v3  ;;  %6007 = vmatpush3.bf16.msra.mxu1 %v6273_v37  ;;  %v1274_v3 = vand.u32 15, %v1228_v53  ;;  %v1295_v35 = vand.u32 15, %v7331_v17  ;;  %v12130_v37 = vsub.s32 6, %v7251_v36 }
  0xfc   : > { %6008 = vmatprep.subr.bf16.mxu1 %v6274_v45  ;;  %vm7322_vm2 = vcmp.gt.s32.totalorder %v1281_v2, 0 }
  0xfd   : > { %vm7333_vm4 = vcmp.lt.s32.totalorder %v1274_v3, 15  ;;  %vm7418_vm5 = vcmp.gt.s32.totalorder %v1295_v35, 0 }
  0xfe   : > { %1039 = vmatpush1.bf16.msra.mxu0 %v6236_v4  ;;  %v2557_v4 = vadd.f32 %v2493_v58, %v2357_v57 }
  0xff   : > { %1040 = vmatprep.subr.bf16.mxu0 %v6237_v5  ;;  %6009 = vmatpush3.bf16.msra.mxu1 %v6275_v46  ;;  %v2629_v5 = vmul.f32 %v7294_v59, %v7289_v56 }
 0x100   : > { %6010 = vmatprep.subr.bf16.mxu1 %v6276_v60 }
 0x101   : > { %814 = vmatmul.mubr.bf16.gmra.mrb[4].mxu0 %v6256_v18 }
 0x102   : > { %823 = vmatprep.mubr.bf16.mxu0 %v6836_v0  ;;  %1041 = vmatpush1.bf16.msra.mxu0 %v6239_v6  ;;  %v2759_v6 = vsub.s32 3, %v7251_v36 }
 0x103   : > { %1042 = vmatprep.subr.bf16.mxu0 %v6240_v7  ;;  %v6277_v7 = vld [vmem:[#allocation12 + $0x10] sm:$0xff]  }
 0x104   : > { %6011 = vmatpush3.bf16.msra.mxu1 %v6277_v7 }
 0x105   : > { %6012 = vmatprep.subr.bf16.mxu1 %v6278_v50 }
 0x106   : > { %1043 = vmatpush1.bf16.msra.mxu0 %v6242_v8  ;;  %v2558_v8 = vadd.f32 %v2494_v62, %v2358_v61 }
 0x107   : > { %1044 = vmatprep.subr.bf16.mxu0 %v6243_v9  ;;  %v2630_v9 = vmul.f32 %v7299_v63, %v7289_v56 }
 0x109   : > { %824 = vmatmul.mubr.bf16.gmra.mrb[8].mxu0 %v6257_v19  ;;  %v7338_v19 = vrot.slane %v7259_v42, %v2759_v6 }
 0x10a   : > { %833 = vmatprep.mubr.bf16.mxu0 %v6836_v0  ;;  %1045 = vmatpush1.bf16.msra.mxu0 %v6245_v10  ;;  %v2359_v10 = vmul.f32 %v7268_v47, %v7257_v41 }
 0x10b   : > { %1046 = vmatprep.subr.bf16.mxu0 %v6246_v11  ;;  %v3031_v11 = vsub.s32 5, %v7251_v36  ;;  %12483 = vst [vmem:[#allocation36_spill] sm:$0xff] %v7338_v19 }
 0x10e   : > { %1047 = vmatpush1.bf16.msra.mxu0 %v6248_v12 }
 0x10f   : > { %1048 = vmatprep.subr.bf16.mxu0 %v6249_v13  ;;  %v7318_v13 = vrot.slane %v551_v55, %v7255_v39  ;;  %v6287_v39 = vld [vmem:[#allocation12 + $0x38] sm:$0xff]  }
 0x111   : > { %834 = vmatmul.mubr.bf16.gmra.mrb[12].mxu0 %v6258_v20  ;;  %v7341_v20 = vrot.slane %v7264_v44, %v2759_v6 }
 0x112   : > { %843 = vmatprep.mubr.bf16.mxu0 %v6836_v0  ;;  %1049 = vmatpush1.bf16.msra.mxu0 %v6251_v14  ;;  %v2360_v14 = vmul.f32 %v7278_v51, %v7257_v41 }
 0x113   : > { %1050 = vmatprep.subr.bf16.mxu0 %v6252_v15 }
 0x116   : > { %1051 = vmatpush1.bf16.msra.mxu0 %v6254_v16  ;;  %v7328_v16 = vadd.s32 24, %v7251_v36 }
 0x118   : > { %v1288_v34 = vand.u32 15, %v7328_v16 }
 0x119   : > { %844 = vmatmul.mubr.bf16.gmra.mrb[16].mxu0 %v6259_v21 }
 0x11a   : > { %853 = vmatprep.mubr.bf16.mxu0 %v6836_v0  ;;  %vm7470_vm6 = vcmp.lt.s32.totalorder %v1288_v34, 15 }
 0x121   : > { %854 = vmatmul.mubr.bf16.gmra.mrb[20].mxu0 %v6260_v22 }
 0x122   : > { %863 = vmatprep.mubr.bf16.mxu0 %v6836_v0 }
 0x129   : > { %864 = vmatmul.mubr.bf16.gmra.mrb[24].mxu0 %v6261_v23  ;;  %v2693_v23 = vadd.f32 %v2629_v5, %v2557_v4 }
 0x12a   : > { %873 = vmatprep.mubr.bf16.mxu0 %v6836_v0 }
 0x131   : > { %874 = vmatmul.mubr.bf16.gmra.mrb[28].mxu0 %v6262_v24  ;;  %v2694_v24 = vadd.f32 %v2630_v9, %v2558_v8 }
 0x132   : > { %883 = vmatprep.mubr.bf16.mxu0 %v6836_v0 }
 0x139   : > { %884 = vmatmul.mubr.bf16.gmra.mrb[32].mxu0 %v6263_v25  ;;  %v2559_v25 = vadd.f32 %v2493_v58, %v2359_v10  ;;  %v6279_v58 = vld [vmem:[#allocation12 + $0x18] sm:$0xff]  }
 0x13a   : > { %893 = vmatprep.mubr.bf16.mxu0 %v6836_v0  ;;  %6013 = vmatpush3.bf16.msra.mxu1 %v6279_v58 }
 0x141   : > { %894 = vmatmul.mubr.bf16.gmra.mrb[36].mxu0 %v6264_v26  ;;  %v7347_v26 = vrot.slane %v7259_v42, %v3031_v11 }
 0x142   : > { %903 = vmatprep.mubr.bf16.mxu0 %v6836_v0 }
 0x149   : > { %904 = vmatmul.mubr.bf16.gmra.mrb[40].mxu0 %v6265_v27 }
 0x14a   : > { %913 = vmatprep.mubr.bf16.mxu0 %v6836_v0 }
 0x151   : > { %914 = vmatmul.mubr.bf16.gmra.mrb[44].mxu0 %v6266_v28 }
 0x152   : > { %923 = vmatprep.mubr.bf16.mxu0 %v6836_v0 }
 0x159   : > { %924 = vmatmul.mubr.bf16.gmra.mrb[48].mxu0 %v6267_v29  ;;  %v7350_v29 = vadd.f32 %v2494_v62, %v2360_v14 }
 0x15a   : > { %933 = vmatprep.mubr.bf16.mxu0 %v6836_v0 }
 0x161   : > { %934 = vmatmul.mubr.bf16.gmra.mrb[52].mxu0 %v6268_v30  ;;  %v7353_v30 = vrot.slane %v7264_v44, %v3031_v11 }
 0x162   : > { %943 = vmatprep.mubr.bf16.mxu0 %v6836_v0 }
 0x163   : > { %12484 = vst [vmem:[#allocation37_spill] sm:$0xff] %v7353_v30 }
 0x169   : > { %944 = vmatmul.mubr.bf16.gmra.mrb[56].mxu0 %v6269_v31  ;;  %v12134_v31 = vsub.s32 7, %v7251_v36 }
 0x16a   : > { %953 = vmatprep.mubr.bf16.mxu0 %v6836_v0 }
 0x171   : > { %954 = vmatmul.mubr.bf16.gmra.mrb[60].mxu0 %v6270_v32 }
 0x172   : > { %1068 = vmatprep.mubr.bf16.mxu0 %v6836_v0  ;;  %v2895_v0 = vsub.s32 4, %v7251_v36 }
 0x174   : > { %v7315_v12 = vrot.slane %v7259_v42, %v2895_v0  ;;  %v7344_v21 = vrot.slane %v7264_v44, %v2895_v0 }
 0x176   : > { %12478 = vst [vmem:[#allocation35_spill] sm:$0xff] %v7315_v12 }
 0x1cc   : > { %v805_v22 = vpop.f32.mrb[0].mxu0 }
 0x1cd   : > { %v806_v27 = vadd.f32 %v805_v22, %v7303_v1  ;;  %v807_v28 = vpop.f32.mrb[1].mxu0 }
 0x1ce   : > { %v7357_v32 = vadd.f32 %v807_v28, %v7318_v13  ;;  %v809_v33 = vpop.f32.mrb[2].mxu0 }
 0x1cf   : > { %v1735_v38 = vrot.slane %v806_v27, 7  ;;  %v2060_v40 = vrot.slane %v806_v27, 1  ;;  %v2497_v45 = vmul.f32 %v7272_v48, %v806_v27  ;;  %v811_v46 = vpop.f32.mrb[3].mxu0  ;;  %v2901_v53 = vmul.f32 %v7315_v12, %v806_v27 }
 0x1d0   : > { %v1736_v54 = vrot.slane %v7357_v32, 7  ;;  %v2061_v55 = vrot.slane %v7357_v32, 1  ;;  %v2498_v57 = vmul.f32 %v7282_v52, %v7357_v32  ;;  %v2902_v62 = vmul.f32 %v7344_v21, %v7357_v32 }
 0x1d1   : > { %v1870_v60 = vsel %vm1803_vm1, %v7257_v41, %v1735_v38  ;;  %v2195_v61 = vsel %vm2128_vm3, %v7289_v56, %v2060_v40  ;;  %v7380_v0 = vadd.f32 %v809_v33, %v7303_v1  ;;  %v7404_v33 = vadd.f32 %v811_v46, %v7318_v13 }
 0x1d2   : > { %v1952_v2 = vsel %vm7322_vm2, %v1870_v60, 0.0  ;;  %v2275_v3 = vsel %vm7333_vm4, %v2195_v61, 0.0  ;;  %v1871_v4 = vsel %vm1803_vm1, %v7257_v41, %v1736_v54  ;;  %v2196_v5 = vsel %vm2128_vm3, %v7289_v56, %v2061_v55 }
 0x1d3   : > { %v2361_v6 = vmul.f32 %v7268_v47, %v1952_v2  ;;  %v2631_v7 = vmul.f32 %v7294_v59, %v2275_v3  ;;  %v2765_v8 = vmul.f32 %v7338_v19, %v1952_v2  ;;  %v1953_v9 = vsel %vm7322_vm2, %v1871_v4, 0.0 }
 0x1d4   : > { %v2276_v10 = vsel %vm7333_vm4, %v2196_v5, 0.0  ;;  %v2362_v11 = vmul.f32 %v7278_v51, %v1953_v9  ;;  %v2766_v14 = vmul.f32 %v7341_v20, %v1953_v9  ;;  %v1737_v17 = vrot.slane %v7380_v0, 7  ;;  %v815_v22 = vpop.f32.mrb[4].mxu0 }
 0x1d5   : > { %v2561_v27 = vadd.f32 %v2497_v45, %v2361_v6  ;;  %v2829_v28 = vadd.f32 %v2765_v8, %v2693_v23  ;;  %v2062_v32 = vrot.slane %v7380_v0, 1  ;;  %v817_v50 = vpop.f32.mrb[5].mxu0  ;;  %v2632_v15 = vmul.f32 %v7299_v63, %v2276_v10  ;;  %v6280_v23 = vld [vmem:[#allocation12 + $0x60] sm:$0xff]  }
 0x1d6   : > { %v2830_v58 = vadd.f32 %v2766_v14, %v2694_v24  ;;  %v1868_v18 = vsel %vm1803_vm1, %v1735_v38, %v1737_v17  ;;  %v2499_v60 = vmul.f32 %v7272_v48, %v7380_v0  ;;  %v7413_v61 = vpop.f32.mrb[6].mxu0  ;;  %v2695_v3 = vadd.f32 %v2631_v7, %v2559_v25  ;;  %6014 = vmatprep.subr.bf16.mxu1 %v6280_v23 }
 0x1d7   : > { %v2965_v45 = vadd.f32 %v2901_v53, %v2829_v28  ;;  %v2193_v46 = vsel %vm2128_vm3, %v2060_v40, %v2062_v32  ;;  %v2363_v2 = vmul.f32 %v7268_v47, %v1868_v18  ;;  %v7422_v4 = vpop.f32.mrb[7].mxu0  ;;  %v2562_v38 = vadd.f32 %v2498_v57, %v2362_v11 }
 0x1d8   : > { %v2966_v5 = vadd.f32 %v2902_v62, %v2830_v58  ;;  %v2633_v6 = vmul.f32 %v7294_v59, %v2193_v46  ;;  %v2767_v8 = vmul.f32 %v7338_v19, %v1868_v18  ;;  %v3037_v40 = vmul.f32 %v7347_v26, %v2193_v46  ;;  %v6281_v62 = vld [vmem:[#allocation12 + $0x20] sm:$0xff]  }
 0x1d9   : > { %v7426_v53 = vadd.f32 %v2499_v60, %v2363_v2  ;;  %v1738_v9 = vrot.slane %v7404_v33, 7  ;;  %v2063_v25 = vrot.slane %v7404_v33, 1  ;;  %v2903_v10 = vmul.f32 %v7315_v12, %v7380_v0  ;;  %6015 = vmatpush3.bf16.msra.mxu1 %v6281_v62 }
 0x1da   : > { %v2697_v35 = vadd.f32 %v2633_v6, %v2561_v27  ;;  %v2831_v7 = vadd.f32 %v2767_v8, %v2695_v3  ;;  %v2696_v57 = vadd.f32 %v2632_v15, %v7350_v29  ;;  %v3101_v11 = vadd.f32 %v3037_v40, %v2965_v45 }
 0x1db   : > { %v1869_v14 = vsel %vm1803_vm1, %v1736_v54, %v1738_v9  ;;  %v2194_v28 = vsel %vm2128_vm3, %v2061_v55, %v2063_v25  ;;  %v2500_v58 = vmul.f32 %v7282_v52, %v7404_v33  ;;  %v7449_v54 = vadd.f32 %v815_v22, %v7303_v1 }
 0x1dc   : > { %v7440_v18 = vadd.f32 %v2903_v10, %v2831_v7  ;;  %v2364_v27 = vmul.f32 %v7278_v51, %v1869_v14  ;;  %v2634_v60 = vmul.f32 %v7299_v63, %v2194_v28  ;;  %v2768_v23 = vmul.f32 %v7341_v20, %v1869_v14  ;;  %v7445_v29 = vpop.f32.mrb[8].mxu0 }
 0x1dd   : > { %v3038_v15 = vmul.f32 %v7353_v30, %v2194_v28  ;;  %v7452_v55 = vadd.f32 %v817_v50, %v7318_v13  ;;  %v7454_v45 = vpop.f32.mrb[9].mxu0  ;;  %v7457_v46 = vadd.s32 40, %v7251_v36  ;;  %v2904_v8 = vmul.f32 %v7344_v21, %v7404_v33  ;;  %v6284_v50 = vld [vmem:[#allocation12 + $0x70] sm:$0xff]  }
 0x1de   : > { %v7459_v2 = vadd.f32 %v2500_v58, %v2364_v27  ;;  %v2698_v3 = vadd.f32 %v2634_v60, %v2562_v38  ;;  %v2832_v6 = vadd.f32 %v2768_v23, %v2696_v57  ;;  %v7463_v40 = vpop.f32.mrb[10].mxu0  ;;  %v1739_v22 = vrot.slane %v7449_v54, 7  ;;  %v6282_v58 = vld [vmem:[#allocation12 + $0x68] sm:$0xff]  }
 0x1df   : > { %v7465_v7 = vadd.f32 %v3038_v15, %v2966_v5  ;;  %v2064_v10 = vrot.slane %v7449_v54, 1  ;;  %v7475_v62 = vpop.f32.mrb[11].mxu0  ;;  %v7482_v33 = vrot.slane %v7259_v42, %v12130_v37  ;;  %v7487_v5 = vrot.slane %v7259_v42, %v12134_v31  ;;  %v6283_v60 = vld [vmem:[#allocation12 + $0x28] sm:$0xff]   ;;  %6016 = vmatprep.subr.bf16.mxu1 %v6282_v58 }
 0x1e0   : > { %v7477_v38 = vadd.f32 %v2904_v8, %v2832_v6  ;;  %v1740_v16 = vrot.slane %v7452_v55, 7  ;;  %v1866_v34 = vsel %vm1803_vm1, %v1737_v17, %v1739_v22  ;;  %v12132_v14 = vrot.slane %v7452_v55, 1  ;;  %6017 = vmatpush3.bf16.msra.mxu1 %v6283_v60 }
 0x1e1   : > { %12487 = vst [vmem:[#allocation38_spill] sm:$0xff] %v7465_v7  ;;  %12491 = vst [vmem:[#allocation40_spill] sm:$0xff] %v7482_v33  ;;  %v2191_v57 = vsel %vm2128_vm3, %v2062_v32, %v2064_v10  ;;  %v1956_v27 = vsel %vm7418_vm5, %v1866_v34, 0.0  ;;  %v2501_v23 = vmul.f32 %v7272_v48, %v7449_v54  ;;  %v7513_v6 = vadd.f32 %v7413_v61, %v7303_v1 }
 0x1e2   : > { %12490 = vst [vmem:[#allocation39_spill] sm:$0xff] %v7477_v38  ;;  %12492 = vst [vmem:[#allocation41_spill] sm:$0xff] %v7487_v5  ;;  %v2279_v42 = vsel %vm7470_vm6, %v2191_v57, 0.0  ;;  %v1867_v0 = vsel %vm1803_vm1, %v1738_v9, %v1740_v16  ;;  %v2365_v32 = vmul.f32 %v7268_v47, %v1956_v27  ;;  %v2769_v15 = vmul.f32 %v7338_v19, %v1956_v27 }
 0x1e3   : > { %v2635_v8 = vmul.f32 %v7294_v59, %v2279_v42  ;;  %v3173_v34 = vmul.f32 %v7482_v33, %v1956_v27  ;;  %v7519_v9 = vsel %vm7418_vm5, %v1867_v0, 0.0  ;;  %v2192_v57 = vsel %vm2128_vm3, %v2063_v25, %v12132_v14  ;;  %6018 = vmatprep.subr.bf16.mxu1 %v6284_v50 }
 0x1e4   : > { %12493 = vst [vmem:[#allocation42_spill] sm:$0xff] %v7519_v9  ;;  %v7525_v37 = vpop.f32.mrb[12].mxu0  ;;  %v7527_v17 = vadd.f32 %v2501_v23, %v2365_v32  ;;  %v2833_v61 = vadd.f32 %v2769_v15, %v2697_v35  ;;  %v2905_v58 = vmul.f32 %v7315_v12, %v7449_v54  ;;  %v3039_v27 = vmul.f32 %v7347_v26, %v2279_v42 }
 0x1e5   : > { %v7532_v28 = vpop.f32.mrb[13].mxu0  ;;  %v3237_v24 = vadd.f32 %v3173_v34, %v3101_v11  ;;  %v3309_v0 = vmul.f32 %v7487_v5, %v7449_v54  ;;  %v7538_v25 = vsel %vm7470_vm6, %v2192_v57, 0.0  ;;  %v2770_v60 = vmul.f32 %v7341_v20, %v7519_v9 }
 0x1e6   : > { %v7542_v32 = vpop.f32.mrb[14].mxu0  ;;  %v7544_v35 = vadd.f32 %v2905_v58, %v2833_v61  ;;  %v12131_v23 = vrot.slane %v7513_v6, 7  ;;  %v12133_v42 = vrot.slane %v7513_v6, 1  ;;  %v7550_v11 = vadd.f32 %v7422_v4, %v7318_v13 }
 0x1e7   : > { %v7552_v54 = vpop.f32.mrb[15].mxu0  ;;  %v7554_v15 = vadd.f32 %v3309_v0, %v3237_v24  ;;  %v2834_v34 = vadd.f32 %v2770_v60, %v2698_v3  ;;  %v2906_v57 = vmul.f32 %v7344_v21, %v7452_v55  ;;  %v2699_v61 = vadd.f32 %v2635_v8, %v7426_v53 }
 0x1e8   : > { %12494 = vst [vmem:[#allocation43_spill] sm:$0xff] %v7544_v35  ;;  %12495 = vst [vmem:[#allocation44_spill] sm:$0xff] %v7550_v11  ;;  %v2636_v58 = vmul.f32 %v7299_v63, %v7538_v25  ;;  %v1864_v4 = vsel %vm1803_vm1, %v1739_v22, %v12131_v23  ;;  %v7569_v24 = vsel %vm2128_vm3, %v2064_v10, %v12133_v42  ;;  %v1742_v23 = vrot.slane %v7550_v11, 7  ;;  %v6286_v35 = vld [vmem:[#allocation12 + $0x78] sm:$0xff]  }
 0x1e9   : > { %12496 = vst [vmem:[#allocation45_spill] sm:$0xff] %v7554_v15  ;;  %12497 = vst [vmem:[#allocation46_spill] sm:$0xff] %v7569_v24  ;;  %v3103_v3 = vadd.f32 %v3039_v27, %v7440_v18  ;;  %v7572_v0 = vadd.f32 %v2906_v57, %v2834_v34  ;;  %v2367_v53 = vmul.f32 %v7268_v47, %v1864_v4  ;;  %v7581_v14 = vadd.s32 56, %v7251_v36 }
 0x1ea   : > { %v2503_v8 = vmul.f32 %v7272_v48, %v7513_v6  ;;  %v2771_v60 = vmul.f32 %v7338_v19, %v1864_v4  ;;  %v3175_v22 = vmul.f32 %v7482_v33, %v1864_v4  ;;  %v7584_v10 = vadd.s32 64, %v7251_v36 }
 0x1eb   : > { %12498 = vst [vmem:[#allocation47_spill] sm:$0xff] %v7572_v0  ;;  %v2907_v50 = vmul.f32 %v7315_v12, %v7513_v6  ;;  %v2067_v34 = vrot.slane %v7550_v11, 1  ;;  %v3311_v4 = vmul.f32 %v7487_v5, %v7513_v6  ;;  %v7599_v31 = vsel %vm1803_vm1, %v1740_v16, %v1742_v23 }
 0x1ec   : > { %v7586_v18 = vadd.f32 %v2503_v8, %v2367_v53  ;;  %v2835_v27 = vadd.f32 %v2771_v60, %v2699_v61  ;;  %v7591_v57 = vpop.f32.mrb[16].mxu0  ;;  %v3239_v42 = vadd.f32 %v3175_v22, %v3103_v3  ;;  %12499 = vst [vmem:[#allocation48_spill] sm:$0xff] %v7599_v31  ;;  %v2700_v53 = vadd.f32 %v2636_v58, %v7459_v2  ;;  %v6285_v8 = vld [vmem:[#allocation12 + $0x30] sm:$0xff]  }
 0x1ed   : > { %v7602_v61 = vpop.f32.mrb[17].mxu0  ;;  %v12500_v60 = vsub.s32 7, %v7251_v36  ;;  %v12503_v22 = vrot.slane %v7452_v55, 1  ;;  %v2772_v16 = vmul.f32 %v7341_v20, %v7599_v31  ;;  %v2366_v58 = vmul.f32 %v7278_v51, %v7519_v9  ;;  %6019 = vmatpush3.bf16.msra.mxu1 %v6285_v8 }
 0x1ee   : > { %v7609_v3 = vadd.f32 %v2907_v50, %v2835_v27  ;;  %v7619_v2 = vpop.f32.mrb[18].mxu0  ;;  %v7623_v33 = vadd.f32 %v3311_v4, %v3239_v42  ;;  %v12509_v50 = vand.u32 15, %v7457_v46  ;;  %v2908_v42 = vmul.f32 %v7344_v21, %v7550_v11  ;;  %6020 = vmatprep.subr.bf16.mxu1 %v6286_v35 }
 0x1ef   : > { %v7607_v41 = vrot.slane %v7264_v44, %v12500_v60  ;;  %v7615_v56 = vsel %vm2128_vm3, %v12503_v22, %v2067_v34  ;;  %v12506_v44 = vand.u32 15, %v7364_v49  ;;  %v7637_v22 = vpop.f32.mrb[19].mxu0  ;;  %v7643_v49 = vadd.f32 %v7445_v29, %v7303_v1 }
 0x1f0   : > { %12502 = vst [vmem:[#allocation50_spill] sm:$0xff] %v7609_v3  ;;  %12504 = vst [vmem:[#allocation51_spill] sm:$0xff] %v7615_v56  ;;  %vm7633_vm8 = vcmp.lt.s32.totalorder %v12509_v50, 15  ;;  %v2836_v3 = vadd.f32 %v2772_v16, %v2700_v53  ;;  %v1316_v4 = vand.u32 15, %v7581_v14  ;;  %v2502_v46 = vmul.f32 %v7282_v52, %v7452_v55 }
 0x1f1   : > { %12501 = vst [vmem:[#allocation49_spill] sm:$0xff] %v7607_v41  ;;  %12505 = vst [vmem:[#allocation52_spill] sm:$0xff] %v7623_v33  ;;  %vm7627_vm7 = vcmp.gt.s32.totalorder %v12506_v44, 0  ;;  %v2637_v44 = vmul.f32 %v7294_v59, %v7569_v24  ;;  %v7652_v50 = vadd.f32 %v7454_v45, %v7318_v13  ;;  %v1323_v53 = vand.u32 15, %v7584_v10  ;;  %6021 = vmatpush3.bf16.msra.mxu1 %v6287_v39 }
 0x1f2   : > { %12512 = vst [vmem:[#allocation53_spill] sm:$0xff] %v7643_v49  ;;  %v7655_v8 = vadd.f32 %v2908_v42, %v2836_v3  ;;  %v1743_v16 = vrot.slane %v7643_v49, 7  ;;  %v2068_v29 = vrot.slane %v7643_v49, 1  ;;  %v7660_v14 = vadd.s32 72, %v7251_v36 }
 0x1f3   : > { %12513 = vst [vmem:[#allocation54_spill] sm:$0xff] %v7652_v50  ;;  %v2566_v0 = vadd.f32 %v2502_v46, %v2366_v58  ;;  %v2638_v33 = vmul.f32 %v7299_v63, %v7615_v56  ;;  %v1744_v15 = vrot.slane %v7652_v50, 7  ;;  %v2069_v45 = vrot.slane %v7652_v50, 1 }
 0x1f4   : > { %12514 = vst [vmem:[#allocation55_spill] sm:$0xff] %v7655_v8  ;;  %v2504_v10 = vmul.f32 %v7282_v52, %v7550_v11  ;;  %v12515_v3 = vrot.slane %v7513_v6, 7  ;;  %v12516_v8 = vrot.slane %v7513_v6, 1  ;;  %v7678_v46 = vadd.f32 %v7463_v40, %v7303_v1  ;;  %v7680_v43 = vpop.f32.mrb[20].mxu0 }
 0x1f5   : > { %v2701_v9 = vadd.f32 %v2637_v44, %v7527_v17  ;;  %v2188_v6 = vsel %vm2128_vm3, %v2067_v34, %v2069_v45  ;;  %v2368_v39 = vmul.f32 %v7278_v51, %v7599_v31  ;;  %v2702_v34 = vadd.f32 %v2638_v33, %v2566_v0 }
 0x1f6   : > { %v1862_v42 = vsel %vm1803_vm1, %v12515_v3, %v1743_v16  ;;  %v2187_v58 = vsel %vm2128_vm3, %v12516_v8, %v2068_v29  ;;  %12517 = vst [vmem:[#allocation56_spill] sm:$0xff] %v7678_v46  ;;  %v1863_v3 = vsel %vm1803_vm1, %v1742_v23, %v1744_v15  ;;  %v7691_v8 = vpop.f32.mrb[21].mxu0  ;;  %v7705_v17 = vsel %vm7633_vm8, %v2188_v6, 0.0 }
 0x1f7   : > { %v7684_v7 = vsel %vm7627_vm7, %v1862_v42, 0.0  ;;  %v7697_v35 = vsel %vm7627_vm7, %v1863_v3, 0.0  ;;  %v7701_v42 = vsel %vm7633_vm8, %v2187_v58, 0.0  ;;  %12521 = vst [vmem:[#allocation60_spill] sm:$0xff] %v7705_v17  ;;  %v7707_v23 = vpop.f32.mrb[22].mxu0  ;;  %v7715_v27 = vadd.f32 %v7475_v62, %v7318_v13 }
 0x1f8   : > { %12518 = vst [vmem:[#allocation57_spill] sm:$0xff] %v7684_v7  ;;  %v2773_v40 = vmul.f32 %v7338_v19, %v7684_v7  ;;  %12519 = vst [vmem:[#allocation58_spill] sm:$0xff] %v7697_v35  ;;  %v2774_v44 = vmul.f32 %v7341_v20, %v7697_v35  ;;  %v7717_v3 = vpop.f32.mrb[23].mxu0  ;;  %v2909_v60 = vmul.f32 %v7315_v12, %v7643_v49  ;;  %v1745_v6 = vrot.slane %v7678_v46, 7 }
 0x1f9   : > { %12520 = vst [vmem:[#allocation59_spill] sm:$0xff] %v7701_v42  ;;  %12522 = vst [vmem:[#allocation61_spill] sm:$0xff] %v7715_v27  ;;  %v2070_v38 = vrot.slane %v7678_v46, 1  ;;  %v2640_v33 = vmul.f32 %v7299_v63, %v7705_v17  ;;  %v2910_v31 = vmul.f32 %v7344_v21, %v7652_v50  ;;  %v2639_v62 = vmul.f32 %v7294_v59, %v7701_v42 }
 0x1fa   : > { %v2837_v58 = vadd.f32 %v2773_v40, %v2701_v9  ;;  %v2838_v0 = vadd.f32 %v2774_v44, %v2702_v34  ;;  %v7733_v9 = vsel %vm1803_vm1, %v1743_v16, %v1745_v6  ;;  %vm7739_vm9 = vcmp.gt.s32.totalorder %v1323_v53, 0 }
 0x1fb   : > { %12524 = vst [vmem:[#allocation63_spill] sm:$0xff] %v7733_v9  ;;  %v7737_v40 = vsel %vm2128_vm3, %v2068_v29, %v2070_v38  ;;  %v2568_v34 = vadd.f32 %v2504_v10, %v2368_v39  ;;  %v2703_v17 = vadd.f32 %v2639_v62, %v7586_v18  ;;  %v2369_v16 = vmul.f32 %v7268_v47, %v7684_v7 }
 0x1fc   : > { %v7729_v5 = vadd.f32 %v2909_v60, %v2837_v58  ;;  %12525 = vst [vmem:[#allocation64_spill] sm:$0xff] %v7737_v40  ;;  %v7743_v44 = vadd.f32 %v2910_v31, %v2838_v0  ;;  %v7747_v58 = vadd.s32 80, %v7251_v36  ;;  %v2775_v60 = vmul.f32 %v7338_v19, %v7733_v9  ;;  %v7758_v10 = vpop.f32.mrb[24].mxu0 }
 0x1fd   : > { %v1746_v29 = vrot.slane %v7715_v27, 7  ;;  %vm7754_vm10 = vcmp.lt.s32.totalorder %v1316_v4, 15  ;;  %12531 = vst [vmem:[#allocation66_spill] sm:$0xff] %v7758_v10  ;;  %v2505_v31 = vmul.f32 %v7272_v48, %v7643_v49  ;;  %v2071_v18 = vrot.slane %v7715_v27, 1  ;;  %v7764_v62 = vpop.f32.mrb[25].mxu0 }
 0x1fe   : > { %12523 = vst [vmem:[#allocation62_spill] sm:$0xff] %v7729_v5  ;;  %12528 = vst [vmem:[#allocation65_spill] sm:$0xff] %v7743_v44  ;;  %v2704_v39 = vadd.f32 %v2640_v33, %v2568_v34  ;;  %v1330_v0 = vand.u32 15, %v7660_v14  ;;  %v2370_v5 = vmul.f32 %v7278_v51, %v7697_v35  ;;  %v2839_v44 = vadd.f32 %v2775_v60, %v2703_v17  ;;  %v7774_v42 = vpop.f32.mrb[26].mxu0 }
 0x1ff   : > { %12532 = vst [vmem:[#allocation67_spill] sm:$0xff] %v7764_v62  ;;  %v2911_v4 = vmul.f32 %v7315_v12, %v7678_v46  ;;  %v7772_v7 = vsel %vm1803_vm1, %v1744_v15, %v1746_v29  ;;  %12534 = vst [vmem:[#allocation69_spill] sm:$0xff] %v7774_v42  ;;  %v7778_v33 = vsel %vm2128_vm3, %v2069_v45, %v2071_v18  ;;  %v1337_v17 = vand.u32 15, %v7747_v58  ;;  %v7787_v60 = vpop.f32.mrb[27].mxu0 }
 0x200   : > { %12533 = vst [vmem:[#allocation68_spill] sm:$0xff] %v7772_v7  ;;  %12535 = vst [vmem:[#allocation70_spill] sm:$0xff] %v7778_v33  ;;  %v2776_v14 = vmul.f32 %v7341_v20, %v7772_v7  ;;  %v7784_v34 = vadd.f32 %v7525_v37, %v7303_v1  ;;  %v2569_v35 = vadd.f32 %v2505_v31, %v2369_v16  ;;  %vm7879_vm12 = vcmp.lt.s32.totalorder %v1330_v0, 15 }
 0x201   : > { %12537 = vst [vmem:[#allocation72_spill] sm:$0xff] %v7787_v60  ;;  %v2506_v15 = vmul.f32 %v7282_v52, %v7652_v50  ;;  %v2641_v42 = vmul.f32 %v7294_v59, %v7737_v40  ;;  %v7793_v45 = vadd.f32 %v2911_v4, %v2839_v44  ;;  %v2912_v62 = vmul.f32 %v7344_v21, %v7715_v27 }
 0x202   : > { %12536 = vst [vmem:[#allocation71_spill] sm:$0xff] %v7784_v34  ;;  %v2840_v49 = vadd.f32 %v2776_v14, %v2704_v39  ;;  %v1747_v37 = vrot.slane %v7784_v34, 7  ;;  %v2072_v10 = vrot.slane %v7784_v34, 1  ;;  %v2371_v16 = vmul.f32 %v7268_v47, %v7733_v9 }
 0x203   : > { %12538 = vst [vmem:[#allocation73_spill] sm:$0xff] %v7793_v45  ;;  %v2570_v58 = vadd.f32 %v2506_v15, %v2370_v5  ;;  %v7803_v31 = vadd.f32 %v7532_v28, %v7318_v13  ;;  %v7806_v40 = vadd.s32 88, %v7251_v36  ;;  %v2642_v44 = vmul.f32 %v7299_v63, %v7778_v33 }
 0x204   : > { %v7810_v39 = vadd.f32 %v2912_v62, %v2840_v49  ;;  %v1858_v4 = vsel %vm1803_vm1, %v1745_v6, %v1747_v37  ;;  %v2183_v5 = vsel %vm2128_vm3, %v2070_v38, %v2072_v10  ;;  %v7826_v49 = vpop.f32.mrb[28].mxu0  ;;  %v2507_v6 = vmul.f32 %v7272_v48, %v7678_v46 }
 0x205   : > { %12539 = vst [vmem:[#allocation74_spill] sm:$0xff] %v7803_v31  ;;  %v7818_v14 = vsel %vm7739_vm9, %v1858_v4, 0.0  ;;  %v7822_v28 = vsel %vm7754_vm10, %v2183_v5, 0.0  ;;  %v1748_v15 = vrot.slane %v7803_v31, 7  ;;  %v2073_v45 = vrot.slane %v7803_v31, 1  ;;  %12543 = vst [vmem:[#allocation78_spill] sm:$0xff] %v7826_v49 }
 0x206   : > { %12540 = vst [vmem:[#allocation75_spill] sm:$0xff] %v7810_v39  ;;  %12541 = vst [vmem:[#allocation76_spill] sm:$0xff] %v7818_v14  ;;  %v2705_v62 = vadd.f32 %v2641_v42, %v2569_v35  ;;  %v2777_v38 = vmul.f32 %v7338_v19, %v7818_v14  ;;  %v7833_v4 = vadd.s32 96, %v7251_v36  ;;  %v7835_v39 = vpop.f32.mrb[29].mxu0  ;;  %v2372_v5 = vmul.f32 %v7278_v51, %v7772_v7 }
 0x207   : > { %12542 = vst [vmem:[#allocation77_spill] sm:$0xff] %v7822_v28  ;;  %12544 = vst [vmem:[#allocation79_spill] sm:$0xff] %v7835_v39  ;;  %v2913_v9 = vmul.f32 %v7315_v12, %v7784_v34  ;;  %v1859_v33 = vsel %vm1803_vm1, %v1746_v29, %v1748_v15  ;;  %v2184_v35 = vsel %vm2128_vm3, %v2071_v18, %v2073_v45  ;;  %v7845_v42 = vpop.f32.mrb[30].mxu0  ;;  %vm7875_vm11 = vcmp.gt.s32.totalorder %v1337_v17, 0 }
 0x208   : > { %12545 = vst [vmem:[#allocation80_spill] sm:$0xff] %v7845_v42  ;;  %v2643_v46 = vmul.f32 %v7294_v59, %v7822_v28  ;;  %v2841_v50 = vadd.f32 %v2777_v38, %v2705_v62  ;;  %v7851_v39 = vsel %vm7739_vm9, %v1859_v33, 0.0  ;;  %v7855_v7 = vsel %vm7754_vm10, %v2184_v35, 0.0  ;;  %v7857_v49 = vpop.f32.mrb[31].mxu0 }
 0x209   : > { %12546 = vst [vmem:[#allocation81_spill] sm:$0xff] %v7851_v39  ;;  %12547 = vst [vmem:[#allocation82_spill] sm:$0xff] %v7855_v7  ;;  %v2571_v29 = vadd.f32 %v2507_v6, %v2371_v16  ;;  %v2706_v60 = vadd.f32 %v2642_v44, %v2570_v58  ;;  %v2778_v18 = vmul.f32 %v7341_v20, %v7851_v39 }
 0x20a   : > { %v7863_v42 = vadd.f32 %v7542_v32, %v7303_v1  ;;  %v2508_v11 = vmul.f32 %v7282_v52, %v7715_v27  ;;  %v7867_v33 = vadd.f32 %v2913_v9, %v2841_v50  ;;  %v2914_v53 = vmul.f32 %v7344_v21, %v7803_v31 }
 0x20b   : > { %v7873_v62 = vadd.f32 %v7552_v54, %v7318_v13  ;;  %v2644_v32 = vmul.f32 %v7299_v63, %v7855_v7  ;;  %v2842_v50 = vadd.f32 %v2778_v18, %v2706_v60  ;;  %v2373_v54 = vmul.f32 %v7268_v47, %v7818_v14 }
 0x20c   : > { %12548 = vst [vmem:[#allocation83_spill] sm:$0xff] %v7863_v42  ;;  %12549 = vst [vmem:[#allocation84_spill] sm:$0xff] %v7867_v33  ;;  %v1749_v9 = vrot.slane %v7863_v42, 7  ;;  %v2074_v44 = vrot.slane %v7863_v42, 1  ;;  %v2572_v6 = vadd.f32 %v2508_v11, %v2372_v5  ;;  %v2707_v17 = vadd.f32 %v2643_v46, %v2571_v29  ;;  %v7901_v33 = vpop.f32.mrb[32].mxu0 }
 0x20d   : > { %v1750_v38 = vrot.slane %v7873_v62, 7  ;;  %v7890_v35 = vadd.f32 %v2914_v53, %v2842_v50  ;;  %v2075_v18 = vrot.slane %v7873_v62, 1  ;;  %v7907_v46 = vadd.f32 %v7591_v57, %v7303_v1  ;;  %v7913_v11 = vpop.f32.mrb[33].mxu0 }
 0x20e   : > { %v7894_v0 = vsel %vm1803_vm1, %v1747_v37, %v1749_v9  ;;  %v7898_v60 = vsel %vm2128_vm3, %v2072_v10, %v2074_v44  ;;  %v7911_v37 = vadd.s32 104, %v7251_v36  ;;  %v2509_v10 = vmul.f32 %v7272_v48, %v7784_v34 }
 0x20f   : > { %12554 = vst [vmem:[#allocation85_spill] sm:$0xff] %v7890_v35  ;;  %12555 = vst [vmem:[#allocation86_spill] sm:$0xff] %v7894_v0  ;;  %v2779_v5 = vmul.f32 %v7338_v19, %v7894_v0  ;;  %v7919_v53 = vsel %vm1803_vm1, %v1748_v15, %v1750_v38  ;;  %v7923_v50 = vsel %vm2128_vm3, %v2073_v45, %v2075_v18  ;;  %v7925_v35 = vpop.f32.mrb[34].mxu0  ;;  %v1351_v7 = vand.u32 15, %v7833_v4 }
 0x210   : > { %12556 = vst [vmem:[#allocation87_spill] sm:$0xff] %v7898_v60  ;;  %12557 = vst [vmem:[#allocation88_spill] sm:$0xff] %v7919_v53  ;;  %v2708_v57 = vadd.f32 %v2644_v32, %v2572_v6  ;;  %v2374_v29 = vmul.f32 %v7278_v51, %v7851_v39  ;;  %v2915_v28 = vmul.f32 %v7315_v12, %v7863_v42  ;;  %v7932_v34 = vpop.f32.mrb[35].mxu0  ;;  %v7939_v32 = vadd.s32 112, %v7251_v36 }
 0x211   : > { %12558 = vst [vmem:[#allocation89_spill] sm:$0xff] %v7923_v50  ;;  %12559 = vst [vmem:[#allocation90_spill] sm:$0xff] %v7925_v35  ;;  %v2843_v14 = vadd.f32 %v2779_v5, %v2707_v17  ;;  %v2573_v15 = vadd.f32 %v2509_v10, %v2373_v54  ;;  %v2510_v27 = vmul.f32 %v7282_v52, %v7803_v31  ;;  %v1751_v5 = vrot.slane %v7907_v46, 7 }
 0x212   : > { %12560 = vst [vmem:[#allocation91_spill] sm:$0xff] %v7932_v34  ;;  %v2780_v45 = vmul.f32 %v7341_v20, %v7919_v53  ;;  %v2645_v6 = vmul.f32 %v7294_v59, %v7898_v60  ;;  %v2076_v4 = vrot.slane %v7907_v46, 1  ;;  %v2916_v54 = vmul.f32 %v7344_v21, %v7873_v62 }
 0x213   : > { %v7943_v17 = vadd.f32 %v2915_v28, %v2843_v14  ;;  %v7951_v31 = vadd.s32 120, %v7251_v36  ;;  %v2574_v34 = vadd.f32 %v2510_v27, %v2374_v29  ;;  %v1854_v35 = vsel %vm1803_vm1, %v1749_v9, %v1751_v5 }
 0x214   : > { %v2844_v39 = vadd.f32 %v2780_v45, %v2708_v57  ;;  %v2179_v14 = vsel %vm2128_vm3, %v2074_v44, %v2076_v4  ;;  %v7959_v28 = vadd.f32 %v7602_v61, %v7318_v13  ;;  %v2375_v57 = vmul.f32 %v7268_v47, %v7894_v0  ;;  %v7973_v9 = vpop.f32.mrb[36].mxu0 }
 0x215   : > { %12561 = vst [vmem:[#allocation92_spill] sm:$0xff] %v7943_v17  ;;  %v7967_v10 = vsel %vm7875_vm11, %v1854_v35, 0.0  ;;  %v7971_v27 = vsel %vm7879_vm12, %v2179_v14, 0.0  ;;  %12565 = vst [vmem:[#allocation96_spill] sm:$0xff] %v7973_v9  ;;  %v2646_v44 = vmul.f32 %v7299_v63, %v7923_v50  ;;  %v2709_v61 = vadd.f32 %v2645_v6, %v2573_v15 }
 0x216   : > { %v7963_v45 = vadd.f32 %v2916_v54, %v2844_v39  ;;  %12563 = vst [vmem:[#allocation94_spill] sm:$0xff] %v7967_v10  ;;  %12564 = vst [vmem:[#allocation95_spill] sm:$0xff] %v7971_v27  ;;  %v2781_v29 = vmul.f32 %v7338_v19, %v7967_v10  ;;  %v1752_v39 = vrot.slane %v7959_v28, 7  ;;  %v7980_v54 = vpop.f32.mrb[37].mxu0  ;;  %v2511_v35 = vmul.f32 %v7272_v48, %v7863_v42 }
 0x217   : > { %12566 = vst [vmem:[#allocation97_spill] sm:$0xff] %v7980_v54  ;;  %v2917_v14 = vmul.f32 %v7315_v12, %v7907_v46  ;;  %v2077_v17 = vrot.slane %v7959_v28, 1  ;;  %v7990_v0 = vpop.f32.mrb[38].mxu0  ;;  %v2647_v15 = vmul.f32 %v7294_v59, %v7971_v27  ;;  %v7998_v9 = vadd.f32 %v7619_v2, %v7303_v1 }
 0x218   : > { %12562 = vst [vmem:[#allocation93_spill] sm:$0xff] %v7963_v45  ;;  %v7988_v45 = vadd.s32 128, %v7251_v36  ;;  %12567 = vst [vmem:[#allocation98_spill] sm:$0xff] %v7990_v0  ;;  %v2845_v6 = vadd.f32 %v2781_v29, %v2709_v61  ;;  %v1855_v54 = vsel %vm1803_vm1, %v1750_v38, %v1752_v39  ;;  %v8000_v50 = vpop.f32.mrb[39].mxu0  ;;  %v2575_v60 = vadd.f32 %v2511_v35, %v2375_v57 }
 0x219   : > { %v8004_v42 = vsel %vm7875_vm11, %v1855_v54, 0.0  ;;  %v2180_v0 = vsel %vm2128_vm3, %v2075_v18, %v2077_v17  ;;  %v8010_v61 = vadd.f32 %v7637_v22, %v7318_v13  ;;  %v2710_v38 = vadd.f32 %v2646_v44, %v2574_v34 }
 0x21a   : > { %12568 = vst [vmem:[#allocation99_spill] sm:$0xff] %v8004_v42  ;;  %v8012_v29 = vadd.f32 %v2917_v14, %v2845_v6  ;;  %v8016_v2 = vsel %vm7879_vm12, %v2180_v0, 0.0  ;;  %v2782_v57 = vmul.f32 %v7341_v20, %v8004_v42  ;;  %v2376_v58 = vmul.f32 %v7278_v51, %v7919_v53 }
 0x21b   : > { %12570 = vst [vmem:[#allocation101_spill] sm:$0xff] %v8016_v2  ;;  %v2512_v18 = vmul.f32 %v7282_v52, %v7873_v62  ;;  %v1753_v54 = vrot.slane %v7998_v9, 7  ;;  %v2078_v22 = vrot.slane %v7998_v9, 1  ;;  %v2648_v35 = vmul.f32 %v7299_v63, %v8016_v2 }
 0x21c   : > { %12569 = vst [vmem:[#allocation100_spill] sm:$0xff] %v8012_v29  ;;  %v2846_v16 = vadd.f32 %v2782_v57, %v2710_v38  ;;  %v2918_v34 = vmul.f32 %v7344_v21, %v7959_v28  ;;  %v2711_v0 = vadd.f32 %v2647_v15, %v2575_v60  ;;  %vm8030_vm13 = vcmp.gt.s32.totalorder %v1351_v7, 0  ;;  %v8050_v15 = vpop.f32.mrb[40].mxu0 }
 0x21d   : > { %v12573_v14 = vand.u32 15, %v7806_v40  ;;  %v8042_v29 = vsel %vm1803_vm1, %v1751_v5, %v1753_v54  ;;  %v8046_v38 = vsel %vm2128_vm3, %v2076_v4, %v2078_v22  ;;  %v1754_v60 = vrot.slane %v8010_v61, 7 }
 0x21e   : > { %12576 = vst [vmem:[#allocation102_spill] sm:$0xff] %v8042_v29  ;;  %12577 = vst [vmem:[#allocation103_spill] sm:$0xff] %v8046_v38  ;;  %v2079_v7 = vrot.slane %v8010_v61, 1  ;;  %v8052_v57 = vadd.f32 %v2918_v34, %v2846_v16  ;;  %v2783_v40 = vmul.f32 %v7338_v19, %v8042_v29  ;;  %v2576_v27 = vadd.f32 %v2512_v18, %v2376_v58 }
 0x21f   : > { %vm8036_vm14 = vcmp.lt.s32.totalorder %v12573_v14, 15  ;;  %v1365_v14 = vand.u32 15, %v7939_v32  ;;  %v2377_v4 = vmul.f32 %v7268_v47, %v7967_v10  ;;  %v8062_v2 = vsel %vm1803_vm1, %v1752_v39, %v1754_v60 }
 0x220   : > { %12578 = vst [vmem:[#allocation104_spill] sm:$0xff] %v8052_v57  ;;  %12579 = vst [vmem:[#allocation105_spill] sm:$0xff] %v8062_v2  ;;  %v8066_v53 = vsel %vm2128_vm3, %v2077_v17, %v2079_v7  ;;  %v2378_v16 = vmul.f32 %v7278_v51, %v8004_v42  ;;  %v2847_v34 = vadd.f32 %v2783_v40, %v2711_v0 }
 0x221   : > { %12580 = vst [vmem:[#allocation106_spill] sm:$0xff] %v8066_v53  ;;  %v2919_v32 = vmul.f32 %v7315_v12, %v7998_v9  ;;  %v8075_v18 = vmul.f32 %v7607_v41, %v7452_v55  ;;  %v2513_v39 = vmul.f32 %v7272_v48, %v7907_v46  ;;  %v2712_v5 = vadd.f32 %v2648_v35, %v2576_v27 }
 0x222   : > { %v2784_v17 = vmul.f32 %v7341_v20, %v8062_v2  ;;  %v8083_v57 = vmul.f32 %v7353_v30, %v7538_v25  ;;  %v2514_v0 = vmul.f32 %v7282_v52, %v7959_v28  ;;  %v8091_v55 = vadd.f32 %v7680_v43, %v7303_v1 }
 0x223   : > { %12581 = vst [vmem:[#allocation107_spill] sm:$0xff] %v8075_v18  ;;  %v8087_v40 = vadd.f32 %v2919_v32, %v2847_v34  ;;  %v2577_v58 = vadd.f32 %v2513_v39, %v2377_v4  ;;  %v2920_v27 = vmul.f32 %v7344_v21, %v8010_v61  ;;  %v8097_v35 = vadd.f32 %v7691_v8, %v7318_v13 }
 0x224   : > { %v2848_v10 = vadd.f32 %v2784_v17, %v2712_v5  ;;  %v2578_v25 = vadd.f32 %v2514_v0, %v2378_v16  ;;  %v2649_v42 = vmul.f32 %v7294_v59, %v8046_v38  ;;  %v1755_v34 = vrot.slane %v8091_v55, 7 }
 0x225   : > { %12582 = vst [vmem:[#allocation108_spill] sm:$0xff] %v8087_v40  ;;  %v2080_v32 = vrot.slane %v8091_v55, 1  ;;  %v2650_v43 = vmul.f32 %v7299_v63, %v8066_v53  ;;  %v1756_v5 = vrot.slane %v8097_v35, 7  ;;  %v2081_v39 = vrot.slane %v8097_v35, 1 }
 0x226   : > { %v8105_v4 = vadd.f32 %v2920_v27, %v2848_v10  ;;  %v2379_v8 = vmul.f32 %v7268_v47, %v8042_v29  ;;  %v2515_v16 = vmul.f32 %v7272_v48, %v7998_v9  ;;  %v1850_v17 = vsel %vm1803_vm1, %v1753_v54, %v1755_v34 }
 0x227   : > { %v2175_v0 = vsel %vm2128_vm3, %v2078_v22, %v2080_v32  ;;  %v8119_v10 = vsel %vm8030_vm13, %v1850_v17, 0.0  ;;  %v1851_v40 = vsel %vm1803_vm1, %v1754_v60, %v1756_v5  ;;  %v2380_v54 = vmul.f32 %v7278_v51, %v8062_v2 }
 0x228   : > { %12583 = vst [vmem:[#allocation109_spill] sm:$0xff] %v8105_v4  ;;  %12584 = vst [vmem:[#allocation110_spill] sm:$0xff] %v8119_v10  ;;  %v8123_v27 = vsel %vm8036_vm14, %v2175_v0, 0.0  ;;  %v2176_v4 = vsel %vm2128_vm3, %v2079_v7, %v2081_v39  ;;  %v2713_v29 = vadd.f32 %v2649_v42, %v2577_v58  ;;  %v2785_v22 = vmul.f32 %v7338_v19, %v8119_v10 }
 0x229   : > { %12585 = vst [vmem:[#allocation111_spill] sm:$0xff] %v8123_v27  ;;  %v8135_v17 = vsel %vm8030_vm13, %v1851_v40, 0.0  ;;  %v2651_v0 = vmul.f32 %v7294_v59, %v8123_v27  ;;  %v8141_v60 = vsel %vm8036_vm14, %v2176_v4, 0.0  ;;  %v2714_v18 = vadd.f32 %v2650_v43, %v2578_v25 }
 0x22a   : > { %12586 = vst [vmem:[#allocation112_spill] sm:$0xff] %v8135_v17  ;;  %12587 = vst [vmem:[#allocation113_spill] sm:$0xff] %v8141_v60  ;;  %v2786_v7 = vmul.f32 %v7341_v20, %v8135_v17  ;;  %v2516_v42 = vmul.f32 %v7282_v52, %v8010_v61  ;;  %v2849_v58 = vadd.f32 %v2785_v22, %v2713_v29  ;;  %vm8165_vm15 = vcmp.gt.s32.totalorder %v1365_v14, 0 }
 0x22b   : > { %v2921_v44 = vmul.f32 %v7315_v12, %v8091_v55  ;;  %v8151_v40 = vadd.f32 %v7707_v23, %v7303_v1  ;;  %v2579_v27 = vadd.f32 %v2515_v16, %v2379_v8  ;;  %v2922_v6 = vmul.f32 %v7344_v21, %v8097_v35 }
 0x22c   : > { %v2850_v2 = vadd.f32 %v2786_v7, %v2714_v18  ;;  %v8157_v25 = vadd.f32 %v7717_v3, %v7318_v13  ;;  %v2652_v29 = vmul.f32 %v7299_v63, %v8141_v60  ;;  %v12593_v18 = vand.u32 15, %v7911_v37 }
 0x22d   : > { %12588 = vst [vmem:[#allocation114_spill] sm:$0xff] %v8151_v40  ;;  %v8159_v43 = vadd.f32 %v2921_v44, %v2849_v58  ;;  %v1757_v4 = vrot.slane %v8151_v40, 7  ;;  %v2082_v22 = vrot.slane %v8151_v40, 1  ;;  %v2580_v3 = vadd.f32 %v2516_v42, %v2380_v54 }
 0x22e   : > { %12589 = vst [vmem:[#allocation115_spill] sm:$0xff] %v8157_v25  ;;  %vm8171_vm0 = vcmp.lt.s32.totalorder %v12593_v18, 15  ;;  %v8175_v16 = vadd.f32 %v2922_v6, %v2850_v2  ;;  %v2715_v7 = vadd.f32 %v2651_v0, %v2579_v27  ;;  %v1758_v58 = vrot.slane %v8157_v25, 7 }
 0x22f   : > { %12590 = vst [vmem:[#allocation116_spill] sm:$0xff] %v8159_v43  ;;  %v2381_v44 = vmul.f32 %v7268_v47, %v8119_v10  ;;  %v8182_v14 = vsel %vm1803_vm1, %v1755_v34, %v1757_v4  ;;  %v8186_v37 = vsel %vm2128_vm3, %v2080_v32, %v2082_v22  ;;  %v2083_v18 = vrot.slane %v8157_v25, 1  ;;  %v12603_v43 = vld [vmem:[#allocation44_spill] sm:$0xff] }
 0x230   : > { %12596 = vst [vmem:[#allocation117_spill] sm:$0xff] %v8175_v16  ;;  %12597 = vst [vmem:[#allocation118_spill] sm:$0xff] %v8182_v14  ;;  %v8191_v2 = vmul.f32 %v7347_v26, %v7569_v24  ;;  %v8195_v27 = vmul.f32 %v7353_v30, %v7615_v56  ;;  %v2382_v54 = vmul.f32 %v7278_v51, %v8135_v17  ;;  %v12622_v8 = vand.u32 15, %v7951_v31 }
 0x231   : > { %12598 = vst [vmem:[#allocation119_spill] sm:$0xff] %v8186_v37  ;;  %v2787_v34 = vmul.f32 %v7338_v19, %v8182_v14  ;;  %v2517_v32 = vmul.f32 %v7272_v48, %v8091_v55  ;;  %v8205_v0 = vsel %vm1803_vm1, %v1756_v5, %v1758_v58  ;;  %v8209_v42 = vsel %vm2128_vm3, %v2081_v39, %v2083_v18 }
 0x232   : > { %12599 = vst [vmem:[#allocation120_spill] sm:$0xff] %v8191_v2  ;;  %12600 = vst [vmem:[#allocation121_spill] sm:$0xff] %v8195_v27  ;;  %v2716_v6 = vadd.f32 %v2652_v29, %v2580_v3  ;;  %v8213_v16 = vmul.f32 %v7607_v41, %v12603_v43  ;;  %v2518_v10 = vmul.f32 %v7282_v52, %v8097_v35  ;;  %v12605_v29 = vld [vmem:[#allocation66_spill] sm:$0xff]  ;;  %vm8303_vm4 = vcmp.lt.s32.totalorder %v12622_v8, 15 }
 0x233   : > { %12601 = vst [vmem:[#allocation122_spill] sm:$0xff] %v8205_v0  ;;  %12602 = vst [vmem:[#allocation123_spill] sm:$0xff] %v8209_v42  ;;  %v2851_v17 = vadd.f32 %v2787_v34, %v2715_v7  ;;  %v2923_v60 = vmul.f32 %v7315_v12, %v8151_v40  ;;  %v2581_v2 = vadd.f32 %v2517_v32, %v2381_v44  ;;  %v12608_v7 = vld [vmem:[#allocation67_spill] sm:$0xff] }
 0x234   : > { %12604 = vst [vmem:[#allocation44_spill] sm:$0xff] %v8213_v16  ;;  %v2653_v5 = vmul.f32 %v7294_v59, %v8186_v37  ;;  %v2788_v39 = vmul.f32 %v7341_v20, %v8205_v0  ;;  %v8225_v3 = vadd.f32 %v12605_v29, %v7303_v1  ;;  %v2582_v43 = vadd.f32 %v2518_v10, %v2382_v54 }
 0x235   : > { %v2519_v27 = vmul.f32 %v7272_v48, %v8151_v40  ;;  %v8229_v24 = vadd.f32 %v2923_v60, %v2851_v17  ;;  %v8233_v34 = vadd.f32 %v12608_v7, %v7318_v13  ;;  %v2924_v32 = vmul.f32 %v7344_v21, %v8157_v25 }
 0x236   : > { %12606 = vst [vmem:[#allocation66_spill] sm:$0xff] %v8225_v3  ;;  %v2852_v44 = vadd.f32 %v2788_v39, %v2716_v6  ;;  %v1759_v37 = vrot.slane %v8225_v3, 7  ;;  %v2084_v16 = vrot.slane %v8225_v3, 1  ;;  %v2383_v10 = vmul.f32 %v7268_v47, %v8182_v14 }
 0x237   : > { %12607 = vst [vmem:[#allocation124_spill] sm:$0xff] %v8229_v24  ;;  %12609 = vst [vmem:[#allocation67_spill] sm:$0xff] %v8233_v34  ;;  %v2654_v54 = vmul.f32 %v7299_v63, %v8209_v42  ;;  %v1760_v17 = vrot.slane %v8233_v34, 7  ;;  %v2085_v60 = vrot.slane %v8233_v34, 1  ;;  %v2717_v7 = vadd.f32 %v2653_v5, %v2581_v2 }
 0x238   : > { %v8245_v29 = vadd.f32 %v2924_v32, %v2852_v44  ;;  %v1846_v6 = vsel %vm1803_vm1, %v1757_v4, %v1759_v37  ;;  %v2171_v39 = vsel %vm2128_vm3, %v2082_v22, %v2084_v16  ;;  %v2521_v22 = vmul.f32 %v7272_v48, %v8225_v3 }
 0x239   : > { %v8253_v24 = vsel %vm8165_vm15, %v1846_v6, 0.0  ;;  %v8257_v14 = vsel %vm8171_vm0, %v2171_v39, 0.0  ;;  %v1847_v42 = vsel %vm1803_vm1, %v1758_v58, %v1760_v17  ;;  %v2172_v44 = vsel %vm2128_vm3, %v2083_v18, %v2085_v60 }
 0x23a   : > { %12610 = vst [vmem:[#allocation125_spill] sm:$0xff] %v8245_v29  ;;  %12611 = vst [vmem:[#allocation126_spill] sm:$0xff] %v8253_v24  ;;  %v2385_v4 = vmul.f32 %v7268_v47, %v8253_v24  ;;  %v2789_v2 = vmul.f32 %v7338_v19, %v8253_v24  ;;  %v8271_v5 = vsel %vm8165_vm15, %v1847_v42, 0.0  ;;  %v2384_v32 = vmul.f32 %v7278_v51, %v8205_v0  ;;  %v12615_v42 = vld [vmem:[#allocation53_spill] sm:$0xff] }
 0x23b   : > { %12612 = vst [vmem:[#allocation127_spill] sm:$0xff] %v8257_v14  ;;  %12613 = vst [vmem:[#allocation128_spill] sm:$0xff] %v8271_v5  ;;  %v2925_v58 = vmul.f32 %v7315_v12, %v8225_v3  ;;  %v2718_v18 = vadd.f32 %v2654_v54, %v2582_v43  ;;  %v2790_v6 = vmul.f32 %v7341_v20, %v8271_v5  ;;  %v8283_v23 = vsel %vm8171_vm0, %v2172_v44, 0.0  ;;  %v12616_v24 = vld [vmem:[#allocation41_spill] sm:$0xff] }
 0x23c   : > { %v2585_v39 = vadd.f32 %v2521_v22, %v2385_v4  ;;  %v2655_v29 = vmul.f32 %v7294_v59, %v8257_v14  ;;  %v2853_v40 = vadd.f32 %v2789_v2, %v2717_v7  ;;  %12614 = vst [vmem:[#allocation129_spill] sm:$0xff] %v8283_v23  ;;  %v8287_v56 = vmul.f32 %v12616_v24, %v12615_v42  ;;  %v12618_v54 = vld [vmem:[#allocation69_spill] sm:$0xff]  ;;  %v8307_v22 = vpop.f32.mrb[41].mxu0 }
 0x23d   : > { %v2854_v0 = vadd.f32 %v2790_v6, %v2718_v18  ;;  %v2926_v43 = vmul.f32 %v7344_v21, %v8233_v34  ;;  %v8293_v3 = vadd.f32 %v12618_v54, %v7303_v1  ;;  %v12619_v4 = vand.u32 15, %v7988_v45  ;;  %v12626_v45 = vld [vmem:[#allocation72_spill] sm:$0xff] }
 0x23e   : > { %12617 = vst [vmem:[#allocation53_spill] sm:$0xff] %v8287_v56  ;;  %v2583_v2 = vadd.f32 %v2519_v27, %v2383_v10  ;;  %v2520_v18 = vmul.f32 %v7282_v52, %v8157_v25  ;;  %v8311_v6 = vadd.f32 %v2925_v58, %v2853_v40  ;;  %v8315_v42 = vadd.f32 %v12626_v45, %v7318_v13 }
 0x23f   : > { %vm8297_vm2 = vcmp.gt.s32.totalorder %v12619_v4, 0  ;;  %v2656_v54 = vmul.f32 %v7299_v63, %v8283_v23  ;;  %v8319_v31 = vadd.f32 %v2926_v43, %v2854_v0  ;;  %v1761_v4 = vrot.slane %v8293_v3, 7  ;;  %v12634_v23 = vld [vmem:[#allocation78_spill] sm:$0xff] }
 0x240   : > { %12625 = vst [vmem:[#allocation69_spill] sm:$0xff] %v8311_v6  ;;  %v2086_v8 = vrot.slane %v8293_v3, 1  ;;  %v2584_v14 = vadd.f32 %v2520_v18, %v2384_v32  ;;  %v2719_v27 = vadd.f32 %v2655_v29, %v2583_v2  ;;  %v1762_v10 = vrot.slane %v8315_v42, 7  ;;  %v8337_v32 = vpop.f32.mrb[42].mxu0 }
 0x241   : > { %12627 = vst [vmem:[#allocation72_spill] sm:$0xff] %v8319_v31  ;;  %v2087_v40 = vrot.slane %v8315_v42, 1  ;;  %v2386_v58 = vmul.f32 %v7278_v51, %v8271_v5  ;;  %v2522_v45 = vmul.f32 %v7282_v52, %v8233_v34  ;;  %v8331_v0 = vsel %vm1803_vm1, %v1759_v37, %v1761_v4  ;;  %12630 = vst [vmem:[#allocation132_spill] sm:$0xff] %v8337_v32  ;;  %v8347_v37 = vpop.f32.mrb[43].mxu0 }
 0x242   : > { %12628 = vst [vmem:[#allocation130_spill] sm:$0xff] %v8331_v0  ;;  %v8335_v43 = vsel %vm2128_vm3, %v2084_v16, %v2086_v8  ;;  %v2387_v29 = vmul.f32 %v7268_v47, %v8331_v0  ;;  %v2523_v2 = vmul.f32 %v7272_v48, %v8293_v3  ;;  %v2791_v6 = vmul.f32 %v7338_v19, %v8331_v0  ;;  %v8361_v34 = vpop.f32.mrb[44].mxu0 }
 0x243   : > { %12629 = vst [vmem:[#allocation131_spill] sm:$0xff] %v8335_v43  ;;  %v2657_v18 = vmul.f32 %v7294_v59, %v8335_v43  ;;  %12631 = vst [vmem:[#allocation133_spill] sm:$0xff] %v8347_v37  ;;  %v8351_v16 = vsel %vm1803_vm1, %v1760_v17, %v1762_v10  ;;  %v8355_v31 = vsel %vm2128_vm3, %v2085_v60, %v2087_v40  ;;  %v12636_v43 = vld [vmem:[#allocation54_spill] sm:$0xff] }
 0x244   : > { %12632 = vst [vmem:[#allocation134_spill] sm:$0xff] %v8351_v16  ;;  %12633 = vst [vmem:[#allocation135_spill] sm:$0xff] %v8355_v31  ;;  %v2720_v5 = vadd.f32 %v2656_v54, %v2584_v14  ;;  %v8359_v56 = vadd.f32 %v12634_v23, %v7303_v1  ;;  %v8365_v0 = vmul.f32 %v7607_v41, %v12636_v43 }
 0x245   : > { %12635 = vst [vmem:[#allocation78_spill] sm:$0xff] %v8361_v34  ;;  %v2587_v37 = vadd.f32 %v2523_v2, %v2387_v29  ;;  %v2855_v25 = vadd.f32 %v2791_v6, %v2719_v27  ;;  %v2927_v17 = vmul.f32 %v7315_v12, %v8293_v3  ;;  %v2586_v32 = vadd.f32 %v2522_v45, %v2386_v58 }
 0x246   : > { %12637 = vst [vmem:[#allocation54_spill] sm:$0xff] %v8365_v0  ;;  %v2792_v60 = vmul.f32 %v7341_v20, %v8351_v16  ;;  %v1763_v14 = vrot.slane %v8359_v56, 7  ;;  %v2088_v23 = vrot.slane %v8359_v56, 1  ;;  %v2388_v34 = vmul.f32 %v7278_v51, %v8351_v16 }
 0x247   : > { %v8373_v54 = vadd.f32 %v2927_v17, %v2855_v25  ;;  %v2524_v43 = vmul.f32 %v7282_v52, %v8315_v42  ;;  %v2721_v6 = vadd.f32 %v2657_v18, %v2585_v39  ;;  %v2928_v58 = vmul.f32 %v7344_v21, %v8315_v42  ;;  %v12641_v39 = vld [vmem:[#allocation79_spill] sm:$0xff] }
 0x248   : > { %v2856_v27 = vadd.f32 %v2792_v60, %v2720_v5  ;;  %v1842_v45 = vsel %vm1803_vm1, %v1761_v4, %v1763_v14  ;;  %v2167_v29 = vsel %vm2128_vm3, %v2086_v8, %v2088_v23  ;;  %v2525_v5 = vmul.f32 %v7272_v48, %v8359_v56 }
 0x249   : > { %12638 = vst [vmem:[#allocation136_spill] sm:$0xff] %v8373_v54  ;;  %v8387_v25 = vsel %vm8297_vm2, %v1842_v45, 0.0  ;;  %v8391_v2 = vsel %vm8303_vm4, %v2167_v29, 0.0  ;;  %v8397_v18 = vadd.f32 %v12641_v39, %v7318_v13  ;;  %v2588_v45 = vadd.f32 %v2524_v43, %v2388_v34  ;;  %v12643_v43 = vld [vmem:[#allocation80_spill] sm:$0xff] }
 0x24a   : > { %12639 = vst [vmem:[#allocation137_spill] sm:$0xff] %v8387_v25  ;;  %12640 = vst [vmem:[#allocation138_spill] sm:$0xff] %v8391_v2  ;;  %v8399_v17 = vadd.f32 %v2928_v58, %v2856_v27  ;;  %v2389_v4 = vmul.f32 %v7268_v47, %v8387_v25  ;;  %v2659_v8 = vmul.f32 %v7294_v59, %v8391_v2 }
 0x24b   : > { %v2793_v60 = vmul.f32 %v7338_v19, %v8387_v25  ;;  %v2658_v29 = vmul.f32 %v7299_v63, %v8355_v31  ;;  %v1764_v54 = vrot.slane %v8397_v18, 7  ;;  %v2089_v39 = vrot.slane %v8397_v18, 1 }
 0x24c   : > { %12642 = vst [vmem:[#allocation79_spill] sm:$0xff] %v8399_v17  ;;  %v2589_v16 = vadd.f32 %v2525_v5, %v2389_v4  ;;  %v2929_v58 = vmul.f32 %v7315_v12, %v8359_v56  ;;  %v2526_v17 = vmul.f32 %v7282_v52, %v8397_v18  ;;  %v8421_v25 = vadd.f32 %v12643_v43, %v7303_v1 }
 0x24d   : > { %v2857_v27 = vadd.f32 %v2793_v60, %v2721_v6  ;;  %v1843_v2 = vsel %vm1803_vm1, %v1762_v10, %v1764_v54  ;;  %v2168_v34 = vsel %vm2128_vm3, %v2087_v40, %v2089_v39  ;;  %v2723_v0 = vadd.f32 %v2659_v8, %v2587_v37 }
 0x24e   : > { %12644 = vst [vmem:[#allocation80_spill] sm:$0xff] %v8421_v25  ;;  %v8427_v6 = vsel %vm8297_vm2, %v1843_v2, 0.0  ;;  %v8431_v5 = vsel %vm8303_vm4, %v2168_v34, 0.0  ;;  %v8435_v10 = vadd.f32 %v7857_v49, %v7318_v13  ;;  %v2722_v4 = vadd.f32 %v2658_v29, %v2586_v32 }
 0x24f   : > { %v8423_v31 = vadd.f32 %v2929_v58, %v2857_v27  ;;  %12646 = vst [vmem:[#allocation140_spill] sm:$0xff] %v8427_v6  ;;  %12647 = vst [vmem:[#allocation141_spill] sm:$0xff] %v8431_v5  ;;  %v2390_v40 = vmul.f32 %v7278_v51, %v8427_v6  ;;  %v2794_v37 = vmul.f32 %v7341_v20, %v8427_v6  ;;  %v1765_v8 = vrot.slane %v8421_v25, 7 }
 0x250   : > { %12648 = vst [vmem:[#allocation142_spill] sm:$0xff] %v8435_v10  ;;  %v2660_v7 = vmul.f32 %v7299_v63, %v8431_v5  ;;  %v2930_v44 = vmul.f32 %v7344_v21, %v8397_v18  ;;  %v2090_v2 = vrot.slane %v8421_v25, 1  ;;  %v2527_v49 = vmul.f32 %v7272_v48, %v8421_v25  ;;  %v12654_v5 = vld [vmem:[#allocation64_spill] sm:$0xff] }
 0x251   : > { %12645 = vst [vmem:[#allocation139_spill] sm:$0xff] %v8423_v31  ;;  %v2590_v60 = vadd.f32 %v2526_v17, %v2390_v40  ;;  %v2858_v27 = vadd.f32 %v2794_v37, %v2722_v4  ;;  %v8451_v32 = vsel %vm1803_vm1, %v1763_v14, %v1765_v8  ;;  %v1766_v29 = vrot.slane %v8435_v10, 7 }
 0x252   : > { %12649 = vst [vmem:[#allocation143_spill] sm:$0xff] %v8451_v32  ;;  %v8456_v58 = vsel %vm2128_vm3, %v2088_v23, %v2090_v2  ;;  %v2391_v34 = vmul.f32 %v7268_v47, %v8451_v32  ;;  %v2795_v43 = vmul.f32 %v7338_v19, %v8451_v32  ;;  %v2091_v31 = vrot.slane %v8435_v10, 1 }
 0x253   : > { %12650 = vst [vmem:[#allocation144_spill] sm:$0xff] %v8456_v58  ;;  %v8463_v17 = vadd.f32 %v2930_v44, %v2858_v27  ;;  %v2661_v14 = vmul.f32 %v7294_v59, %v8456_v58  ;;  %v2931_v40 = vmul.f32 %v7315_v12, %v8421_v25  ;;  %v8471_v23 = vsel %vm1803_vm1, %v1764_v54, %v1766_v29  ;;  %v12674_v25 = vld [vmem:[#allocation91_spill] sm:$0xff] }
 0x254   : > { %12652 = vst [vmem:[#allocation146_spill] sm:$0xff] %v8471_v23  ;;  %v2591_v4 = vadd.f32 %v2527_v49, %v2391_v34  ;;  %v2859_v37 = vadd.f32 %v2795_v43, %v2723_v0  ;;  %v8475_v6 = vsel %vm2128_vm3, %v2089_v39, %v2091_v31  ;;  %v2392_v44 = vmul.f32 %v7278_v51, %v8471_v23  ;;  %v12656_v49 = vld [vmem:[#allocation56_spill] sm:$0xff] }
 0x255   : > { %12651 = vst [vmem:[#allocation145_spill] sm:$0xff] %v8463_v17  ;;  %12653 = vst [vmem:[#allocation147_spill] sm:$0xff] %v8475_v6  ;;  %v2528_v27 = vmul.f32 %v7282_v52, %v8435_v10  ;;  %v2662_v17 = vmul.f32 %v7299_v63, %v8475_v6  ;;  %v2724_v32 = vadd.f32 %v2660_v7, %v2588_v45  ;;  %v1244_v7 = vadd.s32 136, %v7251_v36 }
 0x256   : > { %v2796_v54 = vmul.f32 %v7341_v20, %v8471_v23  ;;  %v8487_v0 = vmul.f32 %v7347_v26, %v12654_v5  ;;  %v8491_v39 = vmul.f32 %v12616_v24, %v12656_v49  ;;  %v8493_v34 = vadd.f32 %v2931_v40, %v2859_v37 }
 0x257   : > { %v2932_v43 = vmul.f32 %v7344_v21, %v8435_v10  ;;  %v8497_v58 = vadd.f32 %v2528_v27, %v2392_v44  ;;  %v8501_v45 = vadd.f32 %v7901_v33, %v7303_v1  ;;  %v1245_v23 = vadd.s32 144, %v7251_v36  ;;  %v12662_v27 = vld [vmem:[#allocation70_spill] sm:$0xff] }
 0x258   : > { %12655 = vst [vmem:[#allocation148_spill] sm:$0xff] %v8487_v0  ;;  %12657 = vst [vmem:[#allocation56_spill] sm:$0xff] %v8491_v39  ;;  %v2860_v6 = vadd.f32 %v2796_v54, %v2724_v32  ;;  %v2725_v0 = vadd.f32 %v2661_v14, %v2589_v16  ;;  %v8507_v49 = vadd.f32 %v7913_v11, %v7318_v13  ;;  %v12664_v54 = vld [vmem:[#allocation61_spill] sm:$0xff]  ;;  %v12666_v16 = vld [vmem:[#allocation71_spill] sm:$0xff] }
 0x259   : > { %12658 = vst [vmem:[#allocation149_spill] sm:$0xff] %v8493_v34  ;;  %12659 = vst [vmem:[#allocation150_spill] sm:$0xff] %v8501_v45  ;;  %v2726_v40 = vadd.f32 %v2662_v17, %v2590_v60  ;;  %v1386_v34 = vand.u32 15, %v1244_v7  ;;  %v1767_v44 = vrot.slane %v8501_v45, 7  ;;  %v2092_v32 = vrot.slane %v8501_v45, 1 }
 0x25a   : > { %12660 = vst [vmem:[#allocation151_spill] sm:$0xff] %v8507_v49  ;;  %v8509_v37 = vadd.f32 %v2932_v43, %v2860_v6  ;;  %v8515_v33 = vmul.f32 %v7353_v30, %v12662_v27  ;;  %v8519_v10 = vmul.f32 %v7607_v41, %v12664_v54  ;;  %v8523_v11 = vmul.f32 %v12616_v24, %v12666_v16 }
 0x25b   : > { %v1393_v60 = vand.u32 15, %v1245_v23  ;;  %v1838_v6 = vsel %vm1803_vm1, %v1765_v8, %v1767_v44  ;;  %vm2037_vm5 = vcmp.lt.s32.totalorder %v1386_v34, 15  ;;  %v2163_v17 = vsel %vm2128_vm3, %v2090_v2, %v2092_v32 }
 0x25c   : > { %12661 = vst [vmem:[#allocation152_spill] sm:$0xff] %v8509_v37  ;;  %12663 = vst [vmem:[#allocation153_spill] sm:$0xff] %v8515_v33  ;;  %v1768_v14 = vrot.slane %v8507_v49, 7  ;;  %v8530_v43 = vsel %vm2037_vm5, %v2163_v17, 0.0  ;;  %v2529_v7 = vmul.f32 %v7272_v48, %v8501_v45  ;;  %v2093_v54 = vrot.slane %v8507_v49, 1 }
 0x25d   : > { %12665 = vst [vmem:[#allocation61_spill] sm:$0xff] %v8519_v10  ;;  %12667 = vst [vmem:[#allocation71_spill] sm:$0xff] %v8523_v11  ;;  %vm1713_vm6 = vcmp.gt.s32.totalorder %v1393_v60, 0  ;;  %v2663_v23 = vmul.f32 %v7294_v59, %v8530_v43  ;;  %v2933_v8 = vmul.f32 %v7315_v12, %v8501_v45  ;;  %v2530_v11 = vmul.f32 %v7282_v52, %v8507_v49 }
 0x25e   : > { %12668 = vst [vmem:[#allocation154_spill] sm:$0xff] %v8530_v43  ;;  %v8535_v16 = vsel %vm1713_vm6, %v1838_v6, 0.0  ;;  %v1839_v2 = vsel %vm1803_vm1, %v1766_v29, %v1768_v14  ;;  %v2164_v6 = vsel %vm2128_vm3, %v2091_v31, %v2093_v54  ;;  %v8567_v10 = vadd.f32 %v12674_v25, %v7318_v13 }
 0x25f   : > { %12669 = vst [vmem:[#allocation155_spill] sm:$0xff] %v8535_v16  ;;  %v2393_v34 = vmul.f32 %v7268_v47, %v8535_v16  ;;  %v2797_v60 = vmul.f32 %v7338_v19, %v8535_v16  ;;  %v8547_v17 = vsel %vm1713_vm6, %v1839_v2, 0.0  ;;  %v8551_v37 = vsel %vm2037_vm5, %v2164_v6, 0.0  ;;  %v12672_v16 = vld [vmem:[#allocation90_spill] sm:$0xff] }
 0x260   : > { %12670 = vst [vmem:[#allocation156_spill] sm:$0xff] %v8547_v17  ;;  %12671 = vst [vmem:[#allocation157_spill] sm:$0xff] %v8551_v37  ;;  %v2394_v43 = vmul.f32 %v7278_v51, %v8547_v17  ;;  %v2798_v29 = vmul.f32 %v7341_v20, %v8547_v17  ;;  %v2934_v2 = vmul.f32 %v7344_v21, %v8507_v49  ;;  %v1770_v25 = vrot.slane %v8567_v10, 7  ;;  %v8618_v17 = vpop.f32.mrb[45].mxu0 }
 0x261   : > { %v2593_v33 = vadd.f32 %v2529_v7, %v2393_v34  ;;  %v2861_v45 = vadd.f32 %v2797_v60, %v2725_v0  ;;  %v8563_v39 = vadd.f32 %v12672_v16, %v7303_v1  ;;  %v2727_v5 = vadd.f32 %v2663_v23, %v2591_v4  ;;  %12675 = vst [vmem:[#allocation91_spill] sm:$0xff] %v8567_v10  ;;  %v12677_v60 = vld [vmem:[#allocation74_spill] sm:$0xff] }
 0x262   : > { %v2594_v31 = vadd.f32 %v2530_v11, %v2394_v43  ;;  %v2862_v6 = vadd.f32 %v2798_v29, %v2726_v40  ;;  %v2664_v7 = vmul.f32 %v7299_v63, %v8551_v37  ;;  %v8577_v16 = vmul.f32 %v7607_v41, %v12677_v60  ;;  %v12679_v11 = vld [vmem:[#allocation83_spill] sm:$0xff] }
 0x263   : > { %12673 = vst [vmem:[#allocation90_spill] sm:$0xff] %v8563_v39  ;;  %v8569_v27 = vadd.f32 %v2933_v8, %v2861_v45  ;;  %v1769_v0 = vrot.slane %v8563_v39, 7  ;;  %v2094_v34 = vrot.slane %v8563_v39, 1  ;;  %v8581_v4 = vmul.f32 %v12616_v24, %v12679_v11  ;;  %v12682_v45 = vld [vmem:[#allocation87_spill] sm:$0xff] }
 0x264   : > { %12678 = vst [vmem:[#allocation74_spill] sm:$0xff] %v8577_v16  ;;  %v8583_v40 = vadd.f32 %v2934_v2, %v2862_v6  ;;  %v8588_v43 = vmul.f32 %v7347_v26, %v12682_v45  ;;  %v2095_v29 = vrot.slane %v8567_v10, 1  ;;  %v2531_v6 = vmul.f32 %v7272_v48, %v8563_v39 }
 0x265   : > { %12676 = vst [vmem:[#allocation158_spill] sm:$0xff] %v8569_v27  ;;  %12680 = vst [vmem:[#allocation83_spill] sm:$0xff] %v8581_v4  ;;  %v8592_v23 = vsel %vm1803_vm1, %v1767_v44, %v1769_v0  ;;  %v8596_v8 = vsel %vm2128_vm3, %v2092_v32, %v2094_v34  ;;  %v2935_v11 = vmul.f32 %v7315_v12, %v8563_v39  ;;  %v12688_v4 = vld [vmem:[#allocation89_spill] sm:$0xff] }
 0x266   : > { %12681 = vst [vmem:[#allocation159_spill] sm:$0xff] %v8583_v40  ;;  %12683 = vst [vmem:[#allocation160_spill] sm:$0xff] %v8588_v43  ;;  %v2395_v2 = vmul.f32 %v7268_v47, %v8592_v23  ;;  %v2799_v60 = vmul.f32 %v7338_v19, %v8592_v23  ;;  %v8609_v44 = vsel %vm1803_vm1, %v1768_v14, %v1770_v25 }
 0x267   : > { %12684 = vst [vmem:[#allocation161_spill] sm:$0xff] %v8592_v23  ;;  %12685 = vst [vmem:[#allocation162_spill] sm:$0xff] %v8596_v8  ;;  %v8613_v32 = vsel %vm2128_vm3, %v2093_v54, %v2095_v29  ;;  %v2532_v27 = vmul.f32 %v7282_v52, %v8567_v10  ;;  %v2728_v40 = vadd.f32 %v2664_v7, %v8497_v58  ;;  %v12690_v7 = vld [vmem:[#allocation96_spill] sm:$0xff] }
 0x268   : > { %12686 = vst [vmem:[#allocation163_spill] sm:$0xff] %v8609_v44  ;;  %12687 = vst [vmem:[#allocation164_spill] sm:$0xff] %v8613_v32  ;;  %v2595_v37 = vadd.f32 %v2531_v6, %v2395_v2  ;;  %v2665_v23 = vmul.f32 %v7294_v59, %v8596_v8  ;;  %v2863_v43 = vadd.f32 %v2799_v60, %v2727_v5  ;;  %v1246_v60 = vadd.s32 152, %v7251_v36 }
 0x269   : > { %v2396_v14 = vmul.f32 %v7278_v51, %v8609_v44  ;;  %v8626_v45 = vmul.f32 %v7353_v30, %v12688_v4  ;;  %v2666_v54 = vmul.f32 %v7299_v63, %v8613_v32  ;;  %v2800_v58 = vmul.f32 %v7341_v20, %v8609_v44 }
 0x26a   : > { %v8634_v2 = vadd.f32 %v12690_v7, %v7303_v1  ;;  %v8636_v6 = vadd.f32 %v2935_v11, %v2863_v43  ;;  %v1247_v8 = vadd.s32 160, %v7251_v36  ;;  %v8646_v44 = vmul.f32 %v7607_v41, %v7873_v62 }
 0x26b   : > { %12689 = vst [vmem:[#allocation165_spill] sm:$0xff] %v8626_v45  ;;  %v2596_v5 = vadd.f32 %v2532_v27, %v2396_v14  ;;  %v2864_v16 = vadd.f32 %v2800_v58, %v2728_v40  ;;  %v2936_v45 = vmul.f32 %v7344_v21, %v8567_v10  ;;  %v1400_v7 = vand.u32 15, %v1246_v60 }
 0x26c   : > { %12691 = vst [vmem:[#allocation96_spill] sm:$0xff] %v8634_v2  ;;  %12692 = vst [vmem:[#allocation166_spill] sm:$0xff] %v8636_v6  ;;  %v1771_v32 = vrot.slane %v8634_v2, 7  ;;  %v2096_v4 = vrot.slane %v8634_v2, 1  ;;  %v1407_v43 = vand.u32 15, %v1247_v8  ;;  %v2729_v11 = vadd.f32 %v2665_v23, %v2593_v33  ;;  %v12700_v33 = vld [vmem:[#allocation97_spill] sm:$0xff] }
 0x26d   : > { %12693 = vst [vmem:[#allocation167_spill] sm:$0xff] %v8646_v44  ;;  %v8650_v27 = vmul.f32 %v12616_v24, %v7907_v46  ;;  %v8652_v14 = vadd.f32 %v2936_v45, %v2864_v16  ;;  %vm8662_vm8 = vcmp.lt.s32.totalorder %v1400_v7, 15  ;;  %v8668_v46 = vadd.f32 %v12700_v33, %v7318_v13  ;;  %v12704_v23 = vld [vmem:[#allocation98_spill] sm:$0xff] }
 0x26e   : > { %v1834_v40 = vsel %vm1803_vm1, %v1769_v0, %v1771_v32  ;;  %v2159_v58 = vsel %vm2128_vm3, %v2094_v34, %v2096_v4  ;;  %vm8658_vm7 = vcmp.gt.s32.totalorder %v1407_v43, 0  ;;  %v2730_v16 = vadd.f32 %v2666_v54, %v2594_v31 }
 0x26f   : > { %12694 = vst [vmem:[#allocation168_spill] sm:$0xff] %v8650_v27  ;;  %12695 = vst [vmem:[#allocation169_spill] sm:$0xff] %v8652_v14  ;;  %v8672_v45 = vsel %vm8658_vm7, %v1834_v40, 0.0  ;;  %v8676_v0 = vsel %vm8662_vm8, %v2159_v58, 0.0  ;;  %v2533_v34 = vmul.f32 %v7272_v48, %v8634_v2  ;;  %v8682_v8 = vadd.f32 %v12704_v23, %v7303_v1 }
 0x270   : > { %12701 = vst [vmem:[#allocation97_spill] sm:$0xff] %v8668_v46  ;;  %12702 = vst [vmem:[#allocation170_spill] sm:$0xff] %v8672_v45  ;;  %v2397_v60 = vmul.f32 %v7268_v47, %v8672_v45  ;;  %v2801_v31 = vmul.f32 %v7338_v19, %v8672_v45  ;;  %v2937_v54 = vmul.f32 %v7315_v12, %v8634_v2  ;;  %v1772_v7 = vrot.slane %v8668_v46, 7 }
 0x271   : > { %12703 = vst [vmem:[#allocation171_spill] sm:$0xff] %v8676_v0  ;;  %12705 = vst [vmem:[#allocation98_spill] sm:$0xff] %v8682_v8  ;;  %v2667_v43 = vmul.f32 %v7294_v59, %v8676_v0  ;;  %v2097_v40 = vrot.slane %v8668_v46, 1  ;;  %v2534_v58 = vmul.f32 %v7282_v52, %v8668_v46  ;;  %v8698_v33 = vadd.f32 %v8000_v50, %v7318_v13 }
 0x272   : > { %v2597_v23 = vadd.f32 %v2533_v34, %v2397_v60  ;;  %v2865_v14 = vadd.f32 %v2801_v31, %v2729_v11  ;;  %v1835_v45 = vsel %vm1803_vm1, %v1770_v25, %v1772_v7  ;;  %v1773_v27 = vrot.slane %v8682_v8, 7 }
 0x273   : > { %12706 = vst [vmem:[#allocation172_spill] sm:$0xff] %v8698_v33  ;;  %v8705_v2 = vsel %vm8658_vm7, %v1835_v45, 0.0  ;;  %v2160_v0 = vsel %vm2128_vm3, %v2095_v29, %v2097_v40  ;;  %v2938_v10 = vmul.f32 %v7344_v21, %v8668_v46  ;;  %v2098_v50 = vrot.slane %v8682_v8, 1 }
 0x274   : > { %12707 = vst [vmem:[#allocation173_spill] sm:$0xff] %v8705_v2  ;;  %v8712_v44 = vadd.f32 %v2937_v54, %v2865_v14  ;;  %v8716_v11 = vsel %vm8662_vm8, %v2160_v0, 0.0  ;;  %v2398_v25 = vmul.f32 %v7278_v51, %v8705_v2  ;;  %v2802_v6 = vmul.f32 %v7341_v20, %v8705_v2 }
 0x275   : > { %12709 = vst [vmem:[#allocation175_spill] sm:$0xff] %v8716_v11  ;;  %v2668_v29 = vmul.f32 %v7299_v63, %v8716_v11  ;;  %v8726_v45 = vsel %vm1803_vm1, %v1771_v32, %v1773_v27  ;;  %v8730_v14 = vsel %vm2128_vm3, %v2096_v4, %v2098_v50  ;;  %v2731_v62 = vadd.f32 %v2667_v43, %v2595_v37 }
 0x276   : > { %12708 = vst [vmem:[#allocation174_spill] sm:$0xff] %v8712_v44  ;;  %12710 = vst [vmem:[#allocation176_spill] sm:$0xff] %v8726_v45  ;;  %v8732_v0 = vadd.f32 %v2534_v58, %v2398_v25  ;;  %v2866_v34 = vadd.f32 %v2802_v6, %v2730_v16  ;;  %v2399_v60 = vmul.f32 %v7268_v47, %v8726_v45  ;;  %v12251_v58 = vrot.slane %v8698_v33, 7 }
 0x277   : > { %12711 = vst [vmem:[#allocation177_spill] sm:$0xff] %v8730_v14  ;;  %v2535_v31 = vmul.f32 %v7272_v48, %v8682_v8  ;;  %v8740_v54 = vmul.f32 %v7607_v41, %v7959_v28  ;;  %v8744_v32 = vmul.f32 %v7347_v26, %v8046_v38  ;;  %v8748_v37 = vmul.f32 %v12616_v24, %v7998_v9  ;;  %v12741_v38 = vld [vmem:[#allocation38_spill] sm:$0xff] }
 0x278   : > { %v2803_v4 = vmul.f32 %v7338_v19, %v8726_v45  ;;  %v8752_v16 = vadd.f32 %v2938_v10, %v2866_v34  ;;  %v12250_v28 = vrot.slane %v8698_v33, 1  ;;  %v8760_v25 = vmul.f32 %v7353_v30, %v8066_v53 }
 0x279   : > { %12712 = vst [vmem:[#allocation178_spill] sm:$0xff] %v8740_v54  ;;  %12713 = vst [vmem:[#allocation179_spill] sm:$0xff] %v8744_v32  ;;  %v8754_v43 = vadd.f32 %v2535_v31, %v2399_v60  ;;  %v2939_v9 = vmul.f32 %v7315_v12, %v8682_v8  ;;  %v2732_v44 = vadd.f32 %v2668_v29, %v2596_v5  ;;  %v8883_v8 = vld [vmem:[#allocation11 + $0x10] ss:$0 sm:$0xff] }
 0x27a   : > { %12714 = vst [vmem:[#allocation180_spill] sm:$0xff] %v8748_v37  ;;  %12715 = vst [vmem:[#allocation181_spill] sm:$0xff] %v8752_v16  ;;  %v2867_v6 = vadd.f32 %v2803_v4, %v2731_v62  ;;  %v2669_v45 = vmul.f32 %v7294_v59, %v8730_v14  ;;  %v8770_v10 = vsel %vm1803_vm1, %v1772_v7, %v12251_v58 }
 0x27b   : > { %12716 = vst [vmem:[#allocation182_spill] sm:$0xff] %v8760_v25  ;;  %12717 = vst [vmem:[#allocation183_spill] sm:$0xff] %v8770_v10  ;;  %v8776_v34 = vsel %vm2128_vm3, %v2097_v40, %v12250_v28  ;;  %v8780_v62 = vadd.f32 %v8050_v15, %v7303_v1  ;;  %v2400_v29 = vmul.f32 %v7278_v51, %v8770_v10  ;;  %v1248_v40 = vadd.s32 168, %v7251_v36 }
 0x27c   : > { %12718 = vst [vmem:[#allocation184_spill] sm:$0xff] %v8776_v34  ;;  %v8782_v5 = vadd.f32 %v2939_v9, %v2867_v6  ;;  %v2536_v60 = vmul.f32 %v7282_v52, %v8698_v33  ;;  %v2804_v7 = vmul.f32 %v7341_v20, %v8770_v10  ;;  %v8792_v31 = vmul.f32 %v7607_v41, %v8010_v61 }
 0x27d   : > { %12719 = vst [vmem:[#allocation185_spill] sm:$0xff] %v8780_v62  ;;  %v1249_v15 = vadd.s32 176, %v7251_v36  ;;  %v12255_v4 = vrot.slane %v8780_v62, 7  ;;  %v2940_v28 = vmul.f32 %v7344_v21, %v8698_v33  ;;  %v12254_v58 = vrot.slane %v8780_v62, 1 }
 0x27e   : > { %12720 = vst [vmem:[#allocation186_spill] sm:$0xff] %v8782_v5  ;;  %12721 = vst [vmem:[#allocation187_spill] sm:$0xff] %v8792_v31  ;;  %v8797_v6 = vadd.f32 %v2536_v60, %v2400_v29  ;;  %v2868_v9 = vadd.f32 %v2804_v7, %v2732_v44  ;;  %v1414_v5 = vand.u32 15, %v1248_v40  ;;  %v2733_v10 = vadd.f32 %v2669_v45, %v2597_v23  ;;  %v8818_v7 = vpop.f32.mrb[46].mxu0  ;;  %v12728_v23 = vld [vmem:[#allocation39_spill] sm:$0xff] }
 0x27f   : > { %v1421_v16 = vand.u32 15, %v1249_v15  ;;  %v1830_v61 = vsel %vm1803_vm1, %v1773_v27, %v12255_v4  ;;  %v8808_v2 = vmul.f32 %v12616_v24, %v8091_v55  ;;  %v2670_v44 = vmul.f32 %v7299_v63, %v8776_v34  ;;  %v8828_v55 = vld [vmem:[#allocation11 + $0x18] ss:$0 sm:$0xff] }
 0x280   : > { %v8812_v29 = vadd.f32 %v2940_v28, %v2868_v9  ;;  %v2155_v60 = vsel %vm2128_vm3, %v2098_v50, %v12254_v58  ;;  %vm8824_vm10 = vcmp.lt.s32.totalorder %v1414_v5, 15  ;;  %v3104_v45 = vadd.f32 %v8083_v57, %v12728_v23  ;;  %v6545_v28 = vld [vmem:[#allocation11 + $0x8] sm:$0xff]  ;;  %v8836_v50 = vpop.f32.mrb[47].mxu0 }
 0x281   : > { %12722 = vst [vmem:[#allocation188_spill] sm:$0xff] %v8808_v2  ;;  %vm8820_vm9 = vcmp.gt.s32.totalorder %v1421_v16, 0  ;;  %v12729_v15 = vsub.s32 6, %v7251_v36  ;;  %12730 = vst [vmem:[#allocation39_spill] sm:$0xff] %v8836_v50  ;;  %v8840_v16 = vmul.f32 %v7607_v41, %v8097_v35  ;;  %v2537_v58 = vmul.f32 %v7272_v48, %v8780_v62  ;;  %v8850_v23 = vpop.f32.mrb[48].mxu0  ;;  %v12737_v2 = vld [vmem:[#allocation51_spill] sm:$0xff] }
 0x282   : > { %12723 = vst [vmem:[#allocation189_spill] sm:$0xff] %v8812_v29  ;;  %v8844_v5 = vsel %vm8820_vm9, %v1830_v61, 0.0  ;;  %v2941_v57 = vmul.f32 %v7315_v12, %v8780_v62  ;;  %12733 = vst [vmem:[#allocation192_spill] sm:$0xff] %v8850_v23  ;;  %v12735_v61 = vld [vmem:[#allocation42_spill] sm:$0xff]  ;;  %v12736_v29 = vld [vmem:[#allocation48_spill] sm:$0xff]  ;;  %v3446_v32 = vmul.f32 %v8828_v55, %v12737_v2  ;;  %v8873_v37 = vadd.f32 %v8307_v22, %v7318_v13 }
 0x283   : > { %v8834_v9 = vrot.slane %v6545_v28, %v12729_v15  ;;  %12731 = vst [vmem:[#allocation190_spill] sm:$0xff] %v8840_v16  ;;  %12732 = vst [vmem:[#allocation191_spill] sm:$0xff] %v8844_v5  ;;  %v8854_v28 = vsel %vm8824_vm10, %v2155_v60, 0.0  ;;  %v2401_v35 = vmul.f32 %v7268_v47, %v8844_v5  ;;  %v2805_v15 = vmul.f32 %v7338_v19, %v8844_v5  ;;  %v12738_v16 = vld [vmem:[#allocation60_spill] sm:$0xff]  ;;  %v3573_v60 = vld [vmem:[%s12739_s12] sm:$0x3] }
 0x284   : > { %12734 = vst [vmem:[#allocation193_spill] sm:$0xff] %v8854_v28  ;;  %v3448_v25 = vmul.f32 %v8828_v55, %v12738_v16  ;;  %12740 = vst [vmem:[#allocation42_spill] sm:$0xff] %v8873_v37  ;;  %v2671_v2 = vmul.f32 %v7294_v59, %v8854_v28  ;;  %v12267_v54 = vrot.slane %v8873_v37, 7  ;;  %v12266_v53 = vrot.slane %v8873_v37, 1  ;;  %v12744_v22 = vld [vmem:[#allocation107_spill] sm:$0xff] }
 0x285   : > { %v3174_v4 = vmul.f32 %v8834_v9, %v12735_v61  ;;  %v3176_v11 = vmul.f32 %v8834_v9, %v12736_v29  ;;  %v8875_v5 = vadd.f32 %v2537_v58, %v2401_v35  ;;  %v2869_v61 = vadd.f32 %v2805_v15, %v2733_v10  ;;  %12742 = vst [vmem:[#allocation48_spill] sm:$0xff] %v8883_v8  ;;  %v12745_v35 = vld [vmem:[#allocation31_spill] sm:$0xff] }
 0x286   : > { %v2734_v29 = vadd.f32 %v2670_v44, %v8732_v0  ;;  %v8889_v10 = vrot.slane %v3573_v60, %v12745_v35  ;;  %v12748_v0 = vld [vmem:[#allocation44_spill] sm:$0xff]  ;;  %v2538_v15 = vmul.f32 %v7282_v52, %v8873_v37  ;;  %v12753_v35 = vld [vmem:[#allocation59_spill] sm:$0xff]  ;;  %v12781_v27 = vrot.slane %v8780_v62, 1 }
 0x287   : > { %v3238_v34 = vadd.f32 %v3174_v4, %v12741_v38  ;;  %v3240_v31 = vadd.f32 %v3176_v11, %v3104_v45  ;;  %v8885_v14 = vadd.f32 %v2941_v57, %v2869_v61  ;;  %v12747_v38 = vld [vmem:[#allocation29_spill] sm:$0xff]  ;;  %v12749_v11 = vrot.slane %v8698_v33, 7  ;;  %v12752_v61 = vld [vmem:[#allocation46_spill] sm:$0xff] }
 0x288   : > { %12746 = vst [vmem:[#allocation60_spill] sm:$0xff] %v8889_v10  ;;  %v8892_v4 = vrot.slane %v3573_v60, %v12747_v38  ;;  %v12750_v57 = vrot.slane %v8698_v33, 1  ;;  %v3447_v38 = vmul.f32 %v8883_v8, %v12753_v35  ;;  %v2735_v33 = vadd.f32 %v2671_v2, %v8754_v43 }
 0x289   : > { %12743 = vst [vmem:[#allocation51_spill] sm:$0xff] %v8885_v14  ;;  %v3374_v58 = vadd.f32 %v12744_v22, %v3238_v34  ;;  %v3376_v44 = vadd.f32 %v12748_v0, %v3240_v31  ;;  %v1831_v45 = vsel %vm1803_vm1, %v12749_v11, %v12267_v54  ;;  %v3445_v22 = vmul.f32 %v8883_v8, %v12752_v61  ;;  %v12756_v54 = vld [vmem:[#allocation132_spill] sm:$0xff] }
 0x28a   : > { %v2156_v34 = vsel %vm2128_vm3, %v12750_v57, %v12266_v53  ;;  %v8911_v31 = vsel %vm8820_vm9, %v1831_v45, 0.0  ;;  %v12755_v53 = vld [vmem:[#allocation52_spill] sm:$0xff]  ;;  %v8930_v14 = vadd.f32 %v12756_v54, %v7303_v1 }
 0x28b   : > { %v3510_v60 = vadd.f32 %v3446_v32, %v3374_v58  ;;  %12751 = vst [vmem:[#allocation38_spill] sm:$0xff] %v8911_v31  ;;  %v3512_v0 = vadd.f32 %v3448_v25, %v3376_v44  ;;  %v2402_v11 = vmul.f32 %v7278_v51, %v8911_v31  ;;  %v2806_v57 = vmul.f32 %v7341_v20, %v8911_v31  ;;  %v12754_v58 = vld [vmem:[#allocation45_spill] sm:$0xff]  ;;  %v1121_v25 = vpop.f32.mrb[0].mxu1 }
 0x28c   : > { %v2942_v32 = vmul.f32 %v7344_v21, %v8873_v37  ;;  %v3509_v45 = vadd.f32 %v3445_v22, %v12754_v58  ;;  %v3511_v61 = vadd.f32 %v3447_v38, %v12755_v53  ;;  %12757 = vst [vmem:[#allocation107_spill] sm:$0xff] %v8930_v14  ;;  %v1123_v46 = vpop.f32.mrb[1].mxu1  ;;  %v12273_v2 = vrot.slane %v8930_v14, 7  ;;  %v12765_v58 = vld [vmem:[#allocation115_spill] sm:$0xff] }
 0x28d   : > { %v8924_v40 = vadd.f32 %v8892_v4, %v3510_v60  ;;  %v8933_v44 = vadd.f32 %v8892_v4, %v3512_v0  ;;  %v8935_v28 = vadd.f32 %v2538_v15, %v2402_v11  ;;  %v2870_v31 = vadd.f32 %v2806_v57, %v2734_v29  ;;  %v12758_v60 = vld [vmem:[#allocation114_spill] sm:$0xff]  ;;  %v1125_v38 = vpop.f32.mrb[2].mxu1  ;;  %v12760_v15 = vld [vmem:[#allocation119_spill] sm:$0xff] }
 0x28e   : > { %v8940_v23 = vmul.f32 %v12616_v24, %v12758_v60  ;;  %v8946_v54 = vadd.f32 %v8889_v10, %v3509_v45  ;;  %v8949_v22 = vadd.f32 %v8889_v10, %v3511_v61  ;;  %v8953_v29 = vmul.f32 %v7347_v26, %v12760_v15  ;;  %v1127_v0 = vpop.f32.mrb[3].mxu1  ;;  %v12763_v11 = vld [vmem:[#allocation123_spill] sm:$0xff]  ;;  %v12767_v61 = vld [vmem:[#allocation66_spill] sm:$0xff] }
 0x28f   : > { %v8943_v53 = vmul.f32 0.70710677, %v8924_v40  ;;  %v8956_v46 = vmul.f32 0.70710677, %v8933_v44  ;;  %v8958_v43 = vadd.f32 %v2942_v32, %v2870_v31  ;;  %v8963_v57 = vmul.f32 %v7353_v30, %v12763_v11  ;;  %v12769_v38 = vld [vmem:[#allocation67_spill] sm:$0xff] }
 0x290   : > { %12759 = vst [vmem:[#allocation31_spill] sm:$0xff] %v8940_v23  ;;  %12761 = vst [vmem:[#allocation29_spill] sm:$0xff] %v8953_v29  ;;  %v8967_v45 = vmul.f32 %v7607_v41, %v12765_v58  ;;  %v8971_v25 = vmul.f32 %v12616_v24, %v12767_v61  ;;  %v8976_v31 = vmul.f32 %v7607_v41, %v12769_v38  ;;  %v8980_v0 = vmul.f32 0.70710677, %v8946_v54 }
 0x291   : > { %12762 = vst [vmem:[#allocation44_spill] sm:$0xff] %v8958_v43  ;;  %12764 = vst [vmem:[#allocation46_spill] sm:$0xff] %v8963_v57  ;;  %v3778_v60 = vand.u32 2147483647, %v8943_v53  ;;  %v3780_v32 = vand.u32 2147483647, %v8956_v46  ;;  %v8992_v61 = vmul.f32 %v12616_v24, %v8293_v3 }
 0x292   : > { %12766 = vst [vmem:[#allocation59_spill] sm:$0xff] %v8967_v45  ;;  %12768 = vst [vmem:[#allocation45_spill] sm:$0xff] %v8971_v25  ;;  %v12771_v58 = vrot.slane %v8780_v62, 7  ;;  %v8995_v29 = vmul.f32 0.70710677, %v8949_v22  ;;  %vm5058_vm12 = vcmp.lt.f32.partialorder %v8943_v53, 0.0 }
 0x293   : > { %12770 = vst [vmem:[#allocation52_spill] sm:$0xff] %v8976_v31  ;;  %12773 = vst [vmem:[#allocation114_spill] sm:$0xff] %v8992_v61  ;;  %v3842_v25 = vmul.f32 0.3275911, %v3778_v60  ;;  %v4674_v38 = vmul.f32 %v3778_v60, %v3778_v60  ;;  %v12774_v31 = vld [vmem:[#allocation131_spill] sm:$0xff]  ;;  %v4676_v15 = vmul.f32 %v3780_v32, %v3780_v32  ;;  %v12280_v60 = vrot.slane %v8930_v14, 1 }
 0x294   : > { %v8988_v43 = vsel %vm1803_vm1, %v12771_v58, %v12273_v2  ;;  %v8999_v57 = vmul.f32 %v7347_v26, %v12774_v31  ;;  %v3844_v23 = vmul.f32 0.3275911, %v3780_v32  ;;  %v3777_v45 = vand.u32 2147483647, %v8980_v0 }
 0x295   : > { %12772 = vst [vmem:[#allocation132_spill] sm:$0xff] %v8988_v43  ;;  %v9004_v58 = vmul.f32 %v7607_v41, %v8315_v42  ;;  %v3906_v2 = vadd.f32 1.0, %v3842_v25  ;;  %v3779_v3 = vand.u32 2147483647, %v8995_v29  ;;  %v4738_v11 = vsub.f32 0.0, %v4674_v38  ;;  %v12778_v25 = vld [vmem:[#allocation135_spill] sm:$0xff] }
 0x296   : > { %12775 = vst [vmem:[#allocation115_spill] sm:$0xff] %v8999_v57  ;;  %v3908_v61 = vadd.f32 1.0, %v3844_v23  ;;  %v3841_v39 = vmul.f32 0.3275911, %v3777_v45  ;;  %v4673_v49 = vmul.f32 %v3777_v45, %v3777_v45  ;;  %v4740_v31 = vsub.f32 0.0, %v4676_v15 }
 0x297   : > { %12776 = vst [vmem:[#allocation66_spill] sm:$0xff] %v9004_v58  ;;  %6289 = vrcp.f32 %v3906_v2  ;;  %v9010_v32 = vsel %vm8824_vm10, %v2156_v34, 0.0  ;;  %v3843_v57 = vmul.f32 0.3275911, %v3779_v3  ;;  %v4675_v42 = vmul.f32 %v3779_v3, %v3779_v3 }
 0x298   : > { %12777 = vst [vmem:[#allocation67_spill] sm:$0xff] %v9010_v32  ;;  %6291 = vrcp.f32 %v3908_v61  ;;  %v3905_v10 = vadd.f32 1.0, %v3841_v39  ;;  %v4737_v58 = vsub.f32 0.0, %v4673_v49  ;;  %v9014_v8 = vmul.f32 %v7353_v30, %v12778_v25 }
 0x299   : > { %v9018_v23 = vmul.f32 %v12616_v24, %v8359_v56  ;;  %v3907_v45 = vadd.f32 1.0, %v3843_v57  ;;  %v9026_v34 = vsel %vm2128_vm3, %v12781_v27, %v12280_v60  ;;  %v4803_v39 = vmul.f32 1.442695, %v4738_v11 }
 0x29a   : > { %12779 = vst [vmem:[#allocation194_spill] sm:$0xff] %v9014_v8  ;;  %12782 = vst [vmem:[#allocation196_spill] sm:$0xff] %v9026_v34  ;;  %v2672_v49 = vmul.f32 %v7299_v63, %v9010_v32  ;;  %v2403_v15 = vmul.f32 %v7268_v47, %v8988_v43  ;;  %v2539_v56 = vmul.f32 %v7272_v48, %v8930_v14  ;;  %v4807_v57 = vmul.f32 1.442695, %v4740_v31 }
 0x29b   : > { %12780 = vst [vmem:[#allocation195_spill] sm:$0xff] %v9018_v23  ;;  %v9036_v2 = vmul.f32 %v7607_v41, %v8397_v18  ;;  %6293 = vrcp.f32 %v3905_v10  ;;  %v2807_v61 = vmul.f32 %v7338_v19, %v8988_v43  ;;  %v4739_v11 = vsub.f32 0.0, %v4675_v42  ;;  %v12784_v18 = vld [vmem:[#allocation133_spill] sm:$0xff] }
 0x29c   : > { %6295 = vrcp.f32 %v3907_v45  ;;  %v4801_v38 = vmul.f32 1.442695, %v4737_v58  ;;  %v9040_v3 = vadd.f32 %v2539_v56, %v2403_v15  ;;  %v9043_v27 = vmul.f32 0.5, %v8924_v40  ;;  %v12786_v58 = vld [vmem:[#allocation78_spill] sm:$0xff]  ;;  %v9063_v15 = vpop.f32.mrb[49].mxu0 }
 0x29d   : > { %12783 = vst [vmem:[#allocation197_spill] sm:$0xff] %v9036_v2  ;;  %v2871_v60 = vadd.f32 %v2807_v61, %v2735_v33  ;;  %v2943_v32 = vmul.f32 %v7315_v12, %v8930_v14  ;;  %v9049_v23 = vadd.f32 %v12784_v18, %v7318_v13  ;;  %v9052_v10 = vmul.f32 0.5, %v8933_v44  ;;  %12789 = vst [vmem:[#allocation199_spill] sm:$0xff] %v9063_v15 }
 0x29e   : > { %6297 = vpow2.f32 %v4803_v39  ;;  %v2736_v31 = vadd.f32 %v2672_v49, %v8797_v6  ;;  %v9057_v42 = vadd.f32 %v12786_v58, %v7303_v1  ;;  %v4805_v56 = vmul.f32 1.442695, %v4739_v11 }
 0x29f   : > { %12785 = vst [vmem:[#allocation133_spill] sm:$0xff] %v9049_v23  ;;  %6299 = vpow2.f32 %v4807_v57  ;;  %v9059_v40 = vadd.f32 %v2943_v32, %v2871_v60  ;;  %v12283_v33 = vrot.slane %v9049_v23, 7  ;;  %v12284_v45 = vrot.slane %v9049_v23, 1 }
 0x2a0   : > { %12787 = vst [vmem:[#allocation78_spill] sm:$0xff] %v9057_v42  ;;  %6301 = vpow2.f32 %v4801_v38  ;;  %v2673_v44 = vmul.f32 %v7294_v59, %v9026_v34  ;;  %v1251_v6 = vadd.s32 192, %v7251_v36  ;;  %v12790_v60 = vrot.slane %v8873_v37, 7 }
 0x2a1   : > { %12788 = vst [vmem:[#allocation198_spill] sm:$0xff] %v9059_v40  ;;  %v9068_v39 = vpop.eup %6289  ;;  %v12792_v49 = vrot.slane %v8873_v37, 1  ;;  %v12794_v11 = vrot.slane %v9057_v42, 7  ;;  %v12795_v40 = vrot.slane %v8930_v14, 7  ;;  %6303 = vpow2.f32 %v4805_v56 }
 0x2a2   : > { %v9076_v32 = vsel %vm1803_vm1, %v12790_v60, %v12283_v33  ;;  %v9088_v38 = vpop.eup %6291  ;;  %v4098_v18 = vmul.f32 1.0614054, %v9068_v39  ;;  %v2540_v60 = vmul.f32 %v7282_v52, %v9049_v23  ;;  %v1435_v61 = vand.u32 15, %v1251_v6 }
 0x2a3   : > { %12791 = vst [vmem:[#allocation200_spill] sm:$0xff] %v9076_v32  ;;  %v9084_v57 = vsel %vm2128_vm3, %v12792_v49, %v12284_v45  ;;  %v2404_v58 = vmul.f32 %v7278_v51, %v9076_v32  ;;  %v2808_v33 = vmul.f32 %v7341_v20, %v9076_v32  ;;  %v4100_v49 = vmul.f32 1.0614054, %v9088_v38 }
 0x2a4   : > { %12793 = vst [vmem:[#allocation201_spill] sm:$0xff] %v9084_v57  ;;  %v9099_v45 = vadd.s32 184, %v7251_v36  ;;  %v1826_v43 = vsel %vm1803_vm1, %v12795_v40, %v12794_v11  ;;  %v4162_v2 = vadd.f32 -1.4531521, %v4098_v18  ;;  %v2944_v32 = vmul.f32 %v7344_v21, %v9049_v23 }
 0x2a5   : > { %v9107_v8 = vadd.f32 %v2540_v60, %v2404_v58  ;;  %v2872_v25 = vadd.f32 %v2808_v33, %v2736_v31  ;;  %v9111_v34 = vpop.eup %6293  ;;  %v4164_v37 = vadd.f32 -1.4531521, %v4100_v49  ;;  %vm9113_vm11 = vcmp.gt.s32.totalorder %v1435_v61, 0 }
 0x2a6   : > { %v12799_v62 = vrot.slane %v9057_v42, 1  ;;  %v12800_v15 = vrot.slane %v8930_v14, 1  ;;  %v9125_v31 = vpop.eup %6295  ;;  %v4226_v33 = vmul.f32 %v9068_v39, %v4162_v2  ;;  %v4097_v11 = vmul.f32 1.0614054, %v9111_v34 }
 0x2a7   : > { %12796 = vst [vmem:[#allocation202_spill] sm:$0xff] %v9107_v8  ;;  %v9129_v18 = vadd.f32 %v2944_v32, %v2872_v25  ;;  %v9133_v56 = vsel %vm9113_vm11, %v1826_v43, 0.0  ;;  %v4228_v61 = vmul.f32 %v9088_v38, %v4164_v37  ;;  %v4099_v58 = vmul.f32 1.0614054, %v9125_v31  ;;  %v12804_v25 = vld [vmem:[#allocation47_spill] sm:$0xff] }
 0x2a8   : > { %v9123_v40 = vsel %vm2128_vm3, %v12800_v15, %v12799_v62  ;;  %12802 = vst [vmem:[#allocation204_spill] sm:$0xff] %v9133_v56  ;;  %v2405_v62 = vmul.f32 %v7268_v47, %v9133_v56  ;;  %v2541_v15 = vmul.f32 %v7272_v48, %v9057_v42  ;;  %v6298_v60 = vpop.eup %6297  ;;  %v4290_v2 = vadd.f32 1.4214138, %v4226_v33 }
 0x2a9   : > { %12801 = vst [vmem:[#allocation203_spill] sm:$0xff] %v9129_v18  ;;  %v4161_v49 = vadd.f32 -1.4531521, %v4097_v11  ;;  %v2737_v32 = vadd.f32 %v2673_v44, %v8875_v5  ;;  %v6300_v18 = vpop.eup %6299  ;;  %v4292_v43 = vadd.f32 1.4214138, %v4228_v61  ;;  %v2809_v37 = vmul.f32 %v7338_v19, %v9133_v56 }
 0x2aa   : > { %v4163_v14 = vadd.f32 -1.4531521, %v4099_v58  ;;  %v9143_v41 = vadd.f32 %v2541_v15, %v2405_v62  ;;  %v9147_v8 = vpop.eup %6301  ;;  %v4354_v47 = vmul.f32 %v9068_v39, %v4290_v2  ;;  %v2674_v33 = vmul.f32 %v7299_v63, %v9084_v57  ;;  %v12805_v2 = vld [vmem:[#allocation121_spill] sm:$0xff] }
 0x2ab   : > { %v4225_v48 = vmul.f32 %v9111_v34, %v4161_v49  ;;  %v2945_v5 = vmul.f32 %v7315_v12, %v9057_v42  ;;  %v4356_v44 = vmul.f32 %v9088_v38, %v4292_v43  ;;  %v2873_v61 = vadd.f32 %v2809_v37, %v2737_v32  ;;  %v12806_v49 = vld [vmem:[#allocation58_spill] sm:$0xff]  ;;  %v12808_v12 = vld [vmem:[#allocation55_spill] sm:$0xff]  ;;  %v12809_v37 = vld [vmem:[#allocation68_spill] sm:$0xff] }
 0x2ac   : > { %12803 = vst [vmem:[#allocation205_spill] sm:$0xff] %v9143_v41  ;;  %v4227_v11 = vmul.f32 %v9125_v31, %v4163_v14  ;;  %v3044_v58 = vmul.f32 %v7353_v30, %v12738_v16  ;;  %v4418_v62 = vadd.f32 -0.28449672, %v4354_v47  ;;  %v3106_v56 = vadd.f32 %v12805_v2, %v12804_v25  ;;  %v6304_v16 = vpop.eup %6303 }
 0x2ad   : > { %v4289_v15 = vadd.f32 1.4214138, %v4225_v48  ;;  %v3178_v41 = vmul.f32 %v8834_v9, %v12806_v49  ;;  %v4420_v57 = vadd.f32 -0.28449672, %v4356_v44  ;;  %v9163_v50 = vadd.f32 %v2945_v5, %v2873_v61  ;;  %v12810_v49 = vld [vmem:[#allocation70_spill] sm:$0xff] }
 0x2ae   : > { %v4291_v19 = vadd.f32 1.4214138, %v4227_v11  ;;  %v3108_v43 = vadd.f32 %v3044_v58, %v12808_v12  ;;  %v4482_v14 = vmul.f32 %v9068_v39, %v4418_v62  ;;  %v3180_v47 = vmul.f32 %v8834_v9, %v12809_v37  ;;  %v12811_v5 = vld [vmem:[#allocation82_spill] sm:$0xff] }
 0x2af   : > { %12807 = vst [vmem:[#allocation47_spill] sm:$0xff] %v9163_v50  ;;  %v4353_v32 = vmul.f32 %v9111_v34, %v4289_v15  ;;  %v3242_v48 = vadd.f32 %v3178_v41, %v3106_v56  ;;  %v4484_v25 = vmul.f32 %v9088_v38, %v4420_v57  ;;  %v3450_v44 = vmul.f32 %v8828_v55, %v12810_v49  ;;  %v12812_v62 = vld [vmem:[#allocation54_spill] sm:$0xff] }
 0x2b0   : > { %v4355_v2 = vmul.f32 %v9125_v31, %v4291_v19  ;;  %v3452_v11 = vmul.f32 %v8828_v55, %v12811_v5  ;;  %v4546_v12 = vadd.f32 0.2548296, %v4482_v14  ;;  %v3244_v58 = vadd.f32 %v3180_v47, %v3108_v43  ;;  %v12814_v14 = vld [vmem:[#allocation61_spill] sm:$0xff] }
 0x2b1   : > { %v4417_v61 = vadd.f32 -0.28449672, %v4353_v32  ;;  %v3378_v15 = vadd.f32 %v12812_v62, %v3242_v48  ;;  %v4548_v50 = vadd.f32 0.2548296, %v4484_v25  ;;  %v9180_v57 = vadd.f32 %v8618_v17, %v7318_v13 }
 0x2b2   : > { %v4419_v41 = vadd.f32 -0.28449672, %v4355_v2  ;;  %v9183_v19 = vadd.f32 %v2674_v33, %v8935_v28  ;;  %v4610_v56 = vmul.f32 %v9068_v39, %v4546_v12  ;;  %v3380_v32 = vadd.f32 %v12814_v14, %v3244_v58  ;;  %v9195_v39 = vpop.f32.mrb[50].mxu0 }
 0x2b3   : > { %12813 = vst [vmem:[#allocation121_spill] sm:$0xff] %v9180_v57  ;;  %v4481_v37 = vmul.f32 %v9111_v34, %v4417_v61  ;;  %v3514_v43 = vadd.f32 %v3450_v44, %v3378_v15  ;;  %v4612_v47 = vmul.f32 %v9088_v38, %v4548_v50  ;;  %v12306_v25 = vrot.slane %v9180_v57, 7 }
 0x2b4   : > { %v4483_v48 = vmul.f32 %v9125_v31, %v4419_v41  ;;  %v12305_v2 = vrot.slane %v9180_v57, 1  ;;  %v4930_v17 = vmul.f32 %v6298_v60, %v4610_v56  ;;  %v3516_v62 = vadd.f32 %v3452_v11, %v3380_v32  ;;  %v9209_v11 = vpop.f32.mrb[51].mxu0 }
 0x2b5   : > { %v4545_v49 = vadd.f32 0.2548296, %v4481_v37  ;;  %v9193_v28 = vadd.f32 %v8892_v4, %v3514_v43  ;;  %v4932_v33 = vmul.f32 %v6300_v18, %v4612_v47  ;;  %v12815_v50 = vrot.slane %v9049_v23, 7  ;;  %12817 = vst [vmem:[#allocation58_spill] sm:$0xff] %v9209_v11  ;;  %v9216_v41 = vpop.f32.mrb[52].mxu0 }
 0x2b6   : > { %v4547_v12 = vadd.f32 0.2548296, %v4483_v48  ;;  %v12816_v60 = vrot.slane %v9049_v23, 1  ;;  %v4994_v61 = vsub.f32 1.0, %v4930_v17  ;;  %v3649_v18 = vmul.f32 0.5, %v8946_v54  ;;  %12818 = vst [vmem:[#allocation55_spill] sm:$0xff] %v9216_v41 }
 0x2b7   : > { %v1827_v38 = vsel %vm1803_vm1, %v12815_v50, %v12306_v25  ;;  %v4609_v58 = vmul.f32 %v9111_v34, %v4545_v49  ;;  %v9214_v15 = vadd.f32 %v8892_v4, %v3516_v62  ;;  %v4996_v56 = vsub.f32 1.0, %v4932_v33 }
 0x2b8   : > { %v2152_v44 = vsel %vm2128_vm3, %v12816_v60, %v12305_v2  ;;  %vm5060_vm13 = vcmp.lt.f32.partialorder %v8956_v46, 0.0  ;;  %v4611_v37 = vmul.f32 %v9125_v31, %v4547_v12  ;;  %v9221_v14 = vmul.f32 0.70710677, %v9193_v28 }
 0x2b9   : > { %v5122_v32 = vsub.f32 0.0, %v4994_v61  ;;  %v4929_v43 = vmul.f32 %v9147_v8, %v4609_v58  ;;  %vm5057_vm14 = vcmp.lt.f32.partialorder %v8980_v0, 0.0  ;;  %v9226_v54 = vmul.f32 0.70710677, %v9214_v15 }
 0x2ba   : > { %v5124_v34 = vsub.f32 0.0, %v4996_v56  ;;  %v4931_v47 = vmul.f32 %v6304_v16, %v4611_v37  ;;  %v12819_v48 = vand.u32 15, %v9099_v45  ;;  %v3782_v46 = vand.u32 2147483647, %v9221_v14 }
 0x2bb   : > { %v5186_v31 = vsel %vm5058_vm12, %v5122_v32, %v4994_v61  ;;  %v4993_v49 = vsub.f32 1.0, %v4929_v43  ;;  %vm5059_vm0 = vcmp.lt.f32.partialorder %v8995_v29, 0.0  ;;  %v3784_v8 = vand.u32 2147483647, %v9226_v54 }
 0x2bc   : > { %vm9230_vm15 = vcmp.lt.s32.totalorder %v12819_v48, 15  ;;  %v5188_v62 = vsel %vm5060_vm13, %v5124_v34, %v4996_v56  ;;  %v5250_v33 = vadd.f32 1.0, %v5186_v31  ;;  %v4995_v12 = vsub.f32 1.0, %v4931_v47 }
 0x2bd   : > { %v3846_v16 = vmul.f32 0.3275911, %v3782_v46  ;;  %v5252_v50 = vadd.f32 1.0, %v5188_v62  ;;  %v5121_v45 = vsub.f32 0.0, %v4993_v49  ;;  %v9242_v60 = vsel %vm9230_vm15, %v9123_v40, 0.0 }
 0x2be   : > { %12822 = vst [vmem:[#allocation68_spill] sm:$0xff] %v9242_v60  ;;  %v3848_v58 = vmul.f32 0.3275911, %v3784_v8  ;;  %v5123_v37 = vsub.f32 0.0, %v4995_v12  ;;  %v4678_v61 = vmul.f32 %v3782_v46, %v3782_v46  ;;  %v9246_v32 = vsel %vm9113_vm11, %v1827_v38, 0.0  ;;  %v12824_v38 = vld [vmem:[#allocation80_spill] sm:$0xff] }
 0x2bf   : > { %v3910_v53 = vadd.f32 1.0, %v3846_v16  ;;  %12823 = vst [vmem:[#allocation70_spill] sm:$0xff] %v9246_v32  ;;  %v5314_v56 = vmul.f32 %v5250_v33, %v9043_v27  ;;  %v5316_v43 = vmul.f32 %v5252_v50, %v9052_v10  ;;  %v5185_v34 = vsel %vm5057_vm14, %v5121_v45, %v4993_v49 }
 0x2c0   : > { %v3912_v47 = vadd.f32 1.0, %v3848_v58  ;;  %v5187_v40 = vsel %vm5059_vm0, %v5123_v37, %v4995_v12  ;;  %v5249_v48 = vadd.f32 1.0, %v5185_v34  ;;  %v4680_v31 = vmul.f32 %v3784_v8, %v3784_v8  ;;  %v12827_v12 = vld [vmem:[#allocation144_spill] sm:$0xff]  ;;  %v12831_v34 = vld [vmem:[#allocation57_spill] sm:$0xff] }
 0x2c1   : > { %6305 = vrcp.f32 %v3910_v53  ;;  %v5378_v62 = vpack.c.bf16 %v5316_v43, %v5314_v56  ;;  %v3651_v46 = vmul.f32 0.5, %v8949_v22  ;;  %v5251_v6 = vadd.f32 1.0, %v5187_v40  ;;  %v12830_v56 = vld [vmem:[#allocation120_spill] sm:$0xff] }
 0x2c2   : > { %6307 = vrcp.f32 %v3912_v47  ;;  %v9257_v27 = vmul.f32 %v12616_v24, %v12824_v38  ;;  %v2675_v0 = vmul.f32 %v7294_v59, %v9242_v60  ;;  %v9263_v10 = vsel %vm9230_vm15, %v2152_v44, 0.0  ;;  %v12832_v47 = vld [vmem:[#allocation40_spill] sm:$0xff] }
 0x2c3   : > { %12826 = vst [vmem:[#allocation54_spill] sm:$0xff] %v9263_v10  ;;  %v2406_v29 = vmul.f32 %v7278_v51, %v9246_v32  ;;  %5576 = vmatprep.mubr.bf16.mxu1 %v5378_v62  ;;  %v5313_v49 = vmul.f32 %v5249_v48, %v3649_v18  ;;  %v5315_v8 = vmul.f32 %v5251_v6, %v3651_v46  ;;  %v4742_v22 = vsub.f32 0.0, %v4678_v61  ;;  %v12829_v61 = vld [vmem:[#allocation43_spill] sm:$0xff]  ;;  %v12834_v46 = vld [vmem:[#allocation50_spill] sm:$0xff] }
 0x2c4   : > { %12825 = vst [vmem:[#allocation82_spill] sm:$0xff] %v9257_v27  ;;  %v2542_v33 = vmul.f32 %v7282_v52, %v9180_v57  ;;  %v9271_v16 = vmul.f32 %v7347_v26, %v12827_v12  ;;  %v4744_v50 = vsub.f32 0.0, %v4680_v31  ;;  %v2676_v17 = vmul.f32 %v7299_v63, %v9263_v10  ;;  %v12833_v48 = vld [vmem:[#allocation63_spill] sm:$0xff] }
 0x2c5   : > { %v2810_v44 = vmul.f32 %v7341_v20, %v9246_v32  ;;  %v5377_v45 = vpack.c.bf16 %v5315_v8, %v5313_v49  ;;  %v2946_v18 = vmul.f32 %v7344_v21, %v9180_v57  ;;  %v3043_v37 = vmul.f32 %v7347_v26, %v12753_v35  ;;  %v12837_v49 = vld [vmem:[#allocation39_spill] sm:$0xff] }
 0x2c6   : > { %12828 = vst [vmem:[#allocation61_spill] sm:$0xff] %v9271_v16  ;;  %v9277_v58 = vadd.f32 %v2542_v33, %v2406_v29  ;;  %v3105_v43 = vadd.f32 %v12830_v56, %v12829_v61  ;;  %v3177_v40 = vmul.f32 %v12832_v47, %v12831_v34  ;;  %v3179_v31 = vmul.f32 %v12832_v47, %v12833_v48  ;;  %v12839_v33 = vld [vmem:[#allocation202_spill] sm:$0xff]  ;;  %v12841_v61 = vld [vmem:[#allocation48_spill] sm:$0xff]  ;;  %v12860_v16 = vld [vmem:[#allocation49_spill] sm:$0xff] }
 0x2c7   : > { %v2874_v53 = vadd.f32 %v2810_v44, %v9183_v19  ;;  %5577 = vmatmul.mubr.bf16.vlgmr.msra.gmra.mrb[4].mxu1 %v5377_v45  ;;  %v4811_v62 = vmul.f32 1.442695, %v4742_v22  ;;  %v3107_v6 = vadd.f32 %v3043_v37, %v12834_v46  ;;  %v9293_v38 = vadd.f32 %v8818_v7, %v7303_v1  ;;  %v12840_v22 = vld [vmem:[#allocation77_spill] sm:$0xff] }
 0x2c8   : > { %v2739_v35 = vadd.f32 %v2675_v0, %v9040_v3  ;;  %v3241_v29 = vadd.f32 %v3177_v40, %v3105_v43  ;;  %v9300_v8 = vadd.f32 %v12837_v49, %v7318_v13  ;;  %v9303_v44 = vadd.f32 %v2676_v17, %v12839_v33  ;;  %v12842_v0 = vld [vmem:[#allocation53_spill] sm:$0xff] }
 0x2c9   : > { %12835 = vst [vmem:[#allocation80_spill] sm:$0xff] %v9293_v38  ;;  %v9296_v19 = vadd.f32 %v2946_v18, %v2874_v53  ;;  %v3243_v45 = vadd.f32 %v3179_v31, %v3107_v6  ;;  %v3451_v37 = vmul.f32 %v12841_v61, %v12840_v22  ;;  %v12307_v56 = vrot.slane %v9293_v38, 7  ;;  %v12843_v53 = vld [vmem:[#allocation64_spill] sm:$0xff] }
 0x2ca   : > { %12838 = vst [vmem:[#allocation120_spill] sm:$0xff] %v9300_v8  ;;  %v12311_v7 = vrot.slane %v9293_v38, 1  ;;  %v4815_v3 = vmul.f32 1.442695, %v4744_v50  ;;  %v3377_v18 = vadd.f32 %v12842_v0, %v3241_v29  ;;  %v3449_v43 = vmul.f32 %v12841_v61, %v12843_v53  ;;  %v12844_v31 = vld [vmem:[#allocation56_spill] sm:$0xff] }
 0x2cb   : > { %12836 = vst [vmem:[#allocation43_spill] sm:$0xff] %v9296_v19  ;;  %v9309_v34 = vpop.eup %6305  ;;  %v3379_v46 = vadd.f32 %v12844_v31, %v3243_v45  ;;  %v12845_v6 = vrot.slane %v9057_v42, 7  ;;  %v12847_v29 = vrot.slane %v9057_v42, 1  ;;  %v12849_v45 = vld [vmem:[#allocation32_spill] sm:$0xff]  ;;  %v12850_v31 = vld [vmem:[#allocation33_spill] sm:$0xff]  ;;  %v12852_v19 = vld [vmem:[#allocation35_spill] sm:$0xff]  ;;  %6309 = vpow2.f32 %v4811_v62 }
 0x2cc   : > { %v9315_v17 = vpop.eup %6307  ;;  %v4102_v48 = vmul.f32 1.0614054, %v9309_v34  ;;  %v3513_v0 = vadd.f32 %v3449_v43, %v3377_v18  ;;  %v2543_v2 = vmul.f32 %v12850_v31, %v9293_v38  ;;  %v2947_v32 = vmul.f32 %v12852_v19, %v9293_v38  ;;  %v9405_v42 = vpop.f32.mrb[53].mxu0 }
 0x2cd   : > { %v9325_v50 = vsel %vm1803_vm1, %v12845_v6, %v12307_v56  ;;  %v9333_v49 = vsel %vm2128_vm3, %v12847_v29, %v12311_v7  ;;  %v4104_v33 = vmul.f32 1.0614054, %v9315_v17  ;;  %v3515_v6 = vadd.f32 %v3451_v37, %v3379_v46  ;;  %v12851_v56 = vld [vmem:[#allocation36_spill] sm:$0xff]  ;;  %12871 = vst [vmem:[#allocation56_spill] sm:$0xff] %v9405_v42  ;;  %v12886_v42 = vld [vmem:[#allocation81_spill] sm:$0xff] }
 0x2ce   : > { %12846 = vst [vmem:[#allocation57_spill] sm:$0xff] %v9325_v50  ;;  %12848 = vst [vmem:[#allocation40_spill] sm:$0xff] %v9333_v49  ;;  %v2407_v53 = vmul.f32 %v12849_v45, %v9325_v50  ;;  %v4166_v25 = vadd.f32 -1.4531521, %v4102_v48  ;;  %v2811_v40 = vmul.f32 %v12851_v56, %v9325_v50  ;;  %v12853_v29 = vld [vmem:[#allocation60_spill] sm:$0xff]  ;;  %v12854_v18 = vrot.slane %v9300_v8, 7 }
 0x2cf   : > { %v4168_v60 = vadd.f32 -1.4531521, %v4104_v33  ;;  %v9345_v7 = vadd.f32 %v12853_v29, %v3513_v0  ;;  %v12855_v43 = vrot.slane %v9180_v57, 7  ;;  %v9359_v46 = vadd.f32 %v12853_v29, %v3515_v6  ;;  %v12857_v0 = vld [vmem:[#allocation147_spill] sm:$0xff] }
 0x2d0   : > { %v9347_v10 = vadd.f32 %v2543_v2, %v2407_v53  ;;  %v4230_v37 = vmul.f32 %v9309_v34, %v4166_v25  ;;  %v2875_v50 = vadd.f32 %v2811_v40, %v2739_v35  ;;  %v9364_v2 = vmul.f32 %v7353_v30, %v12857_v0  ;;  %v12859_v53 = vld [vmem:[#allocation142_spill] sm:$0xff] }
 0x2d1   : > { %v9355_v48 = vsel %vm1803_vm1, %v12855_v43, %v12854_v18  ;;  %v9368_v12 = vmul.f32 %v12860_v16, %v12859_v53  ;;  %v4232_v27 = vmul.f32 %v9315_v17, %v4168_v60  ;;  %v9372_v18 = vmul.f32 0.70710677, %v9345_v7 }
 0x2d2   : > { %12856 = vst [vmem:[#allocation63_spill] sm:$0xff] %v9355_v48  ;;  %12858 = vst [vmem:[#allocation50_spill] sm:$0xff] %v9364_v2  ;;  %v4294_v25 = vadd.f32 1.4214138, %v4230_v37  ;;  %v9375_v6 = vmul.f32 0.70710677, %v9359_v46  ;;  %v9377_v35 = vadd.f32 %v2947_v32, %v2875_v50  ;;  %v2408_v40 = vmul.f32 %v7278_v51, %v9355_v48 }
 0x2d3   : > { %12861 = vst [vmem:[#allocation39_spill] sm:$0xff] %v9368_v12  ;;  %v4296_v43 = vadd.f32 1.4214138, %v4232_v27  ;;  %v3781_v33 = vand.u32 2147483647, %v9372_v18  ;;  %v12863_v53 = vrot.slane %v9300_v8, 1  ;;  %6311 = vpow2.f32 %v4815_v3 }
 0x2d4   : > { %12862 = vst [vmem:[#allocation202_spill] sm:$0xff] %v9377_v35  ;;  %v12864_v60 = vrot.slane %v9180_v57, 1  ;;  %v4358_v37 = vmul.f32 %v9309_v34, %v4294_v25  ;;  %v3783_v32 = vand.u32 2147483647, %v9375_v6  ;;  %v2544_v50 = vmul.f32 %v7282_v52, %v9300_v8  ;;  %v12866_v27 = vld [vmem:[#allocation150_spill] sm:$0xff]  ;;  %v12868_v57 = vld [vmem:[#allocation151_spill] sm:$0xff] }
 0x2d5   : > { %v9396_v62 = vmul.f32 %v12616_v24, %v12866_v27  ;;  %v4360_v35 = vmul.f32 %v9315_v17, %v4296_v43  ;;  %v3845_v12 = vmul.f32 0.3275911, %v3781_v33  ;;  %v4677_v0 = vmul.f32 %v3781_v33, %v3781_v33 }
 0x2d6   : > { %v9388_v2 = vsel %vm2128_vm3, %v12864_v60, %v12863_v53  ;;  %v9401_v53 = vmul.f32 %v12860_v16, %v12868_v57  ;;  %v4422_v60 = vadd.f32 -0.28449672, %v4358_v37  ;;  %v3847_v25 = vmul.f32 0.3275911, %v3783_v32 }
 0x2d7   : > { %12865 = vst [vmem:[#allocation77_spill] sm:$0xff] %v9388_v2  ;;  %12867 = vst [vmem:[#allocation48_spill] sm:$0xff] %v9396_v62  ;;  %v9403_v3 = vadd.f32 %v2544_v50, %v2408_v40  ;;  %v4424_v23 = vadd.f32 -0.28449672, %v4360_v35  ;;  %v3909_v41 = vadd.f32 1.0, %v3845_v12  ;;  %v4679_v11 = vmul.f32 %v3783_v32, %v3783_v32  ;;  %v12872_v12 = vld [vmem:[#allocation90_spill] sm:$0xff] }
 0x2d8   : > { %12869 = vst [vmem:[#allocation53_spill] sm:$0xff] %v9401_v53  ;;  %v2812_v27 = vmul.f32 %v7341_v20, %v9355_v48  ;;  %v4486_v43 = vmul.f32 %v9309_v34, %v4422_v60  ;;  %v3911_v62 = vadd.f32 1.0, %v3847_v25  ;;  %v4741_v33 = vsub.f32 0.0, %v4677_v0 }
 0x2d9   : > { %12870 = vst [vmem:[#allocation64_spill] sm:$0xff] %v9403_v3  ;;  %v2677_v57 = vmul.f32 %v7294_v59, %v9333_v49  ;;  %v4488_v37 = vmul.f32 %v9315_v17, %v4424_v23  ;;  %6313 = vrcp.f32 %v3909_v41  ;;  %v2948_v35 = vmul.f32 %v7344_v21, %v9300_v8 }
 0x2da   : > { %v2876_v40 = vadd.f32 %v2812_v27, %v9303_v44  ;;  %v9418_v32 = vmul.f32 %v12616_v24, %v12872_v12  ;;  %v3654_v50 = vmul.f32 0.5, %v9193_v28  ;;  %v4550_v60 = vadd.f32 0.2548296, %v4486_v43  ;;  %v12875_v44 = vld [vmem:[#allocation192_spill] sm:$0xff]  ;;  %v6310_v12 = vpop.eup %6309 }
 0x2db   : > { %6315 = vrcp.f32 %v3911_v62  ;;  %v3656_v0 = vmul.f32 0.5, %v9214_v15  ;;  %v4552_v25 = vadd.f32 0.2548296, %v4488_v37  ;;  %v4743_v48 = vsub.f32 0.0, %v4679_v11  ;;  %v12877_v62 = vld [vmem:[#allocation205_spill] sm:$0xff] }
 0x2dc   : > { %12873 = vst [vmem:[#allocation142_spill] sm:$0xff] %v9418_v32  ;;  %v9422_v53 = vadd.f32 %v2948_v35, %v2876_v40  ;;  %v4614_v23 = vmul.f32 %v9309_v34, %v4550_v60  ;;  %vm5062_vm2 = vcmp.lt.f32.partialorder %v9221_v14, 0.0  ;;  %v4809_v41 = vmul.f32 1.442695, %v4741_v33  ;;  %v12885_v32 = vld [vmem:[#allocation75_spill] sm:$0xff] }
 0x2dd   : > { %v9428_v27 = vadd.f32 %v12875_v44, %v7303_v1  ;;  %v4616_v28 = vmul.f32 %v9315_v17, %v4552_v25  ;;  %vm5064_vm4 = vcmp.lt.f32.partialorder %v9226_v54, 0.0  ;;  %v1253_v15 = vadd.s32 208, %v7251_v36  ;;  %v6312_v43 = vpop.eup %6311 }
 0x2de   : > { %12874 = vst [vmem:[#allocation150_spill] sm:$0xff] %v9422_v53  ;;  %v2741_v11 = vadd.f32 %v2677_v57, %v12877_v62  ;;  %v4934_v37 = vmul.f32 %v6310_v12, %v4614_v23  ;;  %v2678_v34 = vmul.f32 %v7299_v63, %v9388_v2  ;;  %v4813_v60 = vmul.f32 1.442695, %v4743_v48 }
 0x2df   : > { %12876 = vst [vmem:[#allocation151_spill] sm:$0xff] %v9428_v27  ;;  %v12320_v33 = vrot.slane %v9428_v27, 7  ;;  %v12319_v40 = vrot.slane %v9428_v27, 1  ;;  %v4936_v35 = vmul.f32 %v6312_v43, %v4616_v28  ;;  %v1449_v44 = vand.u32 15, %v1253_v15 }
 0x2e0   : > { %v3048_v17 = vmul.f32 %v7353_v30, %v12811_v5  ;;  %v4998_v25 = vsub.f32 1.0, %v4934_v37  ;;  %6317 = vpow2.f32 %v4809_v41  ;;  %v12878_v57 = vrot.slane %v9293_v38, 7 }
 0x2e1   : > { %v12879_v12 = vrot.slane %v9293_v38, 1  ;;  %v5000_v28 = vsub.f32 1.0, %v4936_v35  ;;  %v9455_v5 = vadd.s32 200, %v7251_v36  ;;  %vm9457_vm5 = vcmp.gt.s32.totalorder %v1449_v44, 0  ;;  %v12884_v35 = vld [vmem:[#allocation153_spill] sm:$0xff] }
 0x2e2   : > { %v1822_v23 = vsel %vm1803_vm1, %v12878_v57, %v12320_v33  ;;  %v2545_v15 = vmul.f32 %v12850_v31, %v9428_v27  ;;  %v5126_v62 = vsub.f32 0.0, %v4998_v25  ;;  %v2949_v37 = vmul.f32 %v12852_v19, %v9428_v27  ;;  %v12883_v57 = vld [vmem:[#allocation65_spill] sm:$0xff] }
 0x2e3   : > { %v9452_v48 = vsel %vm2128_vm3, %v12879_v12, %v12319_v40  ;;  %v9465_v43 = vsel %vm9457_vm5, %v1822_v23, 0.0  ;;  %v3110_v12 = vadd.f32 %v12884_v35, %v12883_v57  ;;  %v9471_v40 = vpop.eup %6313  ;;  %v5128_v44 = vsub.f32 0.0, %v5000_v28  ;;  %v12887_v35 = vld [vmem:[#allocation88_spill] sm:$0xff] }
 0x2e4   : > { %12882 = vst [vmem:[#allocation90_spill] sm:$0xff] %v9465_v43  ;;  %v2409_v33 = vmul.f32 %v12849_v45, %v9465_v43  ;;  %v2813_v53 = vmul.f32 %v12851_v56, %v9465_v43  ;;  %v3112_v2 = vadd.f32 %v3048_v17, %v12885_v32  ;;  %v5190_v23 = vsel %vm5062_vm2, %v5126_v62, %v4998_v25  ;;  %v12888_v45 = vld [vmem:[#allocation89_spill] sm:$0xff] }
 0x2e5   : > { %v9478_v49 = vpop.eup %6315  ;;  %v4101_v38 = vmul.f32 1.0614054, %v9471_v40  ;;  %v3182_v57 = vmul.f32 %v8834_v9, %v12886_v42  ;;  %v3184_v3 = vmul.f32 %v8834_v9, %v12887_v35  ;;  %v5192_v24 = vsel %vm5064_vm4, %v5128_v44, %v5000_v28  ;;  %v12890_v28 = vld [vmem:[#allocation74_spill] sm:$0xff] }
 0x2e6   : > { %v5254_v19 = vadd.f32 1.0, %v5190_v23  ;;  %v4103_v43 = vmul.f32 1.0614054, %v9478_v49  ;;  %v9490_v32 = vadd.f32 %v2545_v15, %v2409_v33  ;;  %v5256_v17 = vadd.f32 1.0, %v5192_v24  ;;  %v12891_v15 = vld [vmem:[#allocation167_spill] sm:$0xff] }
 0x2e7   : > { %v4165_v29 = vadd.f32 -1.4531521, %v4101_v38  ;;  %v2877_v14 = vadd.f32 %v2813_v53, %v2741_v11  ;;  %v3246_v25 = vadd.f32 %v3182_v57, %v3110_v12  ;;  %v3248_v31 = vadd.f32 %v3184_v3, %v3112_v2  ;;  %v12892_v38 = vld [vmem:[#allocation101_spill] sm:$0xff]  ;;  %v9507_v11 = vpop.f32.mrb[54].mxu0 }
 0x2e8   : > { %v5318_v62 = vmul.f32 %v5254_v19, %v3654_v50  ;;  %v4167_v56 = vadd.f32 -1.4531521, %v4103_v43  ;;  %v3454_v42 = vmul.f32 %v8828_v55, %v12888_v45  ;;  %v5320_v27 = vmul.f32 %v5256_v17, %v3656_v0  ;;  %v12893_v19 = vld [vmem:[#allocation199_spill] sm:$0xff]  ;;  %v9511_v12 = vpop.f32.mrb[55].mxu0 }
 0x2e9   : > { %v4229_v35 = vmul.f32 %v9471_v40, %v4165_v29  ;;  %v9495_v54 = vadd.f32 %v2949_v37, %v2877_v14  ;;  %v3382_v44 = vadd.f32 %v12890_v28, %v3246_v25  ;;  %v3384_v24 = vadd.f32 %v12891_v15, %v3248_v31  ;;  %v12898_v25 = vld [vmem:[#allocation162_spill] sm:$0xff]  ;;  %v12903_v15 = vld [vmem:[#allocation91_spill] sm:$0xff] }
 0x2ea   : > { %v4231_v33 = vmul.f32 %v9478_v49, %v4167_v56  ;;  %v3456_v53 = vmul.f32 %v8828_v55, %v12892_v38  ;;  %v9504_v2 = vadd.f32 %v12893_v19, %v7318_v13  ;;  %v6318_v3 = vpop.eup %6317  ;;  %v5380_v45 = vpack.c.bf16 %v5320_v27, %v5318_v62 }
 0x2eb   : > { %12889 = vst [vmem:[#allocation192_spill] sm:$0xff] %v9495_v54  ;;  %v4293_v50 = vadd.f32 1.4214138, %v4229_v35  ;;  %v3518_v0 = vadd.f32 %v3454_v42, %v3382_v44  ;;  %v2742_v29 = vadd.f32 %v2678_v34, %v9277_v58  ;;  %6319 = vpow2.f32 %v4813_v60  ;;  %v9518_v58 = vpop.f32.mrb[56].mxu0  ;;  %v12901_v44 = vld [vmem:[#allocation164_spill] sm:$0xff] }
 0x2ec   : > { %12894 = vst [vmem:[#allocation205_spill] sm:$0xff] %v9504_v2  ;;  %v4295_v43 = vadd.f32 1.4214138, %v4231_v33  ;;  %v3520_v37 = vadd.f32 %v3456_v53, %v3384_v24  ;;  %v12336_v56 = vrot.slane %v9504_v2, 7  ;;  %v12335_v31 = vrot.slane %v9504_v2, 1  ;;  %5584 = vmatprep.mubr.bf16.mxu1 %v5380_v45  ;;  %12895 = vst [vmem:[#allocation65_spill] sm:$0xff] %v9518_v58 }
 0x2ed   : > { %v4357_v55 = vmul.f32 %v9471_v40, %v4293_v50  ;;  %v1442_v27 = vand.u32 15, %v9455_v5  ;;  %v9516_v23 = vadd.f32 %v8892_v4, %v3518_v0  ;;  %v12896_v17 = vrot.slane %v9300_v8, 7 }
 0x2ee   : > { %v4359_v34 = vmul.f32 %v9478_v49, %v4295_v43  ;;  %v9522_v57 = vadd.f32 %v8892_v4, %v3520_v37  ;;  %v12897_v60 = vrot.slane %v9300_v8, 1  ;;  %v9538_v62 = vmul.f32 %v7347_v26, %v12898_v25 }
 0x2ef   : > { %v1823_v14 = vsel %vm1803_vm1, %v12896_v17, %v12336_v56  ;;  %v4421_v42 = vadd.f32 -0.28449672, %v4357_v55  ;;  %v9541_v35 = vmul.f32 0.70710677, %v9516_v23  ;;  %v9549_v33 = vmul.f32 %v7353_v30, %v12901_v44 }
 0x2f0   : > { %v2148_v5 = vsel %vm2128_vm3, %v12897_v60, %v12335_v31  ;;  %12899 = vst [vmem:[#allocation153_spill] sm:$0xff] %v9538_v62  ;;  %v9545_v28 = vsel %vm9457_vm5, %v1823_v14, 0.0  ;;  %v9553_v24 = vmul.f32 %v12860_v16, %v12903_v15  ;;  %v4423_v53 = vadd.f32 -0.28449672, %v4359_v34 }
 0x2f1   : > { %12900 = vst [vmem:[#allocation75_spill] sm:$0xff] %v9545_v28  ;;  %12902 = vst [vmem:[#allocation81_spill] sm:$0xff] %v9549_v33  ;;  %v9556_v19 = vmul.f32 0.70710677, %v9522_v57  ;;  %v4485_v45 = vmul.f32 %v9471_v40, %v4421_v42  ;;  %v3786_v50 = vand.u32 2147483647, %v9541_v35  ;;  %v2410_v41 = vmul.f32 %v7278_v51, %v9545_v28 }
 0x2f2   : > { %12904 = vst [vmem:[#allocation88_spill] sm:$0xff] %v9553_v24  ;;  %v2546_v0 = vmul.f32 %v7282_v52, %v9504_v2  ;;  %v9565_v43 = vmul.f32 0.5, %v9345_v7  ;;  %v4487_v37 = vmul.f32 %v9478_v49, %v4423_v53  ;;  %vm9568_vm6 = vcmp.lt.s32.totalorder %v1442_v27, 15  ;;  %v12933_v33 = vld [vmem:[#allocation97_spill] sm:$0xff] }
 0x2f3   : > { %v3788_v34 = vand.u32 2147483647, %v9556_v19  ;;  %v3655_v17 = vmul.f32 0.5, %v9359_v46  ;;  %v4549_v14 = vadd.f32 0.2548296, %v4485_v45  ;;  %vm5061_vm7 = vcmp.lt.f32.partialorder %v9372_v18, 0.0 }
 0x2f4   : > { %v3850_v60 = vmul.f32 0.3275911, %v3786_v50  ;;  %v9574_v42 = vadd.f32 %v2546_v0, %v2410_v41  ;;  %v4551_v15 = vadd.f32 0.2548296, %v4487_v37  ;;  %v2814_v7 = vmul.f32 %v7341_v20, %v9545_v28  ;;  %v12920_v18 = vld [vmem:[#allocation151_spill] sm:$0xff] }
 0x2f5   : > { %v3852_v31 = vmul.f32 0.3275911, %v3788_v34  ;;  %v4613_v27 = vmul.f32 %v9471_v40, %v4549_v14  ;;  %vm5063_vm8 = vcmp.lt.f32.partialorder %v9375_v6, 0.0  ;;  %v9584_v53 = vsel %vm9568_vm6, %v9452_v48, 0.0  ;;  %v6320_v40 = vpop.eup %6319 }
 0x2f6   : > { %12907 = vst [vmem:[#allocation89_spill] sm:$0xff] %v9584_v53  ;;  %v3914_v46 = vadd.f32 1.0, %v3850_v60  ;;  %v2950_v45 = vmul.f32 %v7344_v21, %v9504_v2  ;;  %v4615_v41 = vmul.f32 %v9478_v49, %v4551_v15  ;;  %v9591_v37 = vsel %vm9568_vm6, %v2148_v5, 0.0  ;;  %v12911_v15 = vld [vmem:[#allocation62_spill] sm:$0xff] }
 0x2f7   : > { %v3916_v0 = vadd.f32 1.0, %v3852_v31  ;;  %12908 = vst [vmem:[#allocation74_spill] sm:$0xff] %v9591_v37  ;;  %v2878_v56 = vadd.f32 %v2814_v7, %v2742_v29  ;;  %v4933_v14 = vmul.f32 %v6318_v3, %v4613_v27  ;;  %v4682_v54 = vmul.f32 %v3786_v50, %v3786_v50  ;;  %v12910_v29 = vld [vmem:[#allocation73_spill] sm:$0xff]  ;;  %v12912_v50 = vld [vmem:[#allocation148_spill] sm:$0xff] }
 0x2f8   : > { %6321 = vrcp.f32 %v3914_v46  ;;  %v3047_v48 = vmul.f32 %v7347_v26, %v12840_v22  ;;  %v4935_v28 = vmul.f32 %v6320_v40, %v4615_v41  ;;  %v2679_v60 = vmul.f32 %v7294_v59, %v9584_v53  ;;  %v12913_v27 = vld [vmem:[#allocation76_spill] sm:$0xff]  ;;  %v12914_v46 = vld [vmem:[#allocation86_spill] sm:$0xff]  ;;  %v12918_v53 = vld [vmem:[#allocation71_spill] sm:$0xff] }
 0x2f9   : > { %6323 = vrcp.f32 %v3916_v0  ;;  %v9597_v62 = vadd.f32 %v2950_v45, %v2878_v56  ;;  %v4997_v49 = vsub.f32 1.0, %v4933_v14  ;;  %v4684_v31 = vmul.f32 %v3788_v34, %v3788_v34  ;;  %v12915_v45 = vld [vmem:[#allocation95_spill] sm:$0xff] }
 0x2fa   : > { %v2680_v5 = vmul.f32 %v7299_v63, %v9591_v37  ;;  %v3111_v55 = vadd.f32 %v3047_v48, %v12910_v29  ;;  %v4999_v3 = vsub.f32 1.0, %v4935_v28  ;;  %v3109_v7 = vadd.f32 %v12912_v50, %v12911_v15  ;;  %v12917_v50 = vld [vmem:[#allocation87_spill] sm:$0xff] }
 0x2fb   : > { %12909 = vst [vmem:[#allocation167_spill] sm:$0xff] %v9597_v62  ;;  %v3181_v22 = vmul.f32 %v12832_v47, %v12913_v27  ;;  %v3183_v41 = vmul.f32 %v12832_v47, %v12914_v46  ;;  %v5125_v0 = vsub.f32 0.0, %v4997_v49  ;;  %v4746_v56 = vsub.f32 0.0, %v4682_v54 }
 0x2fc   : > { %v3455_v34 = vmul.f32 %v12841_v61, %v12915_v45  ;;  %v9612_v40 = vadd.f32 %v9195_v39, %v7303_v1  ;;  %v5127_v14 = vsub.f32 0.0, %v4999_v3  ;;  %v2743_v29 = vadd.f32 %v2679_v60, %v9347_v10 }
 0x2fd   : > { %v3245_v28 = vadd.f32 %v3181_v22, %v3109_v7  ;;  %v3247_v48 = vadd.f32 %v3183_v41, %v3111_v55  ;;  %v5189_v15 = vsel %vm5061_vm7, %v5125_v0, %v4997_v49  ;;  %v3453_v27 = vmul.f32 %v12841_v61, %v12917_v50  ;;  %v12919_v7 = vld [vmem:[#allocation83_spill] sm:$0xff]  ;;  %v12926_v41 = vld [vmem:[#allocation33_spill] sm:$0xff]  ;;  %v12927_v50 = vld [vmem:[#allocation36_spill] sm:$0xff] }
 0x2fe   : > { %12916 = vst [vmem:[#allocation101_spill] sm:$0xff] %v9612_v40  ;;  %v12343_v54 = vrot.slane %v9612_v40, 7  ;;  %v12342_v46 = vrot.slane %v9612_v40, 1  ;;  %v5191_v62 = vsel %vm5063_vm8, %v5127_v14, %v4999_v3  ;;  %v5253_v39 = vadd.f32 1.0, %v5189_v15 }
 0x2ff   : > { %v3381_v37 = vadd.f32 %v12918_v53, %v3245_v28  ;;  %v3383_v55 = vadd.f32 %v12919_v7, %v3247_v48  ;;  %v5255_v22 = vadd.f32 1.0, %v5191_v62  ;;  %v4748_v10 = vsub.f32 0.0, %v4684_v31  ;;  %v12925_v62 = vld [vmem:[#allocation32_spill] sm:$0xff] }
 0x300   : > { %v12921_v60 = vrot.slane %v12920_v18, 7  ;;  %v12923_v6 = vrot.slane %v12920_v18, 1  ;;  %v2547_v0 = vmul.f32 %v12926_v41, %v9612_v40  ;;  %v5317_v28 = vmul.f32 %v5253_v39, %v9565_v43 }
 0x301   : > { %v3517_v53 = vadd.f32 %v3453_v27, %v3381_v37  ;;  %v3519_v3 = vadd.f32 %v3455_v34, %v3383_v55  ;;  %v5319_v48 = vmul.f32 %v5255_v22, %v3655_v17  ;;  %v4819_v15 = vmul.f32 1.442695, %v4746_v56  ;;  %v12928_v34 = vld [vmem:[#allocation60_spill] sm:$0xff]  ;;  %v12929_v56 = vld [vmem:[#allocation35_spill] sm:$0xff] }
 0x302   : > { %v9631_v61 = vsel %vm1803_vm1, %v12921_v60, %v12343_v54  ;;  %v9639_v49 = vsel %vm2128_vm3, %v12923_v6, %v12342_v46  ;;  %v9645_v14 = vpop.eup %6321  ;;  %v2951_v39 = vmul.f32 %v12929_v56, %v9612_v40  ;;  %v12930_v22 = vld [vmem:[#allocation96_spill] sm:$0xff]  ;;  %v12931_v54 = vld [vmem:[#allocation41_spill] sm:$0xff]  ;;  %vm5066_vm9 = vcmp.lt.f32.partialorder %v9541_v35, 0.0 }
 0x303   : > { %12922 = vst [vmem:[#allocation199_spill] sm:$0xff] %v9631_v61  ;;  %12924 = vst [vmem:[#allocation91_spill] sm:$0xff] %v9639_v49  ;;  %v2411_v31 = vmul.f32 %v12925_v62, %v9631_v61  ;;  %v2815_v7 = vmul.f32 %v12927_v50, %v9631_v61  ;;  %v9650_v60 = vpop.eup %6323  ;;  %v4106_v37 = vmul.f32 1.0614054, %v9645_v14  ;;  %v9654_v27 = vadd.f32 %v12928_v34, %v3517_v53 }
 0x304   : > { %v9657_v55 = vadd.f32 %v12928_v34, %v3519_v3  ;;  %v5379_v46 = vpack.c.bf16 %v5319_v48, %v5317_v28  ;;  %v4108_v43 = vmul.f32 1.0614054, %v9650_v60  ;;  %v9666_v61 = vmul.f32 %v12931_v54, %v12930_v22  ;;  %v12936_v28 = vld [vmem:[#allocation58_spill] sm:$0xff] }
 0x305   : > { %v9659_v6 = vadd.f32 %v2547_v0, %v2411_v31  ;;  %v2879_v17 = vadd.f32 %v2815_v7, %v2743_v29  ;;  %v9670_v53 = vmul.f32 %v12860_v16, %v12933_v33  ;;  %v4170_v25 = vadd.f32 -1.4531521, %v4106_v37  ;;  %v12938_v37 = vld [vmem:[#allocation64_spill] sm:$0xff] }
 0x306   : > { %12932 = vst [vmem:[#allocation73_spill] sm:$0xff] %v9666_v61  ;;  %v9673_v3 = vmul.f32 0.70710677, %v9654_v27  ;;  %5585 = vmatmul.mubr.bf16.gmra.mrb[8].mxu1 %v5379_v46  ;;  %v4172_v31 = vadd.f32 -1.4531521, %v4108_v43  ;;  %v9682_v48 = vadd.f32 %v12936_v28, %v7318_v13  ;;  %v2744_v61 = vadd.f32 %v2680_v5, %v12938_v37 }
 0x307   : > { %12934 = vst [vmem:[#allocation62_spill] sm:$0xff] %v9670_v53  ;;  %v9676_v0 = vmul.f32 0.70710677, %v9657_v55  ;;  %v9678_v29 = vadd.f32 %v2951_v39, %v2879_v17  ;;  %v4234_v7 = vmul.f32 %v9645_v14, %v4170_v25  ;;  %v4823_v22 = vmul.f32 1.442695, %v4748_v10 }
 0x308   : > { %12937 = vst [vmem:[#allocation76_spill] sm:$0xff] %v9682_v48  ;;  %v3785_v33 = vand.u32 2147483647, %v9673_v3  ;;  %v4236_v53 = vmul.f32 %v9650_v60, %v4172_v31  ;;  %6325 = vpow2.f32 %v4819_v15  ;;  %v12345_v43 = vrot.slane %v9682_v48, 7 }
 0x309   : > { %12935 = vst [vmem:[#allocation148_spill] sm:$0xff] %v9678_v29  ;;  %v3787_v46 = vand.u32 2147483647, %v9676_v0  ;;  %v4298_v17 = vadd.f32 1.4214138, %v4234_v7  ;;  %v12347_v28 = vrot.slane %v9682_v48, 1  ;;  %6327 = vpow2.f32 %v4823_v22 }
 0x30a   : > { %v3849_v39 = vmul.f32 0.3275911, %v3785_v33  ;;  %v4681_v29 = vmul.f32 %v3785_v33, %v3785_v33  ;;  %v4300_v24 = vadd.f32 1.4214138, %v4236_v53  ;;  %v12939_v10 = vrot.slane %v9504_v2, 7 }
 0x30b   : > { %v3851_v44 = vmul.f32 0.3275911, %v3787_v46  ;;  %v4683_v25 = vmul.f32 %v3787_v46, %v3787_v46  ;;  %v4362_v15 = vmul.f32 %v9645_v14, %v4298_v17  ;;  %v12941_v7 = vrot.slane %v9504_v2, 1  ;;  %v12944_v17 = vld [vmem:[#allocation177_spill] sm:$0xff] }
 0x30c   : > { %v9697_v5 = vsel %vm1803_vm1, %v12939_v10, %v12345_v43  ;;  %v3913_v31 = vadd.f32 1.0, %v3849_v39  ;;  %v4364_v33 = vmul.f32 %v9650_v60, %v4300_v24  ;;  %v4745_v46 = vsub.f32 0.0, %v4681_v29  ;;  %v9711_v43 = vpop.f32.mrb[57].mxu0  ;;  %v12946_v24 = vld [vmem:[#allocation98_spill] sm:$0xff] }
 0x30d   : > { %12940 = vst [vmem:[#allocation86_spill] sm:$0xff] %v9697_v5  ;;  %v9706_v53 = vsel %vm2128_vm3, %v12941_v7, %v12347_v28  ;;  %v3915_v37 = vadd.f32 1.0, %v3851_v44  ;;  %v2412_v10 = vmul.f32 %v7278_v51, %v9697_v5  ;;  %12943 = vst [vmem:[#allocation87_spill] sm:$0xff] %v9711_v43  ;;  %v9715_v22 = vmul.f32 %v7347_v26, %v12944_v17 }
 0x30e   : > { %12942 = vst [vmem:[#allocation95_spill] sm:$0xff] %v9706_v53  ;;  %v4426_v39 = vadd.f32 -0.28449672, %v4362_v15  ;;  %6329 = vrcp.f32 %v3913_v31  ;;  %v2548_v2 = vmul.f32 %v7282_v52, %v9682_v48  ;;  %v4428_v7 = vadd.f32 -0.28449672, %v4364_v33 }
 0x30f   : > { %12945 = vst [vmem:[#allocation71_spill] sm:$0xff] %v9715_v22  ;;  %6331 = vrcp.f32 %v3915_v37  ;;  %v4747_v28 = vsub.f32 0.0, %v4683_v25  ;;  %v2681_v44 = vmul.f32 %v7294_v59, %v9639_v49  ;;  %v9723_v29 = vmul.f32 %v12931_v54, %v12946_v24 }
 0x310   : > { %v4490_v18 = vmul.f32 %v9645_v14, %v4426_v39  ;;  %v9726_v8 = vadd.f32 %v2548_v2, %v2412_v10  ;;  %v2816_v15 = vmul.f32 %v7341_v20, %v9697_v5  ;;  %v3658_v31 = vmul.f32 0.5, %v9516_v23  ;;  %v12948_v39 = vld [vmem:[#allocation55_spill] sm:$0xff] }
 0x311   : > { %12947 = vst [vmem:[#allocation83_spill] sm:$0xff] %v9723_v29  ;;  %v9732_v33 = vmul.f32 0.5, %v9522_v57  ;;  %v4492_v25 = vmul.f32 %v9650_v60, %v4428_v7  ;;  %v4817_v37 = vmul.f32 1.442695, %v4745_v46  ;;  %v2952_v24 = vmul.f32 %v7344_v21, %v9682_v48 }
 0x312   : > { %v4554_v22 = vadd.f32 0.2548296, %v4490_v18  ;;  %v2880_v17 = vadd.f32 %v2816_v15, %v2744_v61  ;;  %v9739_v2 = vadd.f32 %v12948_v39, %v7303_v1  ;;  %v6326_v10 = vpop.eup %6325  ;;  %v4821_v23 = vmul.f32 1.442695, %v4747_v28 }
 0x313   : > { %v4556_v29 = vadd.f32 0.2548296, %v4492_v25  ;;  %v1255_v57 = vadd.s32 224, %v7251_v36  ;;  %v2745_v5 = vadd.f32 %v2681_v44, %v9490_v32  ;;  %vm5068_vm10 = vcmp.lt.f32.partialorder %v9556_v19, 0.0  ;;  %v6328_v39 = vpop.eup %6327 }
 0x314   : > { %12949 = vst [vmem:[#allocation96_spill] sm:$0xff] %v9739_v2  ;;  %v4618_v46 = vmul.f32 %v9645_v14, %v4554_v22  ;;  %v9745_v18 = vadd.f32 %v2952_v24, %v2880_v17  ;;  %v12354_v61 = vrot.slane %v9739_v2, 7  ;;  %v12353_v7 = vrot.slane %v9739_v2, 1 }
 0x315   : > { %v4620_v15 = vmul.f32 %v9650_v60, %v4556_v29  ;;  %v2682_v25 = vmul.f32 %v7299_v63, %v9706_v53  ;;  %v1463_v28 = vand.u32 15, %v1255_v57  ;;  %6333 = vpow2.f32 %v4817_v37 }
 0x316   : > { %12950 = vst [vmem:[#allocation97_spill] sm:$0xff] %v9745_v18  ;;  %v4938_v49 = vmul.f32 %v6326_v10, %v4618_v46  ;;  %v12951_v32 = vrot.slane %v9612_v40, 7  ;;  %v12952_v60 = vrot.slane %v9612_v40, 1  ;;  %6335 = vpow2.f32 %v4821_v23  ;;  %v12958_v40 = vld [vmem:[#allocation93_spill] sm:$0xff] }
 0x317   : > { %v4940_v22 = vmul.f32 %v6328_v39, %v4620_v15  ;;  %v9768_v44 = vadd.s32 216, %v7251_v36  ;;  %vm9770_vm11 = vcmp.gt.s32.totalorder %v1463_v28, 0  ;;  %v2549_v57 = vmul.f32 %v12926_v41, %v9739_v2 }
 0x318   : > { %v1818_v14 = vsel %vm1803_vm1, %v12951_v32, %v12354_v61  ;;  %v9765_v17 = vsel %vm2128_vm3, %v12952_v60, %v12353_v7  ;;  %v9774_v37 = vpop.eup %6329  ;;  %v5002_v24 = vsub.f32 1.0, %v4938_v49  ;;  %v3052_v23 = vmul.f32 %v7353_v30, %v12892_v38  ;;  %v12956_v7 = vld [vmem:[#allocation85_spill] sm:$0xff] }
 0x319   : > { %v9778_v10 = vsel %vm9770_vm11, %v1818_v14, 0.0  ;;  %v9784_v46 = vpop.eup %6331  ;;  %v5004_v15 = vsub.f32 1.0, %v4940_v22  ;;  %v4105_v28 = vmul.f32 1.0614054, %v9774_v37  ;;  %v2953_v49 = vmul.f32 %v12929_v56, %v9739_v2  ;;  %v12957_v61 = vld [vmem:[#allocation165_spill] sm:$0xff] }
 0x31a   : > { %12955 = vst [vmem:[#allocation58_spill] sm:$0xff] %v9778_v10  ;;  %v2413_v39 = vmul.f32 %v12925_v62, %v9778_v10  ;;  %v5130_v32 = vsub.f32 0.0, %v5002_v24  ;;  %v4107_v14 = vmul.f32 1.0614054, %v9784_v46  ;;  %v2817_v60 = vmul.f32 %v12927_v50, %v9778_v10  ;;  %v12959_v62 = vld [vmem:[#allocation99_spill] sm:$0xff] }
 0x31b   : > { %v3114_v38 = vadd.f32 %v12957_v61, %v12956_v7  ;;  %v5132_v18 = vsub.f32 0.0, %v5004_v15  ;;  %v4169_v53 = vadd.f32 -1.4531521, %v4105_v28  ;;  %v3116_v43 = vadd.f32 %v3052_v23, %v12958_v40  ;;  %v12960_v7 = vld [vmem:[#allocation105_spill] sm:$0xff] }
 0x31c   : > { %v9796_v22 = vadd.f32 %v2549_v57, %v2413_v39  ;;  %v5194_v58 = vsel %vm5066_vm9, %v5130_v32, %v5002_v24  ;;  %v4171_v41 = vadd.f32 -1.4531521, %v4107_v14  ;;  %v2881_v56 = vadd.f32 %v2817_v60, %v2745_v5  ;;  %v9811_v32 = vld [vmem:[#allocation11 + $0x18] ss:$0 sm:$0xff] }
 0x31d   : > { %v3186_v34 = vmul.f32 %v8834_v9, %v12959_v62  ;;  %v5196_v10 = vsel %vm5068_vm10, %v5132_v18, %v5004_v15  ;;  %v5258_v50 = vadd.f32 1.0, %v5194_v58  ;;  %v4233_v61 = vmul.f32 %v9774_v37, %v4169_v53  ;;  %v12962_v62 = vld [vmem:[#allocation106_spill] sm:$0xff] }
 0x31e   : > { %v3188_v57 = vmul.f32 %v8834_v9, %v12960_v7  ;;  %v5260_v28 = vadd.f32 1.0, %v5196_v10  ;;  %v4235_v40 = vmul.f32 %v9784_v46, %v4171_v41  ;;  %v9809_v23 = vadd.f32 %v2953_v49, %v2881_v56  ;;  %v12963_v15 = vld [vmem:[#allocation178_spill] sm:$0xff]  ;;  %v12964_v10 = vld [vmem:[#allocation113_spill] sm:$0xff] }
 0x31f   : > { %v3250_v35 = vadd.f32 %v3186_v34, %v3114_v38  ;;  %v5322_v24 = vmul.f32 %v5258_v50, %v3658_v31  ;;  %v4297_v5 = vadd.f32 1.4214138, %v4233_v61  ;;  %v3458_v19 = vmul.f32 %v9811_v32, %v12962_v62  ;;  %v6334_v58 = vpop.eup %6333  ;;  %v12965_v50 = vld [vmem:[#allocation187_spill] sm:$0xff]  ;;  %v9826_v38 = vpop.f32.mrb[58].mxu0 }
 0x320   : > { %12961 = vst [vmem:[#allocation64_spill] sm:$0xff] %v9809_v23  ;;  %v3252_v39 = vadd.f32 %v3188_v57, %v3116_v43  ;;  %v5324_v53 = vmul.f32 %v5260_v28, %v9732_v33  ;;  %v4299_v18 = vadd.f32 1.4214138, %v4235_v40  ;;  %v3460_v41 = vmul.f32 %v9811_v32, %v12964_v10  ;;  %v6336_v56 = vpop.eup %6335  ;;  %v12966_v43 = vld [vmem:[#allocation56_spill] sm:$0xff]  ;;  %v9830_v28 = vpop.f32.mrb[59].mxu0 }
 0x321   : > { %v3386_v14 = vadd.f32 %v12963_v15, %v3250_v35  ;;  %v4361_v34 = vmul.f32 %v9774_v37, %v4297_v5  ;;  %v9823_v49 = vadd.f32 %v12966_v43, %v7318_v13  ;;  %v2746_v60 = vadd.f32 %v2682_v25, %v9574_v42  ;;  %v9834_v62 = vpop.f32.mrb[60].mxu0  ;;  %v12969_v15 = vld [vmem:[#allocation184_spill] sm:$0xff] }
 0x322   : > { %v3388_v31 = vadd.f32 %v12965_v50, %v3252_v39  ;;  %v5382_v33 = vpack.c.bf16 %v5324_v53, %v5322_v24  ;;  %v4363_v61 = vmul.f32 %v9784_v46, %v4299_v18  ;;  %v1456_v7 = vand.u32 15, %v9768_v44  ;;  %12968 = vst [vmem:[#allocation55_spill] sm:$0xff] %v9834_v62  ;;  %v12971_v25 = vld [vmem:[#allocation172_spill] sm:$0xff] }
 0x323   : > { %12967 = vst [vmem:[#allocation98_spill] sm:$0xff] %v9823_v49  ;;  %v3522_v57 = vadd.f32 %v3458_v19, %v3386_v14  ;;  %v4425_v40 = vadd.f32 -0.28449672, %v4361_v34  ;;  %v12365_v5 = vrot.slane %v9823_v49, 7  ;;  %v12364_v39 = vrot.slane %v9823_v49, 1 }
 0x324   : > { %v3524_v35 = vadd.f32 %v3460_v41, %v3388_v31  ;;  %v9838_v42 = vmul.f32 %v7353_v30, %v12969_v15  ;;  %v9842_v24 = vmul.f32 %v12860_v16, %v12971_v25  ;;  %5592 = vmatprep.mubr.bf16.mxu1 %v5382_v33  ;;  %v4427_v44 = vadd.f32 -0.28449672, %v4363_v61 }
 0x325   : > { %v9845_v19 = vadd.f32 %v8892_v4, %v3522_v57  ;;  %v4489_v53 = vmul.f32 %v9774_v37, %v4425_v40  ;;  %v12973_v14 = vrot.slane %v9682_v48, 7  ;;  %v12974_v34 = vrot.slane %v9682_v48, 1 }
 0x326   : > { %12970 = vst [vmem:[#allocation85_spill] sm:$0xff] %v9838_v42  ;;  %12972 = vst [vmem:[#allocation165_spill] sm:$0xff] %v9842_v24  ;;  %v9849_v18 = vadd.f32 %v8892_v4, %v3524_v35  ;;  %v4491_v31 = vmul.f32 %v9784_v46, %v4427_v44  ;;  %vm9864_vm12 = vcmp.lt.s32.totalorder %v1456_v7, 15  ;;  %v3657_v57 = vmul.f32 0.5, %v9654_v27 }
 0x327   : > { %v1819_v41 = vsel %vm1803_vm1, %v12973_v14, %v12365_v5  ;;  %v2144_v50 = vsel %vm2128_vm3, %v12974_v34, %v12364_v39  ;;  %v9869_v33 = vmul.f32 0.70710677, %v9845_v19  ;;  %v3659_v40 = vmul.f32 0.5, %v9657_v55 }
 0x328   : > { %v9873_v61 = vsel %vm9770_vm11, %v1819_v41, 0.0  ;;  %v4553_v35 = vadd.f32 0.2548296, %v4489_v53  ;;  %v9878_v25 = vmul.f32 0.70710677, %v9849_v18  ;;  %vm5065_vm13 = vcmp.lt.f32.partialorder %v9673_v3, 0.0 }
 0x329   : > { %12977 = vst [vmem:[#allocation93_spill] sm:$0xff] %v9873_v61  ;;  %v4555_v44 = vadd.f32 0.2548296, %v4491_v31  ;;  %v3790_v7 = vand.u32 2147483647, %v9869_v33  ;;  %v2414_v14 = vmul.f32 %v7278_v51, %v9873_v61  ;;  %v2550_v29 = vmul.f32 %v7282_v52, %v9823_v49 }
 0x32a   : > { %v4617_v41 = vmul.f32 %v9774_v37, %v4553_v35  ;;  %vm5067_vm14 = vcmp.lt.f32.partialorder %v9676_v0, 0.0  ;;  %v9891_v27 = vsel %vm9864_vm12, %v9765_v17, 0.0  ;;  %v3792_v55 = vand.u32 2147483647, %v9878_v25 }
 0x32b   : > { %12978 = vst [vmem:[#allocation99_spill] sm:$0xff] %v9891_v27  ;;  %v4619_v53 = vmul.f32 %v9784_v46, %v4555_v44  ;;  %v3854_v34 = vmul.f32 0.3275911, %v3790_v7  ;;  %v9897_v31 = vsel %vm9864_vm12, %v2144_v50, 0.0  ;;  %v9899_v39 = vadd.f32 %v2550_v29, %v2414_v14 }
 0x32c   : > { %12979 = vst [vmem:[#allocation105_spill] sm:$0xff] %v9897_v31  ;;  %v4937_v5 = vmul.f32 %v6334_v58, %v4617_v41  ;;  %v3856_v37 = vmul.f32 0.3275911, %v3792_v55  ;;  %v4686_v35 = vmul.f32 %v3790_v7, %v3790_v7  ;;  %v2818_v23 = vmul.f32 %v7341_v20, %v9873_v61  ;;  %v12985_v61 = vld [vmem:[#allocation102_spill] sm:$0xff] }
 0x32d   : > { %v4939_v42 = vmul.f32 %v6336_v56, %v4619_v53  ;;  %v3918_v17 = vadd.f32 1.0, %v3854_v34  ;;  %v2954_v24 = vmul.f32 %v7344_v21, %v9823_v49  ;;  %v3051_v46 = vmul.f32 %v7347_v26, %v12915_v45  ;;  %v12981_v34 = vld [vmem:[#allocation84_spill] sm:$0xff] }
 0x32e   : > { %v5001_v44 = vsub.f32 1.0, %v4937_v5  ;;  %v3920_v43 = vadd.f32 1.0, %v3856_v37  ;;  %v4688_v50 = vmul.f32 %v3792_v55, %v3792_v55  ;;  %v2882_v15 = vadd.f32 %v2818_v23, %v2746_v60  ;;  %v12982_v45 = vld [vmem:[#allocation160_spill] sm:$0xff]  ;;  %v12984_v23 = vld [vmem:[#allocation94_spill] sm:$0xff] }
 0x32f   : > { %v5003_v14 = vsub.f32 1.0, %v4939_v42  ;;  %v2683_v58 = vmul.f32 %v7294_v59, %v9891_v27  ;;  %6337 = vrcp.f32 %v3918_v17  ;;  %v2684_v7 = vmul.f32 %v7299_v63, %v9897_v31  ;;  %v12983_v37 = vld [vmem:[#allocation92_spill] sm:$0xff] }
 0x330   : > { %v5129_v56 = vsub.f32 0.0, %v5001_v44  ;;  %6339 = vrcp.f32 %v3920_v43  ;;  %v4750_v29 = vsub.f32 0.0, %v4686_v35  ;;  %v9911_v41 = vadd.f32 %v2954_v24, %v2882_v15  ;;  %v9922_v43 = vld [vmem:[#allocation11 + $0x10] ss:$0 sm:$0xff] }
 0x331   : > { %v5131_v53 = vsub.f32 0.0, %v5003_v14  ;;  %v3113_v5 = vadd.f32 %v12982_v45, %v12981_v34  ;;  %v3115_v55 = vadd.f32 %v3051_v46, %v12983_v37  ;;  %v3185_v60 = vmul.f32 %v12832_v47, %v12984_v23  ;;  %v12986_v15 = vld [vmem:[#allocation103_spill] sm:$0xff] }
 0x332   : > { %12980 = vst [vmem:[#allocation106_spill] sm:$0xff] %v9911_v41  ;;  %v5193_v42 = vsel %vm5065_vm13, %v5129_v56, %v5001_v44  ;;  %v4752_v17 = vsub.f32 0.0, %v4688_v50  ;;  %v3187_v27 = vmul.f32 %v12832_v47, %v12985_v61  ;;  %v3457_v24 = vmul.f32 %v9922_v43, %v12986_v15  ;;  %v12987_v45 = vld [vmem:[#allocation111_spill] sm:$0xff]  ;;  %v12989_v56 = vld [vmem:[#allocation168_spill] sm:$0xff] }
 0x333   : > { %v5195_v35 = vsel %vm5067_vm14, %v5131_v53, %v5003_v14  ;;  %v5257_v34 = vadd.f32 1.0, %v5193_v42  ;;  %v3249_v46 = vadd.f32 %v3185_v60, %v3113_v5  ;;  %v3459_v37 = vmul.f32 %v9922_v43, %v12987_v45  ;;  %v12991_v5 = vld [vmem:[#allocation180_spill] sm:$0xff] }
 0x334   : > { %v5259_v23 = vadd.f32 1.0, %v5195_v35  ;;  %v3251_v3 = vadd.f32 %v3187_v27, %v3115_v55  ;;  %v9932_v44 = vadd.f32 %v9507_v11, %v7303_v1  ;;  %v2747_v61 = vadd.f32 %v2683_v58, %v9659_v6  ;;  %v12992_v55 = vld [vmem:[#allocation185_spill] sm:$0xff] }
 0x335   : > { %v5321_v50 = vmul.f32 %v5257_v34, %v3657_v57  ;;  %v3385_v41 = vadd.f32 %v12989_v56, %v3249_v46  ;;  %v9938_v0 = vadd.f32 %v9511_v12, %v7318_v13  ;;  %v9941_v14 = vadd.f32 %v2684_v7, %v9726_v8  ;;  %v12994_v57 = vld [vmem:[#allocation42_spill] sm:$0xff]  ;;  %v13001_v46 = vld [vmem:[#allocation32_spill] sm:$0xff] }
 0x336   : > { %12988 = vst [vmem:[#allocation178_spill] sm:$0xff] %v9932_v44  ;;  %v5323_v53 = vmul.f32 %v5259_v23, %v3659_v40  ;;  %v3387_v60 = vadd.f32 %v12991_v5, %v3251_v3  ;;  %v12370_v27 = vrot.slane %v9932_v44, 7  ;;  %v12369_v11 = vrot.slane %v9932_v44, 1  ;;  %v13002_v23 = vld [vmem:[#allocation33_spill] sm:$0xff] }
 0x337   : > { %12990 = vst [vmem:[#allocation113_spill] sm:$0xff] %v9938_v0  ;;  %v9948_v6 = vmul.f32 %v12931_v54, %v12992_v55  ;;  %v9952_v58 = vmul.f32 %v12860_v16, %v12994_v57  ;;  %v4827_v12 = vmul.f32 1.442695, %v4750_v29  ;;  %v3521_v42 = vadd.f32 %v3457_v24, %v3385_v41  ;;  %v13000_v41 = vld [vmem:[#allocation60_spill] sm:$0xff] }
 0x338   : > { %v5381_v15 = vpack.c.bf16 %v5323_v53, %v5321_v50  ;;  %v3523_v8 = vadd.f32 %v3459_v37, %v3387_v60  ;;  %v12996_v40 = vrot.slane %v9739_v2, 7  ;;  %v12998_v35 = vrot.slane %v9739_v2, 1  ;;  %v13003_v50 = vld [vmem:[#allocation36_spill] sm:$0xff] }
 0x339   : > { %12993 = vst [vmem:[#allocation187_spill] sm:$0xff] %v9948_v6  ;;  %12995 = vst [vmem:[#allocation56_spill] sm:$0xff] %v9952_v58  ;;  %v9970_v29 = vpop.eup %6337  ;;  %v9973_v24 = vadd.f32 %v13000_v41, %v3521_v42  ;;  %v2551_v3 = vmul.f32 %v13002_v23, %v9932_v44  ;;  %v4831_v60 = vmul.f32 1.442695, %v4752_v17  ;;  %v13004_v42 = vld [vmem:[#allocation196_spill] sm:$0xff]  ;;  %6341 = vpow2.f32 %v4827_v12 }
 0x33a   : > { %v9960_v7 = vsel %vm1803_vm1, %v12996_v40, %v12370_v27  ;;  %v9968_v34 = vsel %vm2128_vm3, %v12998_v35, %v12369_v11  ;;  %v9981_v53 = vpop.eup %6339  ;;  %5593 = vmatmul.mubr.bf16.gmra.mrb[12].mxu1 %v5381_v15  ;;  %v4110_v5 = vmul.f32 1.0614054, %v9970_v29  ;;  %v9985_v55 = vadd.f32 %v13000_v41, %v3523_v8  ;;  %v13006_v8 = vld [vmem:[#allocation35_spill] sm:$0xff] }
 0x33b   : > { %12997 = vst [vmem:[#allocation172_spill] sm:$0xff] %v9960_v7  ;;  %12999 = vst [vmem:[#allocation84_spill] sm:$0xff] %v9968_v34  ;;  %v2415_v37 = vmul.f32 %v13001_v46, %v9960_v7  ;;  %v2819_v56 = vmul.f32 %v13003_v50, %v9960_v7  ;;  %v9990_v40 = vmul.f32 %v7347_v26, %v13004_v42  ;;  %v4112_v35 = vmul.f32 1.0614054, %v9981_v53 }
 0x33c   : > { %v9994_v11 = vmul.f32 0.70710677, %v9973_v24  ;;  %v4174_v15 = vadd.f32 -1.4531521, %v4110_v5  ;;  %v9999_v7 = vmul.f32 0.70710677, %v9985_v55  ;;  %v2955_v31 = vmul.f32 %v13006_v8, %v9932_v44 }
 0x33d   : > { %13005 = vst [vmem:[#allocation160_spill] sm:$0xff] %v9990_v40  ;;  %v9996_v27 = vadd.f32 %v2551_v3, %v2415_v37  ;;  %v2883_v17 = vadd.f32 %v2819_v56, %v2747_v61  ;;  %v4176_v57 = vadd.f32 -1.4531521, %v4112_v35  ;;  %v13007_v40 = vrot.slane %v9938_v0, 7 }
 0x33e   : > { %v3789_v42 = vand.u32 2147483647, %v9994_v11  ;;  %v13008_v6 = vrot.slane %v9823_v49, 7  ;;  %v4238_v3 = vmul.f32 %v9970_v29, %v4174_v15  ;;  %6343 = vpow2.f32 %v4831_v60 }
 0x33f   : > { %v3791_v61 = vand.u32 2147483647, %v9999_v7  ;;  %v10014_v56 = vadd.f32 %v2955_v31, %v2883_v17  ;;  %v4240_v5 = vmul.f32 %v9981_v53, %v4176_v57  ;;  %v12377_v58 = vrot.slane %v9938_v0, 1 }
 0x340   : > { %v10010_v37 = vsel %vm1803_vm1, %v13008_v6, %v13007_v40  ;;  %v3853_v12 = vmul.f32 0.3275911, %v3789_v42  ;;  %v4685_v35 = vmul.f32 %v3789_v42, %v3789_v42  ;;  %v4302_v2 = vadd.f32 1.4214138, %v4238_v3 }
 0x341   : > { %13009 = vst [vmem:[#allocation92_spill] sm:$0xff] %v10010_v37  ;;  %13010 = vst [vmem:[#allocation94_spill] sm:$0xff] %v10014_v56  ;;  %v3855_v48 = vmul.f32 0.3275911, %v3791_v61  ;;  %v4687_v62 = vmul.f32 %v3791_v61, %v3791_v61  ;;  %v2416_v6 = vmul.f32 %v7278_v51, %v10010_v37  ;;  %v4304_v40 = vadd.f32 1.4214138, %v4240_v5 }
 0x342   : > { %v3917_v41 = vadd.f32 1.0, %v3853_v12  ;;  %v4749_v15 = vsub.f32 0.0, %v4685_v35  ;;  %v13011_v31 = vrot.slane %v9823_v49, 1  ;;  %v4366_v57 = vmul.f32 %v9970_v29, %v4302_v2  ;;  %v10031_v61 = vpop.f32.mrb[61].mxu0  ;;  %v13014_v5 = vld [vmem:[#allocation107_spill] sm:$0xff]  ;;  %v13016_v35 = vld [vmem:[#allocation133_spill] sm:$0xff] }
 0x343   : > { %v3919_v42 = vadd.f32 1.0, %v3855_v48  ;;  %v4751_v17 = vsub.f32 0.0, %v4687_v62  ;;  %v2552_v3 = vmul.f32 %v7282_v52, %v9938_v0  ;;  %13013 = vst [vmem:[#allocation103_spill] sm:$0xff] %v10031_v61  ;;  %v10035_v12 = vmul.f32 %v12931_v54, %v13014_v5  ;;  %v13019_v62 = vld [vmem:[#allocation201_spill] sm:$0xff] }
 0x344   : > { %v10026_v60 = vsel %vm2128_vm3, %v13011_v31, %v12377_v58  ;;  %v10039_v56 = vmul.f32 %v12860_v16, %v13016_v35  ;;  %v4368_v31 = vmul.f32 %v9981_v53, %v4304_v40  ;;  %6345 = vrcp.f32 %v3917_v41 }
 0x345   : > { %13012 = vst [vmem:[#allocation102_spill] sm:$0xff] %v10026_v60  ;;  %13015 = vst [vmem:[#allocation111_spill] sm:$0xff] %v10035_v12  ;;  %v4430_v58 = vadd.f32 -0.28449672, %v4366_v57  ;;  %6347 = vrcp.f32 %v3919_v42  ;;  %v2685_v48 = vmul.f32 %v7294_v59, %v9968_v34  ;;  %v10044_v2 = vadd.f32 %v2552_v3, %v2416_v6  ;;  %v6342_v6 = vpop.eup %6341 }
 0x346   : > { %13017 = vst [vmem:[#allocation168_spill] sm:$0xff] %v10039_v56  ;;  %v10048_v49 = vmul.f32 %v7353_v30, %v13019_v62  ;;  %v10051_v5 = vmul.f32 0.5, %v9845_v19  ;;  %v4432_v12 = vadd.f32 -0.28449672, %v4368_v31  ;;  %v2820_v35 = vmul.f32 %v7341_v20, %v10010_v37  ;;  %v13021_v31 = vld [vmem:[#allocation65_spill] sm:$0xff] }
 0x347   : > { %13018 = vst [vmem:[#allocation180_spill] sm:$0xff] %v10044_v2  ;;  %v10056_v41 = vmul.f32 0.5, %v9849_v18  ;;  %v4494_v40 = vmul.f32 %v9970_v29, %v4430_v58  ;;  %v4825_v57 = vmul.f32 1.442695, %v4749_v15  ;;  %v4829_v42 = vmul.f32 1.442695, %v4751_v17 }
 0x348   : > { %13020 = vst [vmem:[#allocation185_spill] sm:$0xff] %v10048_v49  ;;  %v4496_v3 = vmul.f32 %v9981_v53, %v4432_v12  ;;  %v2884_v56 = vadd.f32 %v2820_v35, %v9941_v14  ;;  %v2956_v19 = vmul.f32 %v7344_v21, %v9938_v0  ;;  %v10065_v49 = vadd.f32 %v13021_v31, %v7303_v1  ;;  %v6344_v37 = vpop.eup %6343  ;;  %v13033_v2 = vld [vmem:[#allocation122_spill] sm:$0xff] }
 0x349   : > { %v4558_v62 = vadd.f32 0.2548296, %v4494_v40  ;;  %v10068_v18 = vadd.s32 232, %v7251_v36  ;;  %v1257_v58 = vadd.s32 240, %v7251_v36  ;;  %v2749_v15 = vadd.f32 %v2685_v48, %v9796_v22 }
 0x34a   : > { %13022 = vst [vmem:[#allocation42_spill] sm:$0xff] %v10065_v49  ;;  %v4560_v17 = vadd.f32 0.2548296, %v4496_v3  ;;  %vm5070_vm15 = vcmp.lt.f32.partialorder %v9869_v33, 0.0  ;;  %v10075_v14 = vmul.f32 %v7299_v63, %v10026_v60  ;;  %v10077_v12 = vadd.f32 %v2956_v19, %v2884_v56  ;;  %v13035_v33 = vld [vmem:[#allocation190_spill] sm:$0xff] }
 0x34b   : > { %v12383_v35 = vrot.slane %v10065_v49, 7  ;;  %v4622_v40 = vmul.f32 %v9970_v29, %v4558_v62  ;;  %vm5072_vm0 = vcmp.lt.f32.partialorder %v9878_v25, 0.0  ;;  %6349 = vpow2.f32 %v4825_v57 }
 0x34c   : > { %13023 = vst [vmem:[#allocation107_spill] sm:$0xff] %v10077_v12  ;;  %v1477_v31 = vand.u32 15, %v1257_v58  ;;  %v12382_v34 = vrot.slane %v10065_v49, 1  ;;  %v4624_v22 = vmul.f32 %v9981_v53, %v4560_v17  ;;  %6351 = vpow2.f32 %v4829_v42  ;;  %v13031_v12 = vld [vmem:[#allocation109_spill] sm:$0xff] }
 0x34d   : > { %v13024_v48 = vrot.slane %v9932_v44, 7  ;;  %v3056_v3 = vmul.f32 %v7353_v30, %v12964_v10  ;;  %v4942_v29 = vmul.f32 %v6342_v6, %v4622_v40  ;;  %v1470_v62 = vand.u32 15, %v10068_v18 }
 0x34e   : > { %vm10093_vm2 = vcmp.gt.s32.totalorder %v1477_v31, 0  ;;  %v13027_v53 = vrot.slane %v9932_v44, 1  ;;  %v10105_v19 = vpop.eup %6345  ;;  %v4944_v58 = vmul.f32 %v6344_v37, %v4624_v22  ;;  %v2553_v6 = vmul.f32 %v13002_v23, %v10065_v49  ;;  %v13030_v37 = vld [vmem:[#allocation182_spill] sm:$0xff] }
 0x34f   : > { %v1814_v56 = vsel %vm1803_vm1, %v13024_v48, %v12383_v35  ;;  %v2957_v18 = vmul.f32 %v13006_v8, %v10065_v49  ;;  %v10115_v17 = vpop.eup %6347  ;;  %v5006_v40 = vsub.f32 1.0, %v4942_v29  ;;  %v4109_v31 = vmul.f32 1.0614054, %v10105_v19  ;;  %v13032_v29 = vld [vmem:[#allocation112_spill] sm:$0xff] }
 0x350   : > { %v10103_v42 = vsel %vm2128_vm3, %v13027_v53, %v12382_v34  ;;  %v10109_v10 = vsel %vm10093_vm2, %v1814_v56, 0.0  ;;  %v13029_v53 = vld [vmem:[#allocation104_spill] sm:$0xff]  ;;  %v5008_v34 = vsub.f32 1.0, %v4944_v58  ;;  %v4111_v56 = vmul.f32 1.0614054, %v10115_v17 }
 0x351   : > { %13028 = vst [vmem:[#allocation133_spill] sm:$0xff] %v10109_v10  ;;  %v2417_v48 = vmul.f32 %v13001_v46, %v10109_v10  ;;  %v3118_v22 = vadd.f32 %v13030_v37, %v13029_v53  ;;  %v2821_v35 = vmul.f32 %v13003_v50, %v10109_v10  ;;  %v3120_v60 = vadd.f32 %v3056_v3, %v13031_v12  ;;  %v13034_v12 = vld [vmem:[#allocation123_spill] sm:$0xff] }
 0x352   : > { %v5134_v44 = vsub.f32 0.0, %v5006_v40  ;;  %v4173_v61 = vadd.f32 -1.4531521, %v4109_v31  ;;  %v3190_v8 = vmul.f32 %v8834_v9, %v13032_v29  ;;  %v5136_v49 = vsub.f32 0.0, %v5008_v34 }
 0x353   : > { %v10126_v30 = vadd.f32 %v2553_v6, %v2417_v48  ;;  %v4175_v46 = vadd.f32 -1.4531521, %v4111_v56  ;;  %v2885_v23 = vadd.f32 %v2821_v35, %v2749_v15  ;;  %v3192_v58 = vmul.f32 %v8834_v9, %v13033_v2 }
 0x354   : > { %v5198_v53 = vsel %vm5070_vm15, %v5134_v44, %v5006_v40  ;;  %v4237_v37 = vmul.f32 %v10105_v19, %v4173_v61  ;;  %v3254_v10 = vadd.f32 %v3190_v8, %v3118_v22  ;;  %v3462_v3 = vmul.f32 %v9811_v32, %v13034_v12  ;;  %v13036_v22 = vld [vmem:[#allocation129_spill] sm:$0xff] }
 0x355   : > { %v5200_v6 = vsel %vm5072_vm0, %v5136_v49, %v5008_v34  ;;  %v5262_v31 = vadd.f32 1.0, %v5198_v53  ;;  %v4239_v48 = vmul.f32 %v10115_v17, %v4175_v46  ;;  %v10140_v56 = vadd.f32 %v2957_v18, %v2885_v23  ;;  %v6350_v15 = vpop.eup %6349  ;;  %v13037_v49 = vld [vmem:[#allocation87_spill] sm:$0xff] }
 0x356   : > { %v5264_v35 = vadd.f32 1.0, %v5200_v6  ;;  %v4301_v2 = vadd.f32 1.4214138, %v4237_v37  ;;  %v3256_v29 = vadd.f32 %v3192_v58, %v3120_v60  ;;  %v3390_v44 = vadd.f32 %v13035_v33, %v3254_v10  ;;  %v6352_v40 = vpop.eup %6351  ;;  %v13039_v23 = vld [vmem:[#allocation59_spill] sm:$0xff] }
 0x357   : > { %v5326_v8 = vmul.f32 %v5262_v31, %v10051_v5  ;;  %v4303_v61 = vadd.f32 1.4214138, %v4239_v48  ;;  %v3464_v12 = vmul.f32 %v9811_v32, %v13036_v22  ;;  %v10148_v25 = vadd.f32 %v13037_v49, %v7318_v13  ;;  %v10163_v48 = vpop.f32.mrb[62].mxu0 }
 0x358   : > { %v5328_v34 = vmul.f32 %v5264_v35, %v10056_v41  ;;  %v4365_v46 = vmul.f32 %v10105_v19, %v4301_v2  ;;  %v3392_v18 = vadd.f32 %v13039_v23, %v3256_v29  ;;  %v3526_v60 = vadd.f32 %v3462_v3, %v3390_v44  ;;  %v10179_v44 = vpop.f32.mrb[63].mxu0 }
 0x359   : > { %13038 = vst [vmem:[#allocation65_spill] sm:$0xff] %v10148_v25  ;;  %v4367_v10 = vmul.f32 %v10115_v17, %v4303_v61  ;;  %vm10154_vm4 = vcmp.lt.s32.totalorder %v1470_v62, 15  ;;  %v12396_v5 = vrot.slane %v10148_v25, 7  ;;  %v12395_v53 = vrot.slane %v10148_v25, 1  ;;  %13044 = vst [vmem:[#allocation104_spill] sm:$0xff] %v10179_v44 }
 0x35a   : > { %v5384_v37 = vpack.c.bf16 %v5328_v34, %v5326_v8  ;;  %v4429_v6 = vadd.f32 -0.28449672, %v4365_v46  ;;  %v3528_v31 = vadd.f32 %v3464_v12, %v3392_v18  ;;  %v10161_v41 = vadd.f32 %v8892_v4, %v3526_v60  ;;  %v13045_v8 = vld [vmem:[#allocation78_spill] sm:$0xff]  ;;  %v13047_v46 = vld [vmem:[#allocation121_spill] sm:$0xff] }
 0x35b   : > { %v4431_v35 = vadd.f32 -0.28449672, %v4367_v10  ;;  %v13042_v62 = vrot.slane %v9938_v0, 7  ;;  %v13043_v2 = vrot.slane %v9938_v0, 1  ;;  %v2750_v33 = vadd.f32 %v10075_v14, %v9899_v39 }
 0x35c   : > { %v10183_v61 = vmul.f32 %v12931_v54, %v13045_v8  ;;  %5600 = vmatprep.mubr.bf16.mxu1 %v5384_v37  ;;  %v4493_v12 = vmul.f32 %v10105_v19, %v4429_v6  ;;  %v10187_v49 = vadd.f32 %v8892_v4, %v3528_v31  ;;  %v10190_v34 = vmul.f32 0.70710677, %v10161_v41 }
 0x35d   : > { %v1815_v3 = vsel %vm1803_vm1, %v13042_v62, %v12396_v5  ;;  %v2140_v29 = vsel %vm2128_vm3, %v13043_v2, %v12395_v53  ;;  %v10194_v23 = vmul.f32 %v12860_v16, %v13047_v46  ;;  %v3661_v39 = vmul.f32 0.5, %v9973_v24 }
 0x35e   : > { %13046 = vst [vmem:[#allocation182_spill] sm:$0xff] %v10183_v61  ;;  %v4495_v14 = vmul.f32 %v10115_v17, %v4431_v35  ;;  %v10200_v18 = vsel %vm10093_vm2, %v1815_v3, 0.0  ;;  %v3663_v60 = vmul.f32 0.5, %v9985_v55  ;;  %v4557_v10 = vadd.f32 0.2548296, %v4493_v12 }
 0x35f   : > { %13048 = vst [vmem:[#allocation109_spill] sm:$0xff] %v10194_v23  ;;  %13049 = vst [vmem:[#allocation112_spill] sm:$0xff] %v10200_v18  ;;  %v10206_v37 = vsel %vm10154_vm4, %v10103_v42, 0.0  ;;  %v10209_v6 = vmul.f32 0.70710677, %v10187_v49  ;;  %vm5069_vm5 = vcmp.lt.f32.partialorder %v9994_v11, 0.0  ;;  %v2418_v57 = vmul.f32 %v7278_v51, %v10200_v18 }
 0x360   : > { %13050 = vst [vmem:[#allocation122_spill] sm:$0xff] %v10206_v37  ;;  %v4559_v31 = vadd.f32 0.2548296, %v4495_v14  ;;  %v3794_v24 = vand.u32 2147483647, %v10190_v34  ;;  %v2554_v55 = vmul.f32 %v7282_v52, %v10148_v25  ;;  %v4621_v35 = vmul.f32 %v10105_v19, %v4557_v10 }
 0x361   : > { %v3796_v62 = vand.u32 2147483647, %v10209_v6  ;;  %v2822_v42 = vmul.f32 %v7341_v20, %v10200_v18  ;;  %v2958_v3 = vmul.f32 %v7344_v21, %v10148_v25  ;;  %vm5071_vm6 = vcmp.lt.f32.partialorder %v9999_v7, 0.0 }
 0x362   : > { %v4623_v2 = vmul.f32 %v10115_v17, %v4559_v31  ;;  %v3858_v8 = vmul.f32 0.3275911, %v3794_v24  ;;  %v4690_v12 = vmul.f32 %v3794_v24, %v3794_v24  ;;  %v10224_v46 = vadd.f32 %v2554_v55, %v2418_v57  ;;  %v13052_v57 = vld [vmem:[#allocation100_spill] sm:$0xff] }
 0x363   : > { %v4941_v14 = vmul.f32 %v6350_v15, %v4621_v35  ;;  %v3860_v53 = vmul.f32 0.3275911, %v3796_v62  ;;  %v4692_v5 = vmul.f32 %v3796_v62, %v3796_v62  ;;  %v2886_v61 = vadd.f32 %v2822_v42, %v2750_v33 }
 0x364   : > { %v4943_v23 = vmul.f32 %v6352_v40, %v4623_v2  ;;  %v3922_v19 = vadd.f32 1.0, %v3858_v8  ;;  %v10229_v10 = vsel %vm10154_vm4, %v2140_v29, 0.0  ;;  %v4754_v44 = vsub.f32 0.0, %v4690_v12 }
 0x365   : > { %13051 = vst [vmem:[#allocation123_spill] sm:$0xff] %v10229_v10  ;;  %v5005_v18 = vsub.f32 1.0, %v4941_v14  ;;  %v3924_v0 = vadd.f32 1.0, %v3860_v53  ;;  %v10231_v17 = vadd.f32 %v2958_v3, %v2886_v61  ;;  %v2687_v15 = vmul.f32 %v7294_v59, %v10206_v37  ;;  %v13053_v53 = vld [vmem:[#allocation179_spill] sm:$0xff]  ;;  %v13054_v61 = vld [vmem:[#allocation108_spill] sm:$0xff] }
 0x366   : > { %v5007_v31 = vsub.f32 1.0, %v4943_v23  ;;  %6353 = vrcp.f32 %v3922_v19  ;;  %v3055_v40 = vmul.f32 %v7347_v26, %v12987_v45  ;;  %v4756_v24 = vsub.f32 0.0, %v4692_v5  ;;  %v13055_v23 = vld [vmem:[#allocation110_spill] sm:$0xff]  ;;  %v13057_v5 = vld [vmem:[#allocation119_spill] sm:$0xff] }
 0x367   : > { %v5133_v33 = vsub.f32 0.0, %v5005_v18  ;;  %6355 = vrcp.f32 %v3924_v0  ;;  %v2688_v58 = vmul.f32 %v7299_v63, %v10229_v10  ;;  %v3117_v55 = vadd.f32 %v13053_v53, %v13052_v57  ;;  %v13056_v45 = vld [vmem:[#allocation118_spill] sm:$0xff]  ;;  %v13058_v19 = vld [vmem:[#allocation127_spill] sm:$0xff] }
 0x368   : > { %v5135_v29 = vsub.f32 0.0, %v5007_v31  ;;  %v3119_v35 = vadd.f32 %v3055_v40, %v13054_v61  ;;  %v3189_v62 = vmul.f32 %v12832_v47, %v13055_v23  ;;  %v4835_v3 = vmul.f32 1.442695, %v4754_v44  ;;  %v13062_v23 = vld [vmem:[#allocation31_spill] sm:$0xff] }
 0x369   : > { %v5197_v42 = vsel %vm5069_vm5, %v5133_v33, %v5005_v18  ;;  %v3191_v0 = vmul.f32 %v12832_v47, %v13056_v45  ;;  %v3461_v2 = vmul.f32 %v9922_v43, %v13057_v5  ;;  %v3463_v40 = vmul.f32 %v9922_v43, %v13058_v19  ;;  %v13060_v33 = vld [vmem:[#allocation188_spill] sm:$0xff] }
 0x36a   : > { %v5199_v8 = vsel %vm5071_vm6, %v5135_v29, %v5007_v31  ;;  %v5261_v12 = vadd.f32 1.0, %v5197_v42  ;;  %v3253_v14 = vadd.f32 %v3189_v62, %v3117_v55  ;;  %v10256_v11 = vadd.f32 %v9826_v38, %v7303_v1  ;;  %v13061_v31 = vld [vmem:[#allocation180_spill] sm:$0xff] }
 0x36b   : > { %v5263_v57 = vadd.f32 1.0, %v5199_v8  ;;  %v3255_v53 = vadd.f32 %v3191_v0, %v3119_v35  ;;  %v2751_v44 = vadd.f32 %v2687_v15, %v9996_v27  ;;  %v10262_v7 = vadd.f32 %v9830_v28, %v7318_v13  ;;  %v13063_v38 = vld [vmem:[#allocation80_spill] sm:$0xff]  ;;  %v13065_v15 = vld [vmem:[#allocation33_spill] sm:$0xff] }
 0x36c   : > { %13059 = vst [vmem:[#allocation190_spill] sm:$0xff] %v10256_v11  ;;  %v5325_v18 = vmul.f32 %v5261_v12, %v3661_v39  ;;  %v3389_v61 = vadd.f32 %v13060_v33, %v3253_v14  ;;  %v2752_v29 = vadd.f32 %v2688_v58, %v13061_v31  ;;  %v12400_v35 = vrot.slane %v10256_v11, 7  ;;  %v13071_v14 = vld [vmem:[#allocation60_spill] sm:$0xff] }
 0x36d   : > { %v5327_v55 = vmul.f32 %v5263_v57, %v3663_v60  ;;  %v3391_v62 = vadd.f32 %v13062_v23, %v3255_v53  ;;  %v12399_v42 = vrot.slane %v10256_v11, 1  ;;  %v10270_v45 = vmul.f32 %v12931_v54, %v13063_v38  ;;  %v13066_v60 = vld [vmem:[#allocation42_spill] sm:$0xff]  ;;  %v13072_v57 = vld [vmem:[#allocation32_spill] sm:$0xff] }
 0x36e   : > { %v4839_v27 = vmul.f32 1.442695, %v4756_v24  ;;  %v3525_v39 = vadd.f32 %v3461_v2, %v3389_v61  ;;  %v2555_v0 = vmul.f32 %v13065_v15, %v10256_v11  ;;  %v13067_v58 = vrot.slane %v13066_v60, 7  ;;  %v13073_v31 = vld [vmem:[#allocation40_spill] sm:$0xff] }
 0x36f   : > { %13064 = vst [vmem:[#allocation129_spill] sm:$0xff] %v10270_v45  ;;  %v5383_v28 = vpack.c.bf16 %v5327_v55, %v5325_v18  ;;  %v3527_v5 = vadd.f32 %v3463_v40, %v3391_v62  ;;  %v13069_v12 = vrot.slane %v13066_v60, 1  ;;  %v12406_v33 = vrot.slane %v10262_v7, 7 }
 0x370   : > { %v10280_v8 = vsel %vm1803_vm1, %v13067_v58, %v12400_v35  ;;  %v10290_v2 = vpop.eup %6353  ;;  %v10293_v40 = vadd.f32 %v13071_v14, %v3525_v39  ;;  %v10304_v55 = vmul.f32 %v7347_v26, %v13073_v31  ;;  %6357 = vpow2.f32 %v4835_v3 }
 0x371   : > { %13068 = vst [vmem:[#allocation87_spill] sm:$0xff] %v10280_v8  ;;  %v10288_v24 = vsel %vm2128_vm3, %v13069_v12, %v12399_v42  ;;  %v2419_v53 = vmul.f32 %v13072_v57, %v10280_v8  ;;  %v2823_v18 = vmul.f32 %v13003_v50, %v10280_v8  ;;  %v10300_v61 = vpop.eup %6355  ;;  %5601 = vmatmul.mubr.bf16.gmra.mrb[16].mxu1 %v5383_v28  ;;  %v4114_v23 = vmul.f32 1.0614054, %v10290_v2  ;;  %v13075_v42 = vld [vmem:[#allocation35_spill] sm:$0xff] }
 0x372   : > { %13070 = vst [vmem:[#allocation59_spill] sm:$0xff] %v10288_v24  ;;  %13074 = vst [vmem:[#allocation78_spill] sm:$0xff] %v10304_v55  ;;  %v10308_v62 = vadd.f32 %v13071_v14, %v3527_v5  ;;  %v4116_v38 = vmul.f32 1.0614054, %v10300_v61  ;;  %v10312_v39 = vmul.f32 0.70710677, %v10293_v40  ;;  %v2959_v3 = vmul.f32 %v13075_v42, %v10256_v11 }
 0x373   : > { %v10314_v15 = vadd.f32 %v2555_v0, %v2419_v53  ;;  %v4178_v12 = vadd.f32 -1.4531521, %v4114_v23  ;;  %v2887_v28 = vadd.f32 %v2823_v18, %v2751_v44  ;;  %6359 = vpow2.f32 %v4839_v27 }
 0x374   : > { %v10318_v57 = vmul.f32 0.70710677, %v10308_v62  ;;  %v4180_v35 = vadd.f32 -1.4531521, %v4116_v38  ;;  %v3793_v5 = vand.u32 2147483647, %v10312_v39  ;;  %v2556_v18 = vmul.f32 %v7282_v52, %v10262_v7 }
 0x375   : > { %v13076_v8 = vrot.slane %v10148_v25, 7  ;;  %v4242_v53 = vmul.f32 %v10290_v2, %v4178_v12  ;;  %v10333_v44 = vadd.f32 %v2959_v3, %v2887_v28  ;;  %v13079_v37 = vrot.slane %v10262_v7, 1 }
 0x376   : > { %v3795_v23 = vand.u32 2147483647, %v10318_v57  ;;  %v4244_v27 = vmul.f32 %v10300_v61, %v4180_v35  ;;  %v3857_v38 = vmul.f32 0.3275911, %v3793_v5  ;;  %v4689_v58 = vmul.f32 %v3793_v5, %v3793_v5 }
 0x377   : > { %v10329_v0 = vsel %vm1803_vm1, %v13076_v8, %v12406_v33  ;;  %13078 = vst [vmem:[#allocation100_spill] sm:$0xff] %v10333_v44  ;;  %v13080_v10 = vrot.slane %v10148_v25, 1  ;;  %v4306_v12 = vadd.f32 1.4214138, %v4242_v53  ;;  %vm5074_vm7 = vcmp.lt.f32.partialorder %v10190_v34, 0.0  ;;  %v13100_v44 = vld [vmem:[#allocation128_spill] sm:$0xff] }
 0x378   : > { %13077 = vst [vmem:[#allocation121_spill] sm:$0xff] %v10329_v0  ;;  %v3859_v33 = vmul.f32 0.3275911, %v3795_v23  ;;  %v4691_v55 = vmul.f32 %v3795_v23, %v3795_v23  ;;  %v2420_v28 = vmul.f32 %v7278_v51, %v10329_v0  ;;  %v4308_v3 = vadd.f32 1.4214138, %v4244_v27 }
 0x379   : > { %v10344_v8 = vsel %vm2128_vm3, %v13080_v10, %v13079_v37  ;;  %v3921_v52 = vadd.f32 1.0, %v3857_v38  ;;  %v4753_v45 = vsub.f32 0.0, %v4689_v58  ;;  %v2824_v35 = vmul.f32 %v7341_v20, %v10329_v0  ;;  %v13083_v37 = vld [vmem:[#allocation77_spill] sm:$0xff] }
 0x37a   : > { %13081 = vst [vmem:[#allocation179_spill] sm:$0xff] %v10344_v8  ;;  %v4370_v5 = vmul.f32 %v10290_v2, %v4306_v12  ;;  %v3923_v31 = vadd.f32 1.0, %v3859_v33  ;;  %v4755_v25 = vsub.f32 0.0, %v4691_v55  ;;  %v10351_v60 = vadd.f32 %v2556_v18, %v2420_v28  ;;  %v13084_v10 = vld [vmem:[#allocation37_spill] sm:$0xff]  ;;  %v6358_v27 = vpop.eup %6357  ;;  %v13086_v12 = vld [vmem:[#allocation120_spill] sm:$0xff]  ;;  %v13088_v55 = vld [vmem:[#allocation151_spill] sm:$0xff] }
 0x37b   : > { %v10355_v53 = vmul.f32 %v13084_v10, %v13083_v37  ;;  %v4372_v23 = vmul.f32 %v10300_v61, %v4308_v3  ;;  %6361 = vrcp.f32 %v3921_v52  ;;  %v2888_v51 = vadd.f32 %v2824_v35, %v2752_v29  ;;  %v13090_v3 = vld [vmem:[#allocation55_spill] sm:$0xff] }
 0x37c   : > { %13082 = vst [vmem:[#allocation108_spill] sm:$0xff] %v10351_v60  ;;  %v4434_v38 = vadd.f32 -0.28449672, %v4370_v5  ;;  %6363 = vrcp.f32 %v3923_v31  ;;  %v4833_v58 = vmul.f32 1.442695, %v4753_v45  ;;  %v2960_v0 = vmul.f32 %v7344_v21, %v10262_v7 }
 0x37d   : > { %13085 = vst [vmem:[#allocation110_spill] sm:$0xff] %v10355_v53  ;;  %v10362_v33 = vmul.f32 %v12860_v16, %v13086_v12  ;;  %v10366_v18 = vmul.f32 %v12931_v54, %v13088_v55  ;;  %v4436_v28 = vadd.f32 -0.28449672, %v4372_v23  ;;  %v10370_v52 = vadd.f32 %v13090_v3, %v7303_v1  ;;  %v6360_v5 = vpop.eup %6359 }
 0x37e   : > { %v10373_v29 = vmul.f32 0.5, %v10161_v41  ;;  %v4498_v45 = vmul.f32 %v10290_v2, %v4434_v38  ;;  %v4837_v31 = vmul.f32 1.442695, %v4755_v25  ;;  %v10376_v35 = vadd.f32 %v2960_v0, %v2888_v51 }
 0x37f   : > { %13087 = vst [vmem:[#allocation118_spill] sm:$0xff] %v10362_v33  ;;  %13089 = vst [vmem:[#allocation119_spill] sm:$0xff] %v10366_v18  ;;  %v4500_v12 = vmul.f32 %v10300_v61, %v4436_v28  ;;  %v1259_v53 = vadd.s32 256, %v7251_v36  ;;  %v12411_v55 = vrot.slane %v10370_v52, 7  ;;  %v12410_v23 = vrot.slane %v10370_v52, 1  ;;  %v13098_v33 = vld [vmem:[#allocation46_spill] sm:$0xff] }
 0x380   : > { %13091 = vst [vmem:[#allocation127_spill] sm:$0xff] %v10370_v52  ;;  %13092 = vst [vmem:[#allocation188_spill] sm:$0xff] %v10376_v35  ;;  %v3668_v3 = vmul.f32 0.5, %v10187_v49  ;;  %v4562_v18 = vadd.f32 0.2548296, %v4498_v45  ;;  %6365 = vpow2.f32 %v4833_v58  ;;  %v2689_v41 = vmul.f32 %v7294_v59, %v10288_v24 }
 0x381   : > { %v4564_v38 = vadd.f32 0.2548296, %v4500_v12  ;;  %v1491_v25 = vand.u32 15, %v1259_v53  ;;  %v13093_v0 = vrot.slane %v10256_v11, 7  ;;  %v13094_v49 = vrot.slane %v10256_v11, 1 }
 0x382   : > { %v4626_v28 = vmul.f32 %v10290_v2, %v4562_v18  ;;  %vm5076_vm8 = vcmp.lt.f32.partialorder %v10209_v6, 0.0  ;;  %6367 = vpow2.f32 %v4837_v31  ;;  %v2753_v53 = vadd.f32 %v2689_v41, %v10126_v30  ;;  %v13106_v6 = vld [vmem:[#allocation103_spill] sm:$0xff] }
 0x383   : > { %v1810_v51 = vsel %vm1803_vm1, %v13093_v0, %v12411_v55  ;;  %v10398_v58 = vsel %vm2128_vm3, %v13094_v49, %v12410_v23  ;;  %v4628_v45 = vmul.f32 %v10300_v61, %v4564_v38  ;;  %v10405_v12 = vadd.s32 248, %v7251_v36 }
 0x384   : > { %vm10407_vm9 = vcmp.gt.s32.totalorder %v1491_v25, 0  ;;  %v3093_v49 = vmul.f32 %v7347_v26, %v10288_v24  ;;  %v4946_v23 = vmul.f32 %v6358_v27, %v4626_v28  ;;  %v2961_v18 = vmul.f32 %v13075_v42, %v10370_v52  ;;  %v13097_v24 = vld [vmem:[#allocation117_spill] sm:$0xff] }
 0x385   : > { %v2012_v2 = vsel %vm10407_vm9, %v1810_v51, 0.0  ;;  %v3365_v30 = vmul.f32 %v12931_v54, %v10370_v52  ;;  %v10419_v61 = vpop.eup %6361  ;;  %v4948_v31 = vmul.f32 %v6360_v5, %v4628_v45  ;;  %v3060_v28 = vmul.f32 %v13084_v10, %v13036_v22 }
 0x386   : > { %v2825_v41 = vmul.f32 %v13003_v50, %v2012_v2  ;;  %v3157_v38 = vadd.f32 %v3093_v49, %v10140_v56  ;;  %v3229_v25 = vmul.f32 %v12832_v47, %v2012_v2  ;;  %v10424_v55 = vpop.eup %6363  ;;  %v5010_v27 = vsub.f32 1.0, %v4946_v23  ;;  %v13099_v49 = vld [vmem:[#allocation125_spill] sm:$0xff] }
 0x387   : > { %v4113_v51 = vmul.f32 1.0614054, %v10419_v61  ;;  %v3122_v37 = vadd.f32 %v13098_v33, %v13097_v24  ;;  %v5012_v11 = vsub.f32 1.0, %v4948_v31  ;;  %v4115_v5 = vmul.f32 1.0614054, %v10424_v55 }
 0x388   : > { %v2889_v45 = vadd.f32 %v2825_v41, %v2753_v53  ;;  %v3293_v35 = vadd.f32 %v3229_v25, %v3157_v38  ;;  %v5138_v60 = vsub.f32 0.0, %v5010_v27  ;;  %v3124_v2 = vadd.f32 %v3060_v28, %v13099_v49  ;;  %v13102_v53 = vld [vmem:[#allocation134_spill] sm:$0xff] }
 0x389   : > { %v4177_v56 = vadd.f32 -1.4531521, %v4113_v51  ;;  %v3194_v23 = vmul.f32 %v8834_v9, %v13100_v44  ;;  %v5140_v42 = vsub.f32 0.0, %v5012_v11  ;;  %v4179_v50 = vadd.f32 -1.4531521, %v4115_v5  ;;  %v13107_v49 = vld [vmem:[#allocation66_spill] sm:$0xff] }
 0x38a   : > { %v10435_v14 = vadd.f32 %v2961_v18, %v2889_v45  ;;  %v10437_v22 = vadd.f32 %v3365_v30, %v3293_v35  ;;  %v6366_v52 = vpop.eup %6365  ;;  %v5202_v24 = vsel %vm5074_vm7, %v5138_v60, %v5010_v27  ;;  %v3196_v31 = vmul.f32 %v8834_v9, %v13102_v53  ;;  %v13103_v18 = vld [vmem:[#allocation135_spill] sm:$0xff]  ;;  %v13104_v60 = vld [vmem:[#allocation52_spill] sm:$0xff] }
 0x38b   : > { %v4241_v33 = vmul.f32 %v10419_v61, %v4177_v56  ;;  %v3258_v41 = vadd.f32 %v3194_v23, %v3122_v37  ;;  %v5204_v38 = vsel %vm5076_vm8, %v5140_v42, %v5012_v11  ;;  %v5266_v44 = vadd.f32 1.0, %v5202_v24  ;;  %v13105_v56 = vld [vmem:[#allocation141_spill] sm:$0xff] }
 0x38c   : > { %13101 = vst [vmem:[#allocation180_spill] sm:$0xff] %v10437_v22  ;;  %v4243_v25 = vmul.f32 %v10424_v55, %v4179_v50  ;;  %v3466_v35 = vmul.f32 %v9811_v32, %v13103_v18  ;;  %v6368_v30 = vpop.eup %6367  ;;  %v5268_v51 = vadd.f32 1.0, %v5204_v38  ;;  %v3260_v34 = vadd.f32 %v3196_v31, %v3124_v2  ;;  %v13124_v22 = vld [vmem:[#allocation130_spill] sm:$0xff] }
 0x38d   : > { %v4305_v28 = vadd.f32 1.4214138, %v4241_v33  ;;  %v3394_v27 = vadd.f32 %v13104_v60, %v3258_v41  ;;  %v5330_v5 = vmul.f32 %v5266_v44, %v10373_v29  ;;  %v3468_v37 = vmul.f32 %v9811_v32, %v13105_v56 }
 0x38e   : > { %v4307_v45 = vadd.f32 1.4214138, %v4243_v25  ;;  %v10455_v11 = vadd.f32 %v13106_v6, %v7318_v13  ;;  %v5332_v50 = vmul.f32 %v5268_v51, %v3668_v3  ;;  %v3396_v23 = vadd.f32 %v13107_v49, %v3260_v34  ;;  %v13114_v49 = vld [vmem:[#allocation95_spill] sm:$0xff] }
 0x38f   : > { %v4369_v42 = vmul.f32 %v10419_v61, %v4305_v28  ;;  %v3530_v24 = vadd.f32 %v3466_v35, %v3394_v27  ;;  %v2690_v53 = vmul.f32 %v7299_v63, %v10344_v8  ;;  %v13108_v44 = vrot.slane %v10262_v7, 7 }
 0x390   : > { %v4371_v2 = vmul.f32 %v10424_v55, %v4307_v45  ;;  %v12420_v33 = vrot.slane %v10455_v11, 7  ;;  %v12419_v29 = vrot.slane %v10455_v11, 1  ;;  %v5386_v32 = vpack.c.bf16 %v5332_v50, %v5330_v5  ;;  %v13110_v5 = vld [vmem:[#allocation205_spill] sm:$0xff] }
 0x391   : > { %v4433_v31 = vadd.f32 -0.28449672, %v4369_v42  ;;  %v3532_v41 = vadd.f32 %v3468_v37, %v3396_v23  ;;  %v10465_v38 = vadd.f32 %v8892_v4, %v3530_v24  ;;  %v13109_v18 = vrot.slane %v10262_v7, 1  ;;  %v13111_v37 = vld [vmem:[#allocation91_spill] sm:$0xff] }
 0x392   : > { %v4435_v3 = vadd.f32 -0.28449672, %v4371_v2  ;;  %v1811_v25 = vsel %vm1803_vm1, %v13108_v44, %v12420_v33  ;;  %v2754_v51 = vadd.f32 %v2690_v53, %v10224_v46  ;;  %5608 = vmatprep.mubr.bf16.mxu1 %v5386_v32  ;;  %v1484_v34 = vand.u32 15, %v10405_v12  ;;  %v13113_v12 = vld [vmem:[#allocation101_spill] sm:$0xff]  ;;  %v13143_v44 = vld [vmem:[#allocation35_spill] sm:$0xff] }
 0x393   : > { %v10479_v35 = vsel %vm2128_vm3, %v13109_v18, %v12419_v29  ;;  %v4497_v28 = vmul.f32 %v10419_v61, %v4433_v31  ;;  %v10485_v60 = vadd.f32 %v8892_v4, %v3532_v41  ;;  %v10488_v27 = vmul.f32 0.70710677, %v10465_v38 }
 0x394   : > { %v10492_v45 = vmul.f32 %v12860_v16, %v13110_v5  ;;  %v10496_v6 = vmul.f32 %v7347_v26, %v13111_v37  ;;  %v4499_v46 = vmul.f32 %v10424_v55, %v4435_v3  ;;  %v2013_v50 = vsel %vm10407_vm9, %v1811_v25, 0.0 }
 0x395   : > { %v10503_v42 = vmul.f32 %v12931_v54, %v13113_v12  ;;  %v10507_v23 = vmul.f32 %v13084_v10, %v13114_v49  ;;  %v4561_v24 = vadd.f32 0.2548296, %v4497_v28  ;;  %v10510_v2 = vmul.f32 0.70710677, %v10485_v60 }
 0x396   : > { %13112 = vst [vmem:[#allocation31_spill] sm:$0xff] %v10496_v6  ;;  %v3665_v53 = vmul.f32 0.5, %v10293_v40  ;;  %v4563_v32 = vadd.f32 0.2548296, %v4499_v46  ;;  %v3798_v31 = vand.u32 2147483647, %v10488_v27  ;;  %v2826_v0 = vmul.f32 %v7341_v20, %v2013_v50 }
 0x397   : > { %13115 = vst [vmem:[#allocation80_spill] sm:$0xff] %v10507_v23  ;;  %v3667_v41 = vmul.f32 0.5, %v10308_v62  ;;  %v4625_v3 = vmul.f32 %v10419_v61, %v4561_v24  ;;  %vm10517_vm10 = vcmp.lt.s32.totalorder %v1484_v34, 15  ;;  %v3800_v25 = vand.u32 2147483647, %v10510_v2 }
 0x398   : > { %v4627_v18 = vmul.f32 %v10424_v55, %v4563_v32  ;;  %v3862_v28 = vmul.f32 0.3275911, %v3798_v31  ;;  %v2890_v5 = vadd.f32 %v2826_v0, %v2754_v51  ;;  %v2962_v40 = vmul.f32 %v7344_v21, %v10455_v11 }
 0x399   : > { %v4945_v46 = vmul.f32 %v6366_v52, %v4625_v3  ;;  %vm5073_vm11 = vcmp.lt.f32.partialorder %v10312_v39, 0.0  ;;  %v3864_v12 = vmul.f32 0.3275911, %v3800_v25  ;;  %v3094_v62 = vmul.f32 %v13084_v10, %v10344_v8 }
 0x39a   : > { %v4947_v61 = vmul.f32 %v6368_v30, %v4627_v18  ;;  %v10531_v34 = vsel %vm10517_vm10, %v10398_v58, 0.0  ;;  %v3926_v24 = vadd.f32 1.0, %v3862_v28  ;;  %v10533_v55 = vadd.f32 %v2962_v40, %v2890_v5 }
 0x39b   : > { %13118 = vst [vmem:[#allocation33_spill] sm:$0xff] %v10531_v34  ;;  %v5009_v51 = vsub.f32 1.0, %v4945_v46  ;;  %v3928_v32 = vadd.f32 1.0, %v3864_v12  ;;  %v4694_v0 = vmul.f32 %v3798_v31, %v3798_v31  ;;  %v3158_v52 = vadd.f32 %v3094_v62, %v10231_v17  ;;  %v13119_v46 = vld [vmem:[#allocation116_spill] sm:$0xff]  ;;  %v13121_v62 = vld [vmem:[#allocation126_spill] sm:$0xff] }
 0x39c   : > { %v5011_v3 = vsub.f32 1.0, %v4947_v61  ;;  %vm5075_vm12 = vcmp.lt.f32.partialorder %v10318_v57, 0.0  ;;  %6369 = vrcp.f32 %v3926_v24  ;;  %v3230_v29 = vmul.f32 %v8834_v9, %v2013_v50  ;;  %v13120_v50 = vld [vmem:[#allocation29_spill] sm:$0xff] }
 0x39d   : > { %v5137_v30 = vsub.f32 0.0, %v5009_v51  ;;  %v2691_v18 = vmul.f32 %v7294_v59, %v10531_v34  ;;  %6371 = vrcp.f32 %v3928_v32  ;;  %v4696_v58 = vmul.f32 %v3800_v25, %v3800_v25 }
 0x39e   : > { %v5139_v28 = vsub.f32 0.0, %v5011_v3  ;;  %v3294_v5 = vadd.f32 %v3230_v29, %v3158_v52  ;;  %v3366_v40 = vmul.f32 %v12860_v16, %v10455_v11  ;;  %v3059_v17 = vmul.f32 %v7347_v26, %v13058_v19  ;;  %v13123_v29 = vld [vmem:[#allocation124_spill] sm:$0xff] }
 0x39f   : > { %v5201_v57 = vsel %vm5073_vm11, %v5137_v30, %v5009_v51  ;;  %v4758_v31 = vsub.f32 0.0, %v4694_v0  ;;  %v3121_v12 = vadd.f32 %v13120_v50, %v13119_v46  ;;  %v3193_v59 = vmul.f32 %v12832_v47, %v13121_v62  ;;  %v13125_v0 = vld [vmem:[#allocation131_spill] sm:$0xff] }
 0x3a0   : > { %v5203_v61 = vsel %vm5075_vm12, %v5139_v28, %v5011_v3  ;;  %v5265_v25 = vadd.f32 1.0, %v5201_v57  ;;  %v10550_v24 = vadd.f32 %v3366_v40, %v3294_v5  ;;  %v3123_v32 = vadd.f32 %v3059_v17, %v13123_v29  ;;  %v13126_v40 = vld [vmem:[#allocation45_spill] sm:$0xff]  ;;  %v13127_v57 = vld [vmem:[#allocation138_spill] sm:$0xff] }
 0x3a1   : > { %v5267_v52 = vadd.f32 1.0, %v5203_v61  ;;  %v4760_v33 = vsub.f32 0.0, %v4696_v58  ;;  %v3195_v19 = vmul.f32 %v12832_v47, %v13124_v22  ;;  %v3257_v39 = vadd.f32 %v3193_v59, %v3121_v12 }
 0x3a2   : > { %13122 = vst [vmem:[#allocation32_spill] sm:$0xff] %v10550_v24  ;;  %v5329_v51 = vmul.f32 %v5265_v25, %v3665_v53  ;;  %v3465_v30 = vmul.f32 %v9922_v43, %v13125_v0  ;;  %v10559_v46 = vadd.f32 %v10163_v48, %v7303_v1  ;;  %v1260_v3 = vadd.s32 264, %v7251_v36  ;;  %v13128_v1 = vld [vmem:[#allocation114_spill] sm:$0xff] }
 0x3a3   : > { %v5331_v28 = vmul.f32 %v5267_v52, %v3667_v41  ;;  %v3259_v5 = vadd.f32 %v3195_v19, %v3123_v32  ;;  %v3393_v17 = vadd.f32 %v13126_v40, %v3257_v39  ;;  %v3467_v58 = vmul.f32 %v9922_v43, %v13127_v57  ;;  %v13129_v41 = vld [vmem:[#allocation76_spill] sm:$0xff]  ;;  %v13132_v19 = vld [vmem:[#allocation127_spill] sm:$0xff] }
 0x3a4   : > { %v1498_v50 = vand.u32 15, %v1260_v3  ;;  %v12421_v22 = vrot.slane %v10559_v46, 7  ;;  %v2122_v53 = vrot.slane %v10559_v46, 1  ;;  %v2755_v12 = vadd.f32 %v2691_v18, %v10314_v15  ;;  %v13130_v32 = vld [vmem:[#allocation96_spill] sm:$0xff] }
 0x3a5   : > { %v5385_v62 = vpack.c.bf16 %v5331_v28, %v5329_v51  ;;  %v4843_v59 = vmul.f32 1.442695, %v4758_v31  ;;  %v3395_v48 = vadd.f32 %v13128_v1, %v3259_v5  ;;  %v3529_v61 = vadd.f32 %v3465_v30, %v3393_v17  ;;  %v13134_v30 = vld [vmem:[#allocation60_spill] sm:$0xff]  ;;  %v13137_v5 = vld [vmem:[#allocation34_spill] sm:$0xff] }
 0x3a6   : > { %v10569_v25 = vpop.eup %6369  ;;  %v10573_v29 = vmul.f32 %v12860_v16, %v13129_v41  ;;  %v10577_v43 = vmul.f32 %v12931_v54, %v13130_v32  ;;  %v4847_v52 = vmul.f32 1.442695, %v4760_v33  ;;  %v13133_v15 = vrot.slane %v13132_v19, 7  ;;  %v13141_v41 = vld [vmem:[#allocation36_spill] sm:$0xff] }
 0x3a7   : > { %v10585_v31 = vpop.eup %6371  ;;  %5609 = vmatmul.mubr.bf16.gmra.mrb[20].mxu1 %v5385_v62  ;;  %v3095_v39 = vmul.f32 %v7347_v26, %v10531_v34  ;;  %v4118_v51 = vmul.f32 1.0614054, %v10569_v25  ;;  %v3531_v0 = vadd.f32 %v3467_v58, %v3395_v48  ;;  %v10591_v3 = vadd.f32 %v13134_v30, %v3529_v61  ;;  %v13144_v34 = vld [vmem:[#allocation100_spill] sm:$0xff] }
 0x3a8   : > { %13131 = vst [vmem:[#allocation37_spill] sm:$0xff] %v10577_v43  ;;  %v1808_v18 = vsel %vm1803_vm1, %v13133_v15, %v12421_v22  ;;  %v4120_v33 = vmul.f32 1.0614054, %v10585_v31  ;;  %vm10594_vm13 = vcmp.lt.s32.totalorder %v1498_v50, 15  ;;  %v2131_v40 = vsel %vm2128_vm3, %v2122_v53, %v13137_v5 }
 0x3a9   : > { %v13138_v17 = vrot.slane %v13132_v19, 1  ;;  %v4182_v58 = vadd.f32 -1.4531521, %v4118_v51  ;;  %6373 = vpow2.f32 %v4843_v59  ;;  %v10608_v1 = vadd.f32 %v13134_v30, %v3531_v0 }
 0x3aa   : > { %v10611_v50 = vmul.f32 0.70710677, %v10591_v3  ;;  %v4184_v48 = vadd.f32 -1.4531521, %v4120_v33  ;;  %6375 = vpow2.f32 %v4847_v52  ;;  %v10616_v61 = vsel %vm10517_vm10, %v10479_v35, 0.0 }
 0x3ab   : > { %v10605_v62 = vsel %vm2128_vm3, %v13138_v17, %v2122_v53  ;;  %13140 = vst [vmem:[#allocation151_spill] sm:$0xff] %v10616_v61  ;;  %v2827_v32 = vmul.f32 %v13141_v41, %v1808_v18  ;;  %v4246_v53 = vmul.f32 %v10569_v25, %v4182_v58  ;;  %v10621_v19 = vmul.f32 0.70710677, %v10608_v1 }
 0x3ac   : > { %13139 = vst [vmem:[#allocation120_spill] sm:$0xff] %v10605_v62  ;;  %v3797_v59 = vand.u32 2147483647, %v10611_v50  ;;  %v10626_v15 = vsel %vm10594_vm13, %v2131_v40, 0.0  ;;  %v4248_v52 = vmul.f32 %v10585_v31, %v4184_v48  ;;  %v2963_v35 = vmul.f32 %v13143_v44, %v10559_v46 }
 0x3ad   : > { %13142 = vst [vmem:[#allocation55_spill] sm:$0xff] %v10626_v15  ;;  %v2891_v51 = vadd.f32 %v2827_v32, %v2755_v12  ;;  %v3097_v0 = vmul.f32 %v7347_v26, %v10605_v62  ;;  %v4310_v33 = vadd.f32 1.4214138, %v4246_v53  ;;  %v3799_v17 = vand.u32 2147483647, %v10621_v19 }
 0x3ae   : > { %v3861_v58 = vmul.f32 0.3275911, %v3797_v59  ;;  %v4693_v41 = vmul.f32 %v3797_v59, %v3797_v59  ;;  %v4312_v22 = vadd.f32 1.4214138, %v4248_v52  ;;  %v3099_v40 = vmul.f32 %v7347_v26, %v10626_v15  ;;  %v13146_v59 = vld [vmem:[#allocation98_spill] sm:$0xff]  ;;  %v13162_v15 = vld [vmem:[#allocation140_spill] sm:$0xff] }
 0x3af   : > { %v3027_v24 = vadd.f32 %v2963_v35, %v2891_v51  ;;  %v3159_v8 = vadd.f32 %v3095_v39, %v13144_v34  ;;  %v4374_v12 = vmul.f32 %v10569_v25, %v4310_v33  ;;  %v3863_v48 = vmul.f32 0.3275911, %v3799_v17 }
 0x3b0   : > { %v3925_v32 = vadd.f32 1.0, %v3861_v58  ;;  %v4695_v44 = vmul.f32 %v3799_v17, %v3799_v17  ;;  %v4376_v43 = vmul.f32 %v10585_v31, %v4312_v22  ;;  %v4757_v62 = vsub.f32 0.0, %v4693_v41 }
 0x3b1   : > { %v10640_v53 = vadd.f32 %v3097_v0, %v10435_v14  ;;  %v10642_v6 = vadd.f32 %v3099_v40, %v3027_v24  ;;  %v10646_v52 = vmul.f32 %v12860_v16, %v13146_v59  ;;  %v4438_v51 = vadd.f32 -0.28449672, %v4374_v12  ;;  %v13148_v0 = vld [vmem:[#allocation178_spill] sm:$0xff]  ;;  %v13150_v59 = vld [vmem:[#allocation104_spill] sm:$0xff] }
 0x3b2   : > { %v3927_v35 = vadd.f32 1.0, %v3863_v48  ;;  %6377 = vrcp.f32 %v3925_v32  ;;  %v4440_v34 = vadd.f32 -0.28449672, %v4376_v43  ;;  %v2692_v39 = vmul.f32 %v7299_v63, %v10616_v61 }
 0x3b3   : > { %13145 = vst [vmem:[#allocation117_spill] sm:$0xff] %v10640_v53  ;;  %13147 = vst [vmem:[#allocation46_spill] sm:$0xff] %v10646_v52  ;;  %v3096_v22 = vmul.f32 %v13084_v10, %v10616_v61  ;;  %v3231_v33 = vmul.f32 %v12832_v47, %v1808_v18  ;;  %v6374_v14 = vpop.eup %6373  ;;  %v10655_v24 = vmul.f32 %v12931_v54, %v13148_v0  ;;  %v4759_v58 = vsub.f32 0.0, %v4695_v44  ;;  %v13152_v44 = vld [vmem:[#allocation108_spill] sm:$0xff] }
 0x3b4   : > { %v4502_v17 = vmul.f32 %v10569_v25, %v4438_v51  ;;  %6379 = vrcp.f32 %v3927_v35  ;;  %v6376_v41 = vpop.eup %6375  ;;  %v4504_v43 = vmul.f32 %v10585_v31, %v4440_v34  ;;  %v4841_v40 = vmul.f32 1.442695, %v4757_v62  ;;  %v13153_v34 = vld [vmem:[#allocation188_spill] sm:$0xff] }
 0x3b5   : > { %13149 = vst [vmem:[#allocation125_spill] sm:$0xff] %v10655_v24  ;;  %v3295_v12 = vadd.f32 %v3231_v33, %v3159_v8  ;;  %v3367_v63 = vmul.f32 %v12931_v54, %v10559_v46  ;;  %v3670_v48 = vmul.f32 0.5, %v10465_v38  ;;  %v3672_v18 = vmul.f32 0.5, %v10485_v60 }
 0x3b6   : > { %v4566_v32 = vadd.f32 0.2548296, %v4502_v17  ;;  %v10665_v0 = vadd.f32 %v13150_v59, %v7318_v13  ;;  %v4568_v51 = vadd.f32 0.2548296, %v4504_v43  ;;  %v2756_v53 = vadd.f32 %v2692_v39, %v13152_v44 }
 0x3b7   : > { %v10667_v35 = vadd.f32 %v3367_v63, %v3295_v12  ;;  %v3160_v62 = vadd.f32 %v3096_v22, %v13153_v34  ;;  %vm5078_vm14 = vcmp.lt.f32.partialorder %v10488_v27, 0.0  ;;  %vm5080_vm15 = vcmp.lt.f32.partialorder %v10510_v2, 0.0  ;;  %v13165_v27 = vld [vmem:[#allocation146_spill] sm:$0xff] }
 0x3b8   : > { %v4630_v8 = vmul.f32 %v10569_v25, %v4566_v32  ;;  %v12425_v38 = vrot.slane %v10665_v0, 7  ;;  %v2123_v60 = vrot.slane %v10665_v0, 1  ;;  %v4632_v33 = vmul.f32 %v10585_v31, %v4568_v51 }
 0x3b9   : > { %13151 = vst [vmem:[#allocation128_spill] sm:$0xff] %v10667_v35  ;;  %6381 = vpow2.f32 %v4841_v40  ;;  %v4845_v13 = vmul.f32 1.442695, %v4759_v58  ;;  %v13154_v39 = vrot.slane %v10455_v11, 7  ;;  %v2964_v43 = vmul.f32 %v7344_v21, %v10665_v0 }
 0x3ba   : > { %v4950_v17 = vmul.f32 %v6374_v14, %v4630_v8  ;;  %v2132_v22 = vsel %vm2128_vm3, %v2123_v60, %v13137_v5  ;;  %v4952_v31 = vmul.f32 %v6376_v41, %v4632_v33  ;;  %v13155_v12 = vrot.slane %v10455_v11, 1  ;;  %v13159_v33 = vld [vmem:[#allocation72_spill] sm:$0xff] }
 0x3bb   : > { %v1809_v25 = vsel %vm1803_vm1, %v13154_v39, %v12425_v38  ;;  %v10696_v58 = vsel %vm10594_vm13, %v2132_v22, 0.0  ;;  %v3368_v40 = vmul.f32 %v12860_v16, %v10665_v0  ;;  %v3064_v11 = vmul.f32 %v13084_v10, %v13105_v56 }
 0x3bc   : > { %v10692_v14 = vsel %vm2128_vm3, %v13155_v12, %v2123_v60  ;;  %13157 = vst [vmem:[#allocation135_spill] sm:$0xff] %v10696_v58  ;;  %v10700_v63 = vpop.eup %6377  ;;  %v5014_v32 = vsub.f32 1.0, %v4950_v17  ;;  %v2828_v59 = vmul.f32 %v7341_v20, %v1809_v25  ;;  %v5016_v41 = vsub.f32 1.0, %v4952_v31  ;;  %v13160_v17 = vld [vmem:[#allocation194_spill] sm:$0xff] }
 0x3bd   : > { %13156 = vst [vmem:[#allocation134_spill] sm:$0xff] %v10692_v14  ;;  %v3098_v21 = vmul.f32 %v13084_v10, %v10692_v14  ;;  %v4117_v51 = vmul.f32 1.0614054, %v10700_v63  ;;  %v3100_v28 = vmul.f32 %v13084_v10, %v10696_v58  ;;  %v3232_v44 = vmul.f32 %v8834_v9, %v1809_v25  ;;  %v13161_v25 = vld [vmem:[#allocation79_spill] sm:$0xff] }
 0x3be   : > { %v10711_v34 = vpop.eup %6379  ;;  %v5142_v8 = vsub.f32 0.0, %v5014_v32  ;;  %v2892_v60 = vadd.f32 %v2828_v59, %v2756_v53  ;;  %v3126_v39 = vadd.f32 %v13160_v17, %v13159_v33  ;;  %v5144_v22 = vsub.f32 0.0, %v5016_v41 }
 0x3bf   : > { %v10714_v20 = vadd.f32 %v3098_v21, %v10533_v55  ;;  %v4119_v56 = vmul.f32 1.0614054, %v10711_v34  ;;  %v4181_v31 = vadd.f32 -1.4531521, %v4117_v51  ;;  %v3296_v12 = vadd.f32 %v3232_v44, %v3160_v62  ;;  %v10734_v44 = vld [vmem:[#allocation11 + $0x18] ss:$0 sm:$0xff] }
 0x3c0   : > { %v5206_v38 = vsel %vm5078_vm14, %v5142_v8, %v5014_v32  ;;  %v3028_v5 = vadd.f32 %v2964_v43, %v2892_v60  ;;  %v3128_v35 = vadd.f32 %v3064_v11, %v13161_v25  ;;  %v3198_v53 = vmul.f32 %v8834_v9, %v13162_v15  ;;  %v13166_v8 = vld [vmem:[#allocation147_spill] sm:$0xff]  ;;  %v13167_v60 = vld [vmem:[#allocation197_spill] sm:$0xff] }
 0x3c1   : > { %13158 = vst [vmem:[#allocation52_spill] sm:$0xff] %v10714_v20  ;;  %v5208_v55 = vsel %vm5080_vm15, %v5144_v22, %v5016_v41  ;;  %v5270_v59 = vadd.f32 1.0, %v5206_v38  ;;  %v4183_v21 = vadd.f32 -1.4531521, %v4119_v56  ;;  %v4245_v33 = vmul.f32 %v10700_v63, %v4181_v31  ;;  %v13168_v56 = vld [vmem:[#allocation157_spill] sm:$0xff]  ;;  %v13169_v25 = vld [vmem:[#allocation39_spill] sm:$0xff] }
 0x3c2   : > { %v5272_v17 = vadd.f32 1.0, %v5208_v55  ;;  %v10727_v20 = vadd.f32 %v3100_v28, %v3028_v5  ;;  %v10729_v62 = vadd.f32 %v3368_v40, %v3296_v12  ;;  %v3200_v43 = vmul.f32 %v8834_v9, %v13165_v27 }
 0x3c3   : > { %v6382_v32 = vpop.eup %6381  ;;  %v4247_v11 = vmul.f32 %v10711_v34, %v4183_v21  ;;  %v4309_v51 = vadd.f32 1.4214138, %v4245_v33  ;;  %6383 = vpow2.f32 %v4845_v13  ;;  %v3262_v15 = vadd.f32 %v3198_v53, %v3126_v39  ;;  %v13172_v21 = vld [vmem:[#allocation137_spill] sm:$0xff] }
 0x3c4   : > { %13163 = vst [vmem:[#allocation141_spill] sm:$0xff] %v10727_v20  ;;  %13164 = vst [vmem:[#allocation103_spill] sm:$0xff] %v10729_v62  ;;  %v5334_v2 = vmul.f32 %v5270_v59, %v3670_v48  ;;  %v5336_v41 = vmul.f32 %v5272_v17, %v3672_v18  ;;  %v3264_v38 = vadd.f32 %v3200_v43, %v3128_v35  ;;  %v13170_v18 = vld [vmem:[#allocation69_spill] sm:$0xff]  ;;  %v13171_v35 = vld [vmem:[#allocation115_spill] sm:$0xff]  ;;  %vm5077_vm3 = vcmp.lt.f32.partialorder %v10611_v50, 0.0 }
 0x3c5   : > { %v3470_v5 = vmul.f32 %v10734_v44, %v13166_v8  ;;  %v4311_v28 = vadd.f32 1.4214138, %v4247_v11  ;;  %v4373_v40 = vmul.f32 %v10700_v63, %v4309_v51  ;;  %v3398_v22 = vadd.f32 %v13167_v60, %v3262_v15  ;;  %v13173_v17 = vld [vmem:[#allocation84_spill] sm:$0xff]  ;;  %v13176_v15 = vld [vmem:[#allocation143_spill] sm:$0xff] }
 0x3c6   : > { %v3472_v31 = vmul.f32 %v10734_v44, %v13168_v56  ;;  %v5388_v12 = vpack.c.bf16 %v5336_v41, %v5334_v2  ;;  %v3400_v13 = vadd.f32 %v13169_v25, %v3264_v38  ;;  %v3063_v48 = vmul.f32 %v7347_v26, %v13127_v57  ;;  %v13175_v11 = vld [vmem:[#allocation136_spill] sm:$0xff]  ;;  %v13180_v25 = vld [vmem:[#allocation113_spill] sm:$0xff] }
 0x3c7   : > { %v3125_v39 = vadd.f32 %v13171_v35, %v13170_v18  ;;  %v4375_v53 = vmul.f32 %v10711_v34, %v4311_v28  ;;  %v4437_v55 = vadd.f32 -0.28449672, %v4373_v40  ;;  %v3534_v59 = vadd.f32 %v3470_v5, %v3398_v22  ;;  %v13177_v5 = vld [vmem:[#allocation102_spill] sm:$0xff]  ;;  %v10764_v22 = vld [vmem:[#allocation11 + $0x10] ss:$0 sm:$0xff] }
 0x3c8   : > { %v3197_v33 = vmul.f32 %v12832_v47, %v13172_v21  ;;  %v10752_v27 = vmul.f32 %v7347_v26, %v13173_v17  ;;  %5616 = vmatprep.mubr.bf16.mxu1 %v5388_v12  ;;  %v3536_v43 = vadd.f32 %v3472_v31, %v3400_v13  ;;  %v3127_v51 = vadd.f32 %v3063_v48, %v13175_v11  ;;  %v13179_v31 = vld [vmem:[#allocation154_spill] sm:$0xff] }
 0x3c9   : > { %v3199_v57 = vmul.f32 %v12832_v47, %v13176_v15  ;;  %v4439_v2 = vadd.f32 -0.28449672, %v4375_v53  ;;  %v4501_v41 = vmul.f32 %v10700_v63, %v4437_v55  ;;  %v3610_v38 = vadd.f32 %v8892_v4, %v3534_v59  ;;  %v13182_v53 = vld [vmem:[#allocation195_spill] sm:$0xff]  ;;  %v13183_v59 = vld [vmem:[#allocation82_spill] sm:$0xff] }
 0x3ca   : > { %13174 = vst [vmem:[#allocation66_spill] sm:$0xff] %v10752_v27  ;;  %v3261_v8 = vadd.f32 %v3197_v33, %v3125_v39  ;;  %v10761_v28 = vmul.f32 %v13084_v10, %v13177_v5  ;;  %v3612_v40 = vadd.f32 %v8892_v4, %v3536_v43  ;;  %v3471_v12 = vmul.f32 %v10764_v22, %v13179_v31  ;;  %v13184_v33 = vld [vmem:[#allocation144_spill] sm:$0xff] }
 0x3cb   : > { %v3263_v60 = vadd.f32 %v3199_v57, %v3127_v51  ;;  %v10770_v13 = vmul.f32 %v12860_v16, %v13180_v25  ;;  %v4503_v48 = vmul.f32 %v10711_v34, %v4439_v2  ;;  %v4565_v18 = vadd.f32 0.2548296, %v4501_v41  ;;  %v13185_v51 = vld [vmem:[#allocation42_spill] sm:$0xff] }
 0x3cc   : > { %13178 = vst [vmem:[#allocation205_spill] sm:$0xff] %v10761_v28  ;;  %v10773_v35 = vmul.f32 0.70710677, %v3610_v38  ;;  %v10775_v39 = vmul.f32 0.70710677, %v3612_v40  ;;  %v3397_v55 = vadd.f32 %v13182_v53, %v3261_v8  ;;  %v3469_v43 = vmul.f32 %v10764_v22, %v13184_v33 }
 0x3cd   : > { %13181 = vst [vmem:[#allocation91_spill] sm:$0xff] %v10770_v13  ;;  %v3399_v21 = vadd.f32 %v13183_v59, %v3263_v60  ;;  %v6384_v11 = vpop.eup %6383  ;;  %v10783_v15 = vmul.f32 %v12931_v54, %v13185_v51  ;;  %v4567_v57 = vadd.f32 0.2548296, %v4503_v48  ;;  %v4629_v2 = vmul.f32 %v10700_v63, %v4565_v18  ;;  %v13187_v59 = vld [vmem:[#allocation65_spill] sm:$0xff]  ;;  %v13189_v48 = vld [vmem:[#allocation190_spill] sm:$0xff] }
 0x3ce   : > { %v3802_v41 = vand.u32 2147483647, %v10773_v35  ;;  %v10788_v25 = vadd.s32 272, %v7251_v36  ;;  %v3804_v8 = vand.u32 2147483647, %v10775_v39  ;;  %v3533_v53 = vadd.f32 %v3469_v43, %v3397_v55  ;;  %v13194_v43 = vld [vmem:[#allocation152_spill] sm:$0xff] }
 0x3cf   : > { %13186 = vst [vmem:[#allocation101_spill] sm:$0xff] %v10783_v15  ;;  %v3535_v60 = vadd.f32 %v3471_v12, %v3399_v21  ;;  %v10793_v33 = vmul.f32 %v12860_v16, %v13187_v59  ;;  %v4631_v62 = vmul.f32 %v10711_v34, %v4567_v57  ;;  %v4949_v51 = vmul.f32 %v6382_v32, %v4629_v2 }
 0x3d0   : > { %v3866_v20 = vmul.f32 0.3275911, %v3802_v41  ;;  %v10798_v63 = vmul.f32 %v12931_v54, %v13189_v48  ;;  %v3868_v18 = vmul.f32 0.3275911, %v3804_v8  ;;  %v10801_v58 = vadd.f32 %v13134_v30, %v3533_v53  ;;  %v13193_v48 = vld [vmem:[#allocation50_spill] sm:$0xff] }
 0x3d1   : > { %13188 = vst [vmem:[#allocation95_spill] sm:$0xff] %v10793_v33  ;;  %v10804_v14 = vadd.f32 %v13134_v30, %v3535_v60  ;;  %v10808_v12 = vmul.f32 %v12860_v16, %v10262_v7  ;;  %v4951_v55 = vmul.f32 %v6384_v11, %v4631_v62  ;;  %v5013_v21 = vsub.f32 1.0, %v4949_v51  ;;  %v13192_v51 = vld [vmem:[#allocation145_spill] sm:$0xff] }
 0x3d2   : > { %13190 = vst [vmem:[#allocation116_spill] sm:$0xff] %v10798_v63  ;;  %v3930_v34 = vadd.f32 1.0, %v3866_v20  ;;  %v3669_v32 = vmul.f32 0.5, %v10591_v3  ;;  %v3932_v57 = vadd.f32 1.0, %v3868_v18  ;;  %v3068_v2 = vmul.f32 %v13084_v10, %v13168_v56 }
 0x3d3   : > { %13191 = vst [vmem:[#allocation29_spill] sm:$0xff] %v10808_v12  ;;  %v5015_v53 = vsub.f32 1.0, %v4951_v55  ;;  %v5141_v59 = vsub.f32 0.0, %v5013_v21  ;;  %v4698_v60 = vmul.f32 %v3802_v41, %v3802_v41  ;;  %v10816_v7 = vmul.f32 0.70710677, %v10801_v58  ;;  %v13197_v12 = vld [vmem:[#allocation175_spill] sm:$0xff] }
 0x3d4   : > { %6385 = vrcp.f32 %v3930_v34  ;;  %v10819_v20 = vmul.f32 0.70710677, %v10804_v14  ;;  %v4700_v11 = vmul.f32 %v3804_v8, %v3804_v8  ;;  %v3130_v18 = vadd.f32 %v13193_v48, %v13192_v51  ;;  %v13196_v48 = vld [vmem:[#allocation163_spill] sm:$0xff] }
 0x3d5   : > { %6387 = vrcp.f32 %v3932_v57  ;;  %v5143_v3 = vsub.f32 0.0, %v5015_v53  ;;  %v5205_v62 = vsel %vm5077_vm3, %v5141_v59, %v5013_v21  ;;  %vm5079_vm0 = vcmp.lt.f32.partialorder %v10621_v19, 0.0  ;;  %v13195_v19 = vld [vmem:[#allocation156_spill] sm:$0xff] }
 0x3d6   : > { %v5269_v56 = vadd.f32 1.0, %v5205_v62  ;;  %v3801_v41 = vand.u32 2147483647, %v10816_v7  ;;  %v3803_v50 = vand.u32 2147483647, %v10819_v20  ;;  %v3671_v55 = vmul.f32 0.5, %v10608_v1 }
 0x3d7   : > { %v5207_v34 = vsel %vm5079_vm0, %v5143_v3, %v5015_v53  ;;  %v4762_v57 = vsub.f32 0.0, %v4698_v60  ;;  %v3132_v54 = vadd.f32 %v3068_v2, %v13194_v43  ;;  %v10828_v63 = vmul.f32 0.5, %v3610_v38 }
 0x3d8   : > { %v5271_v16 = vadd.f32 1.0, %v5207_v34  ;;  %v3865_v8 = vmul.f32 0.3275911, %v3801_v41  ;;  %v3867_v21 = vmul.f32 0.3275911, %v3803_v50  ;;  %v10830_v59 = vmul.f32 0.5, %v3612_v40 }
 0x3d9   : > { %v4764_v51 = vsub.f32 0.0, %v4700_v11  ;;  %v3202_v62 = vmul.f32 %v8834_v9, %v13195_v19  ;;  %v3204_v15 = vmul.f32 %v8834_v9, %v13196_v48  ;;  %v5333_v27 = vmul.f32 %v5269_v56, %v3669_v32  ;;  %v13198_v32 = vld [vmem:[#allocation53_spill] sm:$0xff]  ;;  %v13199_v56 = vld [vmem:[#allocation164_spill] sm:$0xff] }
 0x3da   : > { %v5335_v1 = vmul.f32 %v5271_v16, %v3671_v55  ;;  %v3929_v53 = vadd.f32 1.0, %v3865_v8  ;;  %v3931_v60 = vadd.f32 1.0, %v3867_v21  ;;  %v4851_v3 = vmul.f32 1.442695, %v4762_v57  ;;  %v13202_v57 = vld [vmem:[#allocation61_spill] sm:$0xff] }
 0x3db   : > { %v4697_v43 = vmul.f32 %v3801_v41, %v3801_v41  ;;  %v3266_v2 = vadd.f32 %v3202_v62, %v3130_v18  ;;  %v3268_v38 = vadd.f32 %v3204_v15, %v3132_v54  ;;  %v3476_v40 = vmul.f32 %v10734_v44, %v13197_v12  ;;  %v13201_v18 = vld [vmem:[#allocation139_spill] sm:$0xff] }
 0x3dc   : > { %v5387_v34 = vpack.c.bf16 %v5335_v1, %v5333_v27  ;;  %6389 = vrcp.f32 %v3929_v53  ;;  %v3067_v11 = vmul.f32 %v7347_v26, %v13179_v31  ;;  %v4699_v48 = vmul.f32 %v3803_v50, %v3803_v50  ;;  %v13200_v27 = vld [vmem:[#allocation88_spill] sm:$0xff]  ;;  %v13203_v31 = vld [vmem:[#allocation149_spill] sm:$0xff]  ;;  %v13204_v53 = vld [vmem:[#allocation155_spill] sm:$0xff] }
 0x3dd   : > { %6391 = vrcp.f32 %v3931_v60  ;;  %v3402_v16 = vadd.f32 %v13198_v32, %v3266_v2  ;;  %v3474_v55 = vmul.f32 %v10734_v44, %v13199_v56  ;;  %v3404_v15 = vadd.f32 %v13200_v27, %v3268_v38 }
 0x3de   : > { %v10840_v19 = vpop.eup %6385  ;;  %5617 = vmatmul.mubr.bf16.gmra.mrb[24].mxu1 %v5387_v34  ;;  %v3129_v8 = vadd.f32 %v13202_v57, %v13201_v18  ;;  %v3131_v21 = vadd.f32 %v3067_v11, %v13203_v31  ;;  %v4855_v50 = vmul.f32 1.442695, %v4764_v51  ;;  %v3201_v60 = vmul.f32 %v12832_v47, %v13204_v53  ;;  %v13205_v34 = vld [vmem:[#allocation161_spill] sm:$0xff]  ;;  %v13208_v57 = vld [vmem:[#allocation162_spill] sm:$0xff] }
 0x3df   : > { %v10845_v41 = vpop.eup %6387  ;;  %v4122_v54 = vmul.f32 1.0614054, %v10840_v19  ;;  %v3538_v1 = vadd.f32 %v3474_v55, %v3402_v16  ;;  %v4761_v32 = vsub.f32 0.0, %v4697_v43  ;;  %v3540_v56 = vadd.f32 %v3476_v40, %v3404_v15  ;;  %v13206_v55 = vld [vmem:[#allocation171_spill] sm:$0xff]  ;;  %v13207_v15 = vld [vmem:[#allocation48_spill] sm:$0xff] }
 0x3e0   : > { %v4124_v62 = vmul.f32 1.0614054, %v10845_v41  ;;  %v3203_v61 = vmul.f32 %v12832_v47, %v13205_v34  ;;  %v4763_v38 = vsub.f32 0.0, %v4699_v48  ;;  %v3265_v18 = vadd.f32 %v3201_v60, %v3129_v8 }
 0x3e1   : > { %v4186_v2 = vadd.f32 -1.4531521, %v4122_v54  ;;  %v10858_v27 = vadd.f32 %v8892_v4, %v3538_v1  ;;  %v10862_v51 = vadd.f32 %v8892_v4, %v3540_v56  ;;  %v3475_v54 = vmul.f32 %v10764_v22, %v13206_v55  ;;  %v13209_v1 = vld [vmem:[#allocation142_spill] sm:$0xff] }
 0x3e2   : > { %v4188_v33 = vadd.f32 -1.4531521, %v4124_v62  ;;  %v3267_v16 = vadd.f32 %v3203_v61, %v3131_v21  ;;  %v3401_v48 = vadd.f32 %v13207_v15, %v3265_v18  ;;  %v3473_v31 = vmul.f32 %v10764_v22, %v13208_v57 }
 0x3e3   : > { %v4250_v11 = vmul.f32 %v10840_v19, %v4186_v2  ;;  %v10868_v40 = vmul.f32 0.70710677, %v10858_v27  ;;  %6393 = vpow2.f32 %v4851_v3  ;;  %v10874_v62 = vmul.f32 0.70710677, %v10862_v51 }
 0x3e4   : > { %v4252_v43 = vmul.f32 %v10845_v41, %v4188_v33  ;;  %v3403_v61 = vadd.f32 %v13209_v1, %v3267_v16  ;;  %6395 = vpow2.f32 %v4855_v50  ;;  %v3537_v33 = vadd.f32 %v3473_v31, %v3401_v48  ;;  %v13210_v50 = vld [vmem:[#allocation30_spill] sm:$0xff] }
 0x3e5   : > { %v4314_v8 = vadd.f32 1.4214138, %v4250_v11  ;;  %v3806_v53 = vand.u32 2147483647, %v10868_v40  ;;  %v4849_v56 = vmul.f32 1.442695, %v4761_v32 }
 0x3e6   : > { %v4316_v21 = vadd.f32 1.4214138, %v4252_v43  ;;  %v10878_v60 = vpop.eup %6389  ;;  %v3808_v34 = vand.u32 2147483647, %v10874_v62  ;;  %v3539_v18 = vadd.f32 %v3475_v54, %v3403_v61  ;;  %v4853_v16 = vmul.f32 1.442695, %v4763_v38 }
 0x3e7   : > { %v4378_v2 = vmul.f32 %v10840_v19, %v4314_v8  ;;  %v10882_v11 = vpop.eup %6391  ;;  %v4121_v15 = vmul.f32 1.0614054, %v10878_v60  ;;  %v3870_v43 = vmul.f32 0.3275911, %v3806_v53  ;;  %v13211_v57 = vrot.slane %v10559_v46, 7 }
 0x3e8   : > { %v4380_v3 = vmul.f32 %v10845_v41, %v4316_v21  ;;  %v4123_v32 = vmul.f32 1.0614054, %v10882_v11  ;;  %v3872_v8 = vmul.f32 0.3275911, %v3808_v34  ;;  %v4702_v24 = vmul.f32 %v3806_v53, %v3806_v53 }
 0x3e9   : > { %v10891_v48 = vsel %vm1803_vm1, %v13211_v57, %v13210_v50  ;;  %v4442_v31 = vadd.f32 -0.28449672, %v4378_v2  ;;  %v4185_v1 = vadd.f32 -1.4531521, %v4121_v15  ;;  %v3934_v61 = vadd.f32 1.0, %v3870_v43 }
 0x3ea   : > { %v4444_v54 = vadd.f32 -0.28449672, %v4380_v3  ;;  %v4187_v28 = vadd.f32 -1.4531521, %v4123_v32  ;;  %6397 = vpow2.f32 %v4849_v56  ;;  %v3936_v38 = vadd.f32 1.0, %v3872_v8 }
 0x3eb   : > { %v4506_v21 = vmul.f32 %v10840_v19, %v4442_v31  ;;  %v4249_v46 = vmul.f32 %v10878_v60, %v4185_v1  ;;  %6399 = vrcp.f32 %v3934_v61  ;;  %v4704_v57 = vmul.f32 %v3808_v34, %v3808_v34 }
 0x3ec   : > { %v4508_v17 = vmul.f32 %v10845_v41, %v4444_v54  ;;  %v10898_v2 = vmul.f32 0.5, %v10801_v58  ;;  %v4251_v3 = vmul.f32 %v10882_v11, %v4187_v28  ;;  %6401 = vrcp.f32 %v3936_v38 }
 0x3ed   : > { %v4570_v13 = vadd.f32 0.2548296, %v4506_v21  ;;  %vm5082_vm2 = vcmp.lt.f32.partialorder %v10773_v35, 0.0  ;;  %v4313_v53 = vadd.f32 1.4214138, %v4249_v46  ;;  %v4766_v43 = vsub.f32 0.0, %v4702_v24  ;;  %v6394_v31 = vpop.eup %6393 }
 0x3ee   : > { %v4572_v15 = vadd.f32 0.2548296, %v4508_v17  ;;  %v10903_v56 = vadd.f32 %v13134_v30, %v3537_v33  ;;  %vm5084_vm4 = vcmp.lt.f32.partialorder %v10775_v39, 0.0  ;;  %v4315_v34 = vadd.f32 1.4214138, %v4251_v3  ;;  %v6396_v28 = vpop.eup %6395 }
 0x3ef   : > { %v4634_v32 = vmul.f32 %v10840_v19, %v4570_v13  ;;  %6403 = vpow2.f32 %v4853_v16  ;;  %v10908_v58 = vadd.f32 %v13134_v30, %v3539_v18  ;;  %v4377_v8 = vmul.f32 %v10878_v60, %v4313_v53 }
 0x3f0   : > { %v4636_v17 = vmul.f32 %v10845_v41, %v4572_v15  ;;  %v4768_v54 = vsub.f32 0.0, %v4704_v57  ;;  %v10913_v24 = vmul.f32 0.70710677, %v10903_v56  ;;  %v10916_v1 = vmul.f32 0.5, %v10804_v14 }
 0x3f1   : > { %v4954_v33 = vmul.f32 %v6394_v31, %v4634_v32  ;;  %v4379_v13 = vmul.f32 %v10882_v11, %v4315_v34  ;;  %v10920_v19 = vmul.f32 0.70710677, %v10908_v58  ;;  %v4441_v16 = vadd.f32 -0.28449672, %v4377_v8 }
 0x3f2   : > { %v4956_v18 = vmul.f32 %v6396_v28, %v4636_v17  ;;  %v4859_v61 = vmul.f32 1.442695, %v4766_v43  ;;  %v3805_v41 = vand.u32 2147483647, %v10913_v24  ;;  %v10924_v46 = vmul.f32 0.5, %v10858_v27 }
 0x3f3   : > { %v5018_v21 = vsub.f32 1.0, %v4954_v33  ;;  %v4443_v38 = vadd.f32 -0.28449672, %v4379_v13  ;;  %v3807_v57 = vand.u32 2147483647, %v10920_v19  ;;  %v4505_v14 = vmul.f32 %v10878_v60, %v4441_v16 }
 0x3f4   : > { %v5020_v3 = vsub.f32 1.0, %v4956_v18  ;;  %v4863_v15 = vmul.f32 1.442695, %v4768_v54  ;;  %v3869_v53 = vmul.f32 0.3275911, %v3805_v41  ;;  %v6398_v31 = vpop.eup %6397  ;;  %v4701_v43 = vmul.f32 %v3805_v41, %v3805_v41 }
 0x3f5   : > { %v5146_v32 = vsub.f32 0.0, %v5018_v21  ;;  %v4507_v34 = vmul.f32 %v10882_v11, %v4443_v38  ;;  %v3871_v28 = vmul.f32 0.3275911, %v3807_v57  ;;  %v10929_v17 = vpop.eup %6399  ;;  %v4569_v33 = vadd.f32 0.2548296, %v4505_v14 }
 0x3f6   : > { %v5148_v8 = vsub.f32 0.0, %v5020_v3  ;;  %v3933_v13 = vadd.f32 1.0, %v3869_v53  ;;  %v10931_v27 = vmul.f32 %v3807_v57, %v3807_v57  ;;  %v10933_v52 = vpop.eup %6401  ;;  %vm5081_vm5 = vcmp.lt.f32.partialorder %v10816_v7, 0.0 }
 0x3f7   : > { %v5210_v18 = vsel %vm5082_vm2, %v5146_v32, %v5018_v21  ;;  %v4571_v54 = vadd.f32 0.2548296, %v4507_v34  ;;  %v4126_v16 = vmul.f32 1.0614054, %v10929_v17  ;;  %v3935_v38 = vadd.f32 1.0, %v3871_v28 }
 0x3f8   : > { %v5212_v41 = vsel %vm5084_vm4, %v5148_v8, %v5020_v3  ;;  %v5274_v5 = vadd.f32 1.0, %v5210_v18  ;;  %v4633_v14 = vmul.f32 %v10878_v60, %v4569_v33  ;;  %vm5083_vm6 = vcmp.lt.f32.partialorder %v10819_v20, 0.0 }
 0x3f9   : > { %v4128_v57 = vmul.f32 1.0614054, %v10933_v52  ;;  %v6404_v53 = vpop.eup %6403  ;;  %v5276_v23 = vadd.f32 1.0, %v5212_v41  ;;  %v4635_v35 = vmul.f32 %v10882_v11, %v4571_v54  ;;  %v4190_v21 = vadd.f32 -1.4531521, %v4126_v16 }
 0x3fa   : > { %6405 = vrcp.f32 %v3933_v13  ;;  %v4953_v32 = vmul.f32 %v6398_v31, %v4633_v14  ;;  %v4765_v28 = vsub.f32 0.0, %v4701_v43  ;;  %v5338_v39 = vmul.f32 %v5274_v5, %v10828_v63  ;;  %v13212_v63 = vld [vmem:[#allocation159_spill] sm:$0xff] }
 0x3fb   : > { %v4192_v34 = vadd.f32 -1.4531521, %v4128_v57  ;;  %6407 = vrcp.f32 %v3935_v38  ;;  %v5340_v3 = vmul.f32 %v5276_v23, %v10830_v59  ;;  %v4955_v8 = vmul.f32 %v6404_v53, %v4635_v35  ;;  %v13213_v23 = vld [vmem:[#allocation81_spill] sm:$0xff] }
 0x3fc   : > { %v4254_v60 = vmul.f32 %v10929_v17, %v4190_v21  ;;  %v5017_v33 = vsub.f32 1.0, %v4953_v32  ;;  %6409 = vpow2.f32 %v4859_v61  ;;  %v3072_v11 = vmul.f32 %v13084_v10, %v13197_v12  ;;  %v13214_v61 = vld [vmem:[#allocation169_spill] sm:$0xff]  ;;  %v13216_v21 = vld [vmem:[#allocation183_spill] sm:$0xff] }
 0x3fd   : > { %v4256_v18 = vmul.f32 %v10933_v52, %v4192_v34  ;;  %v5390_v54 = vpack.c.bf16 %v5340_v3, %v5338_v39  ;;  %v5019_v13 = vsub.f32 1.0, %v4955_v8  ;;  %6411 = vpow2.f32 %v4863_v15  ;;  %v13215_v15 = vld [vmem:[#allocation173_spill] sm:$0xff]  ;;  %v13217_v3 = vld [vmem:[#allocation184_spill] sm:$0xff] }
 0x3fe   : > { %v4318_v31 = vadd.f32 1.4214138, %v4254_v60  ;;  %v5145_v16 = vsub.f32 0.0, %v5017_v33  ;;  %v4767_v5 = vsub.f32 0.0, %v10931_v27  ;;  %v3134_v59 = vadd.f32 %v13213_v23, %v13212_v63 }
 0x3ff   : > { %v4320_v43 = vadd.f32 1.4214138, %v4256_v18  ;;  %5624 = vmatprep.mubr.bf16.mxu1 %v5390_v54  ;;  %v5147_v38 = vsub.f32 0.0, %v5019_v13  ;;  %v4857_v14 = vmul.f32 1.442695, %v4765_v28  ;;  %v3136_v57 = vadd.f32 %v3072_v11, %v13214_v61  ;;  %v13220_v61 = vld [vmem:[#allocation165_spill] sm:$0xff] }
 0x400   : > { %v4382_v41 = vmul.f32 %v10929_v17, %v4318_v31  ;;  %v5209_v12 = vsel %vm5081_vm5, %v5145_v16, %v5017_v33  ;;  %v3206_v35 = vmul.f32 %v8834_v9, %v13215_v15  ;;  %v3208_v27 = vmul.f32 %v8834_v9, %v13216_v21  ;;  %v13218_v31 = vld [vmem:[#allocation67_spill] sm:$0xff] }
 0x401   : > { %v4384_v53 = vmul.f32 %v10933_v52, %v4320_v43  ;;  %v5211_v32 = vsel %vm5083_vm6, %v5147_v38, %v5019_v13  ;;  %v5273_v34 = vadd.f32 1.0, %v5209_v12  ;;  %v3478_v28 = vmul.f32 %v10734_v44, %v13217_v3  ;;  %v13221_v12 = vld [vmem:[#allocation158_spill] sm:$0xff] }
 0x402   : > { %v4446_v39 = vadd.f32 -0.28449672, %v4382_v41  ;;  %v5275_v8 = vadd.f32 1.0, %v5211_v32  ;;  %v3270_v7 = vadd.f32 %v3206_v35, %v3134_v59  ;;  %v3272_v33 = vadd.f32 %v3208_v27, %v3136_v57  ;;  %v13219_v59 = vld [vmem:[#allocation62_spill] sm:$0xff] }
 0x403   : > { %v4448_v60 = vadd.f32 -0.28449672, %v4384_v53  ;;  %v5337_v11 = vmul.f32 %v5273_v34, %v10898_v2  ;;  %v3480_v16 = vmul.f32 %v10734_v44, %v13218_v31  ;;  %v3071_v20 = vmul.f32 %v7347_v26, %v13206_v55  ;;  %v13222_v53 = vld [vmem:[#allocation153_spill] sm:$0xff] }
 0x404   : > { %v10967_v18 = vpop.eup %6405  ;;  %v4510_v54 = vmul.f32 %v10929_v17, %v4446_v39  ;;  %v5339_v43 = vmul.f32 %v5275_v8, %v10916_v1  ;;  %v3406_v38 = vadd.f32 %v13219_v59, %v3270_v7  ;;  %v3408_v57 = vadd.f32 %v13220_v61, %v3272_v33  ;;  %v13226_v7 = vld [vmem:[#allocation166_spill] sm:$0xff]  ;;  %v13326_v39 = vld [vmem:[#allocation103_spill] sm:$0xff] }
 0x405   : > { %v10975_v13 = vpop.eup %6407  ;;  %v4512_v63 = vmul.f32 %v10933_v52, %v4448_v60  ;;  %v4125_v23 = vmul.f32 1.0614054, %v10967_v18  ;;  %v10985_v15 = vadd.f32 %v13222_v53, %v13221_v12  ;;  %v13223_v34 = vand.u32 15, %v10788_v25 }
 0x406   : > { %v4574_v41 = vadd.f32 0.2548296, %v4510_v54  ;;  %v4127_v2 = vmul.f32 1.0614054, %v10975_v13  ;;  %v6410_v55 = vpop.eup %6409  ;;  %v5389_v35 = vpack.c.bf16 %v5339_v43, %v5337_v11  ;;  %v3542_v1 = vadd.f32 %v3478_v28, %v3406_v38 }
 0x407   : > { %v4576_v21 = vadd.f32 0.2548296, %v4512_v63  ;;  %v4189_v27 = vadd.f32 -1.4531521, %v4125_v23  ;;  %v6412_v32 = vpop.eup %6411  ;;  %vm10989_vm7 = vcmp.gt.s32.totalorder %v13223_v34, 0  ;;  %v3544_v60 = vadd.f32 %v3480_v16, %v3408_v57  ;;  %v13228_v34 = vld [vmem:[#allocation176_spill] sm:$0xff] }
 0x408   : > { %v4638_v3 = vmul.f32 %v10929_v17, %v4574_v41  ;;  %v4191_v8 = vadd.f32 -1.4531521, %v4127_v2  ;;  %v3135_v33 = vadd.f32 %v3071_v20, %v13226_v7  ;;  %5625 = vmatmul.mubr.bf16.gmra.mrb[28].mxu1 %v5389_v35  ;;  %v4861_v43 = vmul.f32 1.442695, %v4767_v5 }
 0x409   : > { %v4640_v54 = vmul.f32 %v10933_v52, %v4576_v21  ;;  %v4253_v11 = vmul.f32 %v10967_v18, %v4189_v27  ;;  %v10998_v28 = vadd.f32 %v8892_v4, %v3542_v1  ;;  %v3680_v25 = vmul.f32 0.5, %v10862_v51 }
 0x40a   : > { %v4958_v63 = vmul.f32 %v6410_v55, %v4638_v3  ;;  %v4255_v23 = vmul.f32 %v10975_v13, %v4191_v8  ;;  %v11003_v17 = vadd.f32 %v8892_v4, %v3544_v60  ;;  %vm5086_vm8 = vcmp.lt.f32.partialorder %v10868_v40, 0.0 }
 0x40b   : > { %v4960_v16 = vmul.f32 %v6412_v32, %v4640_v54  ;;  %v4317_v20 = vadd.f32 1.4214138, %v4253_v11  ;;  %v11007_v52 = vmul.f32 0.70710677, %v10998_v28  ;;  %6413 = vpow2.f32 %v4857_v14  ;;  %v13227_v14 = vld [vmem:[#allocation170_spill] sm:$0xff] }
 0x40c   : > { %v5022_v59 = vsub.f32 1.0, %v4958_v63  ;;  %v4319_v5 = vadd.f32 1.4214138, %v4255_v23  ;;  %v11010_v38 = vmul.f32 0.70710677, %v11003_v17  ;;  %6415 = vpow2.f32 %v4861_v43 }
 0x40d   : > { %v5024_v51 = vsub.f32 1.0, %v4960_v16  ;;  %v4381_v41 = vmul.f32 %v10967_v18, %v4317_v20  ;;  %v3810_v2 = vand.u32 2147483647, %v11007_v52  ;;  %vm5088_vm9 = vcmp.lt.f32.partialorder %v10874_v62, 0.0 }
 0x40e   : > { %v5150_v61 = vsub.f32 0.0, %v5022_v59  ;;  %v4383_v57 = vmul.f32 %v10975_v13, %v4319_v5  ;;  %v3812_v12 = vand.u32 2147483647, %v11010_v38  ;;  %v3205_v21 = vmul.f32 %v12832_v47, %v13227_v14 }
 0x40f   : > { %v5152_v53 = vsub.f32 0.0, %v5024_v51  ;;  %v4445_v55 = vadd.f32 -0.28449672, %v4381_v41  ;;  %v3874_v35 = vmul.f32 0.3275911, %v3810_v2  ;;  %v3207_v3 = vmul.f32 %v12832_v47, %v13228_v34  ;;  %v13231_v34 = vld [vmem:[#allocation177_spill] sm:$0xff] }
 0x410   : > { %v5214_v27 = vsel %vm5086_vm8, %v5150_v61, %v5022_v59  ;;  %v4447_v1 = vadd.f32 -0.28449672, %v4383_v57  ;;  %v3876_v32 = vmul.f32 0.3275911, %v3812_v12  ;;  %v4706_v63 = vmul.f32 %v3810_v2, %v3810_v2 }
 0x411   : > { %v5216_v62 = vsel %vm5088_vm9, %v5152_v53, %v5024_v51  ;;  %v5278_v8 = vadd.f32 1.0, %v5214_v27  ;;  %v4509_v60 = vmul.f32 %v10967_v18, %v4445_v55  ;;  %v3938_v7 = vadd.f32 1.0, %v3874_v35 }
 0x412   : > { %v5280_v54 = vadd.f32 1.0, %v5216_v62  ;;  %v4511_v11 = vmul.f32 %v10975_v13, %v4447_v1  ;;  %v3940_v43 = vadd.f32 1.0, %v3876_v32  ;;  %v2016_v40 = vsel %vm10989_vm7, %v10891_v48, 0.0  ;;  %v13229_v1 = vld [vmem:[#allocation73_spill] sm:$0xff] }
 0x413   : > { %v3677_v23 = vmul.f32 0.5, %v10903_v56  ;;  %v4573_v16 = vadd.f32 0.2548296, %v4509_v60  ;;  %6417 = vrcp.f32 %v3938_v7  ;;  %v5342_v20 = vmul.f32 %v5278_v8, %v10924_v46  ;;  %v13232_v62 = vld [vmem:[#allocation193_spill] sm:$0xff]  ;;  %v13235_v60 = vld [vmem:[#allocation38_spill] sm:$0xff] }
 0x414   : > { %v5344_v59 = vmul.f32 %v5280_v54, %v3680_v25  ;;  %v4575_v5 = vadd.f32 0.2548296, %v4511_v11  ;;  %6419 = vrcp.f32 %v3940_v43  ;;  %v3679_v51 = vmul.f32 0.5, %v10908_v58  ;;  %v13230_v25 = vld [vmem:[#allocation83_spill] sm:$0xff]  ;;  %v13236_v54 = vld [vmem:[#allocation200_spill] sm:$0xff] }
 0x415   : > { %v4637_v41 = vmul.f32 %v10967_v18, %v4573_v16  ;;  %v3269_v61 = vadd.f32 %v3205_v21, %v10985_v15  ;;  %v3271_v2 = vadd.f32 %v3207_v3, %v3135_v33  ;;  %v6414_v57 = vpop.eup %6413  ;;  %v4708_v35 = vmul.f32 %v3812_v12, %v3812_v12  ;;  %v13234_v12 = vld [vmem:[#allocation85_spill] sm:$0xff] }
 0x416   : > { %v5392_v53 = vpack.c.bf16 %v5344_v59, %v5342_v20  ;;  %v4639_v55 = vmul.f32 %v10975_v13, %v4575_v5  ;;  %v4770_v56 = vsub.f32 0.0, %v4706_v63  ;;  %v6416_v14 = vpop.eup %6415  ;;  %v3477_v58 = vmul.f32 %v10764_v22, %v13231_v34  ;;  %v13233_v13 = vld [vmem:[#allocation181_spill] sm:$0xff] }
 0x417   : > { %v4957_v27 = vmul.f32 %v6414_v57, %v4637_v41  ;;  %v3405_v46 = vadd.f32 %v13229_v1, %v3269_v61  ;;  %v3407_v32 = vadd.f32 %v13230_v25, %v3271_v2  ;;  %v3479_v15 = vmul.f32 %v10764_v22, %v13232_v62  ;;  %v13237_v20 = vld [vmem:[#allocation189_spill] sm:$0xff] }
 0x418   : > { %5632 = vmatprep.mubr.bf16.mxu1 %v5392_v53  ;;  %v4959_v18 = vmul.f32 %v6416_v14, %v4639_v55  ;;  %v3076_v33 = vmul.f32 %v13084_v10, %v13218_v31  ;;  %v3138_v21 = vadd.f32 %v13234_v12, %v13233_v13  ;;  %v3210_v7 = vmul.f32 %v8834_v9, %v13235_v60  ;;  %v13240_v12 = vld [vmem:[#allocation168_spill] sm:$0xff] }
 0x419   : > { %v5021_v3 = vsub.f32 1.0, %v4957_v27  ;;  %v3541_v8 = vadd.f32 %v3477_v58, %v3405_v46  ;;  %v3212_v11 = vmul.f32 %v8834_v9, %v13236_v54  ;;  %v4772_v63 = vsub.f32 0.0, %v4708_v35  ;;  %v13238_v27 = vld [vmem:[#allocation56_spill] sm:$0xff] }
 0x41a   : > { %v5023_v43 = vsub.f32 1.0, %v4959_v18  ;;  %v3543_v16 = vadd.f32 %v3479_v15, %v3407_v32  ;;  %v3140_v59 = vadd.f32 %v3076_v33, %v13237_v20  ;;  %vm5085_vm10 = vcmp.lt.f32.partialorder %v10913_v24, 0.0  ;;  %v13239_v15 = vld [vmem:[#allocation201_spill] sm:$0xff] }
 0x41b   : > { %v5149_v5 = vsub.f32 0.0, %v5021_v3  ;;  %v3617_v31 = vadd.f32 %v13134_v30, %v3541_v8  ;;  %v3274_v41 = vadd.f32 %v3210_v7, %v3138_v21  ;;  %vm5087_vm11 = vcmp.lt.f32.partialorder %v10920_v19, 0.0 }
 0x41c   : > { %v5151_v61 = vsub.f32 0.0, %v5023_v43  ;;  %v3619_v2 = vadd.f32 %v13134_v30, %v3543_v16  ;;  %v3276_v57 = vadd.f32 %v3212_v11, %v3140_v59  ;;  %v4867_v14 = vmul.f32 1.442695, %v4770_v56 }
 0x41d   : > { %v11053_v53 = vpop.eup %6417  ;;  %v5213_v55 = vsel %vm5085_vm10, %v5149_v5, %v5021_v3  ;;  %v11055_v35 = vmul.f32 0.70710677, %v3617_v31  ;;  %v3410_v1 = vadd.f32 %v13238_v27, %v3274_v41  ;;  %v4871_v34 = vmul.f32 1.442695, %v4772_v63  ;;  %v13241_v3 = vld [vmem:[#allocation54_spill] sm:$0xff] }
 0x41e   : > { %v11058_v46 = vpop.eup %6419  ;;  %v5215_v24 = vsel %vm5087_vm11, %v5151_v61, %v5023_v43  ;;  %v5277_v25 = vadd.f32 1.0, %v5213_v55  ;;  %v4130_v32 = vmul.f32 1.0614054, %v11053_v53  ;;  %v11062_v18 = vmul.f32 0.70710677, %v3619_v2 }
 0x41f   : > { %v5279_v19 = vadd.f32 1.0, %v5215_v24  ;;  %v4132_v58 = vmul.f32 1.0614054, %v11058_v46  ;;  %v3482_v33 = vmul.f32 %v10734_v44, %v13239_v15  ;;  %v3809_v13 = vand.u32 2147483647, %v11055_v35 }
 0x420   : > { %v4194_v56 = vadd.f32 -1.4531521, %v4130_v32  ;;  %v3412_v21 = vadd.f32 %v13240_v12, %v3276_v57  ;;  %v3484_v8 = vmul.f32 %v10734_v44, %v13241_v3  ;;  %v5341_v60 = vmul.f32 %v5277_v25, %v3677_v23 }
 0x421   : > { %v5343_v7 = vmul.f32 %v5279_v19, %v3679_v51  ;;  %v4196_v54 = vadd.f32 -1.4531521, %v4132_v58  ;;  %v3811_v11 = vand.u32 2147483647, %v11062_v18  ;;  %v11076_v43 = vmul.f32 %v12832_v47, %v2016_v40 }
 0x422   : > { %v4258_v63 = vmul.f32 %v11053_v53, %v4194_v56  ;;  %v3873_v16 = vmul.f32 0.3275911, %v3809_v13  ;;  %v3546_v20 = vadd.f32 %v3482_v33, %v3410_v1  ;;  %v11081_v59 = vmul.f32 %v12832_v47, %v13210_v50  ;;  %v13243_v56 = vld [vmem:[#allocation71_spill] sm:$0xff] }
 0x423   : > { %v5391_v44 = vpack.c.bf16 %v5343_v7, %v5341_v60  ;;  %v4260_v23 = vmul.f32 %v11058_v46, %v4196_v54  ;;  %v3875_v51 = vmul.f32 0.3275911, %v3811_v11  ;;  %6421 = vpow2.f32 %v4867_v14 }
 0x424   : > { %v4322_v5 = vadd.f32 1.4214138, %v4258_v63  ;;  %v3937_v41 = vadd.f32 1.0, %v3873_v16  ;;  %v3548_v61 = vadd.f32 %v3484_v8, %v3412_v21  ;;  %6423 = vpow2.f32 %v4871_v34  ;;  %v13244_v8 = vld [vmem:[#allocation186_spill] sm:$0xff] }
 0x425   : > { %5633 = vmatmul.mubr.bf16.gmra.mrb[32].mxu1 %v5391_v44  ;;  %v4324_v48 = vadd.f32 1.4214138, %v4260_v23  ;;  %v3939_v40 = vadd.f32 1.0, %v3875_v51  ;;  %v11085_v57 = vadd.f32 %v8892_v4, %v3546_v20  ;;  %v3075_v1 = vmul.f32 %v7347_v26, %v13232_v62  ;;  %v13246_v23 = vld [vmem:[#allocation132_spill] sm:$0xff] }
 0x426   : > { %v4386_v55 = vmul.f32 %v11053_v53, %v4322_v5  ;;  %6425 = vrcp.f32 %v3937_v41  ;;  %v11089_v27 = vadd.f32 %v8892_v4, %v3548_v61  ;;  %v11094_v14 = vmul.f32 0.5, %v10998_v28  ;;  %v13242_v28 = vld [vmem:[#allocation174_spill] sm:$0xff] }
 0x427   : > { %v4388_v24 = vmul.f32 %v11058_v46, %v4324_v48  ;;  %6427 = vrcp.f32 %v3939_v40  ;;  %v4705_v25 = vmul.f32 %v3809_v13, %v3809_v13  ;;  %v11098_v32 = vmul.f32 0.5, %v11003_v17 }
 0x428   : > { %v4450_v34 = vadd.f32 -0.28449672, %v4386_v55  ;;  %v11100_v19 = vmul.f32 0.5, %v3617_v31  ;;  %v11103_v58 = vmul.f32 0.70710677, %v11085_v57  ;;  %v4707_v33 = vmul.f32 %v3811_v11, %v3811_v11  ;;  %v13245_v11 = vld [vmem:[#allocation191_spill] sm:$0xff] }
 0x429   : > { %v4452_v15 = vadd.f32 -0.28449672, %v4388_v24  ;;  %v11106_v62 = vmul.f32 0.70710677, %v11089_v27  ;;  %v3137_v12 = vadd.f32 %v13243_v56, %v13242_v28  ;;  %v11111_v13 = vmul.f32 0.5, %v3619_v2  ;;  %v13247_v56 = vld [vmem:[#allocation187_spill] sm:$0xff] }
 0x42a   : > { %v4514_v21 = vmul.f32 %v11053_v53, %v4450_v34  ;;  %v3814_v17 = vand.u32 2147483647, %v11103_v58  ;;  %v3139_v31 = vadd.f32 %v3075_v1, %v13244_v8  ;;  %v4769_v7 = vsub.f32 0.0, %v4705_v25 }
 0x42b   : > { %v4516_v60 = vmul.f32 %v11058_v46, %v4452_v15  ;;  %v3816_v54 = vand.u32 2147483647, %v11106_v62  ;;  %v3209_v63 = vmul.f32 %v12832_v47, %v13245_v11  ;;  %v3211_v51 = vmul.f32 %v12832_v47, %v13246_v23 }
 0x42c   : > { %v4578_v16 = vadd.f32 0.2548296, %v4514_v21  ;;  %v3878_v20 = vmul.f32 0.3275911, %v3814_v17  ;;  %v4710_v44 = vmul.f32 %v3814_v17, %v3814_v17  ;;  %vm5090_vm12 = vcmp.lt.f32.partialorder %v11007_v52, 0.0 }
 0x42d   : > { %v4580_v2 = vadd.f32 0.2548296, %v4516_v60  ;;  %v4771_v5 = vsub.f32 0.0, %v4707_v33  ;;  %v3880_v41 = vmul.f32 0.3275911, %v3816_v54  ;;  %v3273_v61 = vadd.f32 %v3209_v63, %v3137_v12  ;;  %v6422_v48 = vpop.eup %6421  ;;  %v13248_v12 = vld [vmem:[#allocation111_spill] sm:$0xff] }
 0x42e   : > { %v4642_v40 = vmul.f32 %v11053_v53, %v4578_v16  ;;  %vm5092_vm13 = vcmp.lt.f32.partialorder %v11010_v38, 0.0  ;;  %v3942_v55 = vadd.f32 1.0, %v3878_v20  ;;  %v4712_v1 = vmul.f32 %v3816_v54, %v3816_v54  ;;  %v6424_v25 = vpop.eup %6423  ;;  %v13249_v20 = vld [vmem:[#allocation196_spill] sm:$0xff] }
 0x42f   : > { %v3275_v24 = vadd.f32 %v3211_v51, %v3139_v31  ;;  %v4644_v34 = vmul.f32 %v11058_v46, %v4580_v2  ;;  %v3944_v15 = vadd.f32 1.0, %v3880_v41  ;;  %v4774_v28 = vsub.f32 0.0, %v4710_v44  ;;  %v13250_v2 = vld [vmem:[#allocation68_spill] sm:$0xff] }
 0x430   : > { %v3409_v21 = vadd.f32 %v13247_v56, %v3273_v61  ;;  %v11126_v17 = vpop.eup %6425  ;;  %v4962_v33 = vmul.f32 %v6422_v48, %v4642_v40  ;;  %v4865_v8 = vmul.f32 1.442695, %v4769_v7  ;;  %6429 = vrcp.f32 %v3942_v55 }
 0x431   : > { %v3411_v60 = vadd.f32 %v13248_v12, %v3275_v24  ;;  %v11129_v53 = vpop.eup %6427  ;;  %v4964_v11 = vmul.f32 %v6424_v25, %v4644_v34  ;;  %v4129_v54 = vmul.f32 1.0614054, %v11126_v17  ;;  %v4869_v31 = vmul.f32 1.442695, %v4771_v5  ;;  %v13252_v34 = vld [vmem:[#allocation185_spill] sm:$0xff] }
 0x432   : > { %6431 = vrcp.f32 %v3944_v15  ;;  %v5026_v63 = vsub.f32 1.0, %v4962_v33  ;;  %v4131_v46 = vmul.f32 1.0614054, %v11129_v53  ;;  %v4776_v16 = vsub.f32 0.0, %v4712_v1  ;;  %v13251_v1 = vld [vmem:[#allocation44_spill] sm:$0xff] }
 0x433   : > { %v3481_v44 = vmul.f32 %v10764_v22, %v13249_v20  ;;  %v5028_v23 = vsub.f32 1.0, %v4964_v11  ;;  %v4193_v51 = vadd.f32 -1.4531521, %v4129_v54  ;;  %v4875_v7 = vmul.f32 1.442695, %v4774_v28 }
 0x434   : > { %v3483_v41 = vmul.f32 %v10764_v22, %v13250_v2  ;;  %v5154_v61 = vsub.f32 0.0, %v5026_v63  ;;  %v4195_v48 = vadd.f32 -1.4531521, %v4131_v46  ;;  %v3080_v5 = vmul.f32 %v13084_v10, %v13241_v3 }
 0x435   : > { %v3545_v40 = vadd.f32 %v3481_v44, %v3409_v21  ;;  %v5156_v55 = vsub.f32 0.0, %v5028_v23  ;;  %v4257_v24 = vmul.f32 %v11126_v17, %v4193_v51  ;;  %v11142_v15 = vadd.f32 %v13252_v34, %v13251_v1  ;;  %v13253_v21 = vld [vmem:[#allocation203_spill] sm:$0xff] }
 0x436   : > { %v3547_v25 = vadd.f32 %v3483_v41, %v3411_v60  ;;  %v5218_v28 = vsel %vm5090_vm12, %v5154_v61, %v5026_v63  ;;  %v4259_v56 = vmul.f32 %v11129_v53, %v4195_v48  ;;  %v11151_v33 = vadd.f32 %v3080_v5, %v13253_v21  ;;  %v13254_v21 = vld [vmem:[#allocation70_spill] sm:$0xff] }
 0x437   : > { %v11148_v22 = vadd.f32 %v13134_v30, %v3545_v40  ;;  %v5220_v3 = vsel %vm5092_vm13, %v5156_v55, %v5028_v23  ;;  %v5282_v12 = vadd.f32 1.0, %v5218_v28  ;;  %v4321_v60 = vadd.f32 1.4214138, %v4257_v24 }
 0x438   : > { %v11156_v11 = vadd.f32 %v13134_v30, %v3547_v25  ;;  %v5284_v54 = vadd.f32 1.0, %v5220_v3  ;;  %v4323_v46 = vadd.f32 1.4214138, %v4259_v56  ;;  %6433 = vpow2.f32 %v4865_v8 }
 0x439   : > { %v11159_v52 = vmul.f32 0.70710677, %v11148_v22  ;;  %v4385_v63 = vmul.f32 %v11126_v17, %v4321_v60  ;;  %6435 = vpow2.f32 %v4869_v31  ;;  %v4879_v20 = vmul.f32 1.442695, %v4776_v16 }
 0x43a   : > { %v11163_v44 = vmul.f32 0.70710677, %v11156_v11  ;;  %v11165_v38 = vpop.eup %6429  ;;  %v5346_v23 = vmul.f32 %v5282_v12, %v11094_v14  ;;  %v5348_v51 = vmul.f32 %v5284_v54, %v11098_v32  ;;  %v4387_v41 = vmul.f32 %v11129_v53, %v4323_v46 }
 0x43b   : > { %v3813_v8 = vand.u32 2147483647, %v11159_v52  ;;  %v4449_v48 = vadd.f32 -0.28449672, %v4385_v63  ;;  %v4134_v40 = vmul.f32 1.0614054, %v11165_v38  ;;  %6437 = vpow2.f32 %v4875_v7 }
 0x43c   : > { %v11171_v61 = vpop.eup %6431  ;;  %v3815_v31 = vand.u32 2147483647, %v11163_v44  ;;  %v5394_v16 = vpack.c.bf16 %v5348_v51, %v5346_v23  ;;  %v4451_v5 = vadd.f32 -0.28449672, %v4387_v41  ;;  %v3214_v7 = vmul.f32 %v8834_v9, %v13254_v21  ;;  %v13256_v21 = vld [vmem:[#allocation77_spill] sm:$0xff] }
 0x43d   : > { %v4136_v55 = vmul.f32 1.0614054, %v11171_v61  ;;  %v3877_v24 = vmul.f32 0.3275911, %v3813_v8  ;;  %v4513_v14 = vmul.f32 %v11126_v17, %v4449_v48  ;;  %v4198_v32 = vadd.f32 -1.4531521, %v4134_v40 }
 0x43e   : > { %v3879_v25 = vmul.f32 0.3275911, %v3815_v31  ;;  %v4709_v1 = vmul.f32 %v3813_v8, %v3813_v8  ;;  %5640 = vmatprep.mubr.bf16.mxu1 %v5394_v16  ;;  %v4515_v34 = vmul.f32 %v11129_v53, %v4451_v5  ;;  %v4711_v54 = vmul.f32 %v3815_v31, %v3815_v31 }
 0x43f   : > { %v4200_v28 = vadd.f32 -1.4531521, %v4136_v55  ;;  %v3941_v56 = vadd.f32 1.0, %v3877_v24  ;;  %v4577_v3 = vadd.f32 0.2548296, %v4513_v14  ;;  %v4262_v12 = vmul.f32 %v11165_v38, %v4198_v32  ;;  %v13255_v14 = vld [vmem:[#allocation63_spill] sm:$0xff] }
 0x440   : > { %v3943_v60 = vadd.f32 1.0, %v3879_v25  ;;  %v4579_v46 = vadd.f32 0.2548296, %v4515_v34  ;;  %vm5089_vm14 = vcmp.lt.f32.partialorder %v11055_v35, 0.0  ;;  %v4773_v23 = vsub.f32 0.0, %v4709_v1 }
 0x441   : > { %v4264_v63 = vmul.f32 %v11171_v61, %v4200_v28  ;;  %6439 = vrcp.f32 %v3941_v56  ;;  %v4641_v51 = vmul.f32 %v11126_v17, %v4577_v3  ;;  %vm5091_vm15 = vcmp.lt.f32.partialorder %v11062_v18, 0.0 }
 0x442   : > { %v11186_v41 = vmul.f32 0.5, %v11085_v57  ;;  %v4326_v8 = vadd.f32 1.4214138, %v4262_v12  ;;  %6441 = vrcp.f32 %v3943_v60  ;;  %v6434_v48 = vpop.eup %6433  ;;  %v4643_v40 = vmul.f32 %v11129_v53, %v4579_v46 }
 0x443   : > { %v11190_v31 = vmul.f32 0.5, %v11089_v27  ;;  %v4328_v16 = vadd.f32 1.4214138, %v4264_v63  ;;  %6443 = vpow2.f32 %v4879_v20  ;;  %v6436_v5 = vpop.eup %6435  ;;  %v4961_v55 = vmul.f32 %v6434_v48, %v4641_v51  ;;  %v11198_v20 = vld [vmem:[#allocation11 + $0x18] ss:$0 sm:$0xff]  ;;  %v13258_v63 = vld [vmem:[#allocation74_spill] sm:$0xff] }
 0x444   : > { %v4390_v24 = vmul.f32 %v11165_v38, %v4326_v8  ;;  %v4775_v17 = vsub.f32 0.0, %v4711_v54  ;;  %v3216_v32 = vmul.f32 %v8834_v9, %v13255_v14  ;;  %v4963_v57 = vmul.f32 %v6436_v5, %v4643_v40  ;;  %v13257_v54 = vld [vmem:[#allocation109_spill] sm:$0xff]  ;;  %v13260_v5 = vld [vmem:[#allocation51_spill] sm:$0xff] }
 0x445   : > { %v4392_v25 = vmul.f32 %v11171_v61, %v4328_v16  ;;  %v4873_v1 = vmul.f32 1.442695, %v4773_v23  ;;  %v3278_v34 = vadd.f32 %v3214_v7, %v11142_v15  ;;  %v6438_v53 = vpop.eup %6437  ;;  %v5025_v28 = vsub.f32 1.0, %v4961_v55  ;;  %v13259_v7 = vld [vmem:[#allocation118_spill] sm:$0xff]  ;;  %v13261_v55 = vld [vmem:[#allocation160_spill] sm:$0xff] }
 0x446   : > { %v4454_v27 = vadd.f32 -0.28449672, %v4390_v24  ;;  %v3280_v56 = vadd.f32 %v3216_v32, %v11151_v33  ;;  %v3486_v3 = vmul.f32 %v11198_v20, %v13256_v21  ;;  %v5027_v12 = vsub.f32 1.0, %v4963_v57 }
 0x447   : > { %v4456_v60 = vadd.f32 -0.28449672, %v4392_v25  ;;  %v3414_v46 = vadd.f32 %v13257_v54, %v3278_v34  ;;  %v3488_v51 = vmul.f32 %v11198_v20, %v13258_v63  ;;  %v5153_v23 = vsub.f32 0.0, %v5025_v28  ;;  %v13262_v25 = vld [vmem:[#allocation198_spill] sm:$0xff] }
 0x448   : > { %v4518_v15 = vmul.f32 %v11165_v38, %v4454_v27  ;;  %v3416_v8 = vadd.f32 %v13259_v7, %v3280_v56  ;;  %v3079_v33 = vmul.f32 %v7347_v26, %v13250_v2  ;;  %v5155_v48 = vsub.f32 0.0, %v5027_v12 }
 0x449   : > { %v4520_v40 = vmul.f32 %v11171_v61, %v4456_v60  ;;  %v3550_v16 = vadd.f32 %v3486_v3, %v3414_v46  ;;  %v11212_v24 = vadd.f32 %v13261_v55, %v13260_v5  ;;  %v5217_v14 = vsel %vm5089_vm14, %v5153_v23, %v5025_v28 }
 0x44a   : > { %v4582_v32 = vadd.f32 0.2548296, %v4518_v15  ;;  %v3552_v57 = vadd.f32 %v3488_v51, %v3416_v8  ;;  %v11217_v34 = vadd.f32 %v3079_v33, %v13262_v25  ;;  %v5219_v2 = vsel %vm5091_vm15, %v5155_v48, %v5027_v12 }
 0x44b   : > { %v11219_v27 = vpop.eup %6439  ;;  %v5281_v56 = vadd.f32 1.0, %v5217_v14  ;;  %v4584_v21 = vadd.f32 0.2548296, %v4520_v40  ;;  %v11224_v3 = vadd.f32 %v8892_v4, %v3550_v16  ;;  %v5283_v54 = vadd.f32 1.0, %v5219_v2 }
 0x44c   : > { %v11226_v60 = vpop.eup %6441  ;;  %v4646_v35 = vmul.f32 %v11165_v38, %v4582_v32  ;;  %v4133_v28 = vmul.f32 1.0614054, %v11219_v27  ;;  %v11231_v46 = vadd.f32 %v8892_v4, %v3552_v57  ;;  %vm5094_vm3 = vcmp.lt.f32.partialorder %v11103_v58, 0.0 }
 0x44d   : > { %v6444_v51 = vpop.eup %6443  ;;  %v4648_v23 = vmul.f32 %v11171_v61, %v4584_v21  ;;  %v4135_v18 = vmul.f32 1.0614054, %v11226_v60  ;;  %v4877_v12 = vmul.f32 1.442695, %v4775_v17  ;;  %v5345_v15 = vmul.f32 %v5281_v56, %v11100_v19  ;;  %v13263_v56 = vld [vmem:[#allocation204_spill] sm:$0xff] }
 0x44e   : > { %v5347_v7 = vmul.f32 %v5283_v54, %v11111_v13  ;;  %v4966_v8 = vmul.f32 %v6438_v53, %v4646_v35  ;;  %v4197_v33 = vadd.f32 -1.4531521, %v4133_v28  ;;  %v11239_v40 = vmul.f32 0.70710677, %v11224_v3 }
 0x44f   : > { %v4968_v38 = vmul.f32 %v6444_v51, %v4648_v23  ;;  %v4199_v48 = vadd.f32 -1.4531521, %v4135_v18  ;;  %v11242_v16 = vmul.f32 0.70710677, %v11231_v46  ;;  %6445 = vpow2.f32 %v4873_v1 }
 0x450   : > { %v5393_v61 = vpack.c.bf16 %v5347_v7, %v5345_v15  ;;  %v5030_v5 = vsub.f32 1.0, %v4966_v8  ;;  %v4261_v55 = vmul.f32 %v11219_v27, %v4197_v33  ;;  %v3818_v13 = vand.u32 2147483647, %v11239_v40 }
 0x451   : > { %v5032_v17 = vsub.f32 1.0, %v4968_v38  ;;  %v4263_v19 = vmul.f32 %v11226_v60, %v4199_v48  ;;  %v3820_v53 = vand.u32 2147483647, %v11242_v16  ;;  %vm5096_vm0 = vcmp.lt.f32.partialorder %v11106_v62, 0.0 }
 0x452   : > { %5641 = vmatmul.mubr.bf16.gmra.mrb[36].mxu1 %v5393_v61  ;;  %v5158_v14 = vsub.f32 0.0, %v5030_v5  ;;  %v4325_v32 = vadd.f32 1.4214138, %v4261_v55  ;;  %6447 = vpow2.f32 %v4877_v12  ;;  %v3882_v2 = vmul.f32 0.3275911, %v3818_v13 }
 0x453   : > { %v5160_v57 = vsub.f32 0.0, %v5032_v17  ;;  %v4327_v25 = vadd.f32 1.4214138, %v4263_v19  ;;  %v3213_v21 = vmul.f32 %v12832_v47, %v13263_v56  ;;  %v3884_v35 = vmul.f32 0.3275911, %v3820_v53 }
 0x454   : > { %v5222_v1 = vsel %vm5094_vm3, %v5158_v14, %v5030_v5  ;;  %v4389_v54 = vmul.f32 %v11219_v27, %v4325_v32  ;;  %v4714_v28 = vmul.f32 %v3818_v13, %v3818_v13  ;;  %v3946_v18 = vadd.f32 1.0, %v3882_v2  ;;  %v11275_v56 = vld [vmem:[#allocation11 + $0x10] ss:$0 sm:$0xff] }
 0x455   : > { %v5224_v51 = vsel %vm5096_vm0, %v5160_v57, %v5032_v17  ;;  %v5286_v23 = vadd.f32 1.0, %v5222_v1  ;;  %v4391_v62 = vmul.f32 %v11226_v60, %v4327_v25  ;;  %v3948_v7 = vadd.f32 1.0, %v3884_v35  ;;  %v13265_v25 = vld [vmem:[#allocation182_spill] sm:$0xff] }
 0x456   : > { %v5288_v15 = vadd.f32 1.0, %v5224_v51  ;;  %v4453_v12 = vadd.f32 -0.28449672, %v4389_v54  ;;  %v4716_v8 = vmul.f32 %v3820_v53, %v3820_v53  ;;  %v11257_v33 = vadd.f32 %v11081_v59, %v10642_v6  ;;  %v13264_v6 = vld [vmem:[#allocation57_spill] sm:$0xff]  ;;  %v13268_v51 = vld [vmem:[#allocation43_spill] sm:$0xff] }
 0x457   : > { %v11261_v58 = vmul.f32 %v8834_v9, %v13210_v50  ;;  %v4455_v38 = vadd.f32 -0.28449672, %v4391_v62  ;;  %6449 = vrcp.f32 %v3946_v18  ;;  %v5350_v48 = vmul.f32 %v5286_v23, %v11186_v41  ;;  %v13269_v23 = vld [vmem:[#allocation110_spill] sm:$0xff]  ;;  %v13270_v18 = vld [vmem:[#allocation129_spill] sm:$0xff] }
 0x458   : > { %v5352_v61 = vmul.f32 %v5288_v15, %v11190_v31  ;;  %v4517_v5 = vmul.f32 %v11219_v27, %v4453_v12  ;;  %6451 = vrcp.f32 %v3948_v7  ;;  %v11267_v55 = vmul.f32 0.5, %v11148_v22  ;;  %v13266_v22 = vld [vmem:[#allocation40_spill] sm:$0xff]  ;;  %v13271_v7 = vld [vmem:[#allocation75_spill] sm:$0xff] }
 0x459   : > { %v4519_v17 = vmul.f32 %v11226_v60, %v4455_v38  ;;  %v3215_v59 = vmul.f32 %v12832_v47, %v13264_v6  ;;  %v3277_v19 = vadd.f32 %v3213_v21, %v11212_v24  ;;  %v6446_v13 = vpop.eup %6445  ;;  %v4778_v32 = vsub.f32 0.0, %v4714_v28  ;;  %v13267_v24 = vld [vmem:[#allocation89_spill] sm:$0xff] }
 0x45a   : > { %v5396_v53 = vpack.c.bf16 %v5352_v61, %v5350_v48  ;;  %v4581_v14 = vadd.f32 0.2548296, %v4517_v5  ;;  %v4780_v41 = vsub.f32 0.0, %v4716_v8  ;;  %v3485_v1 = vmul.f32 %v11275_v56, %v13266_v22  ;;  %v13272_v48 = vld [vmem:[#allocation150_spill] sm:$0xff] }
 0x45b   : > { %v4583_v57 = vadd.f32 0.2548296, %v4519_v17  ;;  %v3279_v31 = vadd.f32 %v3215_v59, %v11217_v34  ;;  %v3413_v2 = vadd.f32 %v13265_v25, %v3277_v19  ;;  %v3487_v21 = vmul.f32 %v11275_v56, %v13267_v24  ;;  %v13273_v5 = vld [vmem:[#allocation86_spill] sm:$0xff] }
 0x45c   : > { %v6448_v54 = vpop.eup %6447  ;;  %5648 = vmatprep.mubr.bf16.mxu1 %v5396_v53  ;;  %v4645_v35 = vmul.f32 %v11219_v27, %v4581_v14  ;;  %v3084_v28 = vmul.f32 %v13084_v10, %v13258_v63  ;;  %v3146_v34 = vadd.f32 %v13269_v23, %v13268_v51  ;;  %v3218_v8 = vmul.f32 %v8834_v9, %v13271_v7 }
 0x45d   : > { %v4647_v62 = vmul.f32 %v11226_v60, %v4583_v57  ;;  %v3415_v15 = vadd.f32 %v13270_v18, %v3279_v31  ;;  %v3549_v12 = vadd.f32 %v3485_v1, %v3413_v2  ;;  %v3687_v38 = vmul.f32 0.5, %v11156_v11 }
 0x45e   : > { %v4965_v27 = vmul.f32 %v6446_v13, %v4645_v35  ;;  %v3148_v61 = vadd.f32 %v3084_v28, %v13272_v48  ;;  %v3220_v17 = vmul.f32 %v8834_v9, %v13273_v5  ;;  %v3282_v60 = vadd.f32 %v3218_v8, %v3146_v34 }
 0x45f   : > { %v4967_v63 = vmul.f32 %v6448_v54, %v4647_v62  ;;  %v3551_v6 = vadd.f32 %v3487_v21, %v3415_v15  ;;  %v11295_v59 = vadd.f32 %v13134_v30, %v3549_v12  ;;  %vm5093_vm2 = vcmp.lt.f32.partialorder %v11159_v52, 0.0  ;;  %v13274_v52 = vld [vmem:[#allocation105_spill] sm:$0xff] }
 0x460   : > { %v5029_v19 = vsub.f32 1.0, %v4965_v27  ;;  %v4883_v53 = vmul.f32 1.442695, %v4778_v32  ;;  %v3284_v14 = vadd.f32 %v3220_v17, %v3148_v61  ;;  %v4887_v13 = vmul.f32 1.442695, %v4780_v41 }
 0x461   : > { %v11298_v57 = vpop.eup %6449  ;;  %v5031_v11 = vsub.f32 1.0, %v4967_v63  ;;  %v11301_v31 = vadd.f32 %v13134_v30, %v3551_v6  ;;  %v11304_v25 = vmul.f32 0.70710677, %v11295_v59  ;;  %v3418_v54 = vadd.f32 %v10492_v45, %v3282_v60 }
 0x462   : > { %v11306_v2 = vpop.eup %6451  ;;  %v5157_v22 = vsub.f32 0.0, %v5029_v19  ;;  %v4138_v1 = vmul.f32 1.0614054, %v11298_v57  ;;  %v3420_v32 = vadd.f32 %v10573_v29, %v3284_v14  ;;  %vm5095_vm4 = vcmp.lt.f32.partialorder %v11163_v44, 0.0 }
 0x463   : > { %v5159_v35 = vsub.f32 0.0, %v5031_v11  ;;  %v4140_v41 = vmul.f32 1.0614054, %v11306_v2  ;;  %v11314_v21 = vmul.f32 0.70710677, %v11301_v31  ;;  %6453 = vpow2.f32 %v4883_v53 }
 0x464   : > { %v5221_v28 = vsel %vm5093_vm2, %v5157_v22, %v5029_v19  ;;  %v4202_v51 = vadd.f32 -1.4531521, %v4138_v1  ;;  %v3817_v23 = vand.u32 2147483647, %v11304_v25  ;;  %6455 = vpow2.f32 %v4887_v13 }
 0x465   : > { %v5223_v34 = vsel %vm5095_vm4, %v5159_v35, %v5031_v11  ;;  %v5285_v62 = vadd.f32 1.0, %v5221_v28  ;;  %v4204_v45 = vadd.f32 -1.4531521, %v4140_v41  ;;  %v3819_v29 = vand.u32 2147483647, %v11314_v21  ;;  %v13276_v35 = vld [vmem:[#allocation47_spill] sm:$0xff] }
 0x466   : > { %v5287_v18 = vadd.f32 1.0, %v5223_v34  ;;  %v4266_v44 = vmul.f32 %v11298_v57, %v4202_v51  ;;  %v3881_v15 = vmul.f32 0.3275911, %v3817_v23  ;;  %v4713_v8 = vmul.f32 %v3817_v23, %v3817_v23  ;;  %v13277_v41 = vld [vmem:[#allocation78_spill] sm:$0xff] }
 0x467   : > { %v4268_v12 = vmul.f32 %v11306_v2, %v4204_v45  ;;  %v3883_v7 = vmul.f32 0.3275911, %v3819_v29  ;;  %v3492_v27 = vmul.f32 %v11198_v20, %v13274_v52  ;;  %v5349_v48 = vmul.f32 %v5285_v62, %v11267_v55  ;;  %v13278_v23 = vld [vmem:[#allocation202_spill] sm:$0xff] }
 0x468   : > { %v5351_v61 = vmul.f32 %v5287_v18, %v3687_v38  ;;  %v4330_v5 = vadd.f32 1.4214138, %v4266_v44  ;;  %v3945_v17 = vadd.f32 1.0, %v3881_v15  ;;  %v3490_v60 = vmul.f32 %v11198_v20, %v13114_v49  ;;  %v13280_v18 = vld [vmem:[#allocation199_spill] sm:$0xff] }
 0x469   : > { %v4332_v63 = vadd.f32 1.4214138, %v4268_v12  ;;  %v3947_v6 = vadd.f32 1.0, %v3883_v7  ;;  %v3083_v19 = vmul.f32 %v7347_v26, %v13267_v24  ;;  %v13275_v53 = vrot.slane %v10665_v0, 7 }
 0x46a   : > { %v5395_v11 = vpack.c.bf16 %v5351_v61, %v5349_v48  ;;  %v4394_v55 = vmul.f32 %v11298_v57, %v4330_v5  ;;  %6457 = vrcp.f32 %v3945_v17  ;;  %v4715_v13 = vmul.f32 %v3819_v29, %v3819_v29  ;;  %v13279_v29 = vld [vmem:[#allocation90_spill] sm:$0xff] }
 0x46b   : > { %v11334_v14 = vsel %vm1803_vm1, %v13275_v53, %v13210_v50  ;;  %v4396_v38 = vmul.f32 %v11306_v2, %v4332_v63  ;;  %6459 = vrcp.f32 %v3947_v6  ;;  %v3554_v22 = vadd.f32 %v3490_v60, %v3418_v54 }
 0x46c   : > { %5649 = vmatmul.mubr.bf16.gmra.mrb[40].mxu1 %v5395_v11  ;;  %v4458_v49 = vadd.f32 -0.28449672, %v4394_v55  ;;  %v4777_v1 = vsub.f32 0.0, %v4713_v8  ;;  %v3556_v24 = vadd.f32 %v3492_v27, %v3420_v32  ;;  %v3145_v0 = vadd.f32 %v13277_v41, %v13276_v35 }
 0x46d   : > { %v11341_v28 = vmul.f32 0.5, %v11224_v3  ;;  %v4460_v50 = vadd.f32 -0.28449672, %v4396_v38  ;;  %v11344_v51 = vadd.f32 %v8892_v4, %v3554_v22  ;;  %v3147_v34 = vadd.f32 %v3083_v19, %v13278_v23  ;;  %v6454_v62 = vpop.eup %6453  ;;  %v13281_v19 = vld [vmem:[#allocation119_spill] sm:$0xff] }
 0x46e   : > { %v4522_v45 = vmul.f32 %v11298_v57, %v4458_v49  ;;  %v11349_v54 = vadd.f32 %v8892_v4, %v3556_v24  ;;  %v3217_v32 = vmul.f32 %v12832_v47, %v13279_v29  ;;  %v3219_v44 = vmul.f32 %v12832_v47, %v13280_v18  ;;  %v6456_v8 = vpop.eup %6455 }
 0x46f   : > { %v11356_v3 = vmul.f32 0.5, %v11231_v46  ;;  %v4524_v15 = vmul.f32 %v11306_v2, %v4460_v50  ;;  %v4779_v12 = vsub.f32 0.0, %v4715_v13  ;;  %v11360_v7 = vmul.f32 0.70710677, %v11344_v51 }
 0x470   : > { %v4586_v27 = vadd.f32 0.2548296, %v4522_v45  ;;  %v4881_v48 = vmul.f32 1.442695, %v4777_v1  ;;  %v11363_v61 = vmul.f32 0.70710677, %v11349_v54  ;;  %v3281_v5 = vadd.f32 %v3217_v32, %v3145_v0 }
 0x471   : > { %v4588_v17 = vadd.f32 0.2548296, %v4524_v15  ;;  %vm5098_vm1 = vcmp.lt.f32.partialorder %v11239_v40, 0.0  ;;  %v3822_v63 = vand.u32 2147483647, %v11360_v7  ;;  %v3283_v46 = vadd.f32 %v3219_v44, %v3147_v34  ;;  %v13282_v45 = vld [vmem:[#allocation99_spill] sm:$0xff] }
 0x472   : > { %v4650_v6 = vmul.f32 %v11298_v57, %v4586_v27  ;;  %vm5100_vm5 = vcmp.lt.f32.partialorder %v11242_v16, 0.0  ;;  %v3824_v60 = vand.u32 2147483647, %v11363_v61  ;;  %v3417_v53 = vadd.f32 %v13281_v19, %v3281_v5 }
 0x473   : > { %v4652_v11 = vmul.f32 %v11306_v2, %v4588_v17  ;;  %v4885_v55 = vmul.f32 1.442695, %v4779_v12  ;;  %v3886_v38 = vmul.f32 0.3275911, %v3822_v63  ;;  %v3419_v13 = vadd.f32 %v10503_v42, %v3283_v46 }
 0x474   : > { %v11373_v22 = vpop.eup %6457  ;;  %v4970_v49 = vmul.f32 %v6454_v62, %v4650_v6  ;;  %6461 = vpow2.f32 %v4881_v48  ;;  %v3888_v1 = vmul.f32 0.3275911, %v3824_v60  ;;  %v4718_v24 = vmul.f32 %v3822_v63, %v3822_v63 }
 0x475   : > { %v11375_v35 = vpop.eup %6459  ;;  %v4972_v57 = vmul.f32 %v6456_v8, %v4652_v11  ;;  %v4137_v41 = vmul.f32 1.0614054, %v11373_v22  ;;  %v3950_v0 = vadd.f32 1.0, %v3886_v38  ;;  %v4720_v50 = vmul.f32 %v3824_v60, %v3824_v60 }
 0x476   : > { %v5034_v23 = vsub.f32 1.0, %v4970_v49  ;;  %v4139_v2 = vmul.f32 1.0614054, %v11375_v35  ;;  %v3952_v34 = vadd.f32 1.0, %v3888_v1  ;;  %v3491_v42 = vmul.f32 %v11275_v56, %v13282_v45 }
 0x477   : > { %v5036_v29 = vsub.f32 1.0, %v4972_v57  ;;  %v4201_v32 = vadd.f32 -1.4531521, %v4137_v41  ;;  %6463 = vrcp.f32 %v3950_v0  ;;  %v3489_v62 = vmul.f32 %v11275_v56, %v13111_v37 }
 0x478   : > { %v5162_v18 = vsub.f32 0.0, %v5034_v23  ;;  %v4203_v44 = vadd.f32 -1.4531521, %v4139_v2  ;;  %6465 = vrcp.f32 %v3952_v34  ;;  %v4782_v15 = vsub.f32 0.0, %v4718_v24  ;;  %v13283_v2 = vld [vmem:[#allocation167_spill] sm:$0xff]  ;;  %v13284_v34 = vld [vmem:[#allocation80_spill] sm:$0xff] }
 0x479   : > { %v5164_v12 = vsub.f32 0.0, %v5036_v29  ;;  %v4265_v8 = vmul.f32 %v11373_v22, %v4201_v32  ;;  %v4784_v27 = vsub.f32 0.0, %v4720_v50  ;;  %v3553_v48 = vadd.f32 %v3489_v62, %v3417_v53 }
 0x47a   : > { %v5226_v5 = vsel %vm5098_vm1, %v5162_v18, %v5034_v23  ;;  %v4267_v17 = vmul.f32 %v11375_v35, %v4203_v44  ;;  %6467 = vpow2.f32 %v4885_v55  ;;  %v3555_v63 = vadd.f32 %v3491_v42, %v3419_v13  ;;  %v13285_v18 = vld [vmem:[#allocation97_spill] sm:$0xff] }
 0x47b   : > { %v5228_v46 = vsel %vm5100_vm5, %v5164_v12, %v5036_v29  ;;  %v5290_v37 = vadd.f32 1.0, %v5226_v5  ;;  %v4329_v6 = vadd.f32 1.4214138, %v4265_v8  ;;  %v11390_v60 = vadd.f32 %v13134_v30, %v3553_v48 }
 0x47c   : > { %v5292_v19 = vadd.f32 1.0, %v5228_v46  ;;  %v4331_v11 = vadd.f32 1.4214138, %v4267_v17  ;;  %v4891_v38 = vmul.f32 1.442695, %v4782_v15  ;;  %v11393_v53 = vadd.f32 %v13134_v30, %v3555_v63 }
 0x47d   : > { %v4393_v40 = vmul.f32 %v11373_v22, %v4329_v6  ;;  %v4895_v49 = vmul.f32 1.442695, %v4784_v27  ;;  %v11397_v55 = vmul.f32 0.70710677, %v11390_v60  ;;  %v3088_v16 = vmul.f32 %v13084_v10, %v13274_v52 }
 0x47e   : > { %v6462_v13 = vpop.eup %6461  ;;  %v5354_v1 = vmul.f32 %v5290_v37, %v11341_v28  ;;  %v5356_v24 = vmul.f32 %v5292_v19, %v11356_v3  ;;  %v4395_v57 = vmul.f32 %v11375_v35, %v4331_v11  ;;  %v11405_v41 = vmul.f32 0.70710677, %v11393_v53 }
 0x47f   : > { %v11408_v0 = vmul.f32 0.5, %v11295_v59  ;;  %v4457_v50 = vadd.f32 -0.28449672, %v4393_v40  ;;  %v3821_v23 = vand.u32 2147483647, %v11397_v55  ;;  %v3150_v42 = vadd.f32 %v13284_v34, %v13283_v2  ;;  %v13287_v34 = vld [vmem:[#allocation92_spill] sm:$0xff] }
 0x480   : > { %v5398_v52 = vpack.c.bf16 %v5356_v24, %v5354_v1  ;;  %v11414_v29 = vmul.f32 0.5, %v11301_v31  ;;  %v4459_v28 = vadd.f32 -0.28449672, %v4395_v57  ;;  %v3823_v3 = vand.u32 2147483647, %v11405_v41  ;;  %v13286_v57 = vld [vmem:[#allocation93_spill] sm:$0xff] }
 0x481   : > { %v11417_v32 = vpop.eup %6463  ;;  %v4521_v62 = vmul.f32 %v11373_v22, %v4457_v50  ;;  %6469 = vpow2.f32 %v4891_v38  ;;  %v3885_v59 = vmul.f32 0.3275911, %v3821_v23  ;;  %v3152_v44 = vadd.f32 %v3088_v16, %v13285_v18 }
 0x482   : > { %v11421_v15 = vpop.eup %6465  ;;  %5656 = vmatprep.mubr.bf16.mxu1 %v5398_v52  ;;  %v4523_v12 = vmul.f32 %v11375_v35, %v4459_v28  ;;  %v4142_v8 = vmul.f32 1.0614054, %v11417_v32  ;;  %6471 = vpow2.f32 %v4895_v49  ;;  %v3887_v31 = vmul.f32 0.3275911, %v3823_v3 }
 0x483   : > { %v4585_v27 = vadd.f32 0.2548296, %v4521_v62  ;;  %v4144_v48 = vmul.f32 1.0614054, %v11421_v15  ;;  %v3949_v5 = vadd.f32 1.0, %v3885_v59  ;;  %v4717_v17 = vmul.f32 %v3821_v23, %v3821_v23  ;;  %v13288_v62 = vld [vmem:[#allocation102_spill] sm:$0xff] }
 0x484   : > { %v6468_v63 = vpop.eup %6467  ;;  %v4587_v46 = vadd.f32 0.2548296, %v4523_v12  ;;  %v4206_v37 = vadd.f32 -1.4531521, %v4142_v8  ;;  %v3951_v6 = vadd.f32 1.0, %v3887_v31  ;;  %v4719_v19 = vmul.f32 %v3823_v3, %v3823_v3  ;;  %v13289_v8 = vld [vmem:[#allocation123_spill] sm:$0xff] }
 0x485   : > { %v4649_v11 = vmul.f32 %v11373_v22, %v4585_v27  ;;  %vm5097_vm6 = vcmp.lt.f32.partialorder %v11304_v25, 0.0  ;;  %v4208_v38 = vadd.f32 -1.4531521, %v4144_v48  ;;  %6473 = vrcp.f32 %v3949_v5 }
 0x486   : > { %v4651_v40 = vmul.f32 %v11375_v35, %v4587_v46  ;;  %vm5099_vm8 = vcmp.lt.f32.partialorder %v11314_v21, 0.0  ;;  %v4270_v49 = vmul.f32 %v11417_v32, %v4206_v37  ;;  %6475 = vrcp.f32 %v3951_v6 }
 0x487   : > { %v4969_v16 = vmul.f32 %v6462_v13, %v4649_v11  ;;  %v4272_v1 = vmul.f32 %v11421_v15, %v4208_v38  ;;  %v4781_v24 = vsub.f32 0.0, %v4717_v17  ;;  %v3222_v50 = vmul.f32 %v8834_v9, %v13286_v57  ;;  %v13290_v17 = vld [vmem:[#allocation46_spill] sm:$0xff]  ;;  %v13292_v38 = vld [vmem:[#allocation192_spill] sm:$0xff] }
 0x488   : > { %v4971_v23 = vmul.f32 %v6468_v63, %v4651_v40  ;;  %v4334_v22 = vadd.f32 1.4214138, %v4270_v49  ;;  %v4783_v2 = vsub.f32 0.0, %v4719_v19  ;;  %v3224_v52 = vmul.f32 %v8834_v9, %v13287_v34  ;;  %v13291_v19 = vld [vmem:[#allocation91_spill] sm:$0xff]  ;;  %v13294_v57 = vld [vmem:[#allocation148_spill] sm:$0xff] }
 0x489   : > { %v5033_v28 = vsub.f32 1.0, %v4969_v16  ;;  %v4336_v35 = vadd.f32 1.4214138, %v4272_v1  ;;  %v3286_v3 = vadd.f32 %v3222_v50, %v3150_v42  ;;  %v3494_v59 = vmul.f32 %v11198_v20, %v13288_v62  ;;  %v13293_v40 = vld [vmem:[#allocation31_spill] sm:$0xff] }
 0x48a   : > { %v5035_v18 = vsub.f32 1.0, %v4971_v23  ;;  %v4398_v13 = vmul.f32 %v11417_v32, %v4334_v22  ;;  %v3288_v12 = vadd.f32 %v3224_v52, %v3152_v44  ;;  %v3496_v31 = vmul.f32 %v11198_v20, %v13289_v8 }
 0x48b   : > { %v6470_v27 = vpop.eup %6469  ;;  %v5161_v48 = vsub.f32 0.0, %v5033_v28  ;;  %v4400_v5 = vmul.f32 %v11421_v15, %v4336_v35  ;;  %v3422_v63 = vadd.f32 %v13290_v17, %v3286_v3  ;;  %v3087_v46 = vmul.f32 %v7347_v26, %v13282_v45 }
 0x48c   : > { %v6472_v42 = vpop.eup %6471  ;;  %v5163_v37 = vsub.f32 0.0, %v5035_v18  ;;  %v4462_v6 = vadd.f32 -0.28449672, %v4398_v13  ;;  %v3424_v11 = vadd.f32 %v13291_v19, %v3288_v12  ;;  %v11448_v44 = vadd.f32 %v13293_v40, %v13292_v38 }
 0x48d   : > { %v5225_v49 = vsel %vm5097_vm6, %v5161_v48, %v5033_v28  ;;  %v4464_v16 = vadd.f32 -0.28449672, %v4400_v5  ;;  %v3558_v1 = vadd.f32 %v3494_v59, %v3422_v63  ;;  %v11453_v50 = vadd.f32 %v3087_v46, %v13294_v57  ;;  %v13295_v57 = vld [vmem:[#allocation58_spill] sm:$0xff] }
 0x48e   : > { %v5227_v45 = vsel %vm5099_vm8, %v5163_v37, %v5035_v18  ;;  %v5289_v23 = vadd.f32 1.0, %v5225_v49  ;;  %v4526_v22 = vmul.f32 %v11417_v32, %v4462_v6  ;;  %v3560_v34 = vadd.f32 %v3496_v31, %v3424_v11 }
 0x48f   : > { %v11458_v52 = vpop.eup %6473  ;;  %v5291_v35 = vadd.f32 1.0, %v5227_v45  ;;  %v3694_v3 = vmul.f32 0.5, %v11344_v51  ;;  %v4528_v25 = vmul.f32 %v11421_v15, %v4464_v16  ;;  %v11463_v28 = vadd.f32 %v8892_v4, %v3558_v1 }
 0x490   : > { %v11465_v62 = vpop.eup %6475  ;;  %v4590_v59 = vadd.f32 0.2548296, %v4526_v22  ;;  %v4141_v21 = vmul.f32 1.0614054, %v11458_v52  ;;  %v4889_v18 = vmul.f32 1.442695, %v4781_v24  ;;  %v11469_v13 = vadd.f32 %v8892_v4, %v3560_v34 }
 0x491   : > { %v5353_v12 = vmul.f32 %v5289_v23, %v11408_v0  ;;  %v5355_v31 = vmul.f32 %v5291_v35, %v11414_v29  ;;  %v4592_v48 = vadd.f32 0.2548296, %v4528_v25  ;;  %v4143_v51 = vmul.f32 1.0614054, %v11465_v62 }
 0x492   : > { %v4654_v5 = vmul.f32 %v11417_v32, %v4590_v59  ;;  %v4205_v17 = vadd.f32 -1.4531521, %v4141_v21  ;;  %v4893_v63 = vmul.f32 1.442695, %v4783_v2  ;;  %v11476_v46 = vmul.f32 0.70710677, %v11463_v28 }
 0x493   : > { %v5397_v37 = vpack.c.bf16 %v5355_v31, %v5353_v12  ;;  %v4656_v24 = vmul.f32 %v11421_v15, %v4592_v48  ;;  %v4207_v6 = vadd.f32 -1.4531521, %v4143_v51  ;;  %v11480_v19 = vmul.f32 0.70710677, %v11469_v13 }
 0x494   : > { %v4974_v0 = vmul.f32 %v6470_v27, %v4654_v5  ;;  %vm5102_vm9 = vcmp.lt.f32.partialorder %v11360_v7, 0.0  ;;  %v4269_v29 = vmul.f32 %v11458_v52, %v4205_v17  ;;  %v3826_v11 = vand.u32 2147483647, %v11476_v46 }
 0x495   : > { %5657 = vmatmul.mubr.bf16.gmra.mrb[44].mxu1 %v5397_v37  ;;  %v4976_v32 = vmul.f32 %v6472_v42, %v4656_v24  ;;  %v4271_v2 = vmul.f32 %v11465_v62, %v4207_v6  ;;  %6477 = vpow2.f32 %v4889_v18  ;;  %v3828_v38 = vand.u32 2147483647, %v11480_v19 }
 0x496   : > { %v5038_v40 = vsub.f32 1.0, %v4974_v0  ;;  %v4333_v15 = vadd.f32 1.4214138, %v4269_v29  ;;  %6479 = vpow2.f32 %v4893_v63  ;;  %v3890_v49 = vmul.f32 0.3275911, %v3826_v11  ;;  %v13296_v0 = vld [vmem:[#allocation172_spill] sm:$0xff] }
 0x497   : > { %v5040_v16 = vsub.f32 1.0, %v4976_v32  ;;  %v4335_v1 = vadd.f32 1.4214138, %v4271_v2  ;;  %v3892_v27 = vmul.f32 0.3275911, %v3828_v38  ;;  %v3221_v45 = vmul.f32 %v12832_v47, %v13295_v57  ;;  %v13297_v2 = vld [vmem:[#allocation84_spill] sm:$0xff] }
 0x498   : > { %v5166_v23 = vsub.f32 0.0, %v5038_v40  ;;  %v4397_v22 = vmul.f32 %v11458_v52, %v4333_v15  ;;  %v3954_v34 = vadd.f32 1.0, %v3890_v49  ;;  %v4722_v42 = vmul.f32 %v3826_v11, %v3826_v11  ;;  %v13298_v49 = vld [vmem:[#allocation37_spill] sm:$0xff] }
 0x499   : > { %v5168_v35 = vsub.f32 0.0, %v5040_v16  ;;  %v4399_v25 = vmul.f32 %v11465_v62, %v4335_v1  ;;  %v3956_v59 = vadd.f32 1.0, %v3892_v27  ;;  %v4724_v21 = vmul.f32 %v3828_v38, %v3828_v38  ;;  %v13299_v1 = vld [vmem:[#allocation122_spill] sm:$0xff] }
 0x49a   : > { %vm5104_vm10 = vcmp.lt.f32.partialorder %v11363_v61, 0.0  ;;  %v5230_v18 = vsel %vm5102_vm9, %v5166_v23, %v5038_v40  ;;  %v4461_v12 = vadd.f32 -0.28449672, %v4397_v22  ;;  %6481 = vrcp.f32 %v3954_v34 }
 0x49b   : > { %v5232_v31 = vsel %vm5104_vm10, %v5168_v35, %v5040_v16  ;;  %v5294_v48 = vadd.f32 1.0, %v5230_v18  ;;  %v4463_v51 = vadd.f32 -0.28449672, %v4399_v25  ;;  %6483 = vrcp.f32 %v3956_v59  ;;  %v13302_v35 = vld [vmem:[#allocation125_spill] sm:$0xff]  ;;  %v13303_v59 = vld [vmem:[#allocation112_spill] sm:$0xff] }
 0x49c   : > { %v3696_v5 = vmul.f32 0.5, %v11349_v54  ;;  %v5296_v17 = vadd.f32 1.0, %v5232_v31  ;;  %v4525_v63 = vmul.f32 %v11458_v52, %v4461_v12  ;;  %v4786_v37 = vsub.f32 0.0, %v4722_v42  ;;  %v13304_v31 = vld [vmem:[#allocation107_spill] sm:$0xff] }
 0x49d   : > { %v4527_v24 = vmul.f32 %v11465_v62, %v4463_v51  ;;  %v4788_v6 = vsub.f32 0.0, %v4724_v21  ;;  %v3223_v61 = vmul.f32 %v12832_v47, %v13296_v0  ;;  %v3285_v7 = vadd.f32 %v3221_v45, %v11448_v44  ;;  %v13301_v45 = vld [vmem:[#allocation205_spill] sm:$0xff] }
 0x49e   : > { %v5358_v29 = vmul.f32 %v5294_v48, %v3694_v3  ;;  %v5360_v11 = vmul.f32 %v5296_v17, %v3696_v5  ;;  %v4589_v32 = vadd.f32 0.2548296, %v4525_v63  ;;  %v3493_v38 = vmul.f32 %v11275_v56, %v13297_v2  ;;  %v13300_v3 = vld [vmem:[#allocation106_spill] sm:$0xff]  ;;  %v13305_v48 = vld [vmem:[#allocation121_spill] sm:$0xff] }
 0x49f   : > { %v6478_v40 = vpop.eup %6477  ;;  %v4591_v54 = vadd.f32 0.2548296, %v4527_v24  ;;  %v3287_v15 = vadd.f32 %v3223_v61, %v11453_v50  ;;  %v3421_v16 = vadd.f32 %v13298_v49, %v3285_v7  ;;  %v3495_v27 = vmul.f32 %v11275_v56, %v13299_v1 }
 0x4a0   : > { %v6480_v57 = vpop.eup %6479  ;;  %v5400_v23 = vpack.c.bf16 %v5360_v11, %v5358_v29  ;;  %v4653_v22 = vmul.f32 %v11458_v52, %v4589_v32  ;;  %v3092_v44 = vmul.f32 %v13084_v10, %v13289_v8  ;;  %v3154_v34 = vadd.f32 %v13301_v45, %v13300_v3 }
 0x4a1   : > { %v4655_v42 = vmul.f32 %v11465_v62, %v4591_v54  ;;  %v3423_v25 = vadd.f32 %v13302_v35, %v3287_v15  ;;  %v3557_v50 = vadd.f32 %v3493_v38, %v3421_v16  ;;  %v3226_v21 = vmul.f32 %v8834_v9, %v13303_v59  ;;  %v13306_v54 = vld [vmem:[#allocation95_spill] sm:$0xff] }
 0x4a2   : > { %5664 = vmatprep.mubr.bf16.mxu1 %v5400_v23  ;;  %v3693_v18 = vmul.f32 0.5, %v11390_v60  ;;  %v4973_v12 = vmul.f32 %v6478_v40, %v4653_v22  ;;  %v3156_v52 = vadd.f32 %v3092_v44, %v13304_v31  ;;  %v3228_v10 = vmul.f32 %v8834_v9, %v13305_v48  ;;  %v13307_v35 = vld [vmem:[#allocation151_spill] sm:$0xff] }
 0x4a3   : > { %v4975_v8 = vmul.f32 %v6480_v57, %v4655_v42  ;;  %v3559_v51 = vadd.f32 %v3495_v27, %v3423_v25  ;;  %v11520_v5 = vadd.f32 %v13134_v30, %v3557_v50  ;;  %v3290_v62 = vadd.f32 %v3226_v21, %v3154_v34 }
 0x4a4   : > { %v11522_v17 = vpop.eup %6481  ;;  %v3695_v63 = vmul.f32 0.5, %v11393_v53  ;;  %v5037_v24 = vsub.f32 1.0, %v4973_v12  ;;  %v4899_v0 = vmul.f32 1.442695, %v4786_v37  ;;  %v3292_v61 = vadd.f32 %v3228_v10, %v3156_v52 }
 0x4a5   : > { %v11525_v60 = vpop.eup %6483  ;;  %v5039_v7 = vsub.f32 1.0, %v4975_v8  ;;  %v4146_v29 = vmul.f32 1.0614054, %v11522_v17  ;;  %v4903_v11 = vmul.f32 1.442695, %v4788_v6  ;;  %v11529_v32 = vadd.f32 %v13134_v30, %v3559_v51  ;;  %v13308_v51 = vld [vmem:[#allocation179_spill] sm:$0xff] }
 0x4a6   : > { %v5165_v2 = vsub.f32 0.0, %v5037_v24  ;;  %v4148_v38 = vmul.f32 1.0614054, %v11525_v60  ;;  %v11533_v40 = vmul.f32 0.70710677, %v11520_v5  ;;  %v3426_v53 = vadd.f32 %v13306_v54, %v3290_v62 }
 0x4a7   : > { %vm5101_vm11 = vcmp.lt.f32.partialorder %v11397_v55, 0.0  ;;  %v5167_v37 = vsub.f32 0.0, %v5039_v7  ;;  %v4210_v15 = vadd.f32 -1.4531521, %v4146_v29  ;;  %v11538_v49 = vmul.f32 0.70710677, %v11529_v32 }
 0x4a8   : > { %vm5103_vm12 = vcmp.lt.f32.partialorder %v11405_v41, 0.0  ;;  %v5229_v6 = vsel %vm5101_vm11, %v5165_v2, %v5037_v24  ;;  %v4212_v16 = vadd.f32 -1.4531521, %v4148_v38  ;;  %v3825_v27 = vand.u32 2147483647, %v11533_v40  ;;  %v13309_v24 = vld [vmem:[#allocation29_spill] sm:$0xff] }
 0x4a9   : > { %v5231_v57 = vsel %vm5103_vm12, %v5167_v37, %v5039_v7  ;;  %v5293_v23 = vadd.f32 1.0, %v5229_v6  ;;  %v4274_v22 = vmul.f32 %v11522_v17, %v4210_v15  ;;  %v3827_v44 = vand.u32 2147483647, %v11538_v49 }
 0x4aa   : > { %v5295_v3 = vadd.f32 1.0, %v5231_v57  ;;  %v4276_v55 = vmul.f32 %v11525_v60, %v4212_v16  ;;  %6485 = vpow2.f32 %v4899_v0  ;;  %v3889_v45 = vmul.f32 0.3275911, %v3825_v27  ;;  %v13314_v57 = vld [vmem:[#allocation87_spill] sm:$0xff] }
 0x4ab   : > { %v4338_v34 = vadd.f32 1.4214138, %v4274_v22  ;;  %6487 = vpow2.f32 %v4903_v11  ;;  %v3891_v42 = vmul.f32 0.3275911, %v3827_v44  ;;  %v3500_v41 = vmul.f32 %v11198_v20, %v13307_v35 }
 0x4ac   : > { %v5357_v25 = vmul.f32 %v5293_v23, %v3693_v18  ;;  %v5359_v50 = vmul.f32 %v5295_v3, %v3695_v63  ;;  %v4340_v59 = vadd.f32 1.4214138, %v4276_v55  ;;  %v3953_v21 = vadd.f32 1.0, %v3889_v45 }
 0x4ad   : > { %v4402_v12 = vmul.f32 %v11522_v17, %v4338_v34  ;;  %v3955_v31 = vadd.f32 1.0, %v3891_v42  ;;  %v4721_v52 = vmul.f32 %v3825_v27, %v3825_v27  ;;  %v3091_v48 = vmul.f32 %v7347_v26, %v13299_v1  ;;  %v13310_v26 = vld [vmem:[#allocation64_spill] sm:$0xff]  ;;  %v13311_v1 = vld [vmem:[#allocation66_spill] sm:$0xff]  ;;  %v13313_v27 = vld [vmem:[#allocation133_spill] sm:$0xff] }
 0x4ae   : > { %v5399_v10 = vpack.c.bf16 %v5359_v50, %v5357_v25  ;;  %v4404_v8 = vmul.f32 %v11525_v60, %v4340_v59  ;;  %6489 = vrcp.f32 %v3953_v21  ;;  %v3498_v62 = vmul.f32 %v11198_v20, %v13308_v51  ;;  %v13312_v20 = vld [vmem:[#allocation94_spill] sm:$0xff]  ;;  %v13315_v21 = vld [vmem:[#allocation101_spill] sm:$0xff] }
 0x4af   : > { %v2017_v18 = vsel %vm10989_vm7, %v11334_v14, 0.0  ;;  %v4466_v63 = vadd.f32 -0.28449672, %v4402_v12  ;;  %6491 = vrcp.f32 %v3955_v31  ;;  %v3428_v0 = vadd.f32 %v13309_v24, %v3292_v61  ;;  %v13316_v31 = vld [vmem:[#allocation59_spill] sm:$0xff]  ;;  %v6288_v51 = vld [vmem:[%s7192_s11] sm:$0xff]   ;;  %s5738_s11 = scalar_lea.sflag [#allocation5], %s7188_s9 }
 0x4b0   : > { %5665 = vmatmul.mubr.bf16.gmra.mrb[48].mxu1 %v5399_v10  ;;  %v4468_v7 = vadd.f32 -0.28449672, %v4404_v8  ;;  %v4723_v29 = vmul.f32 %v3827_v44, %v3827_v44  ;;  %v3562_v11 = vadd.f32 %v3498_v62, %v3426_v53  ;;  %v3153_v2 = vadd.f32 %v13311_v1, %v13310_v26  ;;  %v11594_v62 = vpop.f32.mrb[4].mxu1  ;;  %1069 = vmatmul.mubr.bf16.vlgmr.msra.gmra.mrb[64].mxu0 %v6288_v51  ;;  %v11628_v51 = vld [vmem:[#allocation11 + $0x18] ss:$0 sm:$0xff] }
 0x4b1   : > { %v4530_v38 = vmul.f32 %v11522_v17, %v4466_v63  ;;  %v4785_v54 = vsub.f32 0.0, %v4721_v52  ;;  %v3564_v37 = vadd.f32 %v3500_v41, %v3428_v0  ;;  %v3155_v15 = vadd.f32 %v3091_v48, %v13312_v20 }
 0x4b2   : > { %v4532_v6 = vmul.f32 %v11525_v60, %v4468_v7  ;;  %v11563_v16 = vadd.f32 %v8892_v4, %v3562_v11  ;;  %v3225_v61 = vmul.f32 %v12832_v47, %v13313_v27  ;;  %v3227_v53 = vmul.f32 %v12832_v47, %v13314_v57 }
 0x4b3   : > { %v11570_v23 = vmul.f32 0.5, %v11463_v28  ;;  %v11573_v22 = vmul.f32 0.5, %v11469_v13  ;;  %v4594_v44 = vadd.f32 0.2548296, %v4530_v38  ;;  %v11576_v3 = vadd.f32 %v8892_v4, %v3564_v37 }
 0x4b4   : > { %v6486_v55 = vpop.eup %6485  ;;  %v4596_v45 = vadd.f32 0.2548296, %v4532_v6  ;;  %v4787_v34 = vsub.f32 0.0, %v4723_v29  ;;  %v11579_v42 = vmul.f32 0.70710677, %v11563_v16  ;;  %v3289_v35 = vadd.f32 %v3225_v61, %v3153_v2  ;;  %v11598_v29 = vpop.f32.mrb[5].mxu1 }
 0x4b5   : > { %v6488_v41 = vpop.eup %6487  ;;  %v4658_v47 = vmul.f32 %v11522_v17, %v4594_v44  ;;  %v4897_v28 = vmul.f32 1.442695, %v4785_v54  ;;  %v11583_v25 = vmul.f32 0.70710677, %v11576_v3  ;;  %v3291_v13 = vadd.f32 %v3227_v53, %v3155_v15  ;;  %v13317_v17 = vld [vmem:[#allocation116_spill] sm:$0xff]  ;;  %v11603_v38 = vpop.f32.mrb[6].mxu1 }
 0x4b6   : > { %v4660_v50 = vmul.f32 %v11525_v60, %v4596_v45  ;;  %v3830_v59 = vand.u32 2147483647, %v11579_v42  ;;  %v3425_v12 = vadd.f32 %v13315_v21, %v3289_v35  ;;  %v3497_v52 = vmul.f32 %v11275_v56, %v13316_v31  ;;  %v13318_v15 = vld [vmem:[#allocation33_spill] sm:$0xff]  ;;  %v11608_v27 = vpop.f32.mrb[7].mxu1 }
 0x4b7   : > { %v4978_v48 = vmul.f32 %v6486_v55, %v4658_v47  ;;  %vm5106_vm13 = vcmp.lt.f32.partialorder %v11476_v46, 0.0  ;;  %v3832_v10 = vand.u32 2147483647, %v11583_v25  ;;  %v3427_v8 = vadd.f32 %v13317_v17, %v3291_v13  ;;  %v11610_v55 = vpop.f32.mrb[8].mxu1 }
 0x4b8   : > { %v11596_v63 = vpop.eup %6489  ;;  %v4980_v60 = vmul.f32 %v6488_v41, %v4660_v50  ;;  %v4901_v24 = vmul.f32 1.442695, %v4787_v34  ;;  %v3894_v0 = vmul.f32 0.3275911, %v3830_v59  ;;  %v3561_v7 = vadd.f32 %v3497_v52, %v3425_v12  ;;  %v11612_v41 = vpop.f32.mrb[9].mxu1 }
 0x4b9   : > { %v11600_v11 = vpop.eup %6491  ;;  %v5042_v26 = vsub.f32 1.0, %v4978_v48  ;;  %v4145_v1 = vmul.f32 1.0614054, %v11596_v63  ;;  %6493 = vpow2.f32 %v4897_v28  ;;  %v3896_v2 = vmul.f32 0.3275911, %v3832_v10  ;;  %v11618_v28 = vpop.f32.mrb[10].mxu1 }
 0x4ba   : > { %v5044_v54 = vsub.f32 1.0, %v4980_v60  ;;  %v4147_v37 = vmul.f32 1.0614054, %v11600_v11  ;;  %v3958_v20 = vadd.f32 1.0, %v3894_v0  ;;  %v3499_v6 = vmul.f32 %v11275_v56, %v13318_v15  ;;  %v11621_v21 = vpop.f32.mrb[11].mxu1  ;;  %v13319_v60 = vld [vmem:[#allocation134_spill] sm:$0xff] }
 0x4bb   : > { %v5170_v61 = vsub.f32 0.0, %v5042_v26  ;;  %v4209_v57 = vadd.f32 -1.4531521, %v4145_v1  ;;  %v3960_v53 = vadd.f32 1.0, %v3896_v2  ;;  %v4726_v44 = vmul.f32 %v3830_v59, %v3830_v59 }
 0x4bc   : > { %v5172_v45 = vsub.f32 0.0, %v5044_v54  ;;  %v4211_v34 = vadd.f32 -1.4531521, %v4147_v37  ;;  %6495 = vrcp.f32 %v3958_v20  ;;  %v4728_v35 = vmul.f32 %v3832_v10, %v3832_v10  ;;  %v13321_v20 = vld [vmem:[#allocation135_spill] sm:$0xff] }
 0x4bd   : > { %vm5108_vm14 = vcmp.lt.f32.partialorder %v11480_v19, 0.0  ;;  %v5234_v47 = vsel %vm5106_vm13, %v5170_v61, %v5042_v26  ;;  %v4273_v56 = vmul.f32 %v11596_v63, %v4209_v57  ;;  %6497 = vrcp.f32 %v3960_v53  ;;  %v11623_v19 = vpop.f32.mrb[12].mxu1 }
 0x4be   : > { %v5236_v13 = vsel %vm5108_vm14, %v5172_v45, %v5044_v54  ;;  %v5298_v50 = vadd.f32 1.0, %v5234_v47  ;;  %v4275_v59 = vmul.f32 %v11600_v11, %v4211_v34  ;;  %6499 = vpow2.f32 %v4901_v24  ;;  %v11632_v26 = vpop.f32.mrb[13].mxu1 }
 0x4bf   : > { %v5300_v12 = vadd.f32 1.0, %v5236_v13  ;;  %v4337_v31 = vadd.f32 1.4214138, %v4273_v56  ;;  %v4790_v52 = vsub.f32 0.0, %v4726_v44  ;;  %v3563_v48 = vadd.f32 %v3499_v6, %v3427_v8  ;;  %v11640_v54 = vpop.f32.mrb[14].mxu1  ;;  %v13322_v6 = vld [vmem:[#allocation32_spill] sm:$0xff] }
 0x4c0   : > { %v4339_v46 = vadd.f32 1.4214138, %v4275_v59  ;;  %v4792_v10 = vsub.f32 0.0, %v4728_v35  ;;  %v11626_v17 = vadd.f32 %v13134_v30, %v3561_v7  ;;  %v3502_v0 = vmul.f32 %v11628_v51, %v13319_v60  ;;  %13320 = vst [vmem:[#allocation126_spill] sm:$0xff] %v11640_v54  ;;  %v13325_v35 = vld [vmem:[#allocation141_spill] sm:$0xff] }
 0x4c1   : > { %v5362_v24 = vmul.f32 %v5298_v50, %v11570_v23  ;;  %v5364_v1 = vmul.f32 %v5300_v12, %v11573_v22  ;;  %v4401_v8 = vmul.f32 %v11596_v63, %v4337_v31  ;;  %v11638_v2 = vadd.f32 %v13134_v30, %v3563_v48  ;;  %v11649_v23 = vpop.f32.mrb[15].mxu1 }
 0x4c2   : > { %v4403_v7 = vmul.f32 %v11600_v11, %v4339_v46  ;;  %v11644_v37 = vmul.f32 0.70710677, %v11626_v17  ;;  %v3504_v15 = vmul.f32 %v11628_v51, %v13321_v20  ;;  %v3566_v61 = vadd.f32 %v3502_v0, %v13322_v6  ;;  %13323 = vst [vmem:[#allocation124_spill] sm:$0xff] %v11649_v23  ;;  %v11661_v34 = vpop.f32.mrb[16].mxu1  ;;  %v13341_v23 = vld [vmem:[#allocation128_spill] sm:$0xff] }
 0x4c3   : > { %v6494_v22 = vpop.eup %6493  ;;  %v11656_v57 = vmul.f32 %v8834_v9, %v2017_v18  ;;  %v5402_v53 = vpack.c.bf16 %v5364_v1, %v5362_v24  ;;  %v4465_v44 = vadd.f32 -0.28449672, %v4401_v8  ;;  %v11659_v45 = vmul.f32 0.70710677, %v11638_v2  ;;  %13324 = vst [vmem:[#allocation130_spill] sm:$0xff] %v11661_v34  ;;  %v11669_v14 = vpop.f32.mrb[17].mxu1 }
 0x4c4   : > { %v11665_v47 = vadd.f32 %v11261_v58, %v13325_v35  ;;  %v4467_v56 = vadd.f32 -0.28449672, %v4403_v7  ;;  %v3829_v13 = vand.u32 2147483647, %v11644_v37  ;;  %v3568_v50 = vadd.f32 %v3504_v15, %v13326_v39  ;;  %13327 = vst [vmem:[#allocation131_spill] sm:$0xff] %v11669_v14  ;;  %v11676_v31 = vpop.f32.mrb[18].mxu1 }
 0x4c5   : > { %5672 = vmatprep.mubr.bf16.mxu1 %v5402_v53  ;;  %v11672_v9 = vmul.f32 0.5, %v11520_v5  ;;  %v4529_v18 = vmul.f32 %v11596_v63, %v4465_v44  ;;  %v4907_v59 = vmul.f32 1.442695, %v4790_v52  ;;  %v3831_v12 = vand.u32 2147483647, %v11659_v45  ;;  %13328 = vst [vmem:[#allocation45_spill] sm:$0xff] %v11676_v31 }
 0x4c6   : > { %v11678_v58 = vpop.eup %6495  ;;  %v11681_v48 = vmul.f32 0.5, %v11529_v32  ;;  %v4531_v46 = vmul.f32 %v11600_v11, %v4467_v56  ;;  %v4911_v60 = vmul.f32 1.442695, %v4792_v10  ;;  %v3893_v0 = vmul.f32 0.3275911, %v3829_v13  ;;  %v11684_v24 = vpop.f32.mrb[19].mxu1 }
 0x4c7   : > { %13329 = vst [vmem:[#allocation138_spill] sm:$0xff] %v11684_v24  ;;  %v11686_v5 = vpop.eup %6497  ;;  %v4593_v1 = vadd.f32 0.2548296, %v4529_v18  ;;  %v4150_v52 = vmul.f32 1.0614054, %v11678_v58  ;;  %v4725_v7 = vmul.f32 %v3829_v13, %v3829_v13  ;;  %vm5105_vm7 = vcmp.lt.f32.partialorder %v11533_v40, 0.0 }
 0x4c8   : > { %v3895_v8 = vmul.f32 0.3275911, %v3831_v12  ;;  %v6500_v20 = vpop.eup %6499  ;;  %v4595_v15 = vadd.f32 0.2548296, %v4531_v46  ;;  %v4152_v32 = vmul.f32 1.0614054, %v11686_v5  ;;  %v4727_v53 = vmul.f32 %v3831_v12, %v3831_v12 }
 0x4c9   : > { %v3957_v6 = vadd.f32 1.0, %v3893_v0  ;;  %v4657_v10 = vmul.f32 %v11596_v63, %v4593_v1  ;;  %vm5107_vm15 = vcmp.lt.f32.partialorder %v11538_v49, 0.0  ;;  %v4214_v44 = vadd.f32 -1.4531521, %v4150_v52  ;;  %v11696_v39 = vpop.f32.mrb[20].mxu1 }
 0x4ca   : > { %v3959_v35 = vadd.f32 1.0, %v3895_v8  ;;  %v11694_v56 = vadd.f32 %v8892_v4, %v3566_v61  ;;  %13330 = vst [vmem:[#allocation114_spill] sm:$0xff] %v11696_v39  ;;  %v4659_v13 = vmul.f32 %v11600_v11, %v4595_v15  ;;  %v4216_v18 = vadd.f32 -1.4531521, %v4152_v32  ;;  %v11702_v0 = vpop.f32.mrb[21].mxu1 }
 0x4cb   : > { %6501 = vrcp.f32 %v3957_v6  ;;  %v11700_v46 = vadd.f32 %v8892_v4, %v3568_v50  ;;  %13331 = vst [vmem:[#allocation76_spill] sm:$0xff] %v11702_v0  ;;  %v4977_v12 = vmul.f32 %v6494_v22, %v4657_v10  ;;  %v4278_v63 = vmul.f32 %v11678_v58, %v4214_v44  ;;  %v11705_v52 = vpop.f32.mrb[22].mxu1 }
 0x4cc   : > { %6503 = vrcp.f32 %v3959_v35  ;;  %v4789_v1 = vsub.f32 0.0, %v4725_v7  ;;  %13332 = vst [vmem:[#allocation96_spill] sm:$0xff] %v11705_v52  ;;  %v4979_v61 = vmul.f32 %v6500_v20, %v4659_v13  ;;  %v11708_v8 = vmul.f32 0.5, %v11563_v16  ;;  %v11711_v32 = vpop.f32.mrb[23].mxu1 }
 0x4cd   : > { %v4280_v11 = vmul.f32 %v11686_v5, %v4216_v18  ;;  %v4791_v15 = vsub.f32 0.0, %v4727_v53  ;;  %13333 = vst [vmem:[#allocation127_spill] sm:$0xff] %v11711_v32  ;;  %v5041_v50 = vsub.f32 1.0, %v4977_v12  ;;  %v11714_v6 = vmul.f32 0.5, %v11576_v3  ;;  %v11716_v10 = vpop.f32.mrb[24].mxu1 }
 0x4ce   : > { %v4342_v22 = vadd.f32 1.4214138, %v4278_v63  ;;  %6505 = vpow2.f32 %v4907_v59  ;;  %13334 = vst [vmem:[#allocation60_spill] sm:$0xff] %v11716_v10  ;;  %v5043_v7 = vsub.f32 1.0, %v4979_v61  ;;  %v11719_v20 = vmul.f32 0.70710677, %v11694_v56 }
 0x4cf   : > { %v4344_v44 = vadd.f32 1.4214138, %v4280_v11  ;;  %6507 = vpow2.f32 %v4911_v60  ;;  %v11721_v16 = vpop.f32.mrb[25].mxu1  ;;  %v5169_v35 = vsub.f32 0.0, %v5041_v50  ;;  %v4905_v13 = vmul.f32 1.442695, %v4789_v1 }
 0x4d0   : > { %13335 = vst [vmem:[#allocation36_spill] sm:$0xff] %v11721_v16  ;;  %v4406_v53 = vmul.f32 %v11678_v58, %v4342_v22  ;;  %v11725_v18 = vmul.f32 0.70710677, %v11700_v46  ;;  %v11727_v3 = vpop.f32.mrb[26].mxu1  ;;  %v5171_v59 = vsub.f32 0.0, %v5043_v7  ;;  %v13338_v10 = vld [vmem:[#allocation120_spill] sm:$0xff] }
 0x4d1   : > { %13336 = vst [vmem:[#allocation35_spill] sm:$0xff] %v11727_v3  ;;  %v4408_v12 = vmul.f32 %v11686_v5, %v4344_v44  ;;  %v4909_v63 = vmul.f32 1.442695, %v4791_v15  ;;  %v3834_v60 = vand.u32 2147483647, %v11719_v20  ;;  %v11731_v61 = vpop.f32.mrb[27].mxu1  ;;  %v5233_v11 = vsel %vm5105_vm7, %v5169_v35, %v5041_v50 }
 0x4d2   : > { %13337 = vst [vmem:[#allocation100_spill] sm:$0xff] %v11731_v61  ;;  %v4470_v16 = vadd.f32 -0.28449672, %v4406_v53  ;;  %v3836_v22 = vand.u32 2147483647, %v11725_v18  ;;  %v5235_v3 = vsel %vm5107_vm15, %v5171_v59, %v5043_v7  ;;  %v5297_v44 = vadd.f32 1.0, %v5233_v11 }
 0x4d3   : > { %v11736_v1 = vld [vmem:[#allocation11 + $0x10] ss:$0 sm:$0xff]  ;;  %v4472_v15 = vadd.f32 -0.28449672, %v4408_v12  ;;  %v3898_v52 = vmul.f32 0.3275911, %v3834_v60  ;;  %v4730_v40 = vmul.f32 %v3834_v60, %v3834_v60 }
 0x4d4   : > { %v3501_v32 = vmul.f32 %v11736_v1, %v13338_v10  ;;  %v5299_v0 = vadd.f32 1.0, %v5235_v3  ;;  %v4534_v61 = vmul.f32 %v11678_v58, %v4470_v16  ;;  %v3900_v39 = vmul.f32 0.3275911, %v3836_v22  ;;  %v13339_v60 = vld [vmem:[#allocation55_spill] sm:$0xff] }
 0x4d5   : > { %v11743_v50 = vpop.eup %6501  ;;  %v5361_v35 = vmul.f32 %v5297_v44, %v11672_v9  ;;  %v4536_v53 = vmul.f32 %v11686_v5, %v4472_v15  ;;  %v3962_v24 = vadd.f32 1.0, %v3898_v52  ;;  %v4732_v31 = vmul.f32 %v3836_v22, %v3836_v22 }
 0x4d6   : > { %v11747_v10 = vpop.eup %6503  ;;  %v5363_v49 = vmul.f32 %v5299_v0, %v11681_v48  ;;  %v4598_v7 = vadd.f32 0.2548296, %v4534_v61  ;;  %v4149_v59 = vmul.f32 1.0614054, %v11743_v50  ;;  %v3964_v3 = vadd.f32 1.0, %v3900_v39 }
 0x4d7   : > { %v4600_v12 = vadd.f32 0.2548296, %v4536_v53  ;;  %vm5110_vm3 = vcmp.lt.f32.partialorder %v11579_v42, 0.0  ;;  %v4151_v16 = vmul.f32 1.0614054, %v11747_v10  ;;  %6509 = vrcp.f32 %v3962_v24  ;;  %v13340_v24 = vld [vmem:[#allocation180_spill] sm:$0xff] }
 0x4d8   : > { %v3503_v9 = vmul.f32 %v11736_v1, %v13339_v60  ;;  %v6506_v11 = vpop.eup %6505  ;;  %v5401_v52 = vpack.c.bf16 %v5363_v49, %v5361_v35  ;;  %v4662_v22 = vmul.f32 %v11678_v58, %v4598_v7  ;;  %v4213_v44 = vadd.f32 -1.4531521, %v4149_v59 }
 0x4d9   : > { %6511 = vrcp.f32 %v3964_v3  ;;  %v6508_v48 = vpop.eup %6507  ;;  %v4664_v0 = vmul.f32 %v11686_v5, %v4600_v12  ;;  %v4215_v61 = vadd.f32 -1.4531521, %v4151_v16  ;;  %v4794_v39 = vsub.f32 0.0, %v4730_v40 }
 0x4da   : > { %v4796_v15 = vsub.f32 0.0, %v4732_v31  ;;  %5673 = vmatmul.mubr.bf16.gmra.mrb[52].mxu1 %v5401_v52  ;;  %v4982_v53 = vmul.f32 %v6506_v11, %v4662_v22  ;;  %v4277_v14 = vmul.f32 %v11743_v50, %v4213_v44  ;;  %v3565_v34 = vadd.f32 %v3501_v32, %v13340_v24  ;;  %v13342_v52 = vld [vmem:[#allocation52_spill] sm:$0xff] }
 0x4db   : > { %v3567_v60 = vadd.f32 %v3503_v9, %v13341_v23  ;;  %v4984_v54 = vmul.f32 %v6508_v48, %v4664_v0  ;;  %vm5112_vm0 = vcmp.lt.f32.partialorder %v11583_v25, 0.0  ;;  %v4279_v58 = vmul.f32 %v11747_v10, %v4215_v61 }
 0x4dc   : > { %6513 = vpow2.f32 %v4905_v13  ;;  %v5046_v35 = vsub.f32 1.0, %v4982_v53  ;;  %v4341_v49 = vadd.f32 1.4214138, %v4277_v14  ;;  %v11763_v5 = vadd.f32 %v13134_v30, %v3565_v34  ;;  %v11772_v13 = vpop.f32.mrb[28].mxu1 }
 0x4dd   : > { %v11766_v31 = vadd.f32 %v13134_v30, %v3567_v60  ;;  %v5048_v40 = vsub.f32 1.0, %v4984_v54  ;;  %v11769_v7 = vmul.f32 0.5, %v11626_v17  ;;  %v4343_v32 = vadd.f32 1.4214138, %v4279_v58  ;;  %v11781_v17 = vpop.f32.mrb[29].mxu1 }
 0x4de   : > { %6515 = vpow2.f32 %v4909_v63  ;;  %v5174_v23 = vsub.f32 0.0, %v5046_v35  ;;  %v4405_v59 = vmul.f32 %v11743_v50, %v4341_v49  ;;  %v4915_v3 = vmul.f32 1.442695, %v4794_v39  ;;  %v11790_v44 = vpop.f32.mrb[30].mxu1 }
 0x4df   : > { %v4919_v12 = vmul.f32 1.442695, %v4796_v15  ;;  %v5176_v14 = vsub.f32 0.0, %v5048_v40  ;;  %v4407_v34 = vmul.f32 %v11747_v10, %v4343_v32  ;;  %v11776_v16 = vmul.f32 0.70710677, %v11763_v5  ;;  %13343 = vst [vmem:[#allocation98_spill] sm:$0xff] %v11790_v44 }
 0x4e0   : > { %v11779_v54 = vmul.f32 0.70710677, %v11766_v31  ;;  %v5238_v63 = vsel %vm5110_vm3, %v5174_v23, %v5046_v35  ;;  %v4469_v9 = vadd.f32 -0.28449672, %v4405_v59  ;;  %v1262_v11 = vadd.s32 280, %v7251_v36  ;;  %v11797_v42 = vpop.f32.mrb[31].mxu1 }
 0x4e1   : > { %v11788_v22 = vadd.f32 %v11656_v57, %v13342_v52  ;;  %v11792_v48 = vpop.eup %6509  ;;  %v5240_v0 = vsel %vm5112_vm0, %v5176_v14, %v5048_v40  ;;  %v5302_v61 = vadd.f32 1.0, %v5238_v63  ;;  %v4471_v39 = vadd.f32 -0.28449672, %v4407_v34  ;;  %13344 = vst [vmem:[#allocation178_spill] sm:$0xff] %v11797_v42 }
 0x4e2   : > { %v3833_v15 = vand.u32 2147483647, %v11776_v16  ;;  %v5304_v36 = vadd.f32 1.0, %v5240_v0  ;;  %v4533_v24 = vmul.f32 %v11743_v50, %v4469_v9  ;;  %v4154_v57 = vmul.f32 1.0614054, %v11792_v48 }
 0x4e3   : > { %v11799_v53 = vpop.eup %6511  ;;  %v3835_v60 = vand.u32 2147483647, %v11779_v54  ;;  %v5366_v58 = vmul.f32 %v5302_v61, %v11708_v8  ;;  %v4535_v25 = vmul.f32 %v11747_v10, %v4471_v39  ;;  %v3703_v34 = vmul.f32 0.5, %v11638_v2 }
 0x4e4   : > { %v4156_v35 = vmul.f32 1.0614054, %v11799_v53  ;;  %v3897_v49 = vmul.f32 0.3275911, %v3833_v15  ;;  %v5368_v40 = vmul.f32 %v5304_v36, %v11714_v6  ;;  %v4597_v32 = vadd.f32 0.2548296, %v4533_v24 }
 0x4e5   : > { %v4218_v23 = vadd.f32 -1.4531521, %v4154_v57  ;;  %v3899_v59 = vmul.f32 0.3275911, %v3835_v60  ;;  %v4599_v63 = vadd.f32 0.2548296, %v4535_v25 }
 0x4e6   : > { %v6514_v14 = vpop.eup %6513  ;;  %v4220_v9 = vadd.f32 -1.4531521, %v4156_v35  ;;  %v3961_v52 = vadd.f32 1.0, %v3897_v49  ;;  %v5404_v0 = vpack.c.bf16 %v5368_v40, %v5366_v58  ;;  %v4661_v42 = vmul.f32 %v11743_v50, %v4597_v32 }
 0x4e7   : > { %v4282_v8 = vmul.f32 %v11792_v48, %v4218_v23  ;;  %v3963_v61 = vadd.f32 1.0, %v3899_v59  ;;  %v4663_v44 = vmul.f32 %v11747_v10, %v4599_v63  ;;  %v1512_v36 = vand.u32 15, %v1262_v11 }
 0x4e8   : > { %v6516_v39 = vpop.eup %6515  ;;  %v4284_v6 = vmul.f32 %v11799_v53, %v4220_v9  ;;  %6517 = vrcp.f32 %v3961_v52  ;;  %5680 = vmatprep.mubr.bf16.mxu1 %v5404_v0  ;;  %v4981_v24 = vmul.f32 %v6514_v14, %v4661_v42  ;;  %vm5109_vm2 = vcmp.lt.f32.partialorder %v11644_v37, 0.0  ;;  %v13346_v14 = vld [vmem:[#allocation49_spill] sm:$0xff] }
 0x4e9   : > { %v4346_v2 = vadd.f32 1.4214138, %v4282_v8  ;;  %6519 = vrcp.f32 %v3963_v61  ;;  %v4983_v57 = vmul.f32 %v6516_v39, %v4663_v44  ;;  %v4729_v50 = vmul.f32 %v3833_v15, %v3833_v15  ;;  %v13345_v44 = vld [vmem:[#allocation34_spill] sm:$0xff] }
 0x4ea   : > { %v4348_v58 = vadd.f32 1.4214138, %v4284_v6  ;;  %6521 = vpow2.f32 %v4915_v3  ;;  %v5045_v25 = vsub.f32 1.0, %v4981_v24  ;;  %vm5111_vm4 = vcmp.lt.f32.partialorder %v11659_v45, 0.0 }
 0x4eb   : > { %v4410_v35 = vmul.f32 %v11792_v48, %v4346_v2  ;;  %6523 = vpow2.f32 %v4919_v12  ;;  %v5047_v10 = vsub.f32 1.0, %v4983_v57  ;;  %v11817_v49 = vmul.f32 0.5, %v11694_v56 }
 0x4ec   : > { %v4412_v11 = vmul.f32 %v11799_v53, %v4348_v58  ;;  %vm2055_vm1 = vcmp.lt.s32.totalorder %v1512_v36, 15  ;;  %v5173_v42 = vsub.f32 0.0, %v5045_v25  ;;  %v4731_v32 = vmul.f32 %v3835_v60, %v3835_v60  ;;  %v13347_v36 = vld [vmem:[#allocation117_spill] sm:$0xff] }
 0x4ed   : > { %v4474_v40 = vadd.f32 -0.28449672, %v4410_v35  ;;  %v11821_v23 = vsel %vm2055_vm1, %v13345_v44, 0.0  ;;  %v5175_v3 = vsub.f32 0.0, %v5047_v10  ;;  %v4793_v59 = vsub.f32 0.0, %v4729_v50 }
 0x4ee   : > { %v4476_v15 = vadd.f32 -0.28449672, %v4412_v11  ;;  %v3370_v63 = vmul.f32 0.0, %v13346_v14  ;;  %v5237_v12 = vsel %vm5109_vm2, %v5173_v42, %v5045_v25  ;;  %v3506_v9 = vmul.f32 %v11628_v51, %v13345_v44 }
 0x4ef   : > { %v4538_v56 = vmul.f32 %v11792_v48, %v4474_v40  ;;  %v3508_v52 = vmul.f32 %v11628_v51, %v11821_v23  ;;  %v5239_v60 = vsel %vm5111_vm4, %v5175_v3, %v5047_v10  ;;  %v5301_v0 = vadd.f32 1.0, %v5237_v12 }
 0x4f0   : > { %v4540_v8 = vmul.f32 %v11799_v53, %v4476_v15  ;;  %v3434_v61 = vadd.f32 %v3370_v63, %v11788_v22  ;;  %v5303_v39 = vadd.f32 1.0, %v5239_v60  ;;  %v3436_v37 = vadd.f32 %v3370_v63, %v11665_v47 }
 0x4f1   : > { %v4602_v6 = vadd.f32 0.2548296, %v4538_v56  ;;  %v3297_v24 = vadd.f32 %v11076_v43, %v13347_v36  ;;  %v5365_v57 = vmul.f32 %v5301_v0, %v11769_v7  ;;  %v4795_v58 = vsub.f32 0.0, %v4731_v32 }
 0x4f2   : > { %v11838_v2 = vpop.eup %6517  ;;  %v4604_v51 = vadd.f32 0.2548296, %v4540_v8  ;;  %v3570_v45 = vadd.f32 %v3506_v9, %v3434_v61  ;;  %v5367_v25 = vmul.f32 %v5303_v39, %v3703_v34  ;;  %v3572_v10 = vadd.f32 %v3508_v52, %v3436_v37  ;;  %v13348_v37 = vld [vmem:[#allocation41_spill] sm:$0xff] }
 0x4f3   : > { %v11841_v50 = vpop.eup %6519  ;;  %v4666_v35 = vmul.f32 %v11792_v48, %v4602_v6  ;;  %v4153_v22 = vmul.f32 1.0614054, %v11838_v2  ;;  %v4913_v42 = vmul.f32 1.442695, %v4793_v59  ;;  %vm5114_vm5 = vcmp.lt.f32.partialorder %v11719_v20, 0.0 }
 0x4f4   : > { %v6522_v11 = vpop.eup %6521  ;;  %v4668_v47 = vmul.f32 %v11799_v53, %v4604_v51  ;;  %v4155_v43 = vmul.f32 1.0614054, %v11841_v50  ;;  %v11848_v40 = vadd.f32 %v8892_v4, %v3570_v45  ;;  %v5403_v32 = vpack.c.bf16 %v5367_v25, %v5365_v57 }
 0x4f5   : > { %v6524_v7 = vpop.eup %6523  ;;  %v4986_v3 = vmul.f32 %v6522_v11, %v4666_v35  ;;  %v4217_v15 = vadd.f32 -1.4531521, %v4153_v22  ;;  %v11851_v34 = vadd.f32 %v8892_v4, %v3572_v10  ;;  %v4917_v12 = vmul.f32 1.442695, %v4795_v58 }
 0x4f6   : > { %v4988_v48 = vmul.f32 %v6524_v7, %v4668_v47  ;;  %v4219_v14 = vadd.f32 -1.4531521, %v4155_v43  ;;  %v11855_v63 = vmul.f32 0.70710677, %v11848_v40  ;;  %5681 = vmatmul.mubr.bf16.gmra.mrb[56].mxu1 %v5403_v32  ;;  %vm5116_vm6 = vcmp.lt.f32.partialorder %v11725_v18, 0.0 }
 0x4f7   : > { %v5050_v53 = vsub.f32 1.0, %v4986_v3  ;;  %v4281_v59 = vmul.f32 %v11838_v2, %v4217_v15  ;;  %v11859_v56 = vmul.f32 0.70710677, %v11851_v34  ;;  %6525 = vpow2.f32 %v4913_v42 }
 0x4f8   : > { %v5052_v9 = vsub.f32 1.0, %v4988_v48  ;;  %v4283_v4 = vmul.f32 %v11841_v50, %v4219_v14  ;;  %v3838_v52 = vand.u32 2147483647, %v11855_v63  ;;  %v3369_v36 = vmul.f32 0.0, %v13348_v37  ;;  %v11869_v45 = vpop.f32.mrb[32].mxu1 }
 0x4f9   : > { %v5178_v60 = vsub.f32 0.0, %v5050_v53  ;;  %v4345_v0 = vadd.f32 1.4214138, %v4281_v59  ;;  %v3840_v8 = vand.u32 2147483647, %v11859_v56  ;;  %6527 = vpow2.f32 %v4917_v12  ;;  %v11874_v11 = vpop.f32.mrb[33].mxu1 }
 0x4fa   : > { %v5180_v61 = vsub.f32 0.0, %v5052_v9  ;;  %v4347_v39 = vadd.f32 1.4214138, %v4283_v4  ;;  %v3902_v6 = vmul.f32 0.3275911, %v3838_v52  ;;  %v3708_v47 = vmul.f32 0.5, %v11700_v46 }
 0x4fb   : > { %v5242_v57 = vsel %vm5114_vm5, %v5178_v60, %v5050_v53  ;;  %v4409_v51 = vmul.f32 %v11838_v2, %v4345_v0  ;;  %v3904_v58 = vmul.f32 0.3275911, %v3840_v8  ;;  %v11877_v7 = vpop.f32.mrb[34].mxu1  ;;  %v4734_v3 = vmul.f32 %v3838_v52, %v3838_v52  ;;  %v11896_v60 = vld [vmem:[%s13349_s16] ss:$0 sm:$0xff] }
 0x4fc   : > { %v5244_v25 = vsel %vm5116_vm6, %v5180_v61, %v5052_v9  ;;  %v5306_v35 = vadd.f32 1.0, %v5242_v57  ;;  %v4411_v22 = vmul.f32 %v11841_v50, %v4347_v39  ;;  %v3966_v10 = vadd.f32 1.0, %v3902_v6  ;;  %v11879_v18 = vpop.f32.mrb[35].mxu1 }
 0x4fd   : > { %v5308_v43 = vadd.f32 1.0, %v5244_v25  ;;  %v4473_v20 = vadd.f32 -0.28449672, %v4409_v51  ;;  %v3968_v42 = vadd.f32 1.0, %v3904_v58  ;;  %v3433_v15 = vadd.f32 %v3369_v36, %v3297_v24 }
 0x4fe   : > { %v4475_v32 = vadd.f32 -0.28449672, %v4411_v22  ;;  %6529 = vrcp.f32 %v3966_v10  ;;  %v5370_v48 = vmul.f32 %v5306_v35, %v11817_v49  ;;  %v11884_v46 = vmul.f32 0.5, %v11763_v5  ;;  %v13350_v10 = vld [vmem:[#allocation126_spill] sm:$0xff] }
 0x4ff   : > { %v5372_v14 = vmul.f32 %v5308_v43, %v3708_v47  ;;  %v4537_v53 = vmul.f32 %v11838_v2, %v4473_v20  ;;  %6531 = vrcp.f32 %v3968_v42  ;;  %v3435_v12 = vadd.f32 %v3369_v36, %v11257_v33  ;;  %v13351_v47 = vld [vmem:[#allocation124_spill] sm:$0xff] }
 0x500   : > { %v4539_v59 = vmul.f32 %v11841_v50, %v4475_v32  ;;  %v3505_v9 = vmul.f32 %v11736_v1, %v13345_v44  ;;  %v4736_v52 = vmul.f32 %v3840_v8, %v3840_v8  ;;  %v3507_v49 = vmul.f32 %v11736_v1, %v11821_v23 }
 0x501   : > { %v5406_v24 = vpack.c.bf16 %v5372_v14, %v5370_v48  ;;  %v4601_v4 = vadd.f32 0.2548296, %v4537_v53  ;;  %v4798_v0 = vsub.f32 0.0, %v4734_v3  ;;  %v6024_v33 = vadd.f32 %v11598_v29, %v11594_v62  ;;  %v6526_v39 = vpop.eup %6525 }
 0x502   : > { %v4603_v5 = vadd.f32 0.2548296, %v4539_v59  ;;  %v3569_v61 = vadd.f32 %v3505_v9, %v3433_v15  ;;  %v3571_v6 = vadd.f32 %v3507_v49, %v3435_v12  ;;  %v6027_v8 = vadd.f32 %v11608_v27, %v11603_v38 }
 0x503   : > { %5688 = vmatprep.mubr.bf16.mxu1 %v5406_v24  ;;  %v4665_v44 = vmul.f32 %v11838_v2, %v4601_v4  ;;  %v6030_v1 = vadd.f32 %v11612_v41, %v11610_v55  ;;  %v5579_v36 = vadd.f32 %v6024_v33, %v11896_v60  ;;  %v6033_v62 = vadd.f32 %v11621_v21, %v11618_v28  ;;  %v6528_v29 = vpop.eup %6527 }
 0x504   : > { %v4667_v23 = vmul.f32 %v11841_v50, %v4603_v5  ;;  %v11907_v37 = vadd.f32 %v13134_v30, %v3569_v61  ;;  %v11913_v2 = vadd.f32 %v13134_v30, %v3571_v6  ;;  %v5582_v38 = vadd.f32 %v6027_v8, %v11896_v60 }
 0x505   : > { %v4985_v57 = vmul.f32 %v6526_v39, %v4665_v44  ;;  %v5587_v27 = vadd.f32 %v6030_v1, %v11896_v60  ;;  %v3707_v55 = vmul.f32 0.5, %v11766_v31  ;;  %5705 = vst [vmem:[%s11921_s1] sm:$0xff] %v5579_v36  ;;  %v5590_v30 = vadd.f32 %v6033_v62, %v11896_v60  ;;  %v13353_v36 = vld [vmem:[#allocation131_spill] sm:$0xff] }
 0x506   : > { %v4987_v41 = vmul.f32 %v6528_v29, %v4667_v23  ;;  %v11919_v50 = vmul.f32 0.70710677, %v11907_v37  ;;  %v4800_v21 = vsub.f32 0.0, %v4736_v52  ;;  %v11926_v51 = vmul.f32 0.70710677, %v11913_v2  ;;  %5706 = vst [vmem:[%s11921_s1 + $0x8] sm:$0xff] %v5582_v38 }
 0x507   : > { %v5049_v28 = vsub.f32 1.0, %v4985_v57  ;;  %5707 = vst [vmem:[%s11921_s1 + $0x10] sm:$0xff] %v5587_v27  ;;  %v6036_v31 = vadd.f32 %v11632_v26, %v11623_v19  ;;  %v4923_v35 = vmul.f32 1.442695, %v4798_v0  ;;  %5708 = vst [vmem:[%s11921_s1 + $0x18] sm:$0xff] %v5590_v30  ;;  %v6039_v43 = vadd.f32 %v13351_v47, %v13350_v10  ;;  %v13352_v23 = vld [vmem:[#allocation130_spill] sm:$0xff] }
 0x508   : > { %v11932_v58 = vpop.eup %6529  ;;  %v5051_v25 = vsub.f32 1.0, %v4987_v41  ;;  %v3837_v22 = vand.u32 2147483647, %v11919_v50  ;;  %vm5113_vm8 = vcmp.lt.f32.partialorder %v11776_v16, 0.0  ;;  %v3839_v3 = vand.u32 2147483647, %v11926_v51 }
 0x509   : > { %v11938_v20 = vpop.eup %6531  ;;  %v5177_v42 = vsub.f32 0.0, %v5049_v28  ;;  %v4158_v32 = vmul.f32 1.0614054, %v11932_v58  ;;  %vm5115_vm9 = vcmp.lt.f32.partialorder %v11779_v54, 0.0  ;;  %v4927_v53 = vmul.f32 1.442695, %v4800_v21 }
 0x50a   : > { %v5179_v19 = vsub.f32 0.0, %v5051_v25  ;;  %v4160_v26 = vmul.f32 1.0614054, %v11938_v20  ;;  %v3901_v15 = vmul.f32 0.3275911, %v3837_v22  ;;  %6533 = vpow2.f32 %v4923_v35  ;;  %v13354_v57 = vld [vmem:[#allocation45_spill] sm:$0xff] }
 0x50b   : > { %v5241_v48 = vsel %vm5113_vm8, %v5177_v42, %v5049_v28  ;;  %v4222_v14 = vadd.f32 -1.4531521, %v4158_v32  ;;  %v3903_v59 = vmul.f32 0.3275911, %v3839_v3  ;;  %v5595_v39 = vadd.f32 %v6036_v31, %v11896_v60  ;;  %v13355_v38 = vld [vmem:[#allocation138_spill] sm:$0xff]  ;;  %v13357_v41 = vld [vmem:[#allocation76_spill] sm:$0xff] }
 0x50c   : > { %v5243_v12 = vsel %vm5115_vm9, %v5179_v19, %v5051_v25  ;;  %v5305_v9 = vadd.f32 1.0, %v5241_v48  ;;  %v4224_v24 = vadd.f32 -1.4531521, %v4160_v26  ;;  %v3965_v4 = vadd.f32 1.0, %v3901_v15  ;;  %v13358_v31 = vld [vmem:[#allocation96_spill] sm:$0xff]  ;;  %v13359_v25 = vld [vmem:[#allocation127_spill] sm:$0xff] }
 0x50d   : > { %v5307_v16 = vadd.f32 1.0, %v5243_v12  ;;  %v4286_v52 = vmul.f32 %v11932_v58, %v4222_v14  ;;  %v3967_v49 = vadd.f32 1.0, %v3903_v59  ;;  %v5598_v44 = vadd.f32 %v6039_v43, %v11896_v60  ;;  %5709 = vst [vmem:[%s11921_s1 + $0x20] sm:$0xff] %v5595_v39  ;;  %v13361_v10 = vld [vmem:[#allocation36_spill] sm:$0xff] }
 0x50e   : > { %v4288_v5 = vmul.f32 %v11938_v20, %v4224_v24  ;;  %6535 = vrcp.f32 %v3965_v4  ;;  %v5369_v54 = vmul.f32 %v5305_v9, %v11884_v46  ;;  %v4733_v1 = vmul.f32 %v3837_v22, %v3837_v22  ;;  %v13360_v22 = vld [vmem:[#allocation60_spill] sm:$0xff]  ;;  %v13364_v9 = vld [vmem:[#allocation98_spill] sm:$0xff] }
 0x50f   : > { %v5371_v0 = vmul.f32 %v5307_v16, %v3707_v55  ;;  %v4350_v61 = vadd.f32 1.4214138, %v4286_v52  ;;  %6537 = vrcp.f32 %v3967_v49  ;;  %v6042_v62 = vadd.f32 %v13353_v36, %v13352_v23  ;;  %5710 = vst [vmem:[%s11921_s1 + $0x28] sm:$0xff] %v5598_v44  ;;  %v13356_v55 = vld [vmem:[#allocation114_spill] sm:$0xff]  ;;  %v13363_v19 = vld [vmem:[#allocation100_spill] sm:$0xff] }
 0x510   : > { %v4352_v33 = vadd.f32 1.4214138, %v4288_v5  ;;  %6539 = vpow2.f32 %v4927_v53  ;;  %v4735_v46 = vmul.f32 %v3839_v3, %v3839_v3  ;;  %v6045_v27 = vadd.f32 %v13355_v38, %v13354_v57  ;;  %v13362_v3 = vld [vmem:[#allocation35_spill] sm:$0xff]  ;;  %v13365_v24 = vld [vmem:[#allocation178_spill] sm:$0xff] }
 0x511   : > { %v5405_v6 = vpack.c.bf16 %v5371_v0, %v5369_v54  ;;  %v4414_v8 = vmul.f32 %v11932_v58, %v4350_v61  ;;  %v6048_v30 = vadd.f32 %v13357_v41, %v13356_v55  ;;  %v5603_v21 = vadd.f32 %v6042_v62, %v11896_v60 }
 0x512   : > { %v4416_v29 = vmul.f32 %v11938_v20, %v4352_v33  ;;  %v6051_v35 = vadd.f32 %v13359_v25, %v13358_v31  ;;  %v6054_v47 = vadd.f32 %v13361_v10, %v13360_v22  ;;  %v5606_v42 = vadd.f32 %v6045_v27, %v11896_v60 }
 0x513   : > { %5689 = vmatmul.mubr.bf16.gmra.mrb[60].mxu1 %v5405_v6  ;;  %v4478_v28 = vadd.f32 -0.28449672, %v4414_v8  ;;  %v5611_v32 = vadd.f32 %v6048_v30, %v11896_v60  ;;  %v6057_v26 = vadd.f32 %v13363_v19, %v13362_v3  ;;  %5711 = vst [vmem:[%s11921_s1 + $0x30] sm:$0xff] %v5603_v21  ;;  %v6060_v53 = vadd.f32 %v11781_v17, %v11772_v13 }
 0x514   : > { %v4480_v43 = vadd.f32 -0.28449672, %v4416_v29  ;;  %v5614_v48 = vadd.f32 %v6051_v35, %v11896_v60  ;;  %v5619_v14 = vadd.f32 %v6054_v47, %v11896_v60  ;;  %5712 = vst [vmem:[%s11921_s1 + $0x38] sm:$0xff] %v5606_v42  ;;  %v6063_v4 = vadd.f32 %v13365_v24, %v13364_v9  ;;  %v6534_v52 = vpop.eup %6533 }
 0x515   : > { %v4542_v15 = vmul.f32 %v11932_v58, %v4478_v28  ;;  %5713 = vst [vmem:[%s11921_s1 + $0x40] sm:$0xff] %v5611_v32  ;;  %v5622_v12 = vadd.f32 %v6057_v26, %v11896_v60  ;;  %v6066_v16 = vadd.f32 %v11874_v11, %v11869_v45  ;;  %v5627_v13 = vadd.f32 %v6060_v53, %v11896_v60 }
 0x516   : > { %v4544_v59 = vmul.f32 %v11938_v20, %v4480_v43  ;;  %5714 = vst [vmem:[%s11921_s1 + $0x48] sm:$0xff] %v5614_v48  ;;  %5715 = vst [vmem:[%s11921_s1 + $0x50] sm:$0xff] %v5619_v14  ;;  %v6069_v17 = vadd.f32 %v11879_v18, %v11877_v7  ;;  %v4797_v0 = vsub.f32 0.0, %v4733_v1  ;;  %v5630_v61 = vadd.f32 %v6063_v4, %v11896_v60 }
 0x517   : > { %v4606_v49 = vadd.f32 0.2548296, %v4542_v15  ;;  %5716 = vst [vmem:[%s11921_s1 + $0x58] sm:$0xff] %v5622_v12  ;;  %v5635_v45 = vadd.f32 %v6066_v16, %v11896_v60  ;;  %v4799_v44 = vsub.f32 0.0, %v4735_v46  ;;  %5717 = vst [vmem:[%s11921_s1 + $0x60] sm:$0xff] %v5627_v13  ;;  %vm5118_vm10 = vcmp.lt.f32.partialorder %v11855_v63, 0.0 }
 0x518   : > { %v6536_v5 = vpop.eup %6535  ;;  %v4608_v54 = vadd.f32 0.2548296, %v4544_v59  ;;  %v5638_v6 = vadd.f32 %v6069_v17, %v11896_v60  ;;  %5718 = vst [vmem:[%s11921_s1 + $0x68] sm:$0xff] %v5630_v61  ;;  %v4921_v29 = vmul.f32 1.442695, %v4797_v0  ;;  %vm5120_vm11 = vcmp.lt.f32.partialorder %v11859_v56, 0.0 }
 0x519   : > { %v6538_v11 = vpop.eup %6537  ;;  %v4670_v33 = vmul.f32 %v11932_v58, %v4606_v49  ;;  %v4157_v39 = vmul.f32 1.0614054, %v6536_v5  ;;  %5719 = vst [vmem:[%s11921_s1 + $0x70] sm:$0xff] %v5635_v45  ;;  %v4925_v58 = vmul.f32 1.442695, %v4799_v44  ;;  %v3710_v22 = vmul.f32 0.5, %v11848_v40 }
 0x51a   : > { %v6540_v7 = vpop.eup %6539  ;;  %v4672_v18 = vmul.f32 %v11938_v20, %v4608_v54  ;;  %v4159_v8 = vmul.f32 1.0614054, %v6538_v11  ;;  %5720 = vst [vmem:[%s11921_s1 + $0x78] sm:$0xff] %v5638_v6  ;;  %6541 = vpow2.f32 %v4921_v29  ;;  %v3712_v10 = vmul.f32 0.5, %v11851_v34 }
 0x51b   : > { %v4990_v1 = vmul.f32 %v6534_v52, %v4670_v33  ;;  %v4221_v23 = vadd.f32 -1.4531521, %v4157_v39  ;;  %6543 = vpow2.f32 %v4925_v58  ;;  %vm5117_vm12 = vcmp.lt.f32.partialorder %v11919_v50, 0.0 }
 0x51c   : > { %v4992_v36 = vmul.f32 %v6540_v7, %v4672_v18  ;;  %v4223_v62 = vadd.f32 -1.4531521, %v4159_v8  ;;  %vm5119_vm13 = vcmp.lt.f32.partialorder %v11926_v51, 0.0  ;;  %v3709_v33 = vmul.f32 0.5, %v11907_v37 }
 0x51d   : > { %v5054_v57 = vsub.f32 1.0, %v4990_v1  ;;  %v4285_v38 = vmul.f32 %v6536_v5, %v4221_v23  ;;  %v3711_v39 = vmul.f32 0.5, %v11913_v2 }
 0x51e   : > { %v5056_v27 = vsub.f32 1.0, %v4992_v36  ;;  %v4287_v46 = vmul.f32 %v6538_v11, %v4223_v62 }
 0x51f   : > { %v5182_v55 = vsub.f32 0.0, %v5054_v57  ;;  %v4349_v41 = vadd.f32 1.4214138, %v4285_v38 }
 0x520   : > { %v5184_v30 = vsub.f32 0.0, %v5056_v27  ;;  %v4351_v20 = vadd.f32 1.4214138, %v4287_v46 }
 0x521   : > { %v5246_v28 = vsel %vm5118_vm10, %v5182_v55, %v5054_v57  ;;  %v4413_v21 = vmul.f32 %v6536_v5, %v4349_v41 }
 0x522   : > { %v5248_v31 = vsel %vm5120_vm11, %v5184_v30, %v5056_v27  ;;  %v5310_v25 = vadd.f32 1.0, %v5246_v28  ;;  %v4415_v35 = vmul.f32 %v6538_v11, %v4351_v20 }
 0x523   : > { %v5312_v47 = vadd.f32 1.0, %v5248_v31  ;;  %v4477_v43 = vadd.f32 -0.28449672, %v4413_v21 }
 0x524   : > { %v4479_v42 = vadd.f32 -0.28449672, %v4415_v35  ;;  %v5374_v32 = vmul.f32 %v5310_v25, %v3710_v22  ;;  %v6542_v12 = vpop.eup %6541 }
 0x525   : > { %v5376_v63 = vmul.f32 %v5312_v47, %v3712_v10  ;;  %v4541_v3 = vmul.f32 %v6536_v5, %v4477_v43  ;;  %v6070_v56 = vpop.f32.mrb[36].mxu1  ;;  %v6544_v24 = vpop.eup %6543 }
 0x526   : > { %v4543_v19 = vmul.f32 %v6538_v11, %v4479_v42  ;;  %v6071_v14 = vpop.f32.mrb[37].mxu1 }
 0x527   : > { %v5408_v26 = vpack.c.bf16 %v5376_v63, %v5374_v32  ;;  %v4605_v15 = vadd.f32 0.2548296, %v4541_v3  ;;  %v6072_v59 = vadd.f32 %v6071_v14, %v6070_v56  ;;  %v6073_v40 = vpop.f32.mrb[38].mxu1 }
 0x528   : > { %v4607_v48 = vadd.f32 0.2548296, %v4543_v19  ;;  %v6074_v9 = vpop.f32.mrb[39].mxu1 }
 0x529   : > { %5696 = vmatprep.mubr.bf16.mxu1 %v5408_v26  ;;  %v4669_v53 = vmul.f32 %v6536_v5, %v4605_v15  ;;  %v5643_v16 = vadd.f32 %v6072_v59, %v11896_v60  ;;  %v6075_v52 = vadd.f32 %v6074_v9, %v6073_v40 }
 0x52a   : > { %v4671_v34 = vmul.f32 %v6538_v11, %v4607_v48 }
 0x52b   : > { %v4989_v4 = vmul.f32 %v6542_v12, %v4669_v53  ;;  %5721 = vst [vmem:[%s11921_s1 + $0x80] sm:$0xff] %v5643_v16  ;;  %v5646_v17 = vadd.f32 %v6075_v52, %v11896_v60 }
 0x52c   : > { %v4991_v49 = vmul.f32 %v6544_v24, %v4671_v34 }
 0x52d   : > { %v5053_v13 = vsub.f32 1.0, %v4989_v4  ;;  %5722 = vst [vmem:[%s11921_s1 + $0x88] sm:$0xff] %v5646_v17 }
 0x52e   : > { %v5055_v54 = vsub.f32 1.0, %v4991_v49 }
 0x52f   : > { %v5181_v0 = vsub.f32 0.0, %v5053_v13 }
 0x530   : > { %v5183_v5 = vsub.f32 0.0, %v5055_v54 }
 0x531   : > { %v5245_v61 = vsel %vm5117_vm12, %v5181_v0, %v5053_v13 }
 0x532   : > { %v5247_v45 = vsel %vm5119_vm13, %v5183_v5, %v5055_v54  ;;  %v5309_v11 = vadd.f32 1.0, %v5245_v61 }
 0x533   : > { %v5311_v44 = vadd.f32 1.0, %v5247_v45 }
 0x534   : > { %v5373_v6 = vmul.f32 %v5309_v11, %v3709_v33 }
 0x535   : > { %v5375_v7 = vmul.f32 %v5311_v44, %v3711_v39 }
 0x537   : > { %v5407_v18 = vpack.c.bf16 %v5375_v7, %v5373_v6 }
 0x539   : > { %5697 = vmatmul.mubr.bf16.gmra.mrb[64].mxu1 %v5407_v18 }
 0x53f   : > { %v6076_v8 = vpop.f32.mrb[40].mxu1 }
 0x540   : > { %v6077_v1 = vpop.f32.mrb[41].mxu1 }
 0x541   : > { %v6078_v50 = vadd.f32 %v6077_v1, %v6076_v8  ;;  %v6079_v23 = vpop.f32.mrb[42].mxu1 }
 0x542   : > { %v6080_v51 = vpop.f32.mrb[43].mxu1 }
 0x543   : > { %v5651_v36 = vadd.f32 %v6078_v50, %v11896_v60  ;;  %v6081_v62 = vadd.f32 %v6080_v51, %v6079_v23 }
 0x545   : > { %5723 = vst [vmem:[%s11921_s1 + $0x90] sm:$0xff] %v5651_v36  ;;  %v5654_v37 = vadd.f32 %v6081_v62, %v11896_v60 }
 0x547   : > { %5724 = vst [vmem:[%s11921_s1 + $0x98] sm:$0xff] %v5654_v37 }
 0x568   : > { %v6082_v2 = vpop.f32.mrb[44].mxu1 }
 0x569   : > { %v6083_v29 = vpop.f32.mrb[45].mxu1 }
 0x56a   : > { %v6084_v57 = vadd.f32 %v6083_v29, %v6082_v2  ;;  %v6085_v38 = vpop.f32.mrb[46].mxu1 }
 0x56b   : > { %v6086_v58 = vpop.f32.mrb[47].mxu1 }
 0x56c   : > { %v5659_v27 = vadd.f32 %v6084_v57, %v11896_v60  ;;  %v6087_v46 = vadd.f32 %v6086_v58, %v6085_v38 }
 0x56e   : > { %5725 = vst [vmem:[%s11921_s1 + $0xa0] sm:$0xff] %v5659_v27  ;;  %v5662_v55 = vadd.f32 %v6087_v46, %v11896_v60 }
 0x570   : > { %5726 = vst [vmem:[%s11921_s1 + $0xa8] sm:$0xff] %v5662_v55 }
 0x583   : > { %v6088_v41 = vpop.f32.mrb[48].mxu1  ;;  %v1070_v22 = vpop.f32.mrb[64].mxu0 }
 0x584   : > { %v6089_v30 = vpop.f32.mrb[49].mxu1  ;;  %v1072_v10 = vpop.f32.mrb[65].mxu0 }
 0x585   : > { %v6090_v20 = vadd.f32 %v6089_v30, %v6088_v41  ;;  %v6091_v28 = vpop.f32.mrb[50].mxu1  ;;  %v1074_v47 = vpop.f32.mrb[66].mxu0 }
 0x586   : > { %v6092_v21 = vpop.f32.mrb[51].mxu1  ;;  %v1076_v43 = vpop.f32.mrb[67].mxu0 }
 0x587   : > { %v5667_v31 = vadd.f32 %v6090_v20, %v11896_v60  ;;  %v6093_v25 = vadd.f32 %v6092_v21, %v6091_v28 }
 0x589   : > { %5727 = vst [vmem:[%s11921_s1 + $0xb0] sm:$0xff] %v5667_v31  ;;  %v5670_v35 = vadd.f32 %v6093_v25, %v11896_v60 }
 0x58b   : > { %5728 = vst [vmem:[%s11921_s1 + $0xb8] sm:$0xff] %v5670_v35 }
 0x5ad   : > { %v6094_v42 = vpop.f32.mrb[52].mxu1 }
 0x5ae   : > { %v6095_v32 = vpop.f32.mrb[53].mxu1 }
 0x5af   : > { %v6096_v63 = vadd.f32 %v6095_v32, %v6094_v42  ;;  %v6097_v3 = vpop.f32.mrb[54].mxu1 }
 0x5b0   : > { %v6098_v19 = vpop.f32.mrb[55].mxu1 }
 0x5b1   : > { %v5675_v26 = vadd.f32 %v6096_v63, %v11896_v60  ;;  %v6099_v15 = vadd.f32 %v6098_v19, %v6097_v3 }
 0x5b3   : > { %5729 = vst [vmem:[%s11921_s1 + $0xc0] sm:$0xff] %v5675_v26  ;;  %v5678_v56 = vadd.f32 %v6099_v15, %v11896_v60 }
 0x5b5   : > { %5730 = vst [vmem:[%s11921_s1 + $0xc8] sm:$0xff] %v5678_v56 }
 0x5c9   : > { %v6100_v48 = vpop.f32.mrb[56].mxu1 }
 0x5ca   : > { %v6101_v14 = vpop.f32.mrb[57].mxu1 }
 0x5cb   : > { %v6102_v53 = vadd.f32 %v6101_v14, %v6100_v48  ;;  %v6103_v59 = vpop.f32.mrb[58].mxu1 }
 0x5cc   : > { %v6104_v40 = vpop.f32.mrb[59].mxu1 }
 0x5cd   : > { %v5683_v12 = vadd.f32 %v6102_v53, %v11896_v60  ;;  %v6105_v34 = vadd.f32 %v6104_v40, %v6103_v59 }
 0x5cf   : > { %5731 = vst [vmem:[%s11921_s1 + $0xd0] sm:$0xff] %v5683_v12  ;;  %v5686_v9 = vadd.f32 %v6105_v34, %v11896_v60 }
 0x5d1   : > { %5732 = vst [vmem:[%s11921_s1 + $0xd8] sm:$0xff] %v5686_v9 }
 0x5e6   : > { %v6106_v24 = vpop.f32.mrb[60].mxu1 }
 0x5e7   : > { %v6107_v4 = vpop.f32.mrb[61].mxu1 }
 0x5e8   : > { %v6108_v16 = vadd.f32 %v6107_v4, %v6106_v24  ;;  %v6109_v52 = vpop.f32.mrb[62].mxu1 }
 0x5e9   : > { %v6110_v49 = vpop.f32.mrb[63].mxu1 }
 0x5ea   : > { %v5691_v13 = vadd.f32 %v6108_v16, %v11896_v60  ;;  %v6111_v17 = vadd.f32 %v6110_v49, %v6109_v52 }
 0x5ec   : > { %5733 = vst [vmem:[%s11921_s1 + $0xe0] sm:$0xff] %v5691_v13  ;;  %v5694_v54 = vadd.f32 %v6111_v17, %v11896_v60 }
 0x5ee   : > { %5734 = vst [vmem:[%s11921_s1 + $0xe8] sm:$0xff] %v5694_v54 }
 0x60c   : > { %v6112_v0 = vpop.f32.mrb[64].mxu1 }
 0x60d   : > { %v6113_v5 = vpop.f32.mrb[65].mxu1 }
 0x60e   : > { %v6114_v61 = vadd.f32 %v6113_v5, %v6112_v0  ;;  %v6115_v45 = vpop.f32.mrb[66].mxu1 }
 0x60f   : > { %v6116_v11 = vpop.f32.mrb[67].mxu1 }
 0x610   : > { %v5699_v33 = vadd.f32 %v6114_v61, %v11896_v60  ;;  %v6117_v39 = vadd.f32 %v6116_v11, %v6115_v45 }
 0x612   : > { %5735 = vst [vmem:[%s11921_s1 + $0xf0] sm:$0xff] %v5699_v33  ;;  %v5702_v44 = vadd.f32 %v6117_v39, %v11896_v60 }
 0x614   : > { %5736 = vst [vmem:[%s11921_s1 + $0xf8] sm:$0xff] %v5702_v44 }
 0x615   : > { %6741 = shalt.err (!%p6738_p6)
}
 0x616   : > { %s6742_s17 = scalar_lea.hbm %s12040_s24, 4096  ;;  %s6746_s25 = scalar_lea.hbm %s13368_s3, 8192 }
 0x617   : > { %p6743_p7 = scmp.ne.s32.totalorder %s12040_s24, %s6742_s17  ;;  %p6747_p4 = scmp.lt.u32.totalorder %s12040_s24, %s13368_s3 }
 0x618   : > { %p6748_p12 = scmp.lt.u32.totalorder %s6746_s25, %s6742_s17  ;;  %p6750_p11 = scmp.lt.u32.totalorder %s6742_s17, %s12040_s24 }
 0x619   : > { %p6744_p9 = pnand %p6743_p7, %p13369_p10 }
 0x61a   : > { %p6749_p2 = por %p6748_p12, %p6747_p4 }
 0x61b   : > { %p6745_p8 = pneg %p6744_p9 }
 0x61c   : > { %p6751_p1 = por %p6750_p11, %p6749_p2 }
 0x61e   : > { %p6752_p0 = pnand %p6751_p1, %p6745_p8 }
 0x620   : > { %6755 = shalt.err (!%p6752_p0)
}
 0x621   : > { %s6839_s13 = smov 128   ;;  %s6840_s22 = smov 8  }
 0x622   : > { %6136 = dma.vmem_to_hbm [thread:$0]  (%p13369_p10), %s12042_s8, 4096, %s12040_s24, %s5738_s11, %s6839_s13, %s6839_s13, %s6840_s22  }
 0x623 PF: > { %s13370_s6 = sld [smem:[#allocation20_spill]]  ;;  %s13371_s16 = sld [smem:[#allocation26_spill]] }
 0x624   : > { %s13372_s1 = sld [smem:[#allocation24_spill]] }
 0x629   : > { %s5768_s14 = sand.u32 1, %s13370_s6   ;;  %p13373_p13 = scmp.ne.s32.totalorder %s13371_s16, 0 }
 0x62a   : > { %p13374_p5 = scmp.ge.s32.totalorder %s13372_s1, 2  ;;  %s5769_s29 = scalar_lea.sflag [#allocation5], %s5768_s14 }
 0x62c   : > { %p6159_p3 = pnand %p13374_p5, %p13373_p13 }
 0x62e   : > { %6797 = dma.done.wait (!%p6159_p3), %s5769_s29, 4096  }
 0x62f   : > { %6799 = vsyncadd (!%p6159_p3), %s5769_s29, 4294963200  ;;  %s30_s14 = sadd.s32 1, %s13372_s1   ;;  %s13375_s27 = sld [smem:[#allocation21_spill]] }
 0x630   : > { %p27_p6 = scmp.ge.s32.totalorder %s30_s14, 4   ;;  %s13376_s11 = sld [smem:[#allocation28_spill]] }
 0x631   : > { %s13377_s12 = sld [smem:[#allocation23_spill]]  ;;  %s13378_s13 = sld [smem:[#allocation27_spill]] }
 0x632   : > { %s13379_s30 = smov %s6806_s10  ;;  %29 = sbr.rel (!%p27_p6) target bundleno = 16 (0x10), region = 137 }
 0x635   : > { %s13380_s10 = smov %s13375_s27 }
 0x639   :  { %5774 = vsyncpa [#allocation4], 1 }
 0x63a   :  { %5776 = vsyncpa [#allocation4 + $0x1], 1 }
 0x63b   :  { %5777 = vsyncpa [#allocation7], 1 }
 0x63c   :  { %5779 = vsyncpa [#allocation7 + $0x1], 1 }
 0x63d   :  { %5780 = vsyncpa [#allocation10], 1 }
 0x63e   :  { %5781 = vsyncpa [#allocation13], 1 }
 0x63f   :  { %5782 = vsyncpa [#allocation5], 1 }
 0x640   :  { %5784 = vsyncpa [#allocation5 + $0x1], 1 }

</bundles_post_ra>
